<compile_context>
chip_gen: v7x
topology: tpu7x:2x2x1
jax: 0.10.0
libtpu: 0.0.40
codegen_flags: <defaults>
</compile_context>

<pallas_src>
import functools

import jax
import jax.numpy as jnp
from jax.experimental import pallas as pl
from jax.experimental.pallas import tpu as pltpu


# ----------------------------------------------------------------------------
# Hardware-dependent knobs
# ----------------------------------------------------------------------------

@functools.lru_cache(maxsize=None)
def _vmem_limit_bytes():
    """~100 MiB on v5e/v6e (128 MiB VMEM), ~48 MiB on v7x (64 MiB VMEM)."""
    try:
        cap = int(pltpu.get_tpu_info().vmem_capacity_bytes)
    except Exception:  # non-TPU backend / older jax: assume 128 MiB part
        cap = 128 * 1024 * 1024
    return max(32 << 20, min(cap - (16 << 20), 100 << 20))


def _compiler_params(semantics):
    return pltpu.CompilerParams(dimension_semantics=semantics,
                                vmem_limit_bytes=_vmem_limit_bytes())


def _pick_th(H, W, cin, tc):
    """Conv row-slab height: whole image for small maps (fills the MXU M dim,
    keeps pl.ds starts trivially aligned), else the largest multiple-of-8
    divisor of H whose patch + f32 result stay within a ~10 MiB budget."""
    if H <= 32:
        return H
    per_row = W * (4 * tc + 18 * cin)          # f32 result + bf16 im2col patch
    for cand in (32, 16, 8):
        if H % cand == 0 and cand * per_row <= (10 << 20):
            return cand
    return 8 if H % 8 == 0 else H


def _slab(H):
    """Slab height for the memory-bound elementwise / pooling kernels."""
    if H <= 64:
        return H
    for cand in (64, 32, 16, 8):
        if H % cand == 0:
            return cand
    return H


# ----------------------------------------------------------------------------
# Pallas kernels
# ----------------------------------------------------------------------------

def _conv_bias_act_kernel(x_ref, w_ref, b_ref, o_ref, patch_ref, *,
                          th, w_cols, cin, apply_relu, fuse_pool):
    """Fused 3x3 conv + bias + optional ReLU + optional 2x2 maxpool epilogue.

    x_ref    : (1, H+2, W+2, Cin) bf16 zero-padded NHWC sample (VMEM-resident)
    w_ref    : (1, 9*Cin, TC)     bf16 im2col weights for one Cout tile
    b_ref    : (1, TC)            f32
    o_ref    : (1, TH, W, TC) or (1, TH/2, W/2, TC) when the pool is fused
    patch_ref: (TH, W, 9*Cin)     bf16 VMEM scratch (in-kernel im2col patch)
    """
    TH, W, Cin = th, w_cols, cin
    TC = o_ref.shape[-1]
    s = pl.program_id(2)                       # row-slab index
    r0 = pl.multiple_of(s * TH, TH)

    # In-kernel im2col: build one (TH, W, 9*Cin) patch per slab, then a single
    # K = 9*Cin MXU matmul (instead of 9 small matmuls + 9 f32 acc updates).
    for ky in range(3):                        # 3 aligned slab loads
        rows = x_ref[0, pl.ds(r0 + ky, TH), :, :]          # (TH, W+2, Cin)
        for kx in range(3):
            t = 3 * ky + kx
            patch_ref[:, :, t * Cin:(t + 1) * Cin] = rows[:, kx:kx + W, :]

    patch = patch_ref[...].reshape(TH * W, 9 * Cin)
    y = jnp.dot(patch, w_ref[0], preferred_element_type=jnp.float32)
    y = y + b_ref[...]                         # bias in f32
    if apply_relu:
        y = jnp.maximum(y, 0.0)                # fused ReLU epilogue

    if fuse_pool:
        # Fused 2x2 maxpool: H pairs on an outer dim (cheap), W pairs folded
        # into lane halves (lane-aligned slice whenever TC % 128 == 0).
        y4 = y.reshape(TH // 2, 2, W // 2, 2 * TC)
        yh = jnp.maximum(y4[:, 0], y4[:, 1])               # pool over H
        yp = jnp.maximum(yh[..., :TC], yh[..., TC:])       # pool over W
        o_ref[...] = yp.reshape(1, TH // 2, W // 2, TC).astype(o_ref.dtype)
    else:
        o_ref[...] = y.reshape(1, TH, W, TC).astype(o_ref.dtype)


def _relu_kernel(x_ref, o_ref):
    o_ref[...] = jnp.maximum(x_ref[...], 0).astype(o_ref.dtype)


def _maxpool_kernel(x_ref, o_ref):
    """x_ref: (1, TH, 2, Wo, 2C) — row pairs on an outer dim, column pairs
    folded into lane halves.  o_ref: (1, TH, Wo, C)."""
    C = o_ref.shape[-1]
    a = x_ref[:, :, 0, :, :]                   # even rows   (1, TH, Wo, 2C)
    b = x_ref[:, :, 1, :, :]                   # odd rows
    m = jnp.maximum(a, b)                      # pool over H
    o_ref[...] = jnp.maximum(m[..., :C], m[..., C:])       # pool over W


def _global_avgpool_kernel(x_ref, o_ref, acc_ref, *, inv_hw):
    """AdaptiveAvgPool2d((1,1)) over an H-slab grid axis, f32 accumulation."""
    s = pl.program_id(1)

    @pl.when(s == 0)
    def _():
        acc_ref[...] = jnp.zeros_like(acc_ref)

    x = x_ref[0].astype(jnp.float32)                       # (TH, W, C)
    acc_ref[...] += jnp.sum(jnp.sum(x, axis=0), axis=0, keepdims=True)

    @pl.when(s == pl.num_programs(1) - 1)
    def _():
        o_ref[...] = (acc_ref[...] * inv_hw)[None]


# ----------------------------------------------------------------------------
# pallas_call wrappers
# ----------------------------------------------------------------------------

def conv3x3_bias_act(x, w, b, *, apply_relu=True, fuse_pool=False,
                     out_dtype=jnp.bfloat16):
    """x: (N,H,W,Cin) NHWC, w: (3,3,Cin,Cout), b: (Cout,).
    Returns (activation, did_fuse_pool)."""
    N, H, W, Cin = x.shape
    Cout = w.shape[-1]

    x_in = jnp.pad(x.astype(jnp.bfloat16),
                   ((0, 0), (1, 1), (1, 1), (0, 0)))       # (N, H+2, W+2, Cin)
    w_in = w.astype(jnp.bfloat16).reshape(9 * Cin, Cout)[None]   # (1,9*Cin,Cout)
    b2 = b.astype(jnp.float32).reshape(1, Cout)

    # Lane tile: 256 fills the 2x256^2 MXU N dim on v6e/v7x (Mosaic sub-tiles
    # it for v5e's 128-wide MXU).  Cout=64 (conv1 only) keeps masked stores;
    # accepted per review, the following maxpool is fused instead.
    tc = min(Cout, 256)
    n_ct = Cout // tc
    th = _pick_th(H, W, Cin, tc)
    n_s = H // th

    fuse_pool = bool(fuse_pool and H % 2 == 0 and W % 2 == 0 and th % 2 == 0)
    if fuse_pool:
        out_shape = (N, H // 2, W // 2, Cout)
        out_spec = pl.BlockSpec((1, th // 2, W // 2, tc),
                                lambda n, ct, s: (n, s, 0, ct))
    else:
        out_shape = (N, H, W, Cout)
        out_spec = pl.BlockSpec((1, th, W, tc), lambda n, ct, s: (n, s, 0, ct))

    kernel = functools.partial(_conv_bias_act_kernel, th=th, w_cols=W, cin=Cin,
                               apply_relu=apply_relu, fuse_pool=fuse_pool)
    out = pl.pallas_call(
        kernel,
        out_shape=jax.ShapeDtypeStruct(out_shape, out_dtype),
        grid=(N, n_ct, n_s),
        in_specs=[
            # Padded sample: index constant over (ct, s) -> stays VMEM-resident.
            pl.BlockSpec((1, H + 2, W + 2, Cin), lambda n, ct, s: (n, 0, 0, 0)),
            # Weights / bias: index constant over (n, s) -> no re-DMA per slab.
            pl.BlockSpec((1, 9 * Cin, tc), lambda n, ct, s: (0, 0, ct)),
            pl.BlockSpec((1, tc), lambda n, ct, s: (0, ct)),
        ],
        out_specs=out_spec,
        scratch_shapes=[pltpu.VMEM((th, W, 9 * Cin), jnp.bfloat16)],
        compiler_params=_compiler_params(("parallel", "parallel", "arbitrary")),
    )(x_in, w_in, b2)
    return out, fuse_pool


def relu(x):
    """Standalone ReLU (only used when a pre-ReLU conv output is collected)."""
    N, H, W, C = x.shape
    th = _slab(H)
    return pl.pallas_call(
        _relu_kernel,
        out_shape=jax.ShapeDtypeStruct(x.shape, x.dtype),
        grid=(N, H // th),
        in_specs=[pl.BlockSpec((1, th, W, C), lambda n, s: (n, s, 0, 0))],
        out_specs=pl.BlockSpec((1, th, W, C), lambda n, s: (n, s, 0, 0)),
        compiler_params=_compiler_params(("parallel", "parallel")),
    )(x)


def maxpool2x2(x):
    """MaxPool2d(kernel=2, stride=2), floor mode (torch default). Only used
    when the pool could not be fused into the preceding conv epilogue."""
    N, H, W, C = x.shape
    Ho, Wo = H // 2, W // 2
    x = x[:, :Ho * 2, :Wo * 2, :]
    xr = x.reshape(N, Ho, 2, Wo, 2 * C)        # free row-major reinterpretation
    th = _slab(Ho)
    return pl.pallas_call(
        _maxpool_kernel,
        out_shape=jax.ShapeDtypeStruct((N, Ho, Wo, C), x.dtype),
        grid=(N, Ho // th),
        in_specs=[pl.BlockSpec((1, th, 2, Wo, 2 * C),
                               lambda n, s: (n, s, 0, 0, 0))],
        out_specs=pl.BlockSpec((1, th, Wo, C), lambda n, s: (n, s, 0, 0)),
        compiler_params=_compiler_params(("parallel", "parallel")),
    )(xr)


def global_avgpool(x):
    """AdaptiveAvgPool2d((1,1)) + Flatten: (N, H, W, C) -> (N, C) f32."""
    N, H, W, C = x.shape
    th = _slab(H)
    kernel = functools.partial(_global_avgpool_kernel, inv_hw=1.0 / float(H * W))
    out = pl.pallas_call(
        kernel,
        out_shape=jax.ShapeDtypeStruct((N, 1, C), jnp.float32),
        grid=(N, H // th),
        in_specs=[pl.BlockSpec((1, th, W, C), lambda n, s: (n, s, 0, 0))],
        out_specs=pl.BlockSpec((1, 1, C), lambda n, s: (n, 0, 0)),
        scratch_shapes=[pltpu.VMEM((1, C), jnp.float32)],
        compiler_params=_compiler_params(("parallel", "arbitrary")),
    )(x)
    return out.reshape(N, C)


# ----------------------------------------------------------------------------
# VGG16 "features" architecture (torchvision layer indices)
# ----------------------------------------------------------------------------

VGG16_FEATURES = [
    ("conv", 3, 64), ("relu",), ("conv", 64, 64), ("relu",), ("pool",),
    ("conv", 64, 128), ("relu",), ("conv", 128, 128), ("relu",), ("pool",),
    ("conv", 128, 256), ("relu",), ("conv", 256, 256), ("relu",),
    ("conv", 256, 256), ("relu",), ("pool",),
    ("conv", 256, 512), ("relu",), ("conv", 512, 512), ("relu",),
    ("conv", 512, 512), ("relu",), ("pool",),
    ("conv", 512, 512), ("relu",), ("conv", 512, 512), ("relu",),
    ("conv", 512, 512), ("relu",), ("pool",),
]


class Vgg16FeaturesPallas:
    """JAX/Pallas port of Vgg16Features.

    layers: indices (into VGG16_FEATURES) whose outputs are collected.
    pool:   True  -> AdaptiveAvgPool2d((1,1)) + Flatten per collected feature
            False -> Identity (feature returned as NCHW f32, like torch)
    """

    def __init__(self, layers=(3, 8), pool=True, key=None):
        self.layers = tuple(int(l) for l in layers)
        self.pool = pool
        self.max_layer = max(self.layers) if self.layers else -1
        self.params = {}
        key = jax.random.PRNGKey(0) if key is None else key
        for i, spec in enumerate(VGG16_FEATURES):
            if i > self.max_layer:
                break
            if spec[0] == "conv":
                _, cin, cout = spec
                key, kw, kb = jax.random.split(key, 3)
                w = jax.random.normal(kw, (3, 3, cin, cout), jnp.float32)
                w = w * (2.0 / (cin * 9)) ** 0.5
                b = jax.random.normal(kb, (cout,), jnp.float32) * 0.01
                self.params[i] = (w, b)
        # requires_grad_/no_grad: inference-only here, nothing to do in JAX.

    def _collect(self, i, x, res):
        if i in self.layers:
            if self.pool:
                res.append(global_avgpool(x))                      # (N, C) f32
            else:
                res.append(jnp.transpose(x, (0, 3, 1, 2))
                           .astype(jnp.float32))                   # NCHW f32

    def __call__(self, x_nchw):
        x = jnp.transpose(x_nchw, (0, 2, 3, 1)).astype(jnp.float32)  # -> NHWC
        res = []
        i = 0
        while i <= self.max_layer:
            op = VGG16_FEATURES[i][0]
            if op == "conv":
                w, b = self.params[i]
                H, W = int(x.shape[1]), int(x.shape[2])
                # Fuse the following ReLU (and, when possible, the following
                # 2x2 maxpool) into the conv epilogue unless an intermediate
                # activation must be collected.
                fuse_relu = (i + 1 <= self.max_layer
                             and VGG16_FEATURES[i + 1][0] == "relu"
                             and i not in self.layers)
                fuse_pool = (fuse_relu
                             and i + 2 <= self.max_layer
                             and VGG16_FEATURES[i + 2][0] == "pool"
                             and (i + 1) not in self.layers
                             and H % 2 == 0 and W % 2 == 0)
                x, fused_pool = conv3x3_bias_act(x, w, b,
                                                 apply_relu=fuse_relu,
                                                 fuse_pool=fuse_pool)
                self._collect(i, x, res)
                if fuse_relu:
                    i += 1
                    self._collect(i, x, res)
                    if fused_pool:
                        i += 1
                        self._collect(i, x, res)
            elif op == "relu":
                x = relu(x)
                self._collect(i, x, res)
            else:  # "pool"
                x = maxpool2x2(x)
                self._collect(i, x, res)
            i += 1
        return res


if __name__ == "__main__":
    key = jax.random.PRNGKey(0)
    # small NCHW input consistent with the module (VGG16 expects 3 channels)
    x = jax.random.normal(key, (2, 3, 16, 16), jnp.float32)

    # pool=True path (AdaptiveAvgPool2d((1,1)) + Flatten per collected layer);
    # exercises conv+relu fusion, standalone maxpool and global avg-pool.
    model = Vgg16FeaturesPallas(layers=(3, 8), pool=True,
                                key=jax.random.PRNGKey(0))
    feats = jax.jit(lambda inp: model(inp))(x)
    for f in feats:
        jax.block_until_ready(f)
    assert feats[0].shape == (2, 64)    # after layer 3 (ReLU of conv1_2)
    assert feats[1].shape == (2, 128)   # after layer 8 (ReLU of conv2_2)
    assert all(bool(jnp.all(jnp.isfinite(f))) for f in feats)

    # pool=False (Identity) path; exercises the fused conv+relu+maxpool epilogue.
    model2 = Vgg16FeaturesPallas(layers=(4,), pool=False,
                                 key=jax.random.PRNGKey(0))
    feats2 = jax.jit(lambda inp: model2(inp))(x)
    for f in feats2:
        jax.block_until_ready(f)
    assert feats2[0].shape == (2, 64, 8, 8)   # after layer 4 (first maxpool), NCHW
    assert bool(jnp.all(jnp.isfinite(feats2[0])))

    print("KERNEL_OK")
</pallas_src>

<mosaic_0001>
module attributes {stable_mosaic.version = 11 : i64} {
  func.func @_conv_bias_act_kernel(%arg0: i32, %arg1: i32, %arg2: i32, %arg3: memref<1x18x18x3xbf16, #tpu.memory_space<vmem>>, %arg4: memref<1x27x64xbf16, #tpu.memory_space<vmem>>, %arg5: memref<1x64xf32, #tpu.memory_space<vmem>>, %arg6: memref<1x16x16x64xbf16, #tpu.memory_space<vmem>>, %arg7: memref<16x16x27xbf16, #tpu.memory_space<vmem>>) attributes {dimension_semantics = [#tpu.dimension_semantics<parallel>, #tpu.dimension_semantics<parallel>, #tpu.dimension_semantics<arbitrary>], iteration_bounds = array<i64: 2, 1, 1>, scalar_prefetch = 0 : i64, scratch_operands = 1 : i64, tpu.core_type = #tpu.core_type<tc>, window_params = [{transform_indices = @transform_0, window_bounds = array<i64: 1, 18, 18, 3>}, {transform_indices = @transform_1, window_bounds = array<i64: 1, 27, 64>}, {transform_indices = @transform_2, window_bounds = array<i64: 1, 64>}, {transform_indices = @transform_3, window_bounds = array<i64: 1, 16, 16, 64>}]} {
    %c16_i32 = arith.constant 16 : i32
    %0 = arith.muli %arg2, %c16_i32 : i32
    %1 = tpu.assume_multiple %0, 16 : i32
    %c0_i32 = arith.constant 0 : i32
    %2 = arith.addi %1, %c0_i32 : i32
    %c0 = arith.constant 0 : index
    %3 = arith.index_cast %2 : i32 to index
    %c0_0 = arith.constant 0 : index
    %c0_1 = arith.constant 0 : index
    %4 = vector.load %arg3[%c0, %3, %c0_0, %c0_1] : memref<1x18x18x3xbf16, #tpu.memory_space<vmem>>, vector<1x16x18x3xbf16>
    %5 = vector.shape_cast %4 : vector<1x16x18x3xbf16> to vector<16x18x3xbf16>
    %6 = vector.extract_strided_slice %5 {offsets = [0, 0, 0], sizes = [16, 16, 3], strides = [1, 1, 1]} : vector<16x18x3xbf16> to vector<16x16x3xbf16>
    %c0_2 = arith.constant 0 : index
    %c0_3 = arith.constant 0 : index
    %c0_4 = arith.constant 0 : index
    %7 = vector.load %arg7[%c0_2, %c0_3, %c0_4] : memref<16x16x27xbf16, #tpu.memory_space<vmem>>, vector<16x16x3xbf16>
    tpu.vector_store %arg7[%c0_2, %c0_3, %c0_4], %6 {strides = array<i32>} : memref<16x16x27xbf16, #tpu.memory_space<vmem>>, vector<16x16x3xbf16>,
    %8 = vector.extract_strided_slice %5 {offsets = [0, 1, 0], sizes = [16, 16, 3], strides = [1, 1, 1]} : vector<16x18x3xbf16> to vector<16x16x3xbf16>
    %c0_5 = arith.constant 0 : index
    %c0_6 = arith.constant 0 : index
    %c3 = arith.constant 3 : index
    %9 = vector.load %arg7[%c0_5, %c0_6, %c3] : memref<16x16x27xbf16, #tpu.memory_space<vmem>>, vector<16x16x3xbf16>
    tpu.vector_store %arg7[%c0_5, %c0_6, %c3], %8 {strides = array<i32>} : memref<16x16x27xbf16, #tpu.memory_space<vmem>>, vector<16x16x3xbf16>,
    %10 = vector.extract_strided_slice %5 {offsets = [0, 2, 0], sizes = [16, 16, 3], strides = [1, 1, 1]} : vector<16x18x3xbf16> to vector<16x16x3xbf16>
    %c0_7 = arith.constant 0 : index
    %c0_8 = arith.constant 0 : index
    %c6 = arith.constant 6 : index
    %11 = vector.load %arg7[%c0_7, %c0_8, %c6] : memref<16x16x27xbf16, #tpu.memory_space<vmem>>, vector<16x16x3xbf16>
    tpu.vector_store %arg7[%c0_7, %c0_8, %c6], %10 {strides = array<i32>} : memref<16x16x27xbf16, #tpu.memory_space<vmem>>, vector<16x16x3xbf16>,
    %c1_i32 = arith.constant 1 : i32
    %12 = arith.addi %1, %c1_i32 : i32
    %c0_9 = arith.constant 0 : index
    %13 = arith.index_cast %12 : i32 to index
    %c0_10 = arith.constant 0 : index
    %c0_11 = arith.constant 0 : index
    %14 = vector.load %arg3[%c0_9, %13, %c0_10, %c0_11] : memref<1x18x18x3xbf16, #tpu.memory_space<vmem>>, vector<1x16x18x3xbf16>
    %15 = vector.shape_cast %14 : vector<1x16x18x3xbf16> to vector<16x18x3xbf16>
    %16 = vector.extract_strided_slice %15 {offsets = [0, 0, 0], sizes = [16, 16, 3], strides = [1, 1, 1]} : vector<16x18x3xbf16> to vector<16x16x3xbf16>
    %c0_12 = arith.constant 0 : index
    %c0_13 = arith.constant 0 : index
    %c9 = arith.constant 9 : index
    %17 = vector.load %arg7[%c0_12, %c0_13, %c9] : memref<16x16x27xbf16, #tpu.memory_space<vmem>>, vector<16x16x3xbf16>
    tpu.vector_store %arg7[%c0_12, %c0_13, %c9], %16 {strides = array<i32>} : memref<16x16x27xbf16, #tpu.memory_space<vmem>>, vector<16x16x3xbf16>,
    %18 = vector.extract_strided_slice %15 {offsets = [0, 1, 0], sizes = [16, 16, 3], strides = [1, 1, 1]} : vector<16x18x3xbf16> to vector<16x16x3xbf16>
    %c0_14 = arith.constant 0 : index
    %c0_15 = arith.constant 0 : index
    %c12 = arith.constant 12 : index
    %19 = vector.load %arg7[%c0_14, %c0_15, %c12] : memref<16x16x27xbf16, #tpu.memory_space<vmem>>, vector<16x16x3xbf16>
    tpu.vector_store %arg7[%c0_14, %c0_15, %c12], %18 {strides = array<i32>} : memref<16x16x27xbf16, #tpu.memory_space<vmem>>, vector<16x16x3xbf16>,
    %20 = vector.extract_strided_slice %15 {offsets = [0, 2, 0], sizes = [16, 16, 3], strides = [1, 1, 1]} : vector<16x18x3xbf16> to vector<16x16x3xbf16>
    %c0_16 = arith.constant 0 : index
    %c0_17 = arith.constant 0 : index
    %c15 = arith.constant 15 : index
    %21 = vector.load %arg7[%c0_16, %c0_17, %c15] : memref<16x16x27xbf16, #tpu.memory_space<vmem>>, vector<16x16x3xbf16>
    tpu.vector_store %arg7[%c0_16, %c0_17, %c15], %20 {strides = array<i32>} : memref<16x16x27xbf16, #tpu.memory_space<vmem>>, vector<16x16x3xbf16>,
    %c2_i32 = arith.constant 2 : i32
    %22 = arith.addi %1, %c2_i32 : i32
    %c0_18 = arith.constant 0 : index
    %23 = arith.index_cast %22 : i32 to index
    %c0_19 = arith.constant 0 : index
    %c0_20 = arith.constant 0 : index
    %24 = vector.load %arg3[%c0_18, %23, %c0_19, %c0_20] : memref<1x18x18x3xbf16, #tpu.memory_space<vmem>>, vector<1x16x18x3xbf16>
    %25 = vector.shape_cast %24 : vector<1x16x18x3xbf16> to vector<16x18x3xbf16>
    %26 = vector.extract_strided_slice %25 {offsets = [0, 0, 0], sizes = [16, 16, 3], strides = [1, 1, 1]} : vector<16x18x3xbf16> to vector<16x16x3xbf16>
    %c0_21 = arith.constant 0 : index
    %c0_22 = arith.constant 0 : index
    %c18 = arith.constant 18 : index
    %27 = vector.load %arg7[%c0_21, %c0_22, %c18] : memref<16x16x27xbf16, #tpu.memory_space<vmem>>, vector<16x16x3xbf16>
    tpu.vector_store %arg7[%c0_21, %c0_22, %c18], %26 {strides = array<i32>} : memref<16x16x27xbf16, #tpu.memory_space<vmem>>, vector<16x16x3xbf16>,
    %28 = vector.extract_strided_slice %25 {offsets = [0, 1, 0], sizes = [16, 16, 3], strides = [1, 1, 1]} : vector<16x18x3xbf16> to vector<16x16x3xbf16>
    %c0_23 = arith.constant 0 : index
    %c0_24 = arith.constant 0 : index
    %c21 = arith.constant 21 : index
    %29 = vector.load %arg7[%c0_23, %c0_24, %c21] : memref<16x16x27xbf16, #tpu.memory_space<vmem>>, vector<16x16x3xbf16>
    tpu.vector_store %arg7[%c0_23, %c0_24, %c21], %28 {strides = array<i32>} : memref<16x16x27xbf16, #tpu.memory_space<vmem>>, vector<16x16x3xbf16>,
    %30 = vector.extract_strided_slice %25 {offsets = [0, 2, 0], sizes = [16, 16, 3], strides = [1, 1, 1]} : vector<16x18x3xbf16> to vector<16x16x3xbf16>
    %c0_25 = arith.constant 0 : index
    %c0_26 = arith.constant 0 : index
    %c24 = arith.constant 24 : index
    %31 = vector.load %arg7[%c0_25, %c0_26, %c24] : memref<16x16x27xbf16, #tpu.memory_space<vmem>>, vector<16x16x3xbf16>
    tpu.vector_store %arg7[%c0_25, %c0_26, %c24], %30 {strides = array<i32>} : memref<16x16x27xbf16, #tpu.memory_space<vmem>>, vector<16x16x3xbf16>,
    %c0_27 = arith.constant 0 : index
    %c0_28 = arith.constant 0 : index
    %c0_29 = arith.constant 0 : index
    %32 = vector.load %arg7[%c0_27, %c0_28, %c0_29] : memref<16x16x27xbf16, #tpu.memory_space<vmem>>, vector<16x16x27xbf16>
    %33 = vector.shape_cast %32 : vector<16x16x27xbf16> to vector<256x27xbf16>
    %c0_30 = arith.constant 0 : index
    %c0_31 = arith.constant 0 : index
    %c0_32 = arith.constant 0 : index
    %34 = vector.load %arg4[%c0_30, %c0_31, %c0_32] : memref<1x27x64xbf16, #tpu.memory_space<vmem>>, vector<1x27x64xbf16>
    %35 = vector.shape_cast %34 : vector<1x27x64xbf16> to vector<27x64xbf16>
    %cst = arith.constant dense<0.000000e+00> : vector<256x64xf32>
    %36 = tpu.matmul %33, %35, %cst {dimension_numbers = #tpu.dot_dimension_numbers<[1], [0], [0], [1], [0, 0, 1, 1], [], []>} : vector<256x27xbf16>, vector<27x64xbf16>, vector<256x64xf32> -> vector<256x64xf32>
    %c0_33 = arith.constant 0 : index
    %c0_34 = arith.constant 0 : index
    %37 = vector.load %arg5[%c0_33, %c0_34] : memref<1x64xf32, #tpu.memory_space<vmem>>, vector<1x64xf32>
    %38 = vector.broadcast %37 : vector<1x64xf32> to vector<256x64xf32>
    %39 = arith.addf %36, %38 : vector<256x64xf32>
    %cst_35 = arith.constant 0.000000e+00 : f32
    %40 = vector.broadcast %cst_35 : f32 to vector<256x64xf32>
    %41 = arith.maximumf %39, %40 : vector<256x64xf32>
    %42 = vector.shape_cast %41 : vector<256x64xf32> to vector<1x16x16x64xf32>
    %43 = arith.truncf %42 : vector<1x16x16x64xf32> to vector<1x16x16x64xbf16>
    %c0_36 = arith.constant 0 : index
    %c0_37 = arith.constant 0 : index
    %c0_38 = arith.constant 0 : index
    %c0_39 = arith.constant 0 : index
    %44 = vector.load %arg6[%c0_36, %c0_37, %c0_38, %c0_39] : memref<1x16x16x64xbf16, #tpu.memory_space<vmem>>, vector<1x16x16x64xbf16>
    tpu.vector_store %arg6[%c0_36, %c0_37, %c0_38, %c0_39], %43 {strides = array<i32>} : memref<1x16x16x64xbf16, #tpu.memory_space<vmem>>, vector<1x16x16x64xbf16>,
    return
  }
  func.func @transform_0(%arg0: i32, %arg1: i32, %arg2: i32) -> (i32, i32, i32, i32) {
    %c0_i32 = arith.constant 0 : i32
    %c0_i32_0 = arith.constant 0 : i32
    %c0_i32_1 = arith.constant 0 : i32
    %c0_i32_2 = arith.constant 0 : i32
    return %arg0, %c0_i32, %c0_i32_0, %c0_i32_1 : i32, i32, i32, i32
  }
  func.func @transform_1(%arg0: i32, %arg1: i32, %arg2: i32) -> (i32, i32, i32) {
    %c0_i32 = arith.constant 0 : i32
    %c0_i32_0 = arith.constant 0 : i32
    %c0_i32_1 = arith.constant 0 : i32
    return %c0_i32, %c0_i32_0, %arg1 : i32, i32, i32
  }
  func.func @transform_2(%arg0: i32, %arg1: i32, %arg2: i32) -> (i32, i32) {
    %c0_i32 = arith.constant 0 : i32
    %c0_i32_0 = arith.constant 0 : i32
    return %c0_i32, %arg1 : i32, i32
  }
  func.func @transform_3(%arg0: i32, %arg1: i32, %arg2: i32) -> (i32, i32, i32, i32) {
    %c0_i32 = arith.constant 0 : i32
    %c0_i32_0 = arith.constant 0 : i32
    return %arg0, %arg2, %c0_i32, %arg1 : i32, i32, i32, i32
  }
}

module attributes {stable_mosaic.version = 11 : i64} {
  func.func @_conv_bias_act_kernel(%arg0: i32, %arg1: i32, %arg2: i32, %arg3: memref<1x18x18x64xbf16, #tpu.memory_space<vmem>>, %arg4: memref<1x576x64xbf16, #tpu.memory_space<vmem>>, %arg5: memref<1x64xf32, #tpu.memory_space<vmem>>, %arg6: memref<1x16x16x64xbf16, #tpu.memory_space<vmem>>, %arg7: memref<16x16x576xbf16, #tpu.memory_space<vmem>>) attributes {dimension_semantics = [#tpu.dimension_semantics<parallel>, #tpu.dimension_semantics<parallel>, #tpu.dimension_semantics<arbitrary>], iteration_bounds = array<i64: 2, 1, 1>, scalar_prefetch = 0 : i64, scratch_operands = 1 : i64, tpu.core_type = #tpu.core_type<tc>, window_params = [{transform_indices = @transform_0, window_bounds = array<i64: 1, 18, 18, 64>}, {transform_indices = @transform_1, window_bounds = array<i64: 1, 576, 64>}, {transform_indices = @transform_2, window_bounds = array<i64: 1, 64>}, {transform_indices = @transform_3, window_bounds = array<i64: 1, 16, 16, 64>}]} {
    %c16_i32 = arith.constant 16 : i32
    %0 = arith.muli %arg2, %c16_i32 : i32
    %1 = tpu.assume_multiple %0, 16 : i32
    %c0_i32 = arith.constant 0 : i32
    %2 = arith.addi %1, %c0_i32 : i32
    %c0 = arith.constant 0 : index
    %3 = arith.index_cast %2 : i32 to index
    %c0_0 = arith.constant 0 : index
    %c0_1 = arith.constant 0 : index
    %4 = vector.load %arg3[%c0, %3, %c0_0, %c0_1] : memref<1x18x18x64xbf16, #tpu.memory_space<vmem>>, vector<1x16x18x64xbf16>
    %5 = vector.shape_cast %4 : vector<1x16x18x64xbf16> to vector<16x18x64xbf16>
    %6 = vector.extract_strided_slice %5 {offsets = [0, 0, 0], sizes = [16, 16, 64], strides = [1, 1, 1]} : vector<16x18x64xbf16> to vector<16x16x64xbf16>
    %c0_2 = arith.constant 0 : index
    %c0_3 = arith.constant 0 : index
    %c0_4 = arith.constant 0 : index
    %7 = vector.load %arg7[%c0_2, %c0_3, %c0_4] : memref<16x16x576xbf16, #tpu.memory_space<vmem>>, vector<16x16x64xbf16>
    tpu.vector_store %arg7[%c0_2, %c0_3, %c0_4], %6 {strides = array<i32>} : memref<16x16x576xbf16, #tpu.memory_space<vmem>>, vector<16x16x64xbf16>,
    %8 = vector.extract_strided_slice %5 {offsets = [0, 1, 0], sizes = [16, 16, 64], strides = [1, 1, 1]} : vector<16x18x64xbf16> to vector<16x16x64xbf16>
    %c0_5 = arith.constant 0 : index
    %c0_6 = arith.constant 0 : index
    %c64 = arith.constant 64 : index
    %9 = vector.load %arg7[%c0_5, %c0_6, %c64] : memref<16x16x576xbf16, #tpu.memory_space<vmem>>, vector<16x16x64xbf16>
    tpu.vector_store %arg7[%c0_5, %c0_6, %c64], %8 {strides = array<i32>} : memref<16x16x576xbf16, #tpu.memory_space<vmem>>, vector<16x16x64xbf16>,
    %10 = vector.extract_strided_slice %5 {offsets = [0, 2, 0], sizes = [16, 16, 64], strides = [1, 1, 1]} : vector<16x18x64xbf16> to vector<16x16x64xbf16>
    %c0_7 = arith.constant 0 : index
    %c0_8 = arith.constant 0 : index
    %c128 = arith.constant 128 : index
    %11 = vector.load %arg7[%c0_7, %c0_8, %c128] : memref<16x16x576xbf16, #tpu.memory_space<vmem>>, vector<16x16x64xbf16>
    tpu.vector_store %arg7[%c0_7, %c0_8, %c128], %10 {strides = array<i32>} : memref<16x16x576xbf16, #tpu.memory_space<vmem>>, vector<16x16x64xbf16>,
    %c1_i32 = arith.constant 1 : i32
    %12 = arith.addi %1, %c1_i32 : i32
    %c0_9 = arith.constant 0 : index
    %13 = arith.index_cast %12 : i32 to index
    %c0_10 = arith.constant 0 : index
    %c0_11 = arith.constant 0 : index
    %14 = vector.load %arg3[%c0_9, %13, %c0_10, %c0_11] : memref<1x18x18x64xbf16, #tpu.memory_space<vmem>>, vector<1x16x18x64xbf16>
    %15 = vector.shape_cast %14 : vector<1x16x18x64xbf16> to vector<16x18x64xbf16>
    %16 = vector.extract_strided_slice %15 {offsets = [0, 0, 0], sizes = [16, 16, 64], strides = [1, 1, 1]} : vector<16x18x64xbf16> to vector<16x16x64xbf16>
    %c0_12 = arith.constant 0 : index
    %c0_13 = arith.constant 0 : index
    %c192 = arith.constant 192 : index
    %17 = vector.load %arg7[%c0_12, %c0_13, %c192] : memref<16x16x576xbf16, #tpu.memory_space<vmem>>, vector<16x16x64xbf16>
    tpu.vector_store %arg7[%c0_12, %c0_13, %c192], %16 {strides = array<i32>} : memref<16x16x576xbf16, #tpu.memory_space<vmem>>, vector<16x16x64xbf16>,
    %18 = vector.extract_strided_slice %15 {offsets = [0, 1, 0], sizes = [16, 16, 64], strides = [1, 1, 1]} : vector<16x18x64xbf16> to vector<16x16x64xbf16>
    %c0_14 = arith.constant 0 : index
    %c0_15 = arith.constant 0 : index
    %c256 = arith.constant 256 : index
    %19 = vector.load %arg7[%c0_14, %c0_15, %c256] : memref<16x16x576xbf16, #tpu.memory_space<vmem>>, vector<16x16x64xbf16>
    tpu.vector_store %arg7[%c0_14, %c0_15, %c256], %18 {strides = array<i32>} : memref<16x16x576xbf16, #tpu.memory_space<vmem>>, vector<16x16x64xbf16>,
    %20 = vector.extract_strided_slice %15 {offsets = [0, 2, 0], sizes = [16, 16, 64], strides = [1, 1, 1]} : vector<16x18x64xbf16> to vector<16x16x64xbf16>
    %c0_16 = arith.constant 0 : index
    %c0_17 = arith.constant 0 : index
    %c320 = arith.constant 320 : index
    %21 = vector.load %arg7[%c0_16, %c0_17, %c320] : memref<16x16x576xbf16, #tpu.memory_space<vmem>>, vector<16x16x64xbf16>
    tpu.vector_store %arg7[%c0_16, %c0_17, %c320], %20 {strides = array<i32>} : memref<16x16x576xbf16, #tpu.memory_space<vmem>>, vector<16x16x64xbf16>,
    %c2_i32 = arith.constant 2 : i32
    %22 = arith.addi %1, %c2_i32 : i32
    %c0_18 = arith.constant 0 : index
    %23 = arith.index_cast %22 : i32 to index
    %c0_19 = arith.constant 0 : index
    %c0_20 = arith.constant 0 : index
    %24 = vector.load %arg3[%c0_18, %23, %c0_19, %c0_20] : memref<1x18x18x64xbf16, #tpu.memory_space<vmem>>, vector<1x16x18x64xbf16>
    %25 = vector.shape_cast %24 : vector<1x16x18x64xbf16> to vector<16x18x64xbf16>
    %26 = vector.extract_strided_slice %25 {offsets = [0, 0, 0], sizes = [16, 16, 64], strides = [1, 1, 1]} : vector<16x18x64xbf16> to vector<16x16x64xbf16>
    %c0_21 = arith.constant 0 : index
    %c0_22 = arith.constant 0 : index
    %c384 = arith.constant 384 : index
    %27 = vector.load %arg7[%c0_21, %c0_22, %c384] : memref<16x16x576xbf16, #tpu.memory_space<vmem>>, vector<16x16x64xbf16>
    tpu.vector_store %arg7[%c0_21, %c0_22, %c384], %26 {strides = array<i32>} : memref<16x16x576xbf16, #tpu.memory_space<vmem>>, vector<16x16x64xbf16>,
    %28 = vector.extract_strided_slice %25 {offsets = [0, 1, 0], sizes = [16, 16, 64], strides = [1, 1, 1]} : vector<16x18x64xbf16> to vector<16x16x64xbf16>
    %c0_23 = arith.constant 0 : index
    %c0_24 = arith.constant 0 : index
    %c448 = arith.constant 448 : index
    %29 = vector.load %arg7[%c0_23, %c0_24, %c448] : memref<16x16x576xbf16, #tpu.memory_space<vmem>>, vector<16x16x64xbf16>
    tpu.vector_store %arg7[%c0_23, %c0_24, %c448], %28 {strides = array<i32>} : memref<16x16x576xbf16, #tpu.memory_space<vmem>>, vector<16x16x64xbf16>,
    %30 = vector.extract_strided_slice %25 {offsets = [0, 2, 0], sizes = [16, 16, 64], strides = [1, 1, 1]} : vector<16x18x64xbf16> to vector<16x16x64xbf16>
    %c0_25 = arith.constant 0 : index
    %c0_26 = arith.constant 0 : index
    %c512 = arith.constant 512 : index
    %31 = vector.load %arg7[%c0_25, %c0_26, %c512] : memref<16x16x576xbf16, #tpu.memory_space<vmem>>, vector<16x16x64xbf16>
    tpu.vector_store %arg7[%c0_25, %c0_26, %c512], %30 {strides = array<i32>} : memref<16x16x576xbf16, #tpu.memory_space<vmem>>, vector<16x16x64xbf16>,
    %c0_27 = arith.constant 0 : index
    %c0_28 = arith.constant 0 : index
    %c0_29 = arith.constant 0 : index
    %32 = vector.load %arg7[%c0_27, %c0_28, %c0_29] : memref<16x16x576xbf16, #tpu.memory_space<vmem>>, vector<16x16x576xbf16>
    %33 = vector.shape_cast %32 : vector<16x16x576xbf16> to vector<256x576xbf16>
    %c0_30 = arith.constant 0 : index
    %c0_31 = arith.constant 0 : index
    %c0_32 = arith.constant 0 : index
    %34 = vector.load %arg4[%c0_30, %c0_31, %c0_32] : memref<1x576x64xbf16, #tpu.memory_space<vmem>>, vector<1x576x64xbf16>
    %35 = vector.shape_cast %34 : vector<1x576x64xbf16> to vector<576x64xbf16>
    %cst = arith.constant dense<0.000000e+00> : vector<256x64xf32>
    %36 = tpu.matmul %33, %35, %cst {dimension_numbers = #tpu.dot_dimension_numbers<[1], [0], [0], [1], [0, 0, 1, 1], [], []>} : vector<256x576xbf16>, vector<576x64xbf16>, vector<256x64xf32> -> vector<256x64xf32>
    %c0_33 = arith.constant 0 : index
    %c0_34 = arith.constant 0 : index
    %37 = vector.load %arg5[%c0_33, %c0_34] : memref<1x64xf32, #tpu.memory_space<vmem>>, vector<1x64xf32>
    %38 = vector.broadcast %37 : vector<1x64xf32> to vector<256x64xf32>
    %39 = arith.addf %36, %38 : vector<256x64xf32>
    %cst_35 = arith.constant 0.000000e+00 : f32
    %40 = vector.broadcast %cst_35 : f32 to vector<256x64xf32>
    %41 = arith.maximumf %39, %40 : vector<256x64xf32>
    %42 = vector.shape_cast %41 : vector<256x64xf32> to vector<1x16x16x64xf32>
    %43 = arith.truncf %42 : vector<1x16x16x64xf32> to vector<1x16x16x64xbf16>
    %c0_36 = arith.constant 0 : index
    %c0_37 = arith.constant 0 : index
    %c0_38 = arith.constant 0 : index
    %c0_39 = arith.constant 0 : index
    %44 = vector.load %arg6[%c0_36, %c0_37, %c0_38, %c0_39] : memref<1x16x16x64xbf16, #tpu.memory_space<vmem>>, vector<1x16x16x64xbf16>
    tpu.vector_store %arg6[%c0_36, %c0_37, %c0_38, %c0_39], %43 {strides = array<i32>} : memref<1x16x16x64xbf16, #tpu.memory_space<vmem>>, vector<1x16x16x64xbf16>,
    return
  }
  func.func @transform_0(%arg0: i32, %arg1: i32, %arg2: i32) -> (i32, i32, i32, i32) {
    %c0_i32 = arith.constant 0 : i32
    %c0_i32_0 = arith.constant 0 : i32
    %c0_i32_1 = arith.constant 0 : i32
    %c0_i32_2 = arith.constant 0 : i32
    return %arg0, %c0_i32, %c0_i32_0, %c0_i32_1 : i32, i32, i32, i32
  }
  func.func @transform_1(%arg0: i32, %arg1: i32, %arg2: i32) -> (i32, i32, i32) {
    %c0_i32 = arith.constant 0 : i32
    %c0_i32_0 = arith.constant 0 : i32
    %c0_i32_1 = arith.constant 0 : i32
    return %c0_i32, %c0_i32_0, %arg1 : i32, i32, i32
  }
  func.func @transform_2(%arg0: i32, %arg1: i32, %arg2: i32) -> (i32, i32) {
    %c0_i32 = arith.constant 0 : i32
    %c0_i32_0 = arith.constant 0 : i32
    return %c0_i32, %arg1 : i32, i32
  }
  func.func @transform_3(%arg0: i32, %arg1: i32, %arg2: i32) -> (i32, i32, i32, i32) {
    %c0_i32 = arith.constant 0 : i32
    %c0_i32_0 = arith.constant 0 : i32
    return %arg0, %arg2, %c0_i32, %arg1 : i32, i32, i32, i32
  }
}

module attributes {stable_mosaic.version = 11 : i64} {
  func.func @_global_avgpool_kernel(%arg0: i32, %arg1: i32, %arg2: memref<1x16x16x64xbf16, #tpu.memory_space<vmem>>, %arg3: memref<1x1x64xf32, #tpu.memory_space<vmem>>, %arg4: memref<1x64xf32, #tpu.memory_space<vmem>>) attributes {dimension_semantics = [#tpu.dimension_semantics<parallel>, #tpu.dimension_semantics<arbitrary>], iteration_bounds = array<i64: 2, 1>, scalar_prefetch = 0 : i64, scratch_operands = 1 : i64, tpu.core_type = #tpu.core_type<tc>, window_params = [{transform_indices = @transform_0, window_bounds = array<i64: 1, 16, 16, 64>}, {transform_indices = @transform_1, window_bounds = array<i64: 1, 1, 64>}]} {
    %c0_i32 = arith.constant 0 : i32
    %0 = arith.cmpi eq, %arg1, %c0_i32 : i32
    %1 = arith.extui %0 : i1 to i32
    %c0_i32_0 = arith.constant 0 : i32
    %2 = arith.cmpi ne, %1, %c0_i32_0 : i32
    scf.if %2 {
      %cst_11 = arith.constant 0.000000e+00 : f32
      %15 = vector.broadcast %cst_11 : f32 to vector<1x64xf32>
      %c0_12 = arith.constant 0 : index
      %c0_13 = arith.constant 0 : index
      %16 = vector.load %arg4[%c0_12, %c0_13] : memref<1x64xf32, #tpu.memory_space<vmem>>, vector<1x64xf32>
      tpu.vector_store %arg4[%c0_12, %c0_13], %15 {strides = array<i32>} : memref<1x64xf32, #tpu.memory_space<vmem>>, vector<1x64xf32>,
    } else {
    }
    %c0 = arith.constant 0 : index
    %c0_1 = arith.constant 0 : index
    %c0_2 = arith.constant 0 : index
    %c0_3 = arith.constant 0 : index
    %3 = vector.load %arg2[%c0, %c0_1, %c0_2, %c0_3] : memref<1x16x16x64xbf16, #tpu.memory_space<vmem>>, vector<1x16x16x64xbf16>
    %4 = vector.shape_cast %3 : vector<1x16x16x64xbf16> to vector<16x16x64xbf16>
    %5 = arith.extf %4 : vector<16x16x64xbf16> to vector<16x16x64xf32>
    %c0_4 = arith.constant 0 : index
    %c0_5 = arith.constant 0 : index
    %6 = vector.load %arg4[%c0_4, %c0_5] : memref<1x64xf32, #tpu.memory_space<vmem>>, vector<1x64xf32>
    %cst = arith.constant dense<0.000000e+00> : vector<16x64xf32>
    %7 = vector.multi_reduction <add>, %5, %cst [0] : vector<16x16x64xf32> to vector<16x64xf32>
    %cst_6 = arith.constant dense<0.000000e+00> : vector<64xf32>
    %8 = vector.multi_reduction <add>, %7, %cst_6 [0] : vector<16x64xf32> to vector<64xf32>
    %9 = vector.shape_cast %8 : vector<64xf32> to vector<1x64xf32>
    %10 = arith.addf %6, %9 : vector<1x64xf32>
    %c0_7 = arith.constant 0 : index
    %c0_8 = arith.constant 0 : index
    %11 = vector.load %arg4[%c0_7, %c0_8] : memref<1x64xf32, #tpu.memory_space<vmem>>, vector<1x64xf32>
    tpu.vector_store %arg4[%c0_7, %c0_8], %10 {strides = array<i32>} : memref<1x64xf32, #tpu.memory_space<vmem>>, vector<1x64xf32>,
    %c0_i32_9 = arith.constant 0 : i32
    %12 = arith.cmpi eq, %arg1, %c0_i32_9 : i32
    %13 = arith.extui %12 : i1 to i32
    %c0_i32_10 = arith.constant 0 : i32
    %14 = arith.cmpi ne, %13, %c0_i32_10 : i32
    scf.if %14 {
      %c0_11 = arith.constant 0 : index
      %c0_12 = arith.constant 0 : index
      %15 = vector.load %arg4[%c0_11, %c0_12] : memref<1x64xf32, #tpu.memory_space<vmem>>, vector<1x64xf32>
      %cst_13 = arith.constant 3.906250e-03 : f32
      %16 = vector.broadcast %cst_13 : f32 to vector<1x64xf32>
      %17 = arith.mulf %15, %16 : vector<1x64xf32>
      %18 = vector.shape_cast %17 : vector<1x64xf32> to vector<1x1x64xf32>
      %c0_14 = arith.constant 0 : index
      %c0_15 = arith.constant 0 : index
      %c0_16 = arith.constant 0 : index
      %19 = vector.load %arg3[%c0_14, %c0_15, %c0_16] : memref<1x1x64xf32, #tpu.memory_space<vmem>>, vector<1x1x64xf32>
      tpu.vector_store %arg3[%c0_14, %c0_15, %c0_16], %18 {strides = array<i32>} : memref<1x1x64xf32, #tpu.memory_space<vmem>>, vector<1x1x64xf32>,
    } else {
    }
    return
  }
  func.func @transform_0(%arg0: i32, %arg1: i32) -> (i32, i32, i32, i32) {
    %c0_i32 = arith.constant 0 : i32
    %c0_i32_0 = arith.constant 0 : i32
    %c0_i32_1 = arith.constant 0 : i32
    return %arg0, %arg1, %c0_i32, %c0_i32_0 : i32, i32, i32, i32
  }
  func.func @transform_1(%arg0: i32, %arg1: i32) -> (i32, i32, i32) {
    %c0_i32 = arith.constant 0 : i32
    %c0_i32_0 = arith.constant 0 : i32
    %c0_i32_1 = arith.constant 0 : i32
    return %arg0, %c0_i32, %c0_i32_0 : i32, i32, i32
  }
}

module attributes {stable_mosaic.version = 11 : i64} {
  func.func @_maxpool_kernel(%arg0: i32, %arg1: i32, %arg2: memref<1x8x2x8x128xbf16, #tpu.memory_space<vmem>>, %arg3: memref<1x8x8x64xbf16, #tpu.memory_space<vmem>>) attributes {dimension_semantics = [#tpu.dimension_semantics<parallel>, #tpu.dimension_semantics<parallel>], iteration_bounds = array<i64: 2, 1>, scalar_prefetch = 0 : i64, scratch_operands = 0 : i64, tpu.core_type = #tpu.core_type<tc>, window_params = [{transform_indices = @transform_0, window_bounds = array<i64: 1, 8, 2, 8, 128>}, {transform_indices = @transform_1, window_bounds = array<i64: 1, 8, 8, 64>}]} {
    %c0 = arith.constant 0 : index
    %c0_0 = arith.constant 0 : index
    %c0_1 = arith.constant 0 : index
    %c0_2 = arith.constant 0 : index
    %c0_3 = arith.constant 0 : index
    %0 = vector.load %arg2[%c0, %c0_0, %c0_1, %c0_2, %c0_3] : memref<1x8x2x8x128xbf16, #tpu.memory_space<vmem>>, vector<1x8x1x8x128xbf16>
    %1 = vector.shape_cast %0 : vector<1x8x1x8x128xbf16> to vector<1x8x8x128xbf16>
    %c0_4 = arith.constant 0 : index
    %c0_5 = arith.constant 0 : index
    %c1 = arith.constant 1 : index
    %c0_6 = arith.constant 0 : index
    %c0_7 = arith.constant 0 : index
    %2 = vector.load %arg2[%c0_4, %c0_5, %c1, %c0_6, %c0_7] : memref<1x8x2x8x128xbf16, #tpu.memory_space<vmem>>, vector<1x8x1x8x128xbf16>
    %3 = vector.shape_cast %2 : vector<1x8x1x8x128xbf16> to vector<1x8x8x128xbf16>
    %4 = arith.maximumf %1, %3 : vector<1x8x8x128xbf16>
    %5 = vector.extract_strided_slice %4 {offsets = [0, 0, 0, 0], sizes = [1, 8, 8, 64], strides = [1, 1, 1, 1]} : vector<1x8x8x128xbf16> to vector<1x8x8x64xbf16>
    %6 = vector.extract_strided_slice %4 {offsets = [0, 0, 0, 64], sizes = [1, 8, 8, 64], strides = [1, 1, 1, 1]} : vector<1x8x8x128xbf16> to vector<1x8x8x64xbf16>
    %7 = arith.maximumf %5, %6 : vector<1x8x8x64xbf16>
    %c0_8 = arith.constant 0 : index
    %c0_9 = arith.constant 0 : index
    %c0_10 = arith.constant 0 : index
    %c0_11 = arith.constant 0 : index
    %8 = vector.load %arg3[%c0_8, %c0_9, %c0_10, %c0_11] : memref<1x8x8x64xbf16, #tpu.memory_space<vmem>>, vector<1x8x8x64xbf16>
    tpu.vector_store %arg3[%c0_8, %c0_9, %c0_10, %c0_11], %7 {strides = array<i32>} : memref<1x8x8x64xbf16, #tpu.memory_space<vmem>>, vector<1x8x8x64xbf16>,
    return
  }
  func.func @transform_0(%arg0: i32, %arg1: i32) -> (i32, i32, i32, i32, i32) {
    %c0_i32 = arith.constant 0 : i32
    %c0_i32_0 = arith.constant 0 : i32
    %c0_i32_1 = arith.constant 0 : i32
    %c0_i32_2 = arith.constant 0 : i32
    return %arg0, %arg1, %c0_i32, %c0_i32_0, %c0_i32_1 : i32, i32, i32, i32, i32
  }
  func.func @transform_1(%arg0: i32, %arg1: i32) -> (i32, i32, i32, i32) {
    %c0_i32 = arith.constant 0 : i32
    %c0_i32_0 = arith.constant 0 : i32
    %c0_i32_1 = arith.constant 0 : i32
    return %arg0, %arg1, %c0_i32, %c0_i32_0 : i32, i32, i32, i32
  }
}

module attributes {stable_mosaic.version = 11 : i64} {
  func.func @_conv_bias_act_kernel(%arg0: i32, %arg1: i32, %arg2: i32, %arg3: memref<1x10x10x64xbf16, #tpu.memory_space<vmem>>, %arg4: memref<1x576x128xbf16, #tpu.memory_space<vmem>>, %arg5: memref<1x128xf32, #tpu.memory_space<vmem>>, %arg6: memref<1x8x8x128xbf16, #tpu.memory_space<vmem>>, %arg7: memref<8x8x576xbf16, #tpu.memory_space<vmem>>) attributes {dimension_semantics = [#tpu.dimension_semantics<parallel>, #tpu.dimension_semantics<parallel>, #tpu.dimension_semantics<arbitrary>], iteration_bounds = array<i64: 2, 1, 1>, scalar_prefetch = 0 : i64, scratch_operands = 1 : i64, tpu.core_type = #tpu.core_type<tc>, window_params = [{transform_indices = @transform_0, window_bounds = array<i64: 1, 10, 10, 64>}, {transform_indices = @transform_1, window_bounds = array<i64: 1, 576, 128>}, {transform_indices = @transform_2, window_bounds = array<i64: 1, 128>}, {transform_indices = @transform_3, window_bounds = array<i64: 1, 8, 8, 128>}]} {
    %c8_i32 = arith.constant 8 : i32
    %0 = arith.muli %arg2, %c8_i32 : i32
    %1 = tpu.assume_multiple %0, 8 : i32
    %c0_i32 = arith.constant 0 : i32
    %2 = arith.addi %1, %c0_i32 : i32
    %c0 = arith.constant 0 : index
    %3 = arith.index_cast %2 : i32 to index
    %c0_0 = arith.constant 0 : index
    %c0_1 = arith.constant 0 : index
    %4 = vector.load %arg3[%c0, %3, %c0_0, %c0_1] : memref<1x10x10x64xbf16, #tpu.memory_space<vmem>>, vector<1x8x10x64xbf16>
    %5 = vector.shape_cast %4 : vector<1x8x10x64xbf16> to vector<8x10x64xbf16>
    %6 = vector.extract_strided_slice %5 {offsets = [0, 0, 0], sizes = [8, 8, 64], strides = [1, 1, 1]} : vector<8x10x64xbf16> to vector<8x8x64xbf16>
    %c0_2 = arith.constant 0 : index
    %c0_3 = arith.constant 0 : index
    %c0_4 = arith.constant 0 : index
    %7 = vector.load %arg7[%c0_2, %c0_3, %c0_4] : memref<8x8x576xbf16, #tpu.memory_space<vmem>>, vector<8x8x64xbf16>
    tpu.vector_store %arg7[%c0_2, %c0_3, %c0_4], %6 {strides = array<i32>} : memref<8x8x576xbf16, #tpu.memory_space<vmem>>, vector<8x8x64xbf16>,
    %8 = vector.extract_strided_slice %5 {offsets = [0, 1, 0], sizes = [8, 8, 64], strides = [1, 1, 1]} : vector<8x10x64xbf16> to vector<8x8x64xbf16>
    %c0_5 = arith.constant 0 : index
    %c0_6 = arith.constant 0 : index
    %c64 = arith.constant 64 : index
    %9 = vector.load %arg7[%c0_5, %c0_6, %c64] : memref<8x8x576xbf16, #tpu.memory_space<vmem>>, vector<8x8x64xbf16>
    tpu.vector_store %arg7[%c0_5, %c0_6, %c64], %8 {strides = array<i32>} : memref<8x8x576xbf16, #tpu.memory_space<vmem>>, vector<8x8x64xbf16>,
    %10 = vector.extract_strided_slice %5 {offsets = [0, 2, 0], sizes = [8, 8, 64], strides = [1, 1, 1]} : vector<8x10x64xbf16> to vector<8x8x64xbf16>
    %c0_7 = arith.constant 0 : index
    %c0_8 = arith.constant 0 : index
    %c128 = arith.constant 128 : index
    %11 = vector.load %arg7[%c0_7, %c0_8, %c128] : memref<8x8x576xbf16, #tpu.memory_space<vmem>>, vector<8x8x64xbf16>
    tpu.vector_store %arg7[%c0_7, %c0_8, %c128], %10 {strides = array<i32>} : memref<8x8x576xbf16, #tpu.memory_space<vmem>>, vector<8x8x64xbf16>,
    %c1_i32 = arith.constant 1 : i32
    %12 = arith.addi %1, %c1_i32 : i32
    %c0_9 = arith.constant 0 : index
    %13 = arith.index_cast %12 : i32 to index
    %c0_10 = arith.constant 0 : index
    %c0_11 = arith.constant 0 : index
    %14 = vector.load %arg3[%c0_9, %13, %c0_10, %c0_11] : memref<1x10x10x64xbf16, #tpu.memory_space<vmem>>, vector<1x8x10x64xbf16>
    %15 = vector.shape_cast %14 : vector<1x8x10x64xbf16> to vector<8x10x64xbf16>
    %16 = vector.extract_strided_slice %15 {offsets = [0, 0, 0], sizes = [8, 8, 64], strides = [1, 1, 1]} : vector<8x10x64xbf16> to vector<8x8x64xbf16>
    %c0_12 = arith.constant 0 : index
    %c0_13 = arith.constant 0 : index
    %c192 = arith.constant 192 : index
    %17 = vector.load %arg7[%c0_12, %c0_13, %c192] : memref<8x8x576xbf16, #tpu.memory_space<vmem>>, vector<8x8x64xbf16>
    tpu.vector_store %arg7[%c0_12, %c0_13, %c192], %16 {strides = array<i32>} : memref<8x8x576xbf16, #tpu.memory_space<vmem>>, vector<8x8x64xbf16>,
    %18 = vector.extract_strided_slice %15 {offsets = [0, 1, 0], sizes = [8, 8, 64], strides = [1, 1, 1]} : vector<8x10x64xbf16> to vector<8x8x64xbf16>
    %c0_14 = arith.constant 0 : index
    %c0_15 = arith.constant 0 : index
    %c256 = arith.constant 256 : index
    %19 = vector.load %arg7[%c0_14, %c0_15, %c256] : memref<8x8x576xbf16, #tpu.memory_space<vmem>>, vector<8x8x64xbf16>
    tpu.vector_store %arg7[%c0_14, %c0_15, %c256], %18 {strides = array<i32>} : memref<8x8x576xbf16, #tpu.memory_space<vmem>>, vector<8x8x64xbf16>,
    %20 = vector.extract_strided_slice %15 {offsets = [0, 2, 0], sizes = [8, 8, 64], strides = [1, 1, 1]} : vector<8x10x64xbf16> to vector<8x8x64xbf16>
    %c0_16 = arith.constant 0 : index
    %c0_17 = arith.constant 0 : index
    %c320 = arith.constant 320 : index
    %21 = vector.load %arg7[%c0_16, %c0_17, %c320] : memref<8x8x576xbf16, #tpu.memory_space<vmem>>, vector<8x8x64xbf16>
    tpu.vector_store %arg7[%c0_16, %c0_17, %c320], %20 {strides = array<i32>} : memref<8x8x576xbf16, #tpu.memory_space<vmem>>, vector<8x8x64xbf16>,
    %c2_i32 = arith.constant 2 : i32
    %22 = arith.addi %1, %c2_i32 : i32
    %c0_18 = arith.constant 0 : index
    %23 = arith.index_cast %22 : i32 to index
    %c0_19 = arith.constant 0 : index
    %c0_20 = arith.constant 0 : index
    %24 = vector.load %arg3[%c0_18, %23, %c0_19, %c0_20] : memref<1x10x10x64xbf16, #tpu.memory_space<vmem>>, vector<1x8x10x64xbf16>
    %25 = vector.shape_cast %24 : vector<1x8x10x64xbf16> to vector<8x10x64xbf16>
    %26 = vector.extract_strided_slice %25 {offsets = [0, 0, 0], sizes = [8, 8, 64], strides = [1, 1, 1]} : vector<8x10x64xbf16> to vector<8x8x64xbf16>
    %c0_21 = arith.constant 0 : index
    %c0_22 = arith.constant 0 : index
    %c384 = arith.constant 384 : index
    %27 = vector.load %arg7[%c0_21, %c0_22, %c384] : memref<8x8x576xbf16, #tpu.memory_space<vmem>>, vector<8x8x64xbf16>
    tpu.vector_store %arg7[%c0_21, %c0_22, %c384], %26 {strides = array<i32>} : memref<8x8x576xbf16, #tpu.memory_space<vmem>>, vector<8x8x64xbf16>,
    %28 = vector.extract_strided_slice %25 {offsets = [0, 1, 0], sizes = [8, 8, 64], strides = [1, 1, 1]} : vector<8x10x64xbf16> to vector<8x8x64xbf16>
    %c0_23 = arith.constant 0 : index
    %c0_24 = arith.constant 0 : index
    %c448 = arith.constant 448 : index
    %29 = vector.load %arg7[%c0_23, %c0_24, %c448] : memref<8x8x576xbf16, #tpu.memory_space<vmem>>, vector<8x8x64xbf16>
    tpu.vector_store %arg7[%c0_23, %c0_24, %c448], %28 {strides = array<i32>} : memref<8x8x576xbf16, #tpu.memory_space<vmem>>, vector<8x8x64xbf16>,
    %30 = vector.extract_strided_slice %25 {offsets = [0, 2, 0], sizes = [8, 8, 64], strides = [1, 1, 1]} : vector<8x10x64xbf16> to vector<8x8x64xbf16>
    %c0_25 = arith.constant 0 : index
    %c0_26 = arith.constant 0 : index
    %c512 = arith.constant 512 : index
    %31 = vector.load %arg7[%c0_25, %c0_26, %c512] : memref<8x8x576xbf16, #tpu.memory_space<vmem>>, vector<8x8x64xbf16>
    tpu.vector_store %arg7[%c0_25, %c0_26, %c512], %30 {strides = array<i32>} : memref<8x8x576xbf16, #tpu.memory_space<vmem>>, vector<8x8x64xbf16>,
    %c0_27 = arith.constant 0 : index
    %c0_28 = arith.constant 0 : index
    %c0_29 = arith.constant 0 : index
    %32 = vector.load %arg7[%c0_27, %c0_28, %c0_29] : memref<8x8x576xbf16, #tpu.memory_space<vmem>>, vector<8x8x576xbf16>
    %33 = vector.shape_cast %32 : vector<8x8x576xbf16> to vector<64x576xbf16>
    %c0_30 = arith.constant 0 : index
    %c0_31 = arith.constant 0 : index
    %c0_32 = arith.constant 0 : index
    %34 = vector.load %arg4[%c0_30, %c0_31, %c0_32] : memref<1x576x128xbf16, #tpu.memory_space<vmem>>, vector<1x576x128xbf16>
    %35 = vector.shape_cast %34 : vector<1x576x128xbf16> to vector<576x128xbf16>
    %cst = arith.constant dense<0.000000e+00> : vector<64x128xf32>
    %36 = tpu.matmul %33, %35, %cst {dimension_numbers = #tpu.dot_dimension_numbers<[1], [0], [0], [1], [0, 0, 1, 1], [], []>} : vector<64x576xbf16>, vector<576x128xbf16>, vector<64x128xf32> -> vector<64x128xf32>
    %c0_33 = arith.constant 0 : index
    %c0_34 = arith.constant 0 : index
    %37 = vector.load %arg5[%c0_33, %c0_34] : memref<1x128xf32, #tpu.memory_space<vmem>>, vector<1x128xf32>
    %38 = vector.broadcast %37 : vector<1x128xf32> to vector<64x128xf32>
    %39 = arith.addf %36, %38 : vector<64x128xf32>
    %cst_35 = arith.constant 0.000000e+00 : f32
    %40 = vector.broadcast %cst_35 : f32 to vector<64x128xf32>
    %41 = arith.maximumf %39, %40 : vector<64x128xf32>
    %42 = vector.shape_cast %41 : vector<64x128xf32> to vector<1x8x8x128xf32>
    %43 = arith.truncf %42 : vector<1x8x8x128xf32> to vector<1x8x8x128xbf16>
    %c0_36 = arith.constant 0 : index
    %c0_37 = arith.constant 0 : index
    %c0_38 = arith.constant 0 : index
    %c0_39 = arith.constant 0 : index
    %44 = vector.load %arg6[%c0_36, %c0_37, %c0_38, %c0_39] : memref<1x8x8x128xbf16, #tpu.memory_space<vmem>>, vector<1x8x8x128xbf16>
    tpu.vector_store %arg6[%c0_36, %c0_37, %c0_38, %c0_39], %43 {strides = array<i32>} : memref<1x8x8x128xbf16, #tpu.memory_space<vmem>>, vector<1x8x8x128xbf16>,
    return
  }
  func.func @transform_0(%arg0: i32, %arg1: i32, %arg2: i32) -> (i32, i32, i32, i32) {
    %c0_i32 = arith.constant 0 : i32
    %c0_i32_0 = arith.constant 0 : i32
    %c0_i32_1 = arith.constant 0 : i32
    %c0_i32_2 = arith.constant 0 : i32
    return %arg0, %c0_i32, %c0_i32_0, %c0_i32_1 : i32, i32, i32, i32
  }
  func.func @transform_1(%arg0: i32, %arg1: i32, %arg2: i32) -> (i32, i32, i32) {
    %c0_i32 = arith.constant 0 : i32
    %c0_i32_0 = arith.constant 0 : i32
    %c0_i32_1 = arith.constant 0 : i32
    return %c0_i32, %c0_i32_0, %arg1 : i32, i32, i32
  }
  func.func @transform_2(%arg0: i32, %arg1: i32, %arg2: i32) -> (i32, i32) {
    %c0_i32 = arith.constant 0 : i32
    %c0_i32_0 = arith.constant 0 : i32
    return %c0_i32, %arg1 : i32, i32
  }
  func.func @transform_3(%arg0: i32, %arg1: i32, %arg2: i32) -> (i32, i32, i32, i32) {
    %c0_i32 = arith.constant 0 : i32
    %c0_i32_0 = arith.constant 0 : i32
    return %arg0, %arg2, %c0_i32, %arg1 : i32, i32, i32, i32
  }
}

module attributes {stable_mosaic.version = 11 : i64} {
  func.func @_conv_bias_act_kernel(%arg0: i32, %arg1: i32, %arg2: i32, %arg3: memref<1x10x10x128xbf16, #tpu.memory_space<vmem>>, %arg4: memref<1x1152x128xbf16, #tpu.memory_space<vmem>>, %arg5: memref<1x128xf32, #tpu.memory_space<vmem>>, %arg6: memref<1x8x8x128xbf16, #tpu.memory_space<vmem>>, %arg7: memref<8x8x1152xbf16, #tpu.memory_space<vmem>>) attributes {dimension_semantics = [#tpu.dimension_semantics<parallel>, #tpu.dimension_semantics<parallel>, #tpu.dimension_semantics<arbitrary>], iteration_bounds = array<i64: 2, 1, 1>, scalar_prefetch = 0 : i64, scratch_operands = 1 : i64, tpu.core_type = #tpu.core_type<tc>, window_params = [{transform_indices = @transform_0, window_bounds = array<i64: 1, 10, 10, 128>}, {transform_indices = @transform_1, window_bounds = array<i64: 1, 1152, 128>}, {transform_indices = @transform_2, window_bounds = array<i64: 1, 128>}, {transform_indices = @transform_3, window_bounds = array<i64: 1, 8, 8, 128>}]} {
    %c8_i32 = arith.constant 8 : i32
    %0 = arith.muli %arg2, %c8_i32 : i32
    %1 = tpu.assume_multiple %0, 8 : i32
    %c0_i32 = arith.constant 0 : i32
    %2 = arith.addi %1, %c0_i32 : i32
    %c0 = arith.constant 0 : index
    %3 = arith.index_cast %2 : i32 to index
    %c0_0 = arith.constant 0 : index
    %c0_1 = arith.constant 0 : index
    %4 = vector.load %arg3[%c0, %3, %c0_0, %c0_1] : memref<1x10x10x128xbf16, #tpu.memory_space<vmem>>, vector<1x8x10x128xbf16>
    %5 = vector.shape_cast %4 : vector<1x8x10x128xbf16> to vector<8x10x128xbf16>
    %6 = vector.extract_strided_slice %5 {offsets = [0, 0, 0], sizes = [8, 8, 128], strides = [1, 1, 1]} : vector<8x10x128xbf16> to vector<8x8x128xbf16>
    %c0_2 = arith.constant 0 : index
    %c0_3 = arith.constant 0 : index
    %c0_4 = arith.constant 0 : index
    %7 = vector.load %arg7[%c0_2, %c0_3, %c0_4] : memref<8x8x1152xbf16, #tpu.memory_space<vmem>>, vector<8x8x128xbf16>
    tpu.vector_store %arg7[%c0_2, %c0_3, %c0_4], %6 {strides = array<i32>} : memref<8x8x1152xbf16, #tpu.memory_space<vmem>>, vector<8x8x128xbf16>,
    %8 = vector.extract_strided_slice %5 {offsets = [0, 1, 0], sizes = [8, 8, 128], strides = [1, 1, 1]} : vector<8x10x128xbf16> to vector<8x8x128xbf16>
    %c0_5 = arith.constant 0 : index
    %c0_6 = arith.constant 0 : index
    %c128 = arith.constant 128 : index
    %9 = vector.load %arg7[%c0_5, %c0_6, %c128] : memref<8x8x1152xbf16, #tpu.memory_space<vmem>>, vector<8x8x128xbf16>
    tpu.vector_store %arg7[%c0_5, %c0_6, %c128], %8 {strides = array<i32>} : memref<8x8x1152xbf16, #tpu.memory_space<vmem>>, vector<8x8x128xbf16>,
    %10 = vector.extract_strided_slice %5 {offsets = [0, 2, 0], sizes = [8, 8, 128], strides = [1, 1, 1]} : vector<8x10x128xbf16> to vector<8x8x128xbf16>
    %c0_7 = arith.constant 0 : index
    %c0_8 = arith.constant 0 : index
    %c256 = arith.constant 256 : index
    %11 = vector.load %arg7[%c0_7, %c0_8, %c256] : memref<8x8x1152xbf16, #tpu.memory_space<vmem>>, vector<8x8x128xbf16>
    tpu.vector_store %arg7[%c0_7, %c0_8, %c256], %10 {strides = array<i32>} : memref<8x8x1152xbf16, #tpu.memory_space<vmem>>, vector<8x8x128xbf16>,
    %c1_i32 = arith.constant 1 : i32
    %12 = arith.addi %1, %c1_i32 : i32
    %c0_9 = arith.constant 0 : index
    %13 = arith.index_cast %12 : i32 to index
    %c0_10 = arith.constant 0 : index
    %c0_11 = arith.constant 0 : index
    %14 = vector.load %arg3[%c0_9, %13, %c0_10, %c0_11] : memref<1x10x10x128xbf16, #tpu.memory_space<vmem>>, vector<1x8x10x128xbf16>
    %15 = vector.shape_cast %14 : vector<1x8x10x128xbf16> to vector<8x10x128xbf16>
    %16 = vector.extract_strided_slice %15 {offsets = [0, 0, 0], sizes = [8, 8, 128], strides = [1, 1, 1]} : vector<8x10x128xbf16> to vector<8x8x128xbf16>
    %c0_12 = arith.constant 0 : index
    %c0_13 = arith.constant 0 : index
    %c384 = arith.constant 384 : index
    %17 = vector.load %arg7[%c0_12, %c0_13, %c384] : memref<8x8x1152xbf16, #tpu.memory_space<vmem>>, vector<8x8x128xbf16>
    tpu.vector_store %arg7[%c0_12, %c0_13, %c384], %16 {strides = array<i32>} : memref<8x8x1152xbf16, #tpu.memory_space<vmem>>, vector<8x8x128xbf16>,
    %18 = vector.extract_strided_slice %15 {offsets = [0, 1, 0], sizes = [8, 8, 128], strides = [1, 1, 1]} : vector<8x10x128xbf16> to vector<8x8x128xbf16>
    %c0_14 = arith.constant 0 : index
    %c0_15 = arith.constant 0 : index
    %c512 = arith.constant 512 : index
    %19 = vector.load %arg7[%c0_14, %c0_15, %c512] : memref<8x8x1152xbf16, #tpu.memory_space<vmem>>, vector<8x8x128xbf16>
    tpu.vector_store %arg7[%c0_14, %c0_15, %c512], %18 {strides = array<i32>} : memref<8x8x1152xbf16, #tpu.memory_space<vmem>>, vector<8x8x128xbf16>,
    %20 = vector.extract_strided_slice %15 {offsets = [0, 2, 0], sizes = [8, 8, 128], strides = [1, 1, 1]} : vector<8x10x128xbf16> to vector<8x8x128xbf16>
    %c0_16 = arith.constant 0 : index
    %c0_17 = arith.constant 0 : index
    %c640 = arith.constant 640 : index
    %21 = vector.load %arg7[%c0_16, %c0_17, %c640] : memref<8x8x1152xbf16, #tpu.memory_space<vmem>>, vector<8x8x128xbf16>
    tpu.vector_store %arg7[%c0_16, %c0_17, %c640], %20 {strides = array<i32>} : memref<8x8x1152xbf16, #tpu.memory_space<vmem>>, vector<8x8x128xbf16>,
    %c2_i32 = arith.constant 2 : i32
    %22 = arith.addi %1, %c2_i32 : i32
    %c0_18 = arith.constant 0 : index
    %23 = arith.index_cast %22 : i32 to index
    %c0_19 = arith.constant 0 : index
    %c0_20 = arith.constant 0 : index
    %24 = vector.load %arg3[%c0_18, %23, %c0_19, %c0_20] : memref<1x10x10x128xbf16, #tpu.memory_space<vmem>>, vector<1x8x10x128xbf16>
    %25 = vector.shape_cast %24 : vector<1x8x10x128xbf16> to vector<8x10x128xbf16>
    %26 = vector.extract_strided_slice %25 {offsets = [0, 0, 0], sizes = [8, 8, 128], strides = [1, 1, 1]} : vector<8x10x128xbf16> to vector<8x8x128xbf16>
    %c0_21 = arith.constant 0 : index
    %c0_22 = arith.constant 0 : index
    %c768 = arith.constant 768 : index
    %27 = vector.load %arg7[%c0_21, %c0_22, %c768] : memref<8x8x1152xbf16, #tpu.memory_space<vmem>>, vector<8x8x128xbf16>
    tpu.vector_store %arg7[%c0_21, %c0_22, %c768], %26 {strides = array<i32>} : memref<8x8x1152xbf16, #tpu.memory_space<vmem>>, vector<8x8x128xbf16>,
    %28 = vector.extract_strided_slice %25 {offsets = [0, 1, 0], sizes = [8, 8, 128], strides = [1, 1, 1]} : vector<8x10x128xbf16> to vector<8x8x128xbf16>
    %c0_23 = arith.constant 0 : index
    %c0_24 = arith.constant 0 : index
    %c896 = arith.constant 896 : index
    %29 = vector.load %arg7[%c0_23, %c0_24, %c896] : memref<8x8x1152xbf16, #tpu.memory_space<vmem>>, vector<8x8x128xbf16>
    tpu.vector_store %arg7[%c0_23, %c0_24, %c896], %28 {strides = array<i32>} : memref<8x8x1152xbf16, #tpu.memory_space<vmem>>, vector<8x8x128xbf16>,
    %30 = vector.extract_strided_slice %25 {offsets = [0, 2, 0], sizes = [8, 8, 128], strides = [1, 1, 1]} : vector<8x10x128xbf16> to vector<8x8x128xbf16>
    %c0_25 = arith.constant 0 : index
    %c0_26 = arith.constant 0 : index
    %c1024 = arith.constant 1024 : index
    %31 = vector.load %arg7[%c0_25, %c0_26, %c1024] : memref<8x8x1152xbf16, #tpu.memory_space<vmem>>, vector<8x8x128xbf16>
    tpu.vector_store %arg7[%c0_25, %c0_26, %c1024], %30 {strides = array<i32>} : memref<8x8x1152xbf16, #tpu.memory_space<vmem>>, vector<8x8x128xbf16>,
    %c0_27 = arith.constant 0 : index
    %c0_28 = arith.constant 0 : index
    %c0_29 = arith.constant 0 : index
    %32 = vector.load %arg7[%c0_27, %c0_28, %c0_29] : memref<8x8x1152xbf16, #tpu.memory_space<vmem>>, vector<8x8x1152xbf16>
    %33 = vector.shape_cast %32 : vector<8x8x1152xbf16> to vector<64x1152xbf16>
    %c0_30 = arith.constant 0 : index
    %c0_31 = arith.constant 0 : index
    %c0_32 = arith.constant 0 : index
    %34 = vector.load %arg4[%c0_30, %c0_31, %c0_32] : memref<1x1152x128xbf16, #tpu.memory_space<vmem>>, vector<1x1152x128xbf16>
    %35 = vector.shape_cast %34 : vector<1x1152x128xbf16> to vector<1152x128xbf16>
    %cst = arith.constant dense<0.000000e+00> : vector<64x128xf32>
    %36 = tpu.matmul %33, %35, %cst {dimension_numbers = #tpu.dot_dimension_numbers<[1], [0], [0], [1], [0, 0, 1, 1], [], []>} : vector<64x1152xbf16>, vector<1152x128xbf16>, vector<64x128xf32> -> vector<64x128xf32>
    %c0_33 = arith.constant 0 : index
    %c0_34 = arith.constant 0 : index
    %37 = vector.load %arg5[%c0_33, %c0_34] : memref<1x128xf32, #tpu.memory_space<vmem>>, vector<1x128xf32>
    %38 = vector.broadcast %37 : vector<1x128xf32> to vector<64x128xf32>
    %39 = arith.addf %36, %38 : vector<64x128xf32>
    %cst_35 = arith.constant 0.000000e+00 : f32
    %40 = vector.broadcast %cst_35 : f32 to vector<64x128xf32>
    %41 = arith.maximumf %39, %40 : vector<64x128xf32>
    %42 = vector.shape_cast %41 : vector<64x128xf32> to vector<1x8x8x128xf32>
    %43 = arith.truncf %42 : vector<1x8x8x128xf32> to vector<1x8x8x128xbf16>
    %c0_36 = arith.constant 0 : index
    %c0_37 = arith.constant 0 : index
    %c0_38 = arith.constant 0 : index
    %c0_39 = arith.constant 0 : index
    %44 = vector.load %arg6[%c0_36, %c0_37, %c0_38, %c0_39] : memref<1x8x8x128xbf16, #tpu.memory_space<vmem>>, vector<1x8x8x128xbf16>
    tpu.vector_store %arg6[%c0_36, %c0_37, %c0_38, %c0_39], %43 {strides = array<i32>} : memref<1x8x8x128xbf16, #tpu.memory_space<vmem>>, vector<1x8x8x128xbf16>,
    return
  }
  func.func @transform_0(%arg0: i32, %arg1: i32, %arg2: i32) -> (i32, i32, i32, i32) {
    %c0_i32 = arith.constant 0 : i32
    %c0_i32_0 = arith.constant 0 : i32
    %c0_i32_1 = arith.constant 0 : i32
    %c0_i32_2 = arith.constant 0 : i32
    return %arg0, %c0_i32, %c0_i32_0, %c0_i32_1 : i32, i32, i32, i32
  }
  func.func @transform_1(%arg0: i32, %arg1: i32, %arg2: i32) -> (i32, i32, i32) {
    %c0_i32 = arith.constant 0 : i32
    %c0_i32_0 = arith.constant 0 : i32
    %c0_i32_1 = arith.constant 0 : i32
    return %c0_i32, %c0_i32_0, %arg1 : i32, i32, i32
  }
  func.func @transform_2(%arg0: i32, %arg1: i32, %arg2: i32) -> (i32, i32) {
    %c0_i32 = arith.constant 0 : i32
    %c0_i32_0 = arith.constant 0 : i32
    return %c0_i32, %arg1 : i32, i32
  }
  func.func @transform_3(%arg0: i32, %arg1: i32, %arg2: i32) -> (i32, i32, i32, i32) {
    %c0_i32 = arith.constant 0 : i32
    %c0_i32_0 = arith.constant 0 : i32
    return %arg0, %arg2, %c0_i32, %arg1 : i32, i32, i32, i32
  }
}

module attributes {stable_mosaic.version = 11 : i64} {
  func.func @_global_avgpool_kernel(%arg0: i32, %arg1: i32, %arg2: memref<1x8x8x128xbf16, #tpu.memory_space<vmem>>, %arg3: memref<1x1x128xf32, #tpu.memory_space<vmem>>, %arg4: memref<1x128xf32, #tpu.memory_space<vmem>>) attributes {dimension_semantics = [#tpu.dimension_semantics<parallel>, #tpu.dimension_semantics<arbitrary>], iteration_bounds = array<i64: 2, 1>, scalar_prefetch = 0 : i64, scratch_operands = 1 : i64, tpu.core_type = #tpu.core_type<tc>, window_params = [{transform_indices = @transform_0, window_bounds = array<i64: 1, 8, 8, 128>}, {transform_indices = @transform_1, window_bounds = array<i64: 1, 1, 128>}]} {
    %c0_i32 = arith.constant 0 : i32
    %0 = arith.cmpi eq, %arg1, %c0_i32 : i32
    %1 = arith.extui %0 : i1 to i32
    %c0_i32_0 = arith.constant 0 : i32
    %2 = arith.cmpi ne, %1, %c0_i32_0 : i32
    scf.if %2 {
      %cst_11 = arith.constant 0.000000e+00 : f32
      %15 = vector.broadcast %cst_11 : f32 to vector<1x128xf32>
      %c0_12 = arith.constant 0 : index
      %c0_13 = arith.constant 0 : index
      %16 = vector.load %arg4[%c0_12, %c0_13] : memref<1x128xf32, #tpu.memory_space<vmem>>, vector<1x128xf32>
      tpu.vector_store %arg4[%c0_12, %c0_13], %15 {strides = array<i32>} : memref<1x128xf32, #tpu.memory_space<vmem>>, vector<1x128xf32>,
    } else {
    }
    %c0 = arith.constant 0 : index
    %c0_1 = arith.constant 0 : index
    %c0_2 = arith.constant 0 : index
    %c0_3 = arith.constant 0 : index
    %3 = vector.load %arg2[%c0, %c0_1, %c0_2, %c0_3] : memref<1x8x8x128xbf16, #tpu.memory_space<vmem>>, vector<1x8x8x128xbf16>
    %4 = vector.shape_cast %3 : vector<1x8x8x128xbf16> to vector<8x8x128xbf16>
    %5 = arith.extf %4 : vector<8x8x128xbf16> to vector<8x8x128xf32>
    %c0_4 = arith.constant 0 : index
    %c0_5 = arith.constant 0 : index
    %6 = vector.load %arg4[%c0_4, %c0_5] : memref<1x128xf32, #tpu.memory_space<vmem>>, vector<1x128xf32>
    %cst = arith.constant dense<0.000000e+00> : vector<8x128xf32>
    %7 = vector.multi_reduction <add>, %5, %cst [0] : vector<8x8x128xf32> to vector<8x128xf32>
    %cst_6 = arith.constant dense<0.000000e+00> : vector<128xf32>
    %8 = vector.multi_reduction <add>, %7, %cst_6 [0] : vector<8x128xf32> to vector<128xf32>
    %9 = vector.shape_cast %8 : vector<128xf32> to vector<1x128xf32>
    %10 = arith.addf %6, %9 : vector<1x128xf32>
    %c0_7 = arith.constant 0 : index
    %c0_8 = arith.constant 0 : index
    %11 = vector.load %arg4[%c0_7, %c0_8] : memref<1x128xf32, #tpu.memory_space<vmem>>, vector<1x128xf32>
    tpu.vector_store %arg4[%c0_7, %c0_8], %10 {strides = array<i32>} : memref<1x128xf32, #tpu.memory_space<vmem>>, vector<1x128xf32>,
    %c0_i32_9 = arith.constant 0 : i32
    %12 = arith.cmpi eq, %arg1, %c0_i32_9 : i32
    %13 = arith.extui %12 : i1 to i32
    %c0_i32_10 = arith.constant 0 : i32
    %14 = arith.cmpi ne, %13, %c0_i32_10 : i32
    scf.if %14 {
      %c0_11 = arith.constant 0 : index
      %c0_12 = arith.constant 0 : index
      %15 = vector.load %arg4[%c0_11, %c0_12] : memref<1x128xf32, #tpu.memory_space<vmem>>, vector<1x128xf32>
      %cst_13 = arith.constant 1.562500e-02 : f32
      %16 = vector.broadcast %cst_13 : f32 to vector<1x128xf32>
      %17 = arith.mulf %15, %16 : vector<1x128xf32>
      %18 = vector.shape_cast %17 : vector<1x128xf32> to vector<1x1x128xf32>
      %c0_14 = arith.constant 0 : index
      %c0_15 = arith.constant 0 : index
      %c0_16 = arith.constant 0 : index
      %19 = vector.load %arg3[%c0_14, %c0_15, %c0_16] : memref<1x1x128xf32, #tpu.memory_space<vmem>>, vector<1x1x128xf32>
      tpu.vector_store %arg3[%c0_14, %c0_15, %c0_16], %18 {strides = array<i32>} : memref<1x1x128xf32, #tpu.memory_space<vmem>>, vector<1x1x128xf32>,
    } else {
    }
    return
  }
  func.func @transform_0(%arg0: i32, %arg1: i32) -> (i32, i32, i32, i32) {
    %c0_i32 = arith.constant 0 : i32
    %c0_i32_0 = arith.constant 0 : i32
    %c0_i32_1 = arith.constant 0 : i32
    return %arg0, %arg1, %c0_i32, %c0_i32_0 : i32, i32, i32, i32
  }
  func.func @transform_1(%arg0: i32, %arg1: i32) -> (i32, i32, i32) {
    %c0_i32 = arith.constant 0 : i32
    %c0_i32_0 = arith.constant 0 : i32
    %c0_i32_1 = arith.constant 0 : i32
    return %arg0, %c0_i32, %c0_i32_0 : i32, i32, i32
  }
}

</mosaic_0001>

<bundles_post_ra>
// kernel: _lambda_.9
= control target key start
LH: loop header
LB: loop body
LE: loop exit
PB: predicated region body
PF: predicated region fallthrough
CT: control target
= control target key end

     0   :  { %6 = vsyncpa [#allocation4], 0  ;;  %s909_s0 = inlined_call_operand.hbm [shape: bf16[2,16,16,64], index: 0, kind: input, shape index: {}]   ;;  %s910_s1 = inlined_call_operand.hbm [shape: f32[2,1,64], index: 1, kind: output, shape index: {}]  }
   0x1   :  { %8 = vsyncpa [#allocation4 + $0x1], 0 }
   0x2   :  { %9 = vsyncpa [#allocation5], 0 }
   0x3   :  { %11 = vsyncpa [#allocation5 + $0x1], 0  ;;  %s680_s6 = smov 0   ;;  %s682_s7 = smov 0  }
   0x4   :  { %s684_s8 = smov 0   ;;  %s686_s9 = smov 0  }
   0x5   :  { %s688_s10 = smov 0   ;;  %s690_s11 = smov 0  }
   0x6 LB: > { %s394_s12 = sadd.s32 4294967295, %s663_s11   ;;  %s395_s13 = sadd.s32 4294967294, %s663_s11   ;;  %s663_s11 = sphi %s690_s11, %s17_s11   ;;  %s659_s10 = sphi %s688_s10, %s925_s10   ;;  %s655_s9 = sphi %s686_s9, %s924_s9   ;;  %s651_s8 = sphi %s684_s8, %s923_s8   ;;  %s647_s7 = sphi %s682_s7, %s922_s7   ;;  %s643_s6 = sphi %s680_s6, %s921_s6  }
   0x7   : > { %s29_s14 = sadd.s32 1, %s659_s10  ;;  %s38_s15 = sadd.s32 1, %s651_s8 }
   0x8   : > { %p31_p0 = scmp.ge.s32.totalorder %s29_s14, 2  ;;  %p45_p1 = scmp.ne.s32.totalorder %s651_s8, %s647_s7 }
   0x9   : > { %p46_p2 = scmp.eq.s32.totalorder %s663_s11, 0  ;;  %p51_p3 = scmp.ne.s32.totalorder %s647_s7, %s643_s6 }
   0xa   : > { %s927_s14 = smov (%p31_p0, %s29_s14), 0  ;;  %p52_p5 = scmp.eq.s32.totalorder %s394_s12, 0 }
   0xb   : > { %p721_p4 = por %p46_p2, %p45_p1  ;;  %s33_s17 = ssub.s32 %s659_s10, %s927_s14 }
   0xc   : > { %p75_p6 = scmp.eq.s32.totalorder %s394_s12, 1  ;;  %p36_p7 = scmp.eq.s32.totalorder %s33_s17, 0 }
   0xd   : > { %p727_p8 = por %p52_p5, %p51_p3  ;;  %p81_p10 = scmp.eq.s32.totalorder %s395_s13, 1 }
   0xe   : > { %p731_p9 = por %p75_p6, %p45_p1  ;;  %p498_p13 = scmp.lt.s32.totalorder %s663_s11, 2 }
   0xf   : > { %s736_s20 = scalar_select %p36_p7, %s651_s8, %s38_s15  }
  0x10   : > { %s914_s19 = scalar_select %p731_p9, 1, 0 }
  0x11   : > { %p738_p11 = por %p81_p10, %p51_p3  ;;  %s101_s22 = sand.u32 1, %s651_s8  }
  0x12   : > { %s398_s23 = sshll.u32 %s101_s22, 7  ;;  %s406_s24 = sshll.u32 %s659_s10, 11 }
  0x13   : > { %s915_s21 = scalar_select %p738_p11, 1, 0 }
  0x14   : > { %s749_s27 = scalar_lea.hbm %s909_s0, %s406_s24  ;;  %s105_s28 = scalar_lea.vmem [#allocation3], %s398_s23 }
  0x15   : > { %s115_s29 = sshll.u32 %s105_s28, 4  ;;  %p755_p0 = pnand %p498_p13, %p721_p4  ;;  %s751_s29 = int_to_ptr.vmem [resolvable:$true] %s115_s29 }
  0x16   : > { %s760_s2 = scalar_lea.sflag [#allocation4], %s101_s22  ;;  %s551_s3 = scalar_lea.hbm %s749_s27, 2048 }
  0x17   : > { %p552_p2 = scmp.ne.s32.totalorder %s749_s27, %s551_s3  ;;  %p553_p3 = pneg %p755_p0 }
  0x18   : > { %s556_s12 = scalar_lea.hbm %s909_s0, 4096  ;;  %p557_p4 = scmp.lt.u32.totalorder %s749_s27, %s909_s0 }
  0x19   : > { %p554_p5 = pnand %p553_p3, %p552_p2  ;;  %p558_p7 = scmp.lt.u32.totalorder %s556_s12, %s551_s3 }
  0x1a   : > { %p560_p13 = scmp.lt.u32.totalorder %s551_s3, %s749_s27 }
  0x1b   : > { %p555_p6 = pneg %p554_p5  ;;  %p559_p10 = por %p558_p7, %p557_p4 }
  0x1d   : > { %p561_p12 = por %p560_p13, %p559_p10 }
  0x1f   : > { %p562_p1 = pnand %p561_p12, %p555_p6 }
  0x21   : > { %565 = shalt.err (!%p562_p1)
}
  0x22   : > { %s566_s16 = scalar_lea.vmem %s751_s29, 2048  ;;  %s665_s17 = smov [#allocation3]  }
  0x23   : > { %p567_p2 = scmp.ne.s32.totalorder %s751_s29, %s566_s16  ;;  %s571_s22 = sshll.u32 %s665_s17, 4  ;;  %s572_s22 = int_to_ptr.vmem [resolvable:$false] %s571_s22 }
  0x24   : > { %s573_s23 = scalar_lea.vmem %s572_s22, 4096  ;;  %p574_p9 = scmp.lt.s32.totalorder %s751_s29, %s572_s22 }
  0x25   : > { %p569_p5 = pnand %p567_p2, %p553_p3  ;;  %p575_p4 = scmp.lt.s32.totalorder %s573_s23, %s566_s16 }
  0x27   : > { %p570_p11 = pneg %p569_p5  ;;  %p576_p7 = por %p575_p4, %p574_p9 }
  0x29   : > { %p577_p10 = pnand %p576_p7, %p570_p11 }
  0x2b   : > { %580 = shalt.err (!%p577_p10)
}
  0x2c   : > { %s666_s24 = smov 64   ;;  %s667_s25 = smov 4  }
  0x2d   : > { %493 = dma.hbm_to_vmem [thread:$0]  (!%p755_p0), %s749_s27, 2048, %s751_s29, %s760_s2, %s666_s24, %s666_s24, %s667_s25  }
  0x2e   : > { %p123_p12 = scmp.lt.s32.totalorder %s663_s11, 3  ;;  %p917_p1 = scmp.ge.s32.totalorder %s663_s11, 1 }
  0x30   : > { %p124_p3 = pnand %p917_p1, %p123_p12 }
  0x31   : > { %s792_s26 = sand.u32 (!%p124_p3), 1, %s647_s7  }
  0x32   : > { %127 = sbr.rel (%p124_p3) target bundleno = 135 (0x87), region = 24  ;;  %s402_s28 = sshll.u32 (!%p124_p3), %s792_s26, 7 }
  0x33   : > { %s130_s3 = scalar_lea.sflag (!%p124_p3), [#allocation4], %s792_s26  ;;  %s796_s4 = scalar_lea.vmem (!%p124_p3), [#allocation3], %s402_s28 }
  0x39   : > { %634 = dma.done.wait (%p727_p8), %s130_s3, 2048  }
  0x3a   : > { %636 = vsyncadd (%p727_p8), %s130_s3, 4294965248  ;;  %vm156_vm0 = vcmask 516096   ;;  %v668_v0 = vmov 0.0   ;;  %v408_v1 = vld [vmem:[%s796_s4] sm:$0xff]   ;;  %v471_v2 = vld [vmem:[%s796_s4 + $0x8] sm:$0xff]   ;;  %vm223_vm1 = vcmask 523264  }
  0x3b   : > { %157 = vst.msk [vmem:[#allocation2] sm:$0x1] %vm156_vm0, %v668_v0  ;;  %v472_v3 = vld [vmem:[%s796_s4 + $0x10] sm:$0xff]   ;;  %v473_v4 = vld [vmem:[%s796_s4 + $0x18] sm:$0xff]   ;;  %v409_v5 = vunpack.c.l.bf16 %v408_v1  ;;  %v413_v6 = vunpack.c.l.bf16 %v471_v2  ;;  %v474_v8 = vld [vmem:[%s796_s4 + $0x20] sm:$0xff]   ;;  %v410_v10 = vunpack.c.h.bf16 %v408_v1  ;;  %v414_v11 = vunpack.c.h.bf16 %v471_v2  ;;  %s150_s18 = scalar_lea.vmem [#allocation6], %s792_s26 }
  0x3c   : > { %v417_v7 = vunpack.c.l.bf16 %v472_v3  ;;  %v421_v9 = vunpack.c.l.bf16 %v473_v4  ;;  %v475_v12 = vld [vmem:[%s796_s4 + $0x28] sm:$0xff]   ;;  %v425_v13 = vunpack.c.l.bf16 %v474_v8  ;;  %v418_v17 = vunpack.c.h.bf16 %v472_v3  ;;  %v476_v18 = vld [vmem:[%s796_s4 + $0x30] sm:$0xff]   ;;  %v477_v24 = vld [vmem:[%s796_s4 + $0x38] sm:$0xff]   ;;  %s317_s27 = sshll.u32 %s150_s18, 4  ;;  %s403_s29 = sshll.u32 %s655_s9, 4  ;;  %s856_s27 = int_to_ptr.vmem [resolvable:$true] %s317_s27 }
  0x3d   : > { %v224_v14 = vsel %vm223_vm1, %v409_v5, 0.0  ;;  %v225_v15 = vsel %vm223_vm1, %v413_v6, 0.0  ;;  %v422_v20 = vunpack.c.h.bf16 %v473_v4  ;;  %v429_v21 = vunpack.c.l.bf16 %v475_v12  ;;  %v478_v30 = vld [vmem:[%s796_s4 + $0x40] sm:$0xff]   ;;  %v479_v38 = vld [vmem:[%s796_s4 + $0x48] sm:$0xff]   ;;  %v480_v45 = vld [vmem:[%s796_s4 + $0x50] sm:$0xff]   ;;  %s861_s5 = scalar_lea.hbm %s910_s1, %s403_s29  ;;  %s305_s12 = scalar_lea.sflag [#allocation5], %s792_s26 }
  0x3e   : > { %v227_v16 = vsel %vm223_vm1, %v417_v7, 0.0  ;;  %v226_v19 = vadd.f32 %v225_v15, %v224_v14  ;;  %v229_v22 = vsel %vm223_vm1, %v421_v9, 0.0  ;;  %v426_v23 = vunpack.c.h.bf16 %v474_v8  ;;  %v481_v52 = vld [vmem:[%s796_s4 + $0x58] sm:$0xff]   ;;  %v482_v59 = vld [vmem:[%s796_s4 + $0x60] sm:$0xff]   ;;  %v483_v2 = vld [vmem:[%s796_s4 + $0x68] sm:$0xff]   ;;  %s581_s13 = scalar_lea.vmem %s856_s27, 16 }
  0x3f   : > { %v433_v26 = vunpack.c.l.bf16 %v476_v18  ;;  %v231_v27 = vsel %vm223_vm1, %v425_v13, 0.0  ;;  %v255_v28 = vsel %vm223_vm1, %v410_v10, 0.0  ;;  %v256_v29 = vsel %vm223_vm1, %v414_v11, 0.0  ;;  %v484_v9 = vld [vmem:[%s796_s4 + $0x70] sm:$0xff]   ;;  %p582_p8 = scmp.ne.s32.totalorder %s856_s27, %s581_s13  ;;  %p918_p9 = scmp.ne.s32.totalorder %s914_s19, 0 }
  0x40   : > { %v228_v25 = vadd.f32 %v227_v16, %v226_v19  ;;  %v257_v32 = vadd.f32 %v256_v29, %v255_v28  ;;  %v258_v33 = vsel %vm223_vm1, %v418_v17, 0.0  ;;  %v430_v34 = vunpack.c.h.bf16 %v475_v12  ;;  %v485_v16 = vld [vmem:[%s796_s4 + $0x78] sm:$0xff]   ;;  %s669_s9 = smov [#allocation6]  }
  0x41   : > { %v437_v35 = vunpack.c.l.bf16 %v477_v24  ;;  %v233_v36 = vsel %vm223_vm1, %v429_v21, 0.0  ;;  %v260_v37 = vsel %vm223_vm1, %v422_v20, 0.0  ;;  %v434_v41 = vunpack.c.h.bf16 %v476_v18  ;;  %p583_p11 = pnand %p582_p8, %p918_p9  ;;  %s585_s15 = sshll.u32 %s669_s9, 4  ;;  %s586_s15 = int_to_ptr.vmem [resolvable:$false] %s585_s15 }
  0x42   : > { %v230_v31 = vadd.f32 %v229_v22, %v228_v25  ;;  %v259_v40 = vadd.f32 %v258_v33, %v257_v32  ;;  %v441_v42 = vunpack.c.l.bf16 %v478_v30  ;;  %v235_v43 = vsel %vm223_vm1, %v433_v26, 0.0  ;;  %s587_s16 = scalar_lea.vmem %s586_s15, 32  ;;  %p588_p6 = scmp.lt.s32.totalorder %s856_s27, %s586_s15 }
  0x43   : > { %v262_v44 = vsel %vm223_vm1, %v426_v23, 0.0  ;;  %v438_v48 = vunpack.c.h.bf16 %v477_v24  ;;  %v445_v49 = vunpack.c.l.bf16 %v479_v38  ;;  %v237_v50 = vsel %vm223_vm1, %v437_v35, 0.0  ;;  %p584_p0 = pneg %p583_p11  ;;  %p589_p13 = scmp.lt.s32.totalorder %s587_s16, %s581_s13 }
  0x44   : > { %v232_v39 = vadd.f32 %v231_v27, %v230_v31  ;;  %v261_v47 = vadd.f32 %v260_v37, %v259_v40  ;;  %v264_v51 = vsel %vm223_vm1, %v430_v34, 0.0  ;;  %v442_v55 = vunpack.c.h.bf16 %v478_v30 }
  0x45   : > { %v449_v56 = vunpack.c.l.bf16 %v480_v45  ;;  %v239_v57 = vsel %vm223_vm1, %v441_v42, 0.0  ;;  %v266_v58 = vsel %vm223_vm1, %v434_v41, 0.0  ;;  %v446_v62 = vunpack.c.h.bf16 %v479_v38  ;;  %p590_p2 = por %p589_p13, %p588_p6 }
  0x46   : > { %v234_v46 = vadd.f32 %v233_v36, %v232_v39  ;;  %v263_v54 = vadd.f32 %v262_v44, %v261_v47  ;;  %v453_v63 = vunpack.c.l.bf16 %v481_v52  ;;  %v241_v0 = vsel %vm223_vm1, %v445_v49, 0.0 }
  0x47   : > { %v268_v1 = vsel %vm223_vm1, %v438_v48, 0.0  ;;  %v450_v5 = vunpack.c.h.bf16 %v480_v45  ;;  %v457_v6 = vunpack.c.l.bf16 %v482_v59  ;;  %v243_v7 = vsel %vm223_vm1, %v449_v56, 0.0  ;;  %p591_p5 = pnand %p590_p2, %p584_p0 }
  0x48   : > { %v236_v53 = vadd.f32 %v235_v43, %v234_v46  ;;  %v265_v61 = vadd.f32 %v264_v51, %v263_v54  ;;  %v270_v8 = vsel %vm223_vm1, %v442_v55, 0.0  ;;  %v454_v12 = vunpack.c.h.bf16 %v481_v52  ;;  %v222_v55 = vld [vmem:[#allocation2] sm:$0x1] }
  0x49   : > { %v461_v13 = vunpack.c.l.bf16 %v483_v2  ;;  %v245_v14 = vsel %vm223_vm1, %v453_v63, 0.0  ;;  %v272_v15 = vsel %vm223_vm1, %v446_v62, 0.0  ;;  %v458_v19 = vunpack.c.h.bf16 %v482_v59 }
  0x4a   : > { %v238_v60 = vadd.f32 %v237_v50, %v236_v53  ;;  %v267_v4 = vadd.f32 %v266_v58, %v265_v61  ;;  %v465_v20 = vunpack.c.l.bf16 %v484_v9  ;;  %v247_v21 = vsel %vm223_vm1, %v457_v6, 0.0 }
  0x4b   : > { %v274_v22 = vsel %vm223_vm1, %v450_v5, 0.0  ;;  %v462_v25 = vunpack.c.h.bf16 %v483_v2  ;;  %v469_v26 = vunpack.c.l.bf16 %v485_v16  ;;  %v249_v27 = vsel %vm223_vm1, %v461_v13, 0.0 }
  0x4c   : > { %v240_v3 = vadd.f32 %v239_v57, %v238_v60  ;;  %v269_v11 = vadd.f32 %v268_v1, %v267_v4  ;;  %v276_v28 = vsel %vm223_vm1, %v454_v12, 0.0  ;;  %v466_v31 = vunpack.c.h.bf16 %v484_v9 }
  0x4d   : > { %v251_v32 = vsel %vm223_vm1, %v465_v20, 0.0  ;;  %v278_v33 = vsel %vm223_vm1, %v458_v19, 0.0  ;;  %v470_v36 = vunpack.c.h.bf16 %v485_v16  ;;  %v253_v37 = vsel %vm223_vm1, %v469_v26, 0.0 }
  0x4e   : > { %v242_v10 = vadd.f32 %v241_v0, %v240_v3  ;;  %v271_v18 = vadd.f32 %v270_v8, %v269_v11  ;;  %v280_v38 = vsel %vm223_vm1, %v462_v25, 0.0  ;;  %v282_v41 = vsel %vm223_vm1, %v466_v31, 0.0 }
  0x4f   : > { %v284_v44 = vsel %vm223_vm1, %v470_v36, 0.0 }
  0x50   : > { %v244_v17 = vadd.f32 %v243_v7, %v242_v10  ;;  %v273_v24 = vadd.f32 %v272_v15, %v271_v18 }
  0x52   : > { %v246_v23 = vadd.f32 %v245_v14, %v244_v17  ;;  %v275_v30 = vadd.f32 %v274_v22, %v273_v24 }
  0x54   : > { %v248_v29 = vadd.f32 %v247_v21, %v246_v23  ;;  %v277_v35 = vadd.f32 %v276_v28, %v275_v30 }
  0x56   : > { %v250_v34 = vadd.f32 %v249_v27, %v248_v29  ;;  %v279_v40 = vadd.f32 %v278_v33, %v277_v35 }
  0x58   : > { %v252_v39 = vadd.f32 %v251_v32, %v250_v34  ;;  %v281_v43 = vadd.f32 %v280_v38, %v279_v40 }
  0x5a   : > { %v254_v42 = vadd.f32 %v253_v37, %v252_v39  ;;  %v283_v45 = vadd.f32 %v282_v41, %v281_v43 }
  0x5c   : > { %v285_v46 = vadd.f32 %v284_v44, %v283_v45  ;;  %v286_v47 = vsel %vm223_vm1, %v254_v42, 0.0 }
  0x5e   : > { %v287_v48 = vsel %vm223_vm1, %v285_v46, 0.0 }
  0x5f   : > { %v288_v49 = vadd.f32 %v287_v48, %v286_v47 }
  0x61   : > { %v289_v50 = vrot.slane %v288_v49, 4 }
  0x63   : > { %v290_v51 = vadd.f32 %v289_v50, %v288_v49 }
  0x65   : > { %v291_v52 = vrot.slane %v290_v51, 2 }
  0x67   : > { %v292_v53 = vadd.f32 %v291_v52, %v290_v51 }
  0x69   : > { %v293_v54 = vrot.slane %v292_v53, 1 }
  0x6b   : > { %v294_v56 = vadd.f32 %v293_v54, %v292_v53 }
  0x6d   : > { %v295_v57 = vadd.f32 %v294_v56, %v222_v55 }
  0x6f   : > { %297 = vst.msk [vmem:[#allocation2] sm:$0x1] %vm156_vm0, %v295_v57 }
  0x76   : > { %v301_v58 = vld [vmem:[#allocation2] sm:$0x1] }
  0x77   : > { %v302_v59 = vmul.f32 0.00390625, %v301_v58 }
  0x79   : > { %303 = vst.msk [vmem:[%s150_s18] sm:$0x1] %vm156_vm0, %v302_v59 }
  0x7a   : > { %594 = shalt.err (!%p591_p5)
}
  0x7b   : > { %s595_s17 = scalar_lea.hbm %s861_s5, 16  ;;  %s599_s24 = scalar_lea.hbm %s910_s1, 32 }
  0x7c   : > { %p596_p4 = scmp.ne.s32.totalorder %s861_s5, %s595_s17  ;;  %p600_p12 = scmp.lt.u32.totalorder %s861_s5, %s910_s1 }
  0x7d   : > { %p601_p1 = scmp.lt.u32.totalorder %s599_s24, %s595_s17  ;;  %p603_p8 = scmp.lt.u32.totalorder %s595_s17, %s861_s5 }
  0x7e   : > { %p597_p7 = pnand %p596_p4, %p918_p9 }
  0x7f   : > { %p602_p3 = por %p601_p1, %p600_p12 }
  0x80   : > { %p598_p10 = pneg %p597_p7 }
  0x81   : > { %p604_p11 = por %p603_p8, %p602_p3 }
  0x83   : > { %p605_p0 = pnand %p604_p11, %p598_p10 }
  0x85   : > { %608 = shalt.err (!%p605_p0)
}
  0x86   : > { %488 = dma.vmem_to_hbm [thread:$0]  (%p918_p9), %s856_s27, 16, %s861_s5, %s305_s12  }
  0x87 PF: > { %s329_s28 = sand.u32 1, %s643_s6   ;;  %p919_p6 = scmp.ne.s32.totalorder %s915_s21, 0 }
  0x88   : > { %p920_p13 = scmp.ge.s32.totalorder %s663_s11, 2  ;;  %s330_s3 = scalar_lea.sflag [#allocation5], %s329_s28 }
  0x8a   : > { %p495_p2 = pnand %p920_p13, %p919_p6 }
  0x8c   : > { %638 = dma.done.wait (!%p495_p2), %s330_s3, 16  }
  0x8d   : > { %640 = vsyncadd (!%p495_p2), %s330_s3, 4294967280  ;;  %s17_s11 = sadd.s32 1, %s663_s11   ;;  %s921_s6 = smov %s647_s7 }
  0x8e   : > { %p14_p5 = scmp.ge.s32.totalorder %s17_s11, 4   ;;  %s922_s7 = smov %s651_s8 }
  0x8f   : > { %s923_s8 = smov %s736_s20  ;;  %s924_s9 = smov %s659_s10 }
  0x90   : > { %s925_s10 = smov %s927_s14  ;;  %16 = sbr.rel (!%p14_p5) target bundleno = 6 (0x6), region = 77 }
  0x97   :  { %334 = vsyncpa [#allocation4], 1 }
  0x98   :  { %336 = vsyncpa [#allocation4 + $0x1], 1 }
  0x99   :  { %337 = vsyncpa [#allocation5], 1 }
  0x9a   :  { %339 = vsyncpa [#allocation5 + $0x1], 1 }

// kernel: _lambda_.10
= control target key start
LH: loop header
LB: loop body
LE: loop exit
PB: predicated region body
PF: predicated region fallthrough
CT: control target
= control target key end

     0   :  { %6 = vsyncpa [#allocation3], 0  ;;  %s748_s0 = inlined_call_operand.hbm [shape: bf16[2,8,2,8,128], index: 0, kind: input, shape index: {}]   ;;  %s749_s1 = inlined_call_operand.hbm [shape: bf16[2,8,8,64], index: 1, kind: output, shape index: {}]  }
   0x1   :  { %8 = vsyncpa [#allocation3 + $0x1], 0 }
   0x2   :  { %9 = vsyncpa [#allocation4], 0 }
   0x3   :  { %11 = vsyncpa [#allocation4 + $0x1], 0  ;;  %s554_s6 = smov 0   ;;  %s556_s7 = smov 0  }
   0x4   :  { %s558_s8 = smov 0   ;;  %s560_s9 = smov 0  }
   0x5   :  { %s562_s10 = smov 0   ;;  %s564_s11 = smov 0  }
   0x6 LB: > { %s333_s12 = sadd.s32 4294967295, %s536_s11   ;;  %s334_s13 = sadd.s32 4294967294, %s536_s11   ;;  %s536_s11 = sphi %s564_s11, %s17_s11   ;;  %s532_s10 = sphi %s562_s10, %s764_s10   ;;  %s528_s9 = sphi %s560_s9, %s763_s9   ;;  %s524_s8 = sphi %s558_s8, %s762_s8   ;;  %s520_s7 = sphi %s556_s7, %s761_s7   ;;  %s516_s6 = sphi %s554_s6, %s760_s6  }
   0x7   : > { %s29_s14 = sadd.s32 1, %s532_s10  ;;  %s38_s15 = sadd.s32 1, %s524_s8 }
   0x8   : > { %p31_p0 = scmp.ge.s32.totalorder %s29_s14, 2  ;;  %p45_p1 = scmp.ne.s32.totalorder %s524_s8, %s520_s7 }
   0x9   : > { %p46_p2 = scmp.eq.s32.totalorder %s536_s11, 0  ;;  %p51_p3 = scmp.ne.s32.totalorder %s520_s7, %s516_s6 }
   0xa   : > { %s766_s14 = smov (%p31_p0, %s29_s14), 0  ;;  %p52_p5 = scmp.eq.s32.totalorder %s333_s12, 0 }
   0xb   : > { %p595_p4 = por %p46_p2, %p45_p1  ;;  %s33_s17 = ssub.s32 %s532_s10, %s766_s14 }
   0xc   : > { %p77_p6 = scmp.eq.s32.totalorder %s333_s12, 1  ;;  %p36_p7 = scmp.eq.s32.totalorder %s33_s17, 0 }
   0xd   : > { %p601_p8 = por %p52_p5, %p51_p3  ;;  %p83_p10 = scmp.eq.s32.totalorder %s334_s13, 1 }
   0xe   : > { %p605_p9 = por %p77_p6, %p45_p1  ;;  %p370_p13 = scmp.lt.s32.totalorder %s536_s11, 2 }
   0xf   : > { %s610_s20 = scalar_select %p36_p7, %s524_s8, %s38_s15  }
  0x10   : > { %s753_s19 = scalar_select %p605_p9, 1, 0 }
  0x11   : > { %p612_p11 = por %p83_p10, %p51_p3  ;;  %s103_s22 = sand.u32 1, %s524_s8  }
  0x12   : > { %s337_s23 = sshll.u32 %s103_s22, 6  ;;  %s356_s24 = sshll.u32 %s532_s10, 10 }
  0x13   : > { %s754_s21 = scalar_select %p612_p11, 1, 0 }
  0x14   : > { %s623_s27 = scalar_lea.hbm %s748_s0, %s356_s24  ;;  %s107_s28 = scalar_lea.vmem [#allocation2], %s337_s23 }
  0x15   : > { %s117_s29 = sshll.u32 %s107_s28, 4  ;;  %p629_p0 = pnand %p370_p13, %p595_p4  ;;  %s625_s29 = int_to_ptr.vmem [resolvable:$true] %s117_s29 }
  0x16   : > { %s634_s2 = scalar_lea.sflag [#allocation3], %s103_s22  ;;  %s424_s3 = scalar_lea.hbm %s623_s27, 1024 }
  0x17   : > { %p425_p2 = scmp.ne.s32.totalorder %s623_s27, %s424_s3  ;;  %p426_p3 = pneg %p629_p0 }
  0x18   : > { %s429_s12 = scalar_lea.hbm %s748_s0, 2048  ;;  %p430_p4 = scmp.lt.u32.totalorder %s623_s27, %s748_s0 }
  0x19   : > { %p427_p5 = pnand %p426_p3, %p425_p2  ;;  %p431_p7 = scmp.lt.u32.totalorder %s429_s12, %s424_s3 }
  0x1a   : > { %p433_p13 = scmp.lt.u32.totalorder %s424_s3, %s623_s27 }
  0x1b   : > { %p428_p6 = pneg %p427_p5  ;;  %p432_p10 = por %p431_p7, %p430_p4 }
  0x1d   : > { %p434_p12 = por %p433_p13, %p432_p10 }
  0x1f   : > { %p435_p1 = pnand %p434_p12, %p428_p6 }
  0x21   : > { %438 = shalt.err (!%p435_p1)
}
  0x22   : > { %s439_s16 = scalar_lea.vmem %s625_s29, 1024  ;;  %s538_s17 = smov [#allocation2]  }
  0x23   : > { %p440_p2 = scmp.ne.s32.totalorder %s625_s29, %s439_s16  ;;  %s444_s22 = sshll.u32 %s538_s17, 4  ;;  %s445_s22 = int_to_ptr.vmem [resolvable:$false] %s444_s22 }
  0x24   : > { %s446_s23 = scalar_lea.vmem %s445_s22, 2048  ;;  %p447_p9 = scmp.lt.s32.totalorder %s625_s29, %s445_s22 }
  0x25   : > { %p442_p5 = pnand %p440_p2, %p426_p3  ;;  %p448_p4 = scmp.lt.s32.totalorder %s446_s23, %s439_s16 }
  0x27   : > { %p443_p11 = pneg %p442_p5  ;;  %p449_p7 = por %p448_p4, %p447_p9 }
  0x29   : > { %p450_p10 = pnand %p449_p7, %p443_p11 }
  0x2b   : > { %453 = shalt.err (!%p450_p10)
}
  0x2c   : > { %s539_s24 = smov 64   ;;  %s540_s25 = smov 4  }
  0x2d   : > { %365 = dma.hbm_to_vmem [thread:$0]  (!%p629_p0), %s623_s27, 1024, %s625_s29, %s634_s2, %s539_s24, %s539_s24, %s540_s25  }
  0x2e   : > { %p125_p12 = scmp.lt.s32.totalorder %s536_s11, 3  ;;  %p756_p1 = scmp.ge.s32.totalorder %s536_s11, 1 }
  0x30   : > { %p126_p3 = pnand %p756_p1, %p125_p12 }
  0x31   : > { %s666_s26 = sand.u32 (!%p126_p3), 1, %s520_s7  }
  0x32   : > { %129 = sbr.rel (%p126_p3) target bundleno = 206 (0xce), region = 24  ;;  %s341_s28 = sshll.u32 (!%p126_p3), %s666_s26, 6 }
  0x33   : > { %s132_s3 = scalar_lea.sflag (!%p126_p3), [#allocation3], %s666_s26  ;;  %s135_s4 = scalar_lea.vmem (!%p126_p3), [#allocation2], %s341_s28 }
  0x39   : > { %507 = dma.done.wait (%p601_p8), %s132_s3, 1024  }
  0x3a   : > { %509 = vsyncadd (%p601_p8), %s132_s3, 4294966272  ;;  %v158_v0 = vld [vmem:[%s135_s4 + $0x10] sm:$0xf]  ;;  %v345_v1 = vld [vmem:[%s135_s4 + $0x14] sm:$0xf]  ;;  %s541_s27 = smov 64  }
  0x3b   : > { %v156_v2 = vld [vmem:[%s135_s4] sm:$0xf]  ;;  %v175_v3 = vmax.bf16 %v345_v1, %v158_v0  ;;  %v343_v4 = vld [vmem:[%s135_s4 + $0x4] sm:$0xf]  ;;  %v159_v5 = vld [vmem:[%s135_s4 + $0x18] sm:$0xf] }
  0x3c   : > { %v346_v6 = vld [vmem:[%s135_s4 + $0x1c] sm:$0xf]  ;;  %v173_v7 = vmax.bf16 %v343_v4, %v156_v2  ;;  %v157_v8 = vld [vmem:[%s135_s4 + $0x8] sm:$0xf]  ;;  %v344_v9 = vld [vmem:[%s135_s4 + $0xc] sm:$0xf] }
  0x3d   : > { %193 = vrot.lane.b32.xlu1 %v175_v3, %s541_s27  ;;  %v176_v10 = vmax.bf16 %v346_v6, %v159_v5  ;;  %v174_v11 = vmax.bf16 %v344_v9, %v157_v8  ;;  %v161_v12 = vld [vmem:[%s135_s4 + $0x28] sm:$0xf]  ;;  %v348_v13 = vld [vmem:[%s135_s4 + $0x2c] sm:$0xf]  ;;  %v160_v14 = vld [vmem:[%s135_s4 + $0x20] sm:$0xf] }
  0x3e   : > { %189 = vrot.lane.b32.xlu0 %v173_v7, %s541_s27  ;;  %v347_v15 = vld [vmem:[%s135_s4 + $0x24] sm:$0xf]  ;;  %v178_v16 = vmax.bf16 %v348_v13, %v161_v12  ;;  %v163_v18 = vld [vmem:[%s135_s4 + $0x38] sm:$0xf]  ;;  %v350_v19 = vld [vmem:[%s135_s4 + $0x3c] sm:$0xf] }
  0x3f   : > { %v177_v17 = vmax.bf16 %v347_v15, %v160_v14  ;;  %v162_v20 = vld [vmem:[%s135_s4 + $0x30] sm:$0xf]  ;;  %v349_v21 = vld [vmem:[%s135_s4 + $0x34] sm:$0xf]  ;;  %v180_v22 = vmax.bf16 %v350_v19, %v163_v18  ;;  %s342_s18 = sshll.u32 %s666_s26, 5  ;;  %vm221_vm0 = vcmask 519168  }
  0x40   : > { %v179_v23 = vmax.bf16 %v349_v21, %v162_v20  ;;  %s153_s29 = scalar_lea.vmem [#allocation5], %s342_s18  ;;  %s357_s30 = sshll.u32 %s528_s9, 9 }
  0x41   : > { %195 = vrot.lane.b32.xlu1 %v176_v10, %s541_s27  ;;  %s246_s2 = sshll.u32 %s153_s29, 4  ;;  %s693_s13 = scalar_lea.hbm %s749_s1, %s357_s30  ;;  %s695_s2 = int_to_ptr.vmem [resolvable:$true] %s246_s2 }
  0x42   : > { %191 = vrot.lane.b32.xlu0 %v174_v11, %s541_s27  ;;  %s231_s9 = scalar_lea.sflag [#allocation4], %s666_s26  ;;  %s454_s15 = scalar_lea.vmem %s695_s2, 512 }
  0x43   : > { %p455_p8 = scmp.ne.s32.totalorder %s695_s2, %s454_s15  ;;  %p757_p9 = scmp.ne.s32.totalorder %s753_s19, 0 }
  0x44   : > { %s542_s16 = smov [#allocation5]  }
  0x45   : > { %199 = vrot.lane.b32.xlu1 %v178_v16, %s541_s27  ;;  %p456_p11 = pnand %p455_p8, %p757_p9  ;;  %s458_s17 = sshll.u32 %s542_s16, 4  ;;  %s459_s17 = int_to_ptr.vmem [resolvable:$false] %s458_s17 }
  0x46   : > { %197 = vrot.lane.b32.xlu0 %v177_v17, %s541_s27  ;;  %s460_s22 = scalar_lea.vmem %s459_s17, 1024  ;;  %p461_p6 = scmp.lt.s32.totalorder %s695_s2, %s459_s17 }
  0x47   : > { %p457_p0 = pneg %p456_p11  ;;  %p462_p13 = scmp.lt.s32.totalorder %s460_s22, %s454_s15 }
  0x49   : > { %203 = vrot.lane.b32.xlu1 %v180_v22, %s541_s27  ;;  %p463_p2 = por %p462_p13, %p461_p6 }
  0x4a   : > { %201 = vrot.lane.b32.xlu0 %v179_v23, %s541_s27 }
  0x4b   : > { %p464_p5 = pnand %p463_p2, %p457_p0 }
  0xaf   : > { %v194_v24 = vpop.permute.xlu1 %193 }
  0xb0   : > { %v215_v25 = vmax.bf16 %v194_v24, %v175_v3  ;;  %v190_v26 = vpop.permute.xlu0 %189 }
  0xb1   : > { %v213_v27 = vmax.bf16 %v190_v26, %v173_v7 }
  0xb2   : > { %224 = vst.msk [vmem:[%s153_s29 + $0x8] sm:$0xf] %vm221_vm0, %v215_v25 }
  0xb3   : > { %222 = vst.msk [vmem:[%s153_s29] sm:$0xf] %vm221_vm0, %v213_v27  ;;  %v196_v28 = vpop.permute.xlu1 %195 }
  0xb4   : > { %v216_v29 = vmax.bf16 %v196_v28, %v176_v10  ;;  %v192_v30 = vpop.permute.xlu0 %191 }
  0xb5   : > { %v214_v31 = vmax.bf16 %v192_v30, %v174_v11 }
  0xb6   : > { %225 = vst.msk [vmem:[%s153_s29 + $0xc] sm:$0xf] %vm221_vm0, %v216_v29 }
  0xb7   : > { %223 = vst.msk [vmem:[%s153_s29 + $0x4] sm:$0xf] %vm221_vm0, %v214_v31  ;;  %v200_v32 = vpop.permute.xlu1 %199 }
  0xb8   : > { %v218_v33 = vmax.bf16 %v200_v32, %v178_v16  ;;  %v198_v34 = vpop.permute.xlu0 %197 }
  0xb9   : > { %v217_v35 = vmax.bf16 %v198_v34, %v177_v17 }
  0xba   : > { %227 = vst.msk [vmem:[%s153_s29 + $0x14] sm:$0xf] %vm221_vm0, %v218_v33 }
  0xbb   : > { %226 = vst.msk [vmem:[%s153_s29 + $0x10] sm:$0xf] %vm221_vm0, %v217_v35  ;;  %v204_v36 = vpop.permute.xlu1 %203 }
  0xbc   : > { %v220_v37 = vmax.bf16 %v204_v36, %v180_v22  ;;  %v202_v38 = vpop.permute.xlu0 %201 }
  0xbd   : > { %v219_v39 = vmax.bf16 %v202_v38, %v179_v23 }
  0xbe   : > { %229 = vst.msk [vmem:[%s153_s29 + $0x1c] sm:$0xf] %vm221_vm0, %v220_v37 }
  0xbf   : > { %228 = vst.msk [vmem:[%s153_s29 + $0x18] sm:$0xf] %vm221_vm0, %v219_v39 }
  0xc0   : > { %467 = shalt.err (!%p464_p5)
}
  0xc1   : > { %s468_s23 = scalar_lea.hbm %s693_s13, 512  ;;  %s472_s28 = scalar_lea.hbm %s749_s1, 1024 }
  0xc2   : > { %p469_p4 = scmp.ne.s32.totalorder %s693_s13, %s468_s23  ;;  %p473_p12 = scmp.lt.u32.totalorder %s693_s13, %s749_s1 }
  0xc3   : > { %p474_p1 = scmp.lt.u32.totalorder %s472_s28, %s468_s23  ;;  %p476_p8 = scmp.lt.u32.totalorder %s468_s23, %s693_s13 }
  0xc4   : > { %p470_p7 = pnand %p469_p4, %p757_p9 }
  0xc5   : > { %p475_p3 = por %p474_p1, %p473_p12 }
  0xc6   : > { %p471_p10 = pneg %p470_p7 }
  0xc7   : > { %p477_p11 = por %p476_p8, %p475_p3 }
  0xc9   : > { %p478_p0 = pnand %p477_p11, %p471_p10 }
  0xcb   : > { %481 = shalt.err (!%p478_p0)
}
  0xcc   : > { %s543_s18 = smov 4  }
  0xcd   : > { %360 = dma.vmem_to_hbm [thread:$0]  (%p757_p9), %s695_s2, 512, %s693_s13, %s231_s9, %s541_s27, %s541_s27, %s543_s18  }
  0xce PF: > { %s261_s29 = sand.u32 1, %s516_s6   ;;  %p758_p6 = scmp.ne.s32.totalorder %s754_s21, 0 }
  0xcf   : > { %p759_p13 = scmp.ge.s32.totalorder %s536_s11, 2  ;;  %s262_s30 = scalar_lea.sflag [#allocation4], %s261_s29 }
  0xd1   : > { %p367_p2 = pnand %p759_p13, %p758_p6 }
  0xd3   : > { %511 = dma.done.wait (!%p367_p2), %s262_s30, 512  }
  0xd4   : > { %513 = vsyncadd (!%p367_p2), %s262_s30, 4294966784  ;;  %s17_s11 = sadd.s32 1, %s536_s11   ;;  %s760_s6 = smov %s520_s7 }
  0xd5   : > { %p14_p5 = scmp.ge.s32.totalorder %s17_s11, 4   ;;  %s761_s7 = smov %s524_s8 }
  0xd6   : > { %s762_s8 = smov %s610_s20  ;;  %s763_s9 = smov %s532_s10 }
  0xd7   : > { %s764_s10 = smov %s766_s14  ;;  %16 = sbr.rel (!%p14_p5) target bundleno = 6 (0x6), region = 70 }
  0xde   :  { %267 = vsyncpa [#allocation3], 1 }
  0xdf   :  { %269 = vsyncpa [#allocation3 + $0x1], 1 }
  0xe0   :  { %270 = vsyncpa [#allocation4], 1 }
  0xe1   :  { %272 = vsyncpa [#allocation4 + $0x1], 1 }

// kernel: _lambda_.7
= control target key start
LH: loop header
LB: loop body
LE: loop exit
PB: predicated region body
PF: predicated region fallthrough
CT: control target
= control target key end

     0   :  { %8 = vsyncpa [#allocation4], 0  ;;  %s4700_s0 = inlined_call_operand.hbm [shape: bf16[2,18,18,3], index: 0, kind: input, shape index: {}]   ;;  %s4701_s1 = inlined_call_operand.hbm [shape: bf16[1,27,64], index: 1, kind: input, shape index: {}]   ;;  %s4702_s2 = inlined_call_operand.hbm [shape: f32[1,64], index: 2, kind: input, shape index: {}]   ;;  %s4703_s3 = inlined_call_operand.hbm [shape: bf16[2,16,16,64], index: 3, kind: output, shape index: {}]  }
   0x1   :  { %10 = vsyncpa [#allocation4 + $0x1], 0 }
   0x2   :  { %11 = vsyncpa [#allocation7], 0 }
   0x3   :  { %12 = vsyncpa [#allocation5], 0 }
   0x4   :  { %14 = vsyncpa [#allocation5 + $0x1], 0  ;;  %s3415_s12 = smov 0   ;;  %s3417_s13 = smov 0  }
   0x5   :  { %s3419_s14 = smov 0   ;;  %s3421_s15 = smov 0  }
   0x6   :  { %s3423_s16 = smov 0   ;;  %s3425_s17 = smov 0  }
   0x7 LB: > { %s2657_s18 = sadd.s32 4294967295, %s3376_s17   ;;  %s2658_s19 = sadd.s32 4294967294, %s3376_s17   ;;  %s3376_s17 = sphi %s3425_s17, %s20_s17   ;;  %s3372_s16 = sphi %s3423_s16, %s4725_s16   ;;  %s3368_s15 = sphi %s3421_s15, %s4724_s15   ;;  %s3364_s14 = sphi %s3419_s14, %s4723_s14   ;;  %s3360_s13 = sphi %s3417_s13, %s4722_s13   ;;  %s3356_s12 = sphi %s3415_s12, %s4721_s12  }
   0x8   : > { %p59_p0 = scmp.ne.s32.totalorder %s3360_s13, %s3356_s12  ;;  %p3449_p1 = scmp.eq.s32.totalorder %s2657_s18, 0 }
   0x9   : > { %p3453_p2 = scmp.eq.s32.totalorder %s2657_s18, 1  ;;  %p145_p3 = scmp.eq.s32.totalorder %s2658_s19, 1 }
   0xa   : > { %s4708_s20 = scalar_select %p3449_p1, 1, 0 }
   0xb   : > { %p3459_p4 = por %p3449_p1, %p59_p0  ;;  %p2659_p5 = scmp.ge.s32.totalorder %s3376_s17, 1 }
   0xc   : > { %p3464_p6 = por %p145_p3, %p59_p0  ;;  %p152_p7 = scmp.lt.s32.totalorder %s3376_s17, 3 }
   0xd   : > { %s4710_s22 = scalar_select %p3459_p4, 1, 0 }
   0xe   : > { %s4711_s23 = scalar_select %p3464_p6, 1, 0 }
   0xf   : > { %p3469_p8 = pnand %p2659_p5, %p152_p7  ;;  %s3378_s25 = smov [#allocation6]  }
  0x10   : > { %s166_s26 = sshll.u32 %s3378_s25, 4  ;;  %s3379_s28 = smov [#allocation8]   ;;  %s3473_s26 = int_to_ptr.vmem [resolvable:$true] %s166_s26 }
  0x11   : > { %p3022_p9 = pneg %p3469_p8  ;;  %s182_s29 = sshll.u32 %s3379_s28, 4  ;;  %s3484_s29 = int_to_ptr.vmem [resolvable:$true] %s182_s29 }
  0x12   : > { %s3204_s5 = scalar_lea.hbm %s4701_s1, 256 }
  0x13   : > { %p3480_p11 = pnand %p3022_p9, %p3449_p1  ;;  %p3205_p12 = scmp.ne.s32.totalorder %s4701_s1, %s3204_s5 }
  0x14   : > { %p3211_p5 = scmp.lt.u32.totalorder %s3204_s5, %s4701_s1 }
  0x15   : > { %p3206_p13 = pneg %p3480_p11 }
  0x17   : > { %p3207_p0 = pnand %p3206_p13, %p3205_p12 }
  0x19   : > { %p3208_p3 = pneg %p3207_p0 }
  0x1b   : > { %p3213_p7 = pnand %p3211_p5, %p3208_p3 }
  0x1d   : > { %3216 = shalt.err (!%p3213_p7)
}
  0x1e   : > { %s3217_s10 = scalar_lea.vmem %s3473_s26, 256  ;;  %p3225_p1 = scmp.lt.s32.totalorder %s3473_s26, %s3473_s26 }
  0x1f   : > { %p3218_p9 = scmp.ne.s32.totalorder %s3473_s26, %s3217_s10  ;;  %p3226_p12 = scmp.lt.s32.totalorder %s3217_s10, %s3217_s10 }
  0x21   : > { %p3220_p10 = pnand %p3218_p9, %p3206_p13  ;;  %p3227_p0 = por %p3226_p12, %p3225_p1 }
  0x23   : > { %p3221_p6 = pneg %p3220_p10 }
  0x25   : > { %p3228_p4 = pnand %p3227_p0, %p3221_p6 }
  0x27   : > { %3231 = shalt.err (!%p3228_p4)
}
  0x28   : > { %s3380_s11 = smov 64   ;;  %s3381_s18 = smov 4  }
  0x29   : > { %3025 = dma.hbm_to_vmem [thread:$0]  (!%p3480_p11), %s4701_s1, 256, %s3473_s26, [#allocation7], %s3380_s11, %s3380_s11, %s3381_s18  }
  0x2a   : > { %s3232_s4 = scalar_lea.hbm %s4702_s2, 16 }
  0x2b   : > { %p3233_p1 = scmp.ne.s32.totalorder %s4702_s2, %s3232_s4  ;;  %p3239_p10 = scmp.lt.u32.totalorder %s3232_s4, %s4702_s2 }
  0x2d   : > { %p3235_p4 = pnand %p3233_p1, %p3206_p13 }
  0x2f   : > { %p3236_p6 = pneg %p3235_p4 }
  0x31   : > { %p3241_p3 = pnand %p3239_p10, %p3236_p6 }
  0x33   : > { %3244 = shalt.err (!%p3241_p3)
}
  0x34   : > { %s3245_s26 = scalar_lea.vmem %s3484_s29, 16  ;;  %s3252_s9 = scalar_lea.vmem %s3484_s29, 32 }
  0x35   : > { %p3246_p5 = scmp.ne.s32.totalorder %s3484_s29, %s3245_s26  ;;  %p3253_p12 = scmp.lt.s32.totalorder %s3484_s29, %s3484_s29 }
  0x36   : > { %p3254_p0 = scmp.lt.s32.totalorder %s3252_s9, %s3245_s26 }
  0x37   : > { %p3248_p7 = pnand %p3246_p5, %p3206_p13 }
  0x38   : > { %p3255_p1 = por %p3254_p0, %p3253_p12 }
  0x39   : > { %p3249_p9 = pneg %p3248_p7 }
  0x3b   : > { %p3256_p4 = pnand %p3255_p1, %p3249_p9 }
  0x3d   : > { %3259 = shalt.err (!%p3256_p4)
}
  0x3e   : > { %3028 = dma.hbm_to_vmem [thread:$0]  (!%p3480_p11), %s4702_s2, 16, %s3484_s29, [#allocation7]  }
  0x3f   : > { %s39_s25 = sadd.s32 1, %s3372_s16  ;;  %s46_s28 = sadd.s32 1, %s3364_s14 }
  0x40   : > { %p41_p13 = scmp.ge.s32.totalorder %s39_s25, 2  ;;  %p53_p6 = scmp.ne.s32.totalorder %s3364_s14, %s3360_s13 }
  0x41   : > { %p54_p10 = scmp.eq.s32.totalorder %s3376_s17, 0  ;;  %p3039_p3 = scmp.lt.s32.totalorder %s3376_s17, 2 }
  0x42   : > { %s4727_s25 = smov (%p41_p13, %s39_s25), 0  ;;  %p3552_p7 = por %p3453_p2, %p53_p6 }
  0x43   : > { %p55_p5 = por %p54_p10, %p53_p6  ;;  %s43_s30 = ssub.s32 %s3372_s16, %s4727_s25 }
  0x44   : > { %s4714_s27 = scalar_select %p3552_p7, 1, 0 }
  0x45   : > { %s193_s4 = sand.u32 1, %s3364_s14   ;;  %p44_p9 = scmp.eq.s32.totalorder %s43_s30, 0 }
  0x46   : > { %s3007_s29 = smul.u32 216, %s193_s4  ;;  %p3559_p11 = pnand %p3039_p3, %p55_p5 }
  0x47   : > { %s3564_s6 = scalar_select %p44_p9, %s3364_s14, %s46_s28  }
  0x48   : > { %s3008_s7 = smul.u32 3456, %s3372_s16  ;;  %s197_s8 = scalar_lea.vmem [#allocation3], %s3007_s29 }
  0x49   : > { %s204_s26 = sshll.u32 %s197_s8, 4  ;;  %s3574_s19 = scalar_lea.sflag [#allocation4], %s193_s4  ;;  %s3572_s26 = int_to_ptr.vmem [resolvable:$true] %s204_s26 }
  0x4a   : > { %s3570_s10 = scalar_lea.hbm %s4700_s0, %s3008_s7  ;;  %p3262_p12 = pneg %p3559_p11 }
  0x4b   : > { %s3260_s30 = scalar_lea.hbm %s3570_s10, 3456  ;;  %s3265_s7 = scalar_lea.hbm %s4700_s0, 6912 }
  0x4c   : > { %p3261_p2 = scmp.ne.s32.totalorder %s3570_s10, %s3260_s30  ;;  %p3266_p4 = scmp.lt.u32.totalorder %s3570_s10, %s4700_s0 }
  0x4d   : > { %p3267_p13 = scmp.lt.u32.totalorder %s3265_s7, %s3260_s30  ;;  %p3269_p10 = scmp.lt.u32.totalorder %s3260_s30, %s3570_s10 }
  0x4e   : > { %p3263_p0 = pnand %p3262_p12, %p3261_p2 }
  0x4f   : > { %p3268_p6 = por %p3267_p13, %p3266_p4 }
  0x50   : > { %p3264_p1 = pneg %p3263_p0 }
  0x51   : > { %p3270_p3 = por %p3269_p10, %p3268_p6 }
  0x53   : > { %p3271_p5 = pnand %p3270_p3, %p3264_p1 }
  0x55   : > { %3274 = shalt.err (!%p3271_p5)
}
  0x56   : > { %s3275_s4 = scalar_lea.vmem %s3572_s26, 3456  ;;  %s3382_s9 = smov [#allocation3]  }
  0x57   : > { %p3276_p9 = scmp.ne.s32.totalorder %s3572_s26, %s3275_s4  ;;  %s3280_s28 = sshll.u32 %s3382_s9, 4  ;;  %s3281_s28 = int_to_ptr.vmem [resolvable:$false] %s3280_s28 }
  0x58   : > { %s3282_s29 = scalar_lea.vmem %s3281_s28, 6912  ;;  %p3283_p7 = scmp.lt.s32.totalorder %s3572_s26, %s3281_s28 }
  0x59   : > { %p3278_p2 = pnand %p3276_p9, %p3262_p12  ;;  %p3284_p4 = scmp.lt.s32.totalorder %s3282_s29, %s3275_s4 }
  0x5b   : > { %p3279_p0 = pneg %p3278_p2  ;;  %p3285_p13 = por %p3284_p4, %p3283_p7 }
  0x5d   : > { %p3286_p6 = pnand %p3285_p13, %p3279_p0 }
  0x5f   : > { %3289 = shalt.err (!%p3286_p6)
}
  0x60   : > { %3032 = dma.hbm_to_vmem [thread:$0]  (!%p3559_p11), %s3570_s10, 3456, %s3572_s26, %s3574_s19, %s3380_s11, %s3380_s11, %s3381_s18  }
  0x61   : > { %216 = sbr.rel (%p3469_p8) target bundleno = 721 (0x2d1), region = 32  ;;  %s3608_s30 = sand.u32 (!%p3469_p8), 1, %s3360_s13  }
  0x62   : > { %s3009_s7 = smul.u32 (!%p3469_p8), 216, %s3608_s30  ;;  %s219_s8 = scalar_lea.sflag (!%p3469_p8), [#allocation4], %s3608_s30 }
  0x63   : > { %p4716_p7 = scmp.ne.s32.totalorder (!%p3469_p8), %s4710_s22, 0 }
  0x64   : > { %s3612_s21 = scalar_lea.vmem (!%p3469_p8), [#allocation3], %s3009_s7 }
  0x68   : > { %3343 = dma.done.wait (%p4716_p7), %s219_s8, 3456  }
  0x69   : > { %3345 = vsyncadd (%p4716_p7), %s219_s8, 4294963840  ;;  %p4717_p11 = scmp.ne.s32.totalorder %s4708_s20, 0 }
  0x6b   : > { %3347 = dma.done.wait (%p4717_p11), [#allocation7], 272  }
  0x6c   : > { %3349 = vsyncadd (%p4717_p11), [#allocation7], 4294967024  ;;  %v3623_v0 = vld [vmem:[%s3612_s21 + $0x6c] sm:$0xff]   ;;  %vm726_vm0 = vcmask 1046528   ;;  %s3383_s22 = smov 9   ;;  %v3633_v2 = vld [vmem:[%s3612_s21 + $0x60] sm:$0xff]  }
  0x6d   : > { %v3626_v1 = vld [vmem:[%s3612_s21 + $0xc] sm:$0xff]   ;;  %988 = vrot.lane.b32.xlu1 %v3623_v0, %s3383_s22  ;;  %v3109_v3 = vld [vmem:[%s3612_s21 + $0x68] ss:$0 sps:$4 sm:$0x11]   ;;  %v3637_v4 = vld [vmem:[%s3612_s21] sm:$0xff]   ;;  %v1182_v5 = vshrl.u32 %v3623_v0, 16 }
  0x6e   : > { %972 = vrot.lane.b32.xlu0 %v3626_v1, %s3383_s22  ;;  %v751_v6 = vrot.slane %v3633_v2, 1  ;;  %v752_v7 = vrot.slane %v3109_v3, 1  ;;  %v3111_v8 = vld [vmem:[%s3612_s21 + $0x8] ss:$0 sps:$4 sm:$0x11]   ;;  %v3643_v9 = vld [vmem:[%s3612_s21 + $0x6c] sm:$0xff]  }
  0x6f   : > { %vm468_vm1 = vsmask.f32 7424  ;;  %v727_v10 = vrot.slane %v3637_v4, 1  ;;  %v3647_v11 = vld [vmem:[%s3612_s21 + $0xc] sm:$0xff]   ;;  %v728_v13 = vrot.slane %v3111_v8, 1  ;;  %s3384_s20 = smov 6  }
  0x70   : > { %v753_v12 = vsel %vm726_vm0, %v751_v6, %v752_v7  ;;  %v3113_v14 = vld [vmem:[%s3612_s21 + $0x74] ss:$0 sps:$4 sm:$0x11]   ;;  %v754_v15 = vrot.slane %v3643_v9, 1  ;;  %v730_v16 = vrot.slane %v3647_v11, 1  ;;  %v482_v20 = vshrl.u32 %v3647_v11, 16 }
  0x71   : > { %791 = vrot.lane.b32.xlu1 %v753_v12, %s3384_s20  ;;  %v729_v17 = vsel %vm726_vm0, %v727_v10, %v728_v13  ;;  %v755_v18 = vrot.slane %v3113_v14, 1  ;;  %v3115_v19 = vld [vmem:[%s3612_s21 + $0x14] ss:$0 sps:$4 sm:$0x11]   ;;  %v484_v21 = vshll.u32 %v3647_v11, 16  ;;  %v470_v22 = vshrl.u32 %v3637_v4, 16 }
  0x72   : > { %775 = vrot.lane.b32.xlu0 %v729_v17, %s3384_s20  ;;  %v472_v23 = vshll.u32 %v3637_v4, 16  ;;  %v731_v25 = vrot.slane %v3115_v19, 1  ;;  %v489_v26 = vshll.u32 %v3115_v19, 16  ;;  %v477_v27 = vshll.u32 %v3111_v8, 16  ;;  %v3667_v36 = vld [vmem:[%s3612_s21 + $0x78] sm:$0xff]   ;;  %s3385_s24 = smov 3  }
  0x73   : > { %v756_v24 = vsel %vm726_vm0, %v754_v15, %v755_v18  ;;  %v486_v28 = vrot.slane %v484_v21, 1  ;;  %v578_v30 = vshrl.u32 %v3643_v9, 16  ;;  %v580_v31 = vshll.u32 %v3643_v9, 16  ;;  %v3118_v44 = vld [vmem:[%s3612_s21 + $0x74] ss:$0 sps:$4 sm:$0x11]  }
  0x74   : > { %v474_v29 = vrot.slane %v472_v23, 1  ;;  %v732_v32 = vsel %vm726_vm0, %v730_v16, %v731_v25  ;;  %v491_v33 = vrot.slane %v489_v26, 1  ;;  %v479_v34 = vrot.slane %v477_v27, 1  ;;  %v3119_v49 = vld [vmem:[%s3612_s21 + $0x14] ss:$0 sps:$4 sm:$0x11]  }
  0x75   : > { %793 = vrot.lane.b32.xlu1 %v756_v24, %s3384_s20  ;;  %v585_v35 = vshll.u32 %v3113_v14, 16  ;;  %v487_v37 = vor.u32 %v486_v28, %v482_v20  ;;  %v582_v39 = vrot.slane %v580_v31, 1  ;;  %v566_v40 = vshrl.u32 %v3633_v2, 16  ;;  %v3679_v52 = vld [vmem:[%s3612_s21 + $0x18] sm:$0xff]   ;;  %s3386_s11 = smov 12   ;;  %s3387_s18 = smov 15  }
  0x76   : > { %777 = vrot.lane.b32.xlu0 %v732_v32, %s3384_s20  ;;  %v475_v38 = vor.u32 %v474_v29, %v470_v22  ;;  %v568_v42 = vshll.u32 %v3633_v2, 16  ;;  %v573_v43 = vshll.u32 %v3109_v3, 16  ;;  %v1184_v48 = vshll.u32 %v3623_v0, 16  ;;  %v3120_v58 = vld [vmem:[%s3612_s21 + $0x80] ss:$0 sps:$4 sm:$0x11]  }
  0x77   : > { %v587_v41 = vrot.slane %v585_v35, 1  ;;  %v492_v45 = vsel %vm468_vm1, %v487_v37, %v491_v33  ;;  %v583_v47 = vor.u32 %v582_v39, %v578_v30  ;;  %v1189_v53 = vshll.u32 %v3118_v44, 16  ;;  %v3121_v62 = vld [vmem:[%s3612_s21 + $0x20] ss:$0 sps:$4 sm:$0x11]   ;;  %v3709_v30 = vld [vmem:[%s3612_s21 + $0x78] sm:$0xff]  }
  0x78   : > { %v480_v46 = vsel %vm468_vm1, %v475_v38, %v479_v34  ;;  %v570_v50 = vrot.slane %v568_v42, 1  ;;  %v575_v51 = vrot.slane %v573_v43, 1  ;;  %v1186_v55 = vrot.slane %v1184_v48, 1  ;;  %v3721_v37 = vld [vmem:[%s3612_s21 + $0x80] ss:$0 sps:$4 sm:$0x11]  }
  0x79   : > { %663 = vrot.lane.b32.xlu1 %v492_v45, %s3385_s24  ;;  %v588_v54 = vsel %vm468_vm1, %v583_v47, %v587_v41  ;;  %v1088_v56 = vshll.u32 %v3626_v1, 16  ;;  %v1093_v57 = vshll.u32 %v3119_v49, 16  ;;  %v1086_v60 = vshrl.u32 %v3626_v1, 16  ;;  %v3724_v38 = vld [vmem:[%s3612_s21 + $0x84] sm:$0xff]   ;;  %s3388_s5 = smov 18   ;;  %s3389_s26 = smov 21  }
  0x7a   : > { %661 = vrot.lane.b32.xlu0 %v480_v46, %s3385_s24  ;;  %v571_v59 = vor.u32 %v570_v50, %v566_v40  ;;  %v1196_v61 = vshll.u32 %v3667_v36, 16  ;;  %v1191_v63 = vrot.slane %v1189_v53, 1  ;;  %v1194_v8 = vshrl.u32 %v3667_v36, 16  ;;  %v3729_v40 = vld [vmem:[%s3612_s21 + $0x24] sm:$0xff]   ;;  %s3390_s10 = smov 24   ;;  %s2667_s19 = sshll.u32 %s3608_s30, 7 }
  0x7b   : > { %v1090_v3 = vrot.slane %v1088_v56, 1  ;;  %v1095_v7 = vrot.slane %v1093_v57, 1  ;;  %v1100_v10 = vshll.u32 %v3679_v52, 16  ;;  %v1187_v12 = vor.u32 %v1186_v55, %v1182_v5  ;;  %v3743_v48 = vld [vmem:[%s3612_s21 + $0x8c] ss:$0 sps:$4 sm:$0x11]  }
  0x7c   : > { %v576_v6 = vsel %vm468_vm1, %v571_v59, %v575_v51  ;;  %v1198_v13 = vrot.slane %v1196_v61, 1  ;;  %v1201_v14 = vshll.u32 %v3120_v58, 16  ;;  %v1098_v16 = vshrl.u32 %v3679_v52, 16  ;;  %v3750_v53 = vld [vmem:[%s3612_s21 + $0x2c] ss:$0 sps:$4 sm:$0x11]  }
  0x7d   : > { %679 = vrot.lane.b32.xlu1 %v588_v54, %s3385_s24  ;;  %v1091_v15 = vor.u32 %v1090_v3, %v1086_v60  ;;  %v1102_v17 = vrot.slane %v1100_v10, 1  ;;  %v1105_v18 = vshll.u32 %v3121_v62, 16  ;;  %v1192_v19 = vsel %vm468_vm1, %v1187_v12, %v1191_v63  ;;  %v3753_v54 = vld [vmem:[%s3612_s21 + $0x78] sm:$0xff]   ;;  %s4554_s4 = scalar_lea.vmem [#allocation9], %s2667_s19  ;;  %s2948_s9 = sshll.u32 %s3368_s15, 11 }
  0x7e   : > { %677 = vrot.lane.b32.xlu0 %v576_v6, %s3385_s24  ;;  %v1199_v20 = vor.u32 %v1198_v13, %v1194_v8  ;;  %v1203_v21 = vrot.slane %v1201_v14, 1  ;;  %v1366_v25 = vrot.slane %v3623_v0, 1  ;;  %v1367_v26 = vrot.slane %v3118_v44, 1  ;;  %v3760_v59 = vld [vmem:[%s3612_s21 + $0x18] sm:$0xff]   ;;  %s2536_s28 = sshll.u32 %s4554_s4, 4  ;;  %s4639_s7 = scalar_lea.hbm %s4703_s3, %s2948_s9  ;;  %s4641_s28 = int_to_ptr.vmem [resolvable:$true] %s2536_s28 }
  0x7f   : > { %v1096_v5 = vsel %vm468_vm1, %v1091_v15, %v1095_v7  ;;  %v1103_v22 = vor.u32 %v1102_v17, %v1098_v16  ;;  %v1107_v23 = vrot.slane %v1105_v18, 1  ;;  %v1342_v28 = vrot.slane %v3626_v1, 1  ;;  %v3718_v1 = vld [vmem:[%s3612_s21 + $0x18] sm:$0xff]   ;;  %v3767_v7 = vld [vmem:[%s3612_s21 + $0x80] ss:$0 sps:$4 sm:$0x11]  }
  0x80   : > { %v1204_v24 = vsel %vm468_vm1, %v1199_v20, %v1203_v21  ;;  %v1343_v29 = vrot.slane %v3119_v49, 1  ;;  %v1368_v31 = vsel %vm726_vm0, %v1366_v25, %v1367_v26  ;;  %v1369_v32 = vrot.slane %v3667_v36, 1  ;;  %v3770_v8 = vld [vmem:[%s3612_s21 + $0x20] ss:$0 sps:$4 sm:$0x11]   ;;  %v3790_v26 = vld [vmem:[%s3612_s21 + $0x84] sm:$0xff]  }
  0x81   : > { %990 = vrot.lane.b32.xlu1 %v3667_v36, %s3383_s22  ;;  %v1108_v27 = vsel %vm468_vm1, %v1103_v22, %v1107_v23  ;;  %v1370_v0 = vrot.slane %v3120_v58, 1  ;;  %v1345_v34 = vrot.slane %v3679_v52, 1  ;;  %v1346_v35 = vrot.slane %v3121_v62, 1  ;;  %v3732_v36 = vld [vmem:[%s3612_s21 + $0x20] ss:$0 sps:$4 sm:$0x11]  }
  0x82   : > { %974 = vrot.lane.b32.xlu0 %v3679_v52, %s3383_s22  ;;  %v1344_v33 = vsel %vm726_vm0, %v1342_v28, %v1343_v29  ;;  %v1799_v39 = vshll.u32 %v3709_v30, 16  ;;  %v1703_v43 = vshll.u32 %v3718_v1, 16  ;;  %v1797_v44 = vshrl.u32 %v3709_v30, 16  ;;  %s2519_s8 = scalar_lea.sflag [#allocation5], %s3608_s30  ;;  %p4718_p12 = scmp.ne.s32.totalorder %s4714_s27, 0 }
  0x83   : > { %v1371_v41 = vsel %vm726_vm0, %v1369_v32, %v1370_v0  ;;  %v1347_v42 = vsel %vm726_vm0, %v1345_v34, %v1346_v35  ;;  %v1804_v46 = vshll.u32 %v3721_v37, 16  ;;  %v1708_v47 = vshll.u32 %v3732_v36, 16  ;;  %v3802_v35 = vld [vmem:[%s3612_s21 + $0x8c] ss:$0 sps:$4 sm:$0x11]  }
  0x84   : > { %v1801_v45 = vrot.slane %v1799_v39, 1  ;;  %v1811_v49 = vshll.u32 %v3724_v38, 16  ;;  %v1715_v50 = vshll.u32 %v3729_v40, 16  ;;  %v1701_v51 = vshrl.u32 %v3718_v1, 16 }
  0x85   : > { %1293 = vrot.lane.b32.xlu1 %v1192_v19, %s3386_s11  ;;  %v1705_v52 = vrot.slane %v1703_v43, 1  ;;  %v1806_v56 = vrot.slane %v1804_v46, 1  ;;  %v1809_v57 = vshrl.u32 %v3724_v38, 16  ;;  %v1713_v58 = vshrl.u32 %v3729_v40, 16 }
  0x86   : > { %1277 = vrot.lane.b32.xlu0 %v1096_v5, %s3386_s11  ;;  %v1802_v55 = vor.u32 %v1801_v45, %v1797_v44  ;;  %v1710_v60 = vrot.slane %v1708_v47, 1  ;;  %v1813_v61 = vrot.slane %v1811_v49, 1  ;;  %v1816_v62 = vshll.u32 %v3743_v48, 16 }
  0x87   : > { %v1717_v63 = vrot.slane %v1715_v50, 1  ;;  %v1706_v3 = vor.u32 %v1705_v52, %v1701_v51  ;;  %v1720_v6 = vshll.u32 %v3750_v53, 16  ;;  %v592_v14 = vshll.u32 %v3753_v54, 16 }
  0x88   : > { %v1807_v10 = vsel %vm468_vm1, %v1802_v55, %v1806_v56  ;;  %v1814_v12 = vor.u32 %v1813_v61, %v1809_v57  ;;  %v1818_v13 = vrot.slane %v1816_v62, 1  ;;  %v496_v18 = vshll.u32 %v3760_v59, 16  ;;  %v3829_v61 = vld [vmem:[%s3612_s21 + $0x90] sm:$0xff]  }
  0x89   : > { %1295 = vrot.lane.b32.xlu1 %v1204_v24, %s3386_s11  ;;  %v1711_v15 = vsel %vm468_vm1, %v1706_v3, %v1710_v60  ;;  %v1718_v16 = vor.u32 %v1717_v63, %v1713_v58  ;;  %v1722_v17 = vrot.slane %v1720_v6, 1  ;;  %v1981_v19 = vrot.slane %v3709_v30, 1  ;;  %v3835_v3 = vld [vmem:[%s3612_s21 + $0x30] sm:$0xff]  }
  0x8a   : > { %1279 = vrot.lane.b32.xlu0 %v1108_v27, %s3386_s11  ;;  %v1982_v20 = vrot.slane %v3721_v37, 1  ;;  %v597_v21 = vshll.u32 %v3767_v7, 16  ;;  %v501_v5 = vshll.u32 %v3770_v8, 16  ;;  %v1819_v22 = vsel %vm468_vm1, %v1814_v12, %v1818_v13  ;;  %v3841_v13 = vld [vmem:[%s3612_s21 + $0x9c] sm:$0xff]  }
  0x8b   : > { %v1957_v23 = vrot.slane %v3718_v1, 1  ;;  %v590_v24 = vshrl.u32 %v3753_v54, 16  ;;  %v594_v25 = vrot.slane %v592_v14, 1  ;;  %v1723_v27 = vsel %vm468_vm1, %v1718_v16, %v1722_v17  ;;  %v3844_v14 = vld [vmem:[%s3612_s21 + $0x3c] sm:$0xff]   ;;  %v3888_v17 = vld [vmem:[%s3612_s21 + $0x90] sm:$0xff]  }
  0x8c   : > { %v1958_v28 = vrot.slane %v3732_v36, 1  ;;  %v494_v29 = vshrl.u32 %v3760_v59, 16  ;;  %v599_v32 = vrot.slane %v597_v21, 1  ;;  %v503_v0 = vrot.slane %v501_v5, 1  ;;  %v3896_v5 = vld [vmem:[%s3612_s21 + $0x30] sm:$0xff]  }
  0x8d   : > { %1406 = vrot.lane.b32.xlu1 %v1368_v31, %s3387_s18  ;;  %v3796_v31 = vld [vmem:[%s3612_s21 + $0x24] sm:$0xff]   ;;  %v595_v34 = vor.u32 %v594_v25, %v590_v24  ;;  %v3807_v36 = vld [vmem:[%s3612_s21 + $0x2c] ss:$0 sps:$4 sm:$0x11]   ;;  %v1985_v43 = vrot.slane %v3743_v48, 1  ;;  %v1960_v44 = vrot.slane %v3729_v40, 1 }
  0x8e   : > { %1390 = vrot.lane.b32.xlu0 %v1344_v33, %s3387_s18  ;;  %v1983_v33 = vsel %vm726_vm0, %v1981_v19, %v1982_v20  ;;  %v1959_v37 = vsel %vm726_vm0, %v1957_v23, %v1958_v28  ;;  %v1961_v45 = vrot.slane %v3750_v53, 1  ;;  %v602_v47 = vshrl.u32 %v3790_v26, 16  ;;  %v3143_v19 = vld [vmem:[%s3612_s21 + $0x2c] ss:$0 sps:$4 sm:$0x11]  }
  0x8f   : > { %v600_v46 = vsel %vm468_vm1, %v595_v34, %v599_v32  ;;  %v609_v50 = vshll.u32 %v3802_v35, 16  ;;  %v757_v60 = vrot.slane %v3753_v54, 1  ;;  %v758_v63 = vrot.slane %v3767_v7, 1  ;;  %v3144_v25 = vld [vmem:[%s3612_s21 + $0x98] ss:$0 sps:$4 sm:$0x11]  }
  0x90   : > { %v1962_v56 = vsel %vm726_vm0, %v1960_v44, %v1961_v45  ;;  %v734_v12 = vrot.slane %v3770_v8, 1  ;;  %vm403_vm2 = vcmask 23552   ;;  %v737_v7 = vrot.slane %v3807_v36, 1  ;;  %v3142_v8 = vld [vmem:[%s3612_s21 + $0x8c] ss:$0 sps:$4 sm:$0x11]  }
  0x91   : > { %1408 = vrot.lane.b32.xlu1 %v1371_v41, %s3387_s18  ;;  %v508_v41 = vshll.u32 %v3796_v31, 16  ;;  %v611_v55 = vrot.slane %v609_v50, 1  ;;  %405 = vst.msk [vmem:[#allocation2 + $0x8] sm:$0xff] %vm403_vm2, %v3647_v11  ;;  %404 = vst.msk [vmem:[#allocation2] sm:$0xff] %vm403_vm2, %v3637_v4  ;;  %v760_v4 = vrot.slane %v3790_v26, 1  ;;  %v736_v11 = vrot.slane %v3796_v31, 1 }
  0x92   : > { %1392 = vrot.lane.b32.xlu0 %v1347_v42, %s3387_s18  ;;  %v1984_v42 = vrot.slane %v3724_v38, 1  ;;  %406 = vst.msk [vmem:[#allocation2 + $0x10] sm:$0xff] %vm403_vm2, %v3760_v59  ;;  %407 = vst.msk [vmem:[#allocation2 + $0x18] sm:$0xff] %vm403_vm2, %v3796_v31  ;;  %v1218_v32 = vshrl.u32 %v3888_v17, 16  ;;  %vm2157_vm3 = vcmask 1044480   ;;  %vm2158_vm4 = vcmask 1045504  }
  0x93   : > { %v510_v52 = vrot.slane %v508_v41, 1  ;;  %408 = vst.msk [vmem:[#allocation2 + $0x20] sm:$0xff] %vm403_vm2, %v3835_v3  ;;  %412 = vst.msk [vmem:[#allocation2 + $0x40] sm:$0xff] %vm403_vm2, %v3633_v2  ;;  %v759_v2 = vsel %vm726_vm0, %v757_v60, %v758_v63  ;;  %v738_v21 = vsel %vm726_vm0, %v736_v11, %v737_v7  ;;  %vm709_vm5 = vcmask 48152  }
  0x94   : > { %v1986_v48 = vsel %vm726_vm0, %v1984_v42, %v1985_v43  ;;  %413 = vst.msk [vmem:[#allocation2 + $0x48] sm:$0xff] %vm403_vm2, %v3643_v9  ;;  %414 = vst.msk [vmem:[#allocation2 + $0x50] sm:$0xff] %vm403_vm2, %v3753_v54  ;;  %v761_v9 = vrot.slane %v3802_v35, 1  ;;  %v3880_v54 = vld [vmem:[%s3612_s21 + $0x24] sm:$0xff]   ;;  %vm823_vm6 = vcmask 72752   ;;  %vm1020_vm7 = vcmask 97352  }
  0x95   : > { %1603 = vrot.lane.b32.xlu1 %v3709_v30, %s3388_s5  ;;  %v498_v30 = vrot.slane %v496_v18, 1  ;;  %415 = vst.msk [vmem:[#allocation2 + $0x58] sm:$0xff] %vm403_vm2, %v3790_v26  ;;  %416 = vst.msk [vmem:[#allocation2 + $0x60] sm:$0xff] %vm403_vm2, %v3829_v61  ;;  %v1112_v20 = vshll.u32 %v3880_v54, 16  ;;  %v1110_v23 = vshrl.u32 %v3880_v54, 16  ;;  %vm1325_vm8 = vcmask 121952  }
  0x96   : > { %1587 = vrot.lane.b32.xlu0 %v3718_v1, %s3388_s5  ;;  %v604_v1 = vshll.u32 %v3790_v26, 16  ;;  %417 = vst.msk [vmem:[#allocation2 + $0x68] sm:$0xff] %vm403_vm2, %v3841_v13  ;;  %409 = vst.msk [vmem:[#allocation2 + $0x28] sm:$0xff] %vm403_vm2, %v3844_v14  ;;  %v762_v18 = vsel %vm726_vm0, %v760_v4, %v761_v9  ;;  %v1213_v26 = vshll.u32 %v3142_v8, 16  ;;  %v3950_v4 = vld [vmem:[%s3612_s21 + $0x9c] sm:$0xff]   ;;  %vm1438_vm9 = vcmask 146552  }
  0x97   : > { %v499_v39 = vor.u32 %v498_v30, %v494_v29  ;;  %v1114_v28 = vrot.slane %v1112_v20, 1  ;;  %v1117_v29 = vshll.u32 %v3143_v19, 16  ;;  %v3145_v30 = vld [vmem:[%s3612_s21 + $0x38] ss:$0 sps:$4 sm:$0x11]   ;;  %v3953_v9 = vld [vmem:[%s3612_s21 + $0x3c] sm:$0xff]  }
  0x98   : > { %v606_v49 = vrot.slane %v604_v1, 1  ;;  %v1215_v34 = vrot.slane %v1213_v26, 1  ;;  %v1225_v1 = vshll.u32 %v3144_v25, 16  ;;  %v1129_v41 = vshll.u32 %v3145_v30, 16  ;;  %v3982_v26 = vld [vmem:[%s3612_s21 + $0x54] sm:$0xff]  }
  0x99   : > { %1605 = vrot.lane.b32.xlu1 %v3724_v38, %s3388_s5  ;;  %v504_v51 = vsel %vm468_vm1, %v499_v39, %v503_v0  ;;  %v506_v38 = vshrl.u32 %v3796_v31, 16  ;;  %v1124_v31 = vshll.u32 %v3896_v5, 16  ;;  %v1122_v0 = vshrl.u32 %v3896_v5, 16  ;;  %411 = vst.msk [vmem:[#allocation2 + $0x38] sm:$0xff] %vm403_vm2, %v3982_v26 }
  0x9a   : > { %1589 = vrot.lane.b32.xlu0 %v3729_v40, %s3388_s5  ;;  %v513_v40 = vshll.u32 %v3807_v36, 16  ;;  %v607_v53 = vor.u32 %v606_v49, %v602_v47  ;;  %v1119_v39 = vrot.slane %v1117_v29, 1  ;;  %v1227_v44 = vrot.slane %v1225_v1, 1 }
  0x9b   : > { %v511_v57 = vor.u32 %v510_v52, %v506_v38  ;;  %v1126_v36 = vrot.slane %v1124_v31, 1  ;;  %v1131_v47 = vrot.slane %v1129_v41, 1  ;;  %v3176_v38 = vld [vmem:[#allocation6] sm:$0xff]   ;;  %v1352_v63 = vrot.slane %v3145_v30, 1 }
  0x9c   : > { %v515_v58 = vrot.slane %v513_v40, 1  ;;  %v612_v62 = vsel %vm468_vm1, %v607_v53, %v611_v55  ;;  %v1348_v40 = vrot.slane %v3880_v54, 1  ;;  %v3925_v53 = vld [vmem:[%s3612_s21 + $0x90] sm:$0xff]   ;;  %2967 = vmatprep.subr.bf16.mxu0 %v3176_v38  ;;  %3003 = vmatprep.subr.bf16.mxu1 %v3176_v38  ;;  %v1833_v30 = vshrl.u32 %v3950_v4, 16 }
  0x9d   : > { %1908 = vrot.lane.b32.xlu1 %v1807_v10, %s3389_s26  ;;  %v733_v10 = vrot.slane %v3760_v59, 1  ;;  %2968 = vmatpush3.bf16.msra.mxu0 %v3176_v38  ;;  %v1737_v31 = vshrl.u32 %v3953_v9, 16  ;;  %vm1635_vm10 = vcmask 171152   ;;  %vm1940_vm11 = vcmask 195752  }
  0x9e   : > { %1892 = vrot.lane.b32.xlu0 %v1711_v15, %s3389_s26  ;;  %v516_v6 = vsel %vm468_vm1, %v511_v57, %v515_v58  ;;  %v3847_v15 = vld [vmem:[%s3612_s21 + $0x84] sm:$0xff]   ;;  %v1376_v57 = vrot.slane %v3144_v25, 1  ;;  %v3932_v58 = vld [vmem:[%s3612_s21 + $0x30] sm:$0xff]   ;;  %3005 = vmatpush3.bf16.msra.mxu1 %v3176_v38  ;;  %v1987_v38 = vrot.slane %v3925_v53, 1  ;;  %vm2053_vm12 = vcmask 220352  }
  0x9f   : > { %v735_v59 = vsel %vm726_vm0, %v733_v10, %v734_v12  ;;  %v1208_v16 = vshll.u32 %v3847_v15, 16  ;;  %v1372_v50 = vrot.slane %v3847_v15, 1  ;;  %v1823_v10 = vshll.u32 %v3925_v53, 16  ;;  %v3942_v12 = vld [vmem:[%s3612_s21 + $0x38] ss:$0 sps:$4 sm:$0x11]  }
  0xa0   : > { %v1727_v11 = vshll.u32 %v3932_v58, 16  ;;  %v1732_v20 = vshll.u32 %v3942_v12, 16  ;;  %vm2108_vm13 = vcmask 220160   ;;  %vm2485_vm14 = vcmask 519168  }
  0xa1   : > { %1910 = vrot.lane.b32.xlu1 %v1819_v22, %s3389_s26  ;;  %v1206_v22 = vshrl.u32 %v3847_v15, 16  ;;  %v1210_v24 = vrot.slane %v1208_v16, 1  ;;  %v1825_v7 = vrot.slane %v1823_v10, 1  ;;  %v3962_v16 = vld [vmem:[%s3612_s21 + $0xa4] ss:$0 sps:$4 sm:$0x11]  }
  0xa2   : > { %1894 = vrot.lane.b32.xlu0 %v1723_v27, %s3389_s26  ;;  %v1220_v27 = vshll.u32 %v3888_v17, 16  ;;  %v1734_v1 = vrot.slane %v1732_v20, 1  ;;  %v532_v20 = vshll.u32 %v3844_v14, 16 }
  0xa4   : > { %v1222_v35 = vrot.slane %v1220_v27, 1  ;;  %v1739_v27 = vshll.u32 %v3953_v9, 16 }
  0xa5   : > { %2021 = vrot.lane.b32.xlu1 %v1983_v33, %s3390_s10  ;;  %v1211_v33 = vor.u32 %v1210_v24, %v1206_v22  ;;  %v1729_v22 = vrot.slane %v1727_v11, 1  ;;  %v3391_v24 = vmov 65535  }
  0xa6   : > { %2005 = vrot.lane.b32.xlu0 %v1959_v37, %s3390_s10  ;;  %v1115_v37 = vor.u32 %v1114_v28, %v1110_v23  ;;  %v1223_v43 = vor.u32 %v1222_v35, %v1218_v32  ;;  %v1835_v23 = vshll.u32 %v3950_v4, 16  ;;  %v2159_v25 = vsel %vm2157_vm3, 4294967295, %v3391_v24 }
  0xa7   : > { %v1216_v42 = vsel %vm468_vm1, %v1211_v33, %v1215_v34  ;;  %v2160_v28 = vsel %vm2158_vm4, %v2159_v25, 0  ;;  %v1840_v34 = vshll.u32 %v3962_v16, 16  ;;  %v1991_v24 = vrot.slane %v3962_v16, 1 }
  0xa8   : > { %v1120_v45 = vsel %vm468_vm1, %v1115_v37, %v1119_v39  ;;  %v1228_v49 = vsel %vm468_vm1, %v1223_v43, %v1227_v44  ;;  %v1837_v33 = vrot.slane %v1835_v23, 1  ;;  %v1741_v37 = vrot.slane %v1739_v27, 1 }
  0xa9   : > { %681 = vrot.lane.b32.xlu1 %v600_v46, %s3385_s24  ;;  %v1127_v46 = vor.u32 %v1126_v36, %v1122_v0  ;;  %v4000_v36 = vld [vmem:[%s3612_s21 + $0x98] ss:$0 sps:$4 sm:$0x11]   ;;  %v1842_v43 = vrot.slane %v1840_v34, 1  ;;  %v616_v44 = vshll.u32 %v3829_v61, 16  ;;  %v1990_v23 = vrot.slane %v3950_v4, 1 }
  0xaa   : > { %665 = vrot.lane.b32.xlu0 %v504_v51, %s3385_s24  ;;  %v1373_v51 = vrot.slane %v3142_v8, 1  ;;  %v1725_v8 = vshrl.u32 %v3932_v58, 16  ;;  %v1966_v25 = vrot.slane %v3953_v9, 1 }
  0xab   : > { %v1132_v52 = vsel %vm468_vm1, %v1127_v46, %v1131_v47  ;;  %v1742_v46 = vor.u32 %v1741_v37, %v1737_v31 }
  0xac   : > { %v1374_v55 = vsel %vm726_vm0, %v1372_v50, %v1373_v51  ;;  %v1730_v35 = vor.u32 %v1729_v22, %v1725_v8  ;;  %v520_v50 = vshll.u32 %v3835_v3, 16 }
  0xad   : > { %2023 = vrot.lane.b32.xlu1 %v1986_v48, %s3390_s10  ;;  %v1349_v48 = vrot.slane %v3143_v19, 1 }
  0xae   : > { %2007 = vrot.lane.b32.xlu0 %v1962_v56, %s3390_s10  ;;  %v1375_v56 = vrot.slane %v3888_v17, 1 }
  0xaf   : > { %v1350_v60 = vsel %vm726_vm0, %v1348_v40, %v1349_v48  ;;  %v1963_v40 = vrot.slane %v3932_v58, 1  ;;  %v1964_v48 = vrot.slane %v3942_v12, 1 }
  0xb1   : > { %683 = vrot.lane.b32.xlu1 %v612_v62, %s3385_s24  ;;  %v1351_v62 = vrot.slane %v3896_v5, 1 }
  0xb2   : > { %667 = vrot.lane.b32.xlu0 %v516_v6, %s3385_s24  ;;  %v3937_v6 = vld [vmem:[%s3612_s21 + $0x98] ss:$0 sps:$4 sm:$0x11]  }
  0xb3   : > { %v1828_v19 = vshll.u32 %v3937_v6, 16 }
  0xb5   : > { %795 = vrot.lane.b32.xlu1 %v759_v2, %s3384_s20  ;;  %v1377_v2 = vsel %vm726_vm0, %v1375_v56, %v1376_v57  ;;  %v1830_v0 = vrot.slane %v1828_v19, 1  ;;  %v4036_v19 = vld [vmem:[%s3612_s21 + $0x44] ss:$0 sps:$4 sm:$0x11]  }
  0xb6   : > { %779 = vrot.lane.b32.xlu0 %v735_v59, %s3384_s20  ;;  %v1821_v59 = vshrl.u32 %v3925_v53, 16  ;;  %v537_v16 = vshll.u32 %v4036_v19, 16 }
  0xb8   : > { %v1826_v32 = vor.u32 %v1825_v7, %v1821_v59  ;;  %v628_v59 = vshll.u32 %v3841_v13, 16  ;;  %v1965_v7 = vsel %vm726_vm0, %v1963_v40, %v1964_v48 }
  0xb9   : > { %797 = vrot.lane.b32.xlu1 %v762_v18, %s3384_s20  ;;  %v3965_v18 = vld [vmem:[%s3612_s21 + $0x48] sm:$0xff]  }
  0xba   : > { %781 = vrot.lane.b32.xlu0 %v738_v21, %s3384_s20  ;;  %v3971_v21 = vld [vmem:[%s3612_s21 + $0x44] ss:$0 sps:$4 sm:$0x11]   ;;  %410 = vst.msk [vmem:[#allocation2 + $0x30] sm:$0xff] %vm403_vm2, %v3965_v18  ;;  %v1831_v41 = vsel %vm468_vm1, %v1826_v32, %v1830_v0  ;;  %v630_v31 = vrot.slane %v628_v59, 1 }
  0xbb   : > { %v1744_v39 = vshll.u32 %v3971_v21, 16  ;;  %v1967_v27 = vrot.slane %v3971_v21, 1  ;;  %v1992_v21 = vsel %vm726_vm0, %v1990_v23, %v1991_v24 }
  0xbd   : > { %992 = vrot.lane.b32.xlu1 %v3847_v15, %s3383_s22  ;;  %v3945_v15 = vld [vmem:[%s3612_s21 + $0xa8] sm:$0xff]   ;;  %v1746_v47 = vrot.slane %v1744_v39, 1  ;;  %v1968_v37 = vsel %vm726_vm0, %v1966_v25, %v1967_v27 }
  0xbe   : > { %976 = vrot.lane.b32.xlu0 %v3880_v54, %s3383_s22  ;;  %v1353_v54 = vsel %vm726_vm0, %v1351_v62, %v1352_v63  ;;  %418 = vst.msk [vmem:[#allocation2 + $0x70] sm:$0xff] %vm403_vm2, %v3945_v15  ;;  %v518_v63 = vshrl.u32 %v3835_v3, 16 }
  0xbf   : > { %v1747_v62 = vsel %vm468_vm1, %v1742_v46, %v1746_v47 }
  0xc1   : > { %994 = vrot.lane.b32.xlu1 %v3888_v17, %s3383_s22  ;;  %v3179_v17 = vld [vmem:[#allocation6 + $0x8] sm:$0x3f]  }
  0xc2   : > { %978 = vrot.lane.b32.xlu0 %v3896_v5, %s3383_s22  ;;  %v3974_v5 = vld [vmem:[%s3612_s21 + $0xb4] sm:$0xff]   ;;  %v2162_v29 = vand.u32 %v3179_v17, %v2160_v28 }
  0xc3   : > { %419 = vst.msk [vmem:[#allocation2 + $0x78] sm:$0xff] %vm403_vm2, %v3974_v5 }
  0xc4   : > { %2969 = vmatprep.subr.bf16.mxu0 %v2162_v29  ;;  %3004 = vmatprep.subr.bf16.mxu1 %v2162_v29 }
  0xc5   : > { %1297 = vrot.lane.b32.xlu1 %v1216_v42, %s3386_s11  ;;  %2970 = vmatpush3.bf16.msra.mxu0 %v2162_v29  ;;  %v1838_v42 = vor.u32 %v1837_v33, %v1833_v30  ;;  %v626_v30 = vshrl.u32 %v3841_v13, 16  ;;  %v534_v33 = vrot.slane %v532_v20, 1 }
  0xc6   : > { %1281 = vrot.lane.b32.xlu0 %v1120_v45, %s3386_s11  ;;  %3006 = vmatpush3.bf16.msra.mxu1 %v2162_v29  ;;  %v1735_v45 = vsel %vm468_vm1, %v1730_v35, %v1734_v1 }
  0xc7   : > { %v1843_v57 = vsel %vm468_vm1, %v1838_v42, %v1842_v43  ;;  %v631_v34 = vor.u32 %v630_v31, %v626_v30 }
  0xc9   : > { %1299 = vrot.lane.b32.xlu1 %v1228_v49, %s3386_s11  ;;  %v4008_v49 = vld [vmem:[%s3612_s21 + $0x38] ss:$0 sps:$4 sm:$0x11]  }
  0xca   : > { %1283 = vrot.lane.b32.xlu0 %v1132_v52, %s3386_s11  ;;  %v1988_v52 = vrot.slane %v3937_v6, 1  ;;  %v525_v6 = vshll.u32 %v4008_v49, 16 }
  0xcc   : > { %v527_v17 = vrot.slane %v525_v6, 1  ;;  %v4106_v6 = vld [vmem:[%s3612_s21 + $0x44] ss:$0 sps:$4 sm:$0x11]  }
  0xcd   : > { %1410 = vrot.lane.b32.xlu1 %v1374_v55, %s3387_s18  ;;  %v621_v55 = vshll.u32 %v4000_v36, 16  ;;  %v1141_v20 = vshll.u32 %v4106_v6, 16 }
  0xce   : > { %1394 = vrot.lane.b32.xlu0 %v1350_v60, %s3387_s18  ;;  %v614_v60 = vshrl.u32 %v3829_v61, 16 }
  0xcf   : > { %v623_v10 = vrot.slane %v621_v55, 1  ;;  %v742_v55 = vrot.slane %v3844_v14, 1 }
  0xd1   : > { %1412 = vrot.lane.b32.xlu1 %v1377_v2, %s3387_s18  ;;  %v1989_v2 = vsel %vm726_vm0, %v1987_v38, %v1988_v52  ;;  %v740_v38 = vrot.slane %v4008_v49, 1  ;;  %v4079_v49 = vld [vmem:[%s3612_s21 + $0x9c] sm:$0xff]  }
  0xd2   : > { %1396 = vrot.lane.b32.xlu0 %v1353_v54, %s3387_s18  ;;  %v4031_v54 = vld [vmem:[%s3612_s21 + $0xa4] ss:$0 sps:$4 sm:$0x11]  }
  0xd3   : > { %v633_v32 = vshll.u32 %v4031_v54, 16 }
  0xd5   : > { %1607 = vrot.lane.b32.xlu1 %v3925_v53, %s3388_s5  ;;  %v618_v53 = vrot.slane %v616_v44, 1  ;;  %v635_v35 = vrot.slane %v633_v32, 1  ;;  %v763_v44 = vrot.slane %v3829_v61, 1 }
  0xd6   : > { %1591 = vrot.lane.b32.xlu0 %v3932_v58, %s3388_s5  ;;  %v522_v58 = vrot.slane %v520_v50, 1  ;;  %v739_v50 = vrot.slane %v3835_v3, 1  ;;  %v766_v3 = vrot.slane %v3841_v13, 1 }
  0xd7   : > { %v619_v11 = vor.u32 %v618_v53, %v614_v60  ;;  %v636_v43 = vsel %vm468_vm1, %v631_v34, %v635_v35  ;;  %v4093_v60 = vld [vmem:[%s3612_s21 + $0xa4] ss:$0 sps:$4 sm:$0x11]   ;;  %v1232_v53 = vshll.u32 %v4079_v49, 16 }
  0xd8   : > { %v523_v8 = vor.u32 %v522_v58, %v518_v63  ;;  %v741_v48 = vsel %vm726_vm0, %v739_v50, %v740_v38  ;;  %v4103_v58 = vld [vmem:[%s3612_s21 + $0x48] sm:$0xff]   ;;  %v1355_v38 = vrot.slane %v4106_v6, 1  ;;  %v4186_v6 = vld [vmem:[%s3612_s21 + $0x54] sm:$0xff]  }
  0xd9   : > { %1609 = vrot.lane.b32.xlu1 %v3950_v4, %s3388_s5  ;;  %v624_v29 = vsel %vm468_vm1, %v619_v11, %v623_v10  ;;  %v530_v4 = vshrl.u32 %v3844_v14, 16  ;;  %v4098_v14 = vld [vmem:[%s3612_s21 + $0xa8] sm:$0xff]   ;;  %v1237_v11 = vshll.u32 %v4093_v60, 16  ;;  %v1148_v23 = vshll.u32 %v4103_v58, 16 }
  0xda   : > { %1593 = vrot.lane.b32.xlu0 %v3953_v9, %s3388_s5  ;;  %v528_v0 = vsel %vm468_vm1, %v523_v8, %v527_v17  ;;  %v1244_v8 = vshll.u32 %v4098_v14, 16  ;;  %v1242_v27 = vshrl.u32 %v4098_v14, 16  ;;  %v1146_v31 = vshrl.u32 %v4103_v58, 16 }
  0xdb   : > { %v535_v39 = vor.u32 %v534_v33, %v530_v4  ;;  %v1239_v25 = vrot.slane %v1237_v11, 1  ;;  %v1143_v4 = vrot.slane %v1141_v20, 1  ;;  %v1150_v33 = vrot.slane %v1148_v23, 1 }
  0xdc   : > { %v1763_v23 = vshll.u32 %v4186_v6, 16 }
  0xdd   : > { %1912 = vrot.lane.b32.xlu1 %v1831_v41, %s3389_s26  ;;  %v539_v41 = vrot.slane %v537_v16, 1 }
  0xde   : > { %1896 = vrot.lane.b32.xlu0 %v1735_v45, %s3389_s26  ;;  %v764_v45 = vrot.slane %v4000_v36, 1  ;;  %v767_v36 = vrot.slane %v4031_v54, 1  ;;  %v1234_v54 = vrot.slane %v1232_v53, 1 }
  0xdf   : > { %v4011_v51 = vpop.permute.xlu1 %988  ;;  %v540_v47 = vsel %vm468_vm1, %v535_v39, %v539_v41  ;;  %v1151_v39 = vor.u32 %v1150_v33, %v1146_v31  ;;  %v1765_v33 = vrot.slane %v1763_v23, 1  ;;  %v1972_v23 = vrot.slane %v4186_v6, 1 }
  0xe0   : > { %v4020_v56 = vpop.permute.xlu0 %972  ;;  %v765_v61 = vsel %vm726_vm0, %v763_v44, %v764_v45  ;;  %v1378_v44 = vrot.slane %v4079_v49, 1  ;;  %v1379_v45 = vrot.slane %v4093_v60, 1  ;;  %v4173_v60 = vld [vmem:[%s3612_s21 + $0xb4] sm:$0xff]  }
  0xe1   : > { %1914 = vrot.lane.b32.xlu1 %v1843_v57, %s3389_s26  ;;  %v4087_v57 = vld [vmem:[%s3612_s21 + $0x3c] sm:$0xff]   ;;  %v1859_v11 = vshll.u32 %v4173_v60, 16 }
  0xe2   : > { %1898 = vrot.lane.b32.xlu0 %v1747_v62, %s3389_s26  ;;  %v1136_v10 = vshll.u32 %v4087_v57, 16  ;;  %v1134_v59 = vshrl.u32 %v4087_v57, 16  ;;  %v1354_v50 = vrot.slane %v4087_v57, 1 }
  0xe3   : > { %v792_v12 = vpop.permute.xlu1 %791 }
  0xe4   : > { %v776_v22 = vpop.permute.xlu0 %775 }
  0xe5   : > { %2025 = vrot.lane.b32.xlu1 %v1989_v2, %s3390_s10  ;;  %v1230_v2 = vshrl.u32 %v4079_v49, 16 }
  0xe6   : > { %2009 = vrot.lane.b32.xlu0 %v1965_v7, %s3390_s10  ;;  %v4117_v7 = vld [vmem:[%s3612_s21 + $0xb0] ss:$0 sps:$4 sm:$0x11]  }
  0xe7   : > { %v794_v28 = vpop.permute.xlu1 %793  ;;  %v1249_v30 = vshll.u32 %v4117_v7, 16 }
  0xe8   : > { %v778_v9 = vpop.permute.xlu0 %777 }
  0xe9   : > { %685 = vrot.lane.b32.xlu1 %v624_v29, %s3385_s24  ;;  %v1246_v29 = vrot.slane %v1244_v8, 1  ;;  %v1251_v35 = vrot.slane %v1249_v30, 1 }
  0xea   : > { %669 = vrot.lane.b32.xlu0 %v528_v0, %s3385_s24 }
  0xeb   : > { %v664_v1 = vpop.permute.xlu1 %663  ;;  %v1247_v34 = vor.u32 %v1246_v29, %v1242_v27  ;;  %v1861_v27 = vrot.slane %v1859_v11, 1 }
  0xec   : > { %711 = vst.msk [vmem:[#allocation2 + $0x8] sm:$0xff] %vm709_vm5, %v664_v1  ;;  %v662_v42 = vpop.permute.xlu0 %661 }
  0xed   : > { %710 = vst.msk [vmem:[#allocation2] sm:$0xff] %vm709_vm5, %v662_v42  ;;  %2027 = vrot.lane.b32.xlu1 %v1992_v21, %s3390_s10 }
  0xee   : > { %825 = vst.msk [vmem:[#allocation2 + $0x8] sm:$0xff] %vm823_vm6, %v778_v9  ;;  %824 = vst.msk [vmem:[#allocation2] sm:$0xff] %vm823_vm6, %v776_v22  ;;  %2011 = vrot.lane.b32.xlu0 %v1968_v37, %s3390_s10  ;;  %v4122_v22 = vld [vmem:[%s3612_s21 + $0x50] ss:$0 sps:$4 sm:$0x11]  }
  0xef   : > { %v680_v46 = vpop.permute.xlu1 %679  ;;  %1021 = vst.msk [vmem:[#allocation2] sm:$0xff] %vm1020_vm7, %v4020_v56  ;;  %v743_v56 = vrot.slane %v4036_v19, 1  ;;  %v1138_v19 = vrot.slane %v1136_v10, 1  ;;  %v1153_v16 = vshll.u32 %v4122_v22, 16 }
  0xf0   : > { %719 = vst.msk [vmem:[#allocation2 + $0x48] sm:$0xff] %vm709_vm5, %v680_v46  ;;  %v678_v52 = vpop.permute.xlu0 %677 }
  0xf1   : > { %833 = vst.msk [vmem:[#allocation2 + $0x48] sm:$0xff] %vm823_vm6, %v794_v28  ;;  %687 = vrot.lane.b32.xlu1 %v636_v43, %s3385_s24  ;;  %v744_v63 = vsel %vm726_vm0, %v742_v55, %v743_v56  ;;  %v1235_v28 = vor.u32 %v1234_v54, %v1230_v2  ;;  %v1139_v0 = vor.u32 %v1138_v19, %v1134_v59  ;;  %v1155_v41 = vrot.slane %v1153_v16, 1  ;;  %v4193_v2 = vld [vmem:[%s3612_s21 + $0xbc] ss:$0 sps:$4 sm:$0x11]  }
  0xf2   : > { %718 = vst.msk [vmem:[#allocation2 + $0x40] sm:$0xff] %vm709_vm5, %v678_v52  ;;  %671 = vrot.lane.b32.xlu0 %v540_v47, %s3385_s24  ;;  %v1252_v43 = vsel %vm468_vm1, %v1247_v34, %v1251_v35  ;;  %v1357_v55 = vrot.slane %v4103_v58, 1  ;;  %v1358_v56 = vrot.slane %v4122_v22, 1  ;;  %v4202_v22 = vld [vmem:[%s3612_s21 + $0x5c] ss:$0 sps:$4 sm:$0x11]  }
  0xf3   : > { %832 = vst.msk [vmem:[#allocation2 + $0x40] sm:$0xff] %vm823_vm6, %v792_v12  ;;  %v991_v40 = vpop.permute.xlu1 %990  ;;  %v1240_v21 = vsel %vm468_vm1, %v1235_v28, %v1239_v25  ;;  %v1144_v37 = vsel %vm468_vm1, %v1139_v0, %v1143_v4  ;;  %v1156_v47 = vsel %vm468_vm1, %v1151_v39, %v1155_v41  ;;  %v1857_v25 = vshrl.u32 %v4173_v60, 16 }
  0xf4   : > { %1029 = vst.msk [vmem:[#allocation2 + $0x40] sm:$0xff] %vm1020_vm7, %v4011_v51  ;;  %1030 = vst.msk [vmem:[#allocation2 + $0x48] sm:$0xff] %vm1020_vm7, %v991_v40  ;;  %v975_v13 = vpop.permute.xlu0 %974  ;;  %v768_v51 = vsel %vm726_vm0, %v766_v3, %v767_v36  ;;  %v1381_v3 = vrot.slane %v4098_v14, 1  ;;  %v1382_v36 = vrot.slane %v4117_v7, 1  ;;  %v1864_v28 = vshll.u32 %v4193_v2, 16 }
  0xf5   : > { %1022 = vst.msk [vmem:[#allocation2 + $0x8] sm:$0xff] %vm1020_vm7, %v975_v13  ;;  %799 = vrot.lane.b32.xlu1 %v765_v61, %s3384_s20  ;;  %v1380_v61 = vsel %vm726_vm0, %v1378_v44, %v1379_v45  ;;  %v1761_v4 = vshrl.u32 %v4186_v6, 16  ;;  %v1768_v16 = vshll.u32 %v4202_v22, 16  ;;  %v4228_v44 = vld [vmem:[%s3612_s21 + $0x50] ss:$0 sps:$4 sm:$0x11]  }
  0xf6   : > { %783 = vrot.lane.b32.xlu0 %v741_v48, %s3384_s20  ;;  %v1356_v48 = vsel %vm726_vm0, %v1354_v50, %v1355_v38  ;;  %v1866_v34 = vrot.slane %v1864_v28, 1  ;;  %v544_v45 = vshll.u32 %v3965_v18, 16 }
  0xf7   : > { %v1294_v62 = vpop.permute.xlu1 %1293 }
  0xf8   : > { %1334 = vst.msk [vmem:[#allocation2 + $0x40] sm:$0xff] %vm1325_vm8, %v1294_v62  ;;  %v1278_v12 = vpop.permute.xlu0 %1277  ;;  %v4182_v62 = vld [vmem:[%s3612_s21 + $0x50] ss:$0 sps:$4 sm:$0x11]  }
  0xf9   : > { %1326 = vst.msk [vmem:[#allocation2] sm:$0xff] %vm1325_vm8, %v1278_v12  ;;  %801 = vrot.lane.b32.xlu1 %v768_v51, %s3384_s20  ;;  %v4176_v51 = vld [vmem:[%s3612_s21 + $0xb0] ss:$0 sps:$4 sm:$0x11]   ;;  %v1756_v8 = vshll.u32 %v4182_v62, 16 }
  0xfa   : > { %785 = vrot.lane.b32.xlu0 %v744_v63, %s3384_s20  ;;  %v1852_v7 = vshll.u32 %v4176_v51, 16  ;;  %v1994_v38 = vrot.slane %v4176_v51, 1  ;;  %v549_v51 = vshll.u32 %v4228_v44, 16 }
  0xfb   : > { %v1296_v17 = vpop.permute.xlu1 %1295  ;;  %v1758_v31 = vrot.slane %v1756_v8, 1  ;;  %v556_v8 = vshll.u32 %v3982_v26, 16 }
  0xfc   : > { %1335 = vst.msk [vmem:[#allocation2 + $0x48] sm:$0xff] %vm1325_vm8, %v1296_v17  ;;  %v1280_v24 = vpop.permute.xlu0 %1279  ;;  %v1854_v30 = vrot.slane %v1852_v7, 1  ;;  %v4258_v7 = vld [vmem:[%s3612_s21 + $0x5c] ss:$0 sps:$4 sm:$0x11]  }
  0xfd   : > { %1327 = vst.msk [vmem:[#allocation2 + $0x8] sm:$0xff] %vm1325_vm8, %v1280_v24  ;;  %996 = vrot.lane.b32.xlu1 %v4079_v49, %s3383_s22  ;;  %v4161_v49 = vld [vmem:[%s3612_s21 + $0xa8] sm:$0xff]  }
  0xfe   : > { %980 = vrot.lane.b32.xlu0 %v4087_v57, %s3383_s22  ;;  %v4167_v57 = vld [vmem:[%s3612_s21 + $0x48] sm:$0xff]   ;;  %v1847_v53 = vshll.u32 %v4161_v49, 16  ;;  %v1845_v54 = vshrl.u32 %v4161_v49, 16  ;;  %v1993_v50 = vrot.slane %v4161_v49, 1 }
  0xff   : > { %v1407_v32 = vpop.permute.xlu1 %1406  ;;  %v1751_v10 = vshll.u32 %v4167_v57, 16  ;;  %v1749_v19 = vshrl.u32 %v4167_v57, 16 }
 0x100   : > { %1447 = vst.msk [vmem:[#allocation2 + $0x40] sm:$0xff] %vm1438_vm9, %v1407_v32  ;;  %v1391_v9 = vpop.permute.xlu0 %1390  ;;  %v1849_v59 = vrot.slane %v1847_v53, 1  ;;  %v1995_v53 = vsel %vm726_vm0, %v1993_v50, %v1994_v38  ;;  %v4297_v38 = vld [vmem:[%s3612_s21 + $0xb4] sm:$0xff]  }
 0x101   : > { %1439 = vst.msk [vmem:[#allocation2] sm:$0xff] %vm1438_vm9, %v1391_v9  ;;  %998 = vrot.lane.b32.xlu1 %v4098_v14, %s3383_s22  ;;  %v1383_v14 = vsel %vm726_vm0, %v1381_v3, %v1382_v36  ;;  %v1753_v20 = vrot.slane %v1751_v10, 1  ;;  %v638_v3 = vshrl.u32 %v3945_v15, 16  ;;  %v652_v10 = vshll.u32 %v3974_v5, 16 }
 0x102   : > { %982 = vrot.lane.b32.xlu0 %v4103_v58, %s3383_s22  ;;  %v1359_v58 = vsel %vm726_vm0, %v1357_v55, %v1358_v56  ;;  %v1850_v29 = vor.u32 %v1849_v59, %v1845_v54  ;;  %v551_v59 = vrot.slane %v549_v51, 1  ;;  %v4326_v51 = vld [vmem:[%s3612_s21 + $0x5c] ss:$0 sps:$4 sm:$0x11]  }
 0x103   : > { %v1409_v1 = vpop.permute.xlu1 %1408  ;;  %v1754_v0 = vor.u32 %v1753_v20, %v1749_v19  ;;  %v1996_v19 = vrot.slane %v4173_v60, 1  ;;  %v1997_v20 = vrot.slane %v4193_v2, 1  ;;  %v654_v28 = vrot.slane %v652_v10, 1  ;;  %v4337_v10 = vld [vmem:[%s3612_s21 + $0xc8] ss:$0 sps:$4 sm:$0x11]  }
 0x104   : > { %1448 = vst.msk [vmem:[#allocation2 + $0x48] sm:$0xff] %vm1438_vm9, %v1409_v1  ;;  %v1393_v42 = vpop.permute.xlu0 %1392  ;;  %v1855_v35 = vsel %vm468_vm1, %v1850_v29, %v1854_v30  ;;  %v4223_v1 = vld [vmem:[%s3612_s21 + $0xb0] ss:$0 sps:$4 sm:$0x11]   ;;  %v558_v2 = vrot.slane %v556_v8, 1 }
 0x105   : > { %1440 = vst.msk [vmem:[#allocation2 + $0x8] sm:$0xff] %vm1438_vm9, %v1393_v42  ;;  %1301 = vrot.lane.b32.xlu1 %v1240_v21, %s3386_s11  ;;  %v1862_v21 = vor.u32 %v1861_v27, %v1857_v25  ;;  %v1759_v41 = vsel %vm468_vm1, %v1754_v0, %v1758_v31  ;;  %v1766_v42 = vor.u32 %v1765_v33, %v1761_v4  ;;  %v650_v27 = vshrl.u32 %v3974_v5, 16 }
 0x106   : > { %1285 = vrot.lane.b32.xlu0 %v1144_v37, %s3386_s11  ;;  %v640_v37 = vshll.u32 %v3945_v15, 16  ;;  %v1998_v4 = vsel %vm726_vm0, %v1996_v19, %v1997_v20 }
 0x107   : > { %v1604_v46 = vpop.permute.xlu1 %1603  ;;  %v655_v33 = vor.u32 %v654_v28, %v650_v27 }
 0x108   : > { %1644 = vst.msk [vmem:[#allocation2 + $0x40] sm:$0xff] %vm1635_vm10, %v1604_v46  ;;  %v1588_v52 = vpop.permute.xlu0 %1587  ;;  %v642_v36 = vrot.slane %v640_v37, 1 }
 0x109   : > { %1636 = vst.msk [vmem:[#allocation2] sm:$0xff] %vm1635_vm10, %v1588_v52  ;;  %1303 = vrot.lane.b32.xlu1 %v1252_v43, %s3386_s11  ;;  %v1770_v43 = vrot.slane %v1768_v16, 1  ;;  %v1969_v52 = vrot.slane %v4167_v57, 1 }
 0x10a   : > { %1287 = vrot.lane.b32.xlu0 %v1156_v47, %s3386_s11  ;;  %v1867_v47 = vsel %vm468_vm1, %v1862_v21, %v1866_v34 }
 0x10b   : > { %v1606_v40 = vpop.permute.xlu1 %1605  ;;  %v1771_v56 = vsel %vm468_vm1, %v1766_v42, %v1770_v43  ;;  %v770_v42 = vrot.slane %v4223_v1, 1 }
 0x10c   : > { %1645 = vst.msk [vmem:[#allocation2 + $0x48] sm:$0xff] %vm1635_vm10, %v1606_v40  ;;  %v1590_v13 = vpop.permute.xlu0 %1589  ;;  %v645_v40 = vshll.u32 %v4223_v1, 16  ;;  %v772_v1 = vrot.slane %v3974_v5, 1  ;;  %v1256_v5 = vshll.u32 %v4297_v38, 16 }
 0x10d   : > { %1637 = vst.msk [vmem:[#allocation2 + $0x8] sm:$0xff] %vm1635_vm10, %v1590_v13  ;;  %1414 = vrot.lane.b32.xlu1 %v1380_v61, %s3387_s18  ;;  %v1970_v61 = vrot.slane %v4182_v62, 1  ;;  %v546_v13 = vrot.slane %v544_v45, 1  ;;  %v643_v62 = vor.u32 %v642_v36, %v638_v3  ;;  %v749_v3 = vrot.slane %v4258_v7, 1  ;;  %v4307_v36 = vld [vmem:[%s3612_s21 + $0x54] sm:$0xff]  }
 0x10e   : > { %1398 = vrot.lane.b32.xlu0 %v1356_v48, %s3387_s18 }
 0x10f   : > { %v1909_v63 = vpop.permute.xlu1 %1908  ;;  %v1971_v11 = vsel %vm726_vm0, %v1969_v52, %v1970_v61  ;;  %v748_v61 = vrot.slane %v3982_v26, 1 }
 0x110   : > { %1949 = vst.msk [vmem:[#allocation2 + $0x40] sm:$0xff] %vm1940_vm11, %v1909_v63  ;;  %v1893_v12 = vpop.permute.xlu0 %1892  ;;  %v647_v63 = vrot.slane %v645_v40, 1 }
 0x111   : > { %1941 = vst.msk [vmem:[#allocation2] sm:$0xff] %vm1940_vm11, %v1893_v12  ;;  %1416 = vrot.lane.b32.xlu1 %v1383_v14, %s3387_s18 }
 0x112   : > { %1400 = vrot.lane.b32.xlu0 %v1359_v58, %s3387_s18  ;;  %v4253_v58 = vld [vmem:[%s3612_s21 + $0xbc] ss:$0 sps:$4 sm:$0x11]   ;;  %v648_v25 = vsel %vm468_vm1, %v643_v62, %v647_v63  ;;  %v1258_v62 = vrot.slane %v1256_v5, 1 }
 0x113   : > { %v1911_v17 = vpop.permute.xlu1 %1910  ;;  %v657_v29 = vshll.u32 %v4253_v58, 16 }
 0x114   : > { %1950 = vst.msk [vmem:[#allocation2 + $0x48] sm:$0xff] %vm1940_vm11, %v1911_v17  ;;  %v1895_v24 = vpop.permute.xlu0 %1894 }
 0x115   : > { %1942 = vst.msk [vmem:[#allocation2 + $0x8] sm:$0xff] %vm1940_vm11, %v1895_v24  ;;  %1611 = vrot.lane.b32.xlu1 %v4161_v49, %s3388_s5  ;;  %v542_v49 = vshrl.u32 %v3965_v18, 16  ;;  %v1973_v24 = vrot.slane %v4202_v22, 1  ;;  %v659_v16 = vrot.slane %v657_v29, 1 }
 0x116   : > { %1595 = vrot.lane.b32.xlu0 %v4167_v57, %s3388_s5 }
 0x117   : > { %v2022_v32 = vpop.permute.xlu1 %2021  ;;  %v547_v54 = vor.u32 %v546_v13, %v542_v49  ;;  %v1974_v21 = vsel %vm726_vm0, %v1972_v23, %v1973_v24  ;;  %v750_v49 = vsel %vm726_vm0, %v748_v61, %v749_v3  ;;  %v4323_v13 = vld [vmem:[%s3612_s21 + $0x60] sm:$0xff]   ;;  %v4395_v3 = vld [vmem:[%s3612_s21 + $0xcc] sm:$0xff]  }
 0x118   : > { %2062 = vst.msk [vmem:[#allocation2 + $0x40] sm:$0xff] %vm2053_vm12, %v2022_v32  ;;  %v2006_v9 = vpop.permute.xlu0 %2005  ;;  %v1172_v8 = vshll.u32 %v4323_v13, 16  ;;  %v1170_v27 = vshrl.u32 %v4323_v13, 16 }
 0x119   : > { %2054 = vst.msk [vmem:[#allocation2] sm:$0xff] %vm2053_vm12, %v2006_v9  ;;  %1613 = vrot.lane.b32.xlu1 %v4173_v60, %s3388_s5  ;;  %v552_v32 = vsel %vm468_vm1, %v547_v54, %v551_v59  ;;  %v554_v60 = vshrl.u32 %v3982_v26, 16  ;;  %v4319_v26 = vld [vmem:[%s3612_s21 + $0xbc] ss:$0 sps:$4 sm:$0x11]   ;;  %v1165_v59 = vshll.u32 %v4326_v51, 16 }
 0x11a   : > { %1597 = vrot.lane.b32.xlu0 %v4186_v6, %s3388_s5  ;;  %v561_v6 = vshll.u32 %v4258_v7, 16  ;;  %v1261_v63 = vshll.u32 %v4319_v26, 16  ;;  %v4342_v7 = vld [vmem:[%s3612_s21 + $0x68] ss:$0 sps:$4 sm:$0x11]  }
 0x11b   : > { %v682_v39 = vpop.permute.xlu1 %681  ;;  %v559_v34 = vor.u32 %v558_v2, %v554_v60 }
 0x11c   : > { %720 = vst.msk [vmem:[#allocation2 + $0x50] sm:$0xff] %vm709_vm5, %v682_v39  ;;  %v666_v46 = vpop.permute.xlu0 %665  ;;  %v660_v39 = vsel %vm468_vm1, %v655_v33, %v659_v16  ;;  %v1263_v23 = vrot.slane %v1261_v63, 1 }
 0x11d   : > { %712 = vst.msk [vmem:[#allocation2 + $0x10] sm:$0xff] %vm709_vm5, %v666_v46  ;;  %1916 = vrot.lane.b32.xlu1 %v1855_v35, %s3389_s26  ;;  %v563_v35 = vrot.slane %v561_v6, 1  ;;  %v745_v46 = vrot.slane %v3965_v18, 1  ;;  %v773_v18 = vrot.slane %v4253_v58, 1  ;;  %v1158_v58 = vshrl.u32 %v4307_v36, 16 }
 0x11e   : > { %1900 = vrot.lane.b32.xlu0 %v1759_v41, %s3389_s26  ;;  %v769_v41 = vrot.slane %v3945_v15, 1 }
 0x11f   : > { %v2024_v48 = vpop.permute.xlu1 %2023  ;;  %v2078_v55 = vld [vmem:[#allocation2 + $0x40] sm:$0xff]  ;;  %v564_v45 = vsel %vm468_vm1, %v559_v34, %v563_v35  ;;  %v1384_v34 = vrot.slane %v4297_v38, 1  ;;  %v1385_v35 = vrot.slane %v4319_v26, 1 }
 0x120   : > { %2063 = vst.msk [vmem:[#allocation2 + $0x48] sm:$0xff] %vm2053_vm12, %v2024_v48  ;;  %v2008_v57 = vpop.permute.xlu0 %2007  ;;  %v2070_v14 = vld [vmem:[#allocation2] sm:$0xff]  ;;  %2987 = vmatprep.mubr.msk.bf16.mxu1 %vm2108_vm13, %v2078_v55  ;;  %v771_v15 = vsel %vm726_vm0, %v769_v41, %v770_v42  ;;  %v774_v48 = vsel %vm726_vm0, %v772_v1, %v773_v18  ;;  %v1360_v41 = vrot.slane %v4307_v36, 1  ;;  %v1361_v42 = vrot.slane %v4326_v51, 1 }
 0x121   : > { %2055 = vst.msk [vmem:[#allocation2 + $0x8] sm:$0xff] %vm2053_vm12, %v2008_v57  ;;  %2971 = vmatprep.mubr.msk.bf16.mxu0 %vm2108_vm13, %v2070_v14  ;;  %1918 = vrot.lane.b32.xlu1 %v1867_v47, %s3389_s26  ;;  %v746_v47 = vrot.slane %v4228_v44, 1  ;;  %v4316_v55 = vld [vmem:[%s3612_s21 + $0xc0] sm:$0xff]   ;;  %v1160_v57 = vshll.u32 %v4307_v36, 16  ;;  %v1363_v1 = vrot.slane %v4323_v13, 1  ;;  %v1364_v18 = vrot.slane %v4342_v7, 1 }
 0x122   : > { %1902 = vrot.lane.b32.xlu0 %v1771_v56, %s3389_s26  ;;  %v1266_v20 = vshrl.u32 %v4316_v55, 16  ;;  %v4406_v26 = vld [vmem:[%s3612_s21 + $0x68] ss:$0 sps:$4 sm:$0x11]  }
 0x123   : > { %v684_v12 = vpop.permute.xlu1 %683  ;;  %v747_v52 = vsel %vm726_vm0, %v745_v46, %v746_v47  ;;  %v1162_v54 = vrot.slane %v1160_v57, 1  ;;  %v1387_v46 = vrot.slane %v4316_v55, 1  ;;  %v1388_v47 = vrot.slane %v4337_v10, 1 }
 0x124   : > { %721 = vst.msk [vmem:[#allocation2 + $0x58] sm:$0xff] %vm709_vm5, %v684_v12  ;;  %v668_v17 = vpop.permute.xlu0 %667  ;;  %v1268_v12 = vshll.u32 %v4316_v55, 16 }
 0x125   : > { %713 = vst.msk [vmem:[#allocation2 + $0x18] sm:$0xff] %vm709_vm5, %v668_v17  ;;  %2029 = vrot.lane.b32.xlu1 %v1995_v53, %s3390_s10  ;;  %v1254_v53 = vshrl.u32 %v4297_v38, 16  ;;  %v1163_v29 = vor.u32 %v1162_v54, %v1158_v58  ;;  %v1389_v61 = vsel %vm726_vm0, %v1387_v46, %v1388_v47 }
 0x126   : > { %2013 = vrot.lane.b32.xlu0 %v1971_v11, %s3390_s10  ;;  %v1270_v24 = vrot.slane %v1268_v12, 1  ;;  %v4422_v12 = vld [vmem:[%s3612_s21 + $0x74] ss:$0 sps:$4 sm:$0x11]  }
 0x127   : > { %v796_v30 = vpop.permute.xlu1 %795  ;;  %v2079_v31 = vld [vmem:[#allocation2 + $0x48] sm:$0xff]  ;;  %v1259_v19 = vor.u32 %v1258_v62, %v1254_v53  ;;  %v1883_v62 = vshll.u32 %v4395_v3, 16 }
 0x128   : > { %834 = vst.msk [vmem:[#allocation2 + $0x50] sm:$0xff] %vm823_vm6, %v796_v30  ;;  %v780_v22 = vpop.permute.xlu0 %779  ;;  %v2071_v0 = vld [vmem:[#allocation2 + $0x8] sm:$0xff]  ;;  %2988 = vmatmul.mubr.msk.bf16.vlgmr.msra.gmra.mrb[0].mxu1 %vm2108_vm13, %v2079_v31  ;;  %v1167_v30 = vrot.slane %v1165_v59, 1  ;;  %v1174_v31 = vrot.slane %v1172_v8, 1  ;;  %v1271_v6 = vor.u32 %v1270_v24, %v1266_v20  ;;  %v1881_v59 = vshrl.u32 %v4395_v3, 16 }
 0x129   : > { %826 = vst.msk [vmem:[#allocation2 + $0x10] sm:$0xff] %vm823_vm6, %v780_v22  ;;  %2972 = vmatmul.mubr.msk.bf16.vlgmr.msra.gmra.mrb[0].mxu0 %vm2108_vm13, %v2071_v0  ;;  %689 = vrot.lane.b32.xlu1 %v648_v25, %s3385_s24  ;;  %v1273_v25 = vshll.u32 %v4337_v10, 16  ;;  %v1264_v2 = vsel %vm468_vm1, %v1259_v19, %v1263_v23  ;;  %v4417_v53 = vld [vmem:[%s3612_s21 + $0xd4] ss:$0 sps:$4 sm:$0x11]   ;;  %v1780_v10 = vshll.u32 %v4406_v26, 16 }
 0x12a   : > { %673 = vrot.lane.b32.xlu0 %v552_v32, %s3385_s24  ;;  %v1177_v32 = vshll.u32 %v4342_v7, 16  ;;  %v1175_v33 = vor.u32 %v1174_v31, %v1170_v27  ;;  %v1885_v19 = vrot.slane %v1883_v62, 1  ;;  %v1888_v20 = vshll.u32 %v4417_v53, 16 }
 0x12b   : > { %v798_v9 = vpop.permute.xlu1 %797  ;;  %v1275_v22 = vrot.slane %v1273_v25, 1  ;;  %v1782_v25 = vrot.slane %v1780_v10, 1 }
 0x12c   : > { %835 = vst.msk [vmem:[#allocation2 + $0x58] sm:$0xff] %vm823_vm6, %v798_v9  ;;  %v782_v37 = vpop.permute.xlu0 %781  ;;  %v1179_v16 = vrot.slane %v1177_v32, 1  ;;  %v1886_v31 = vor.u32 %v1885_v19, %v1881_v59  ;;  %v1890_v32 = vrot.slane %v1888_v20, 1 }
 0x12d   : > { %827 = vst.msk [vmem:[#allocation2 + $0x18] sm:$0xff] %vm823_vm6, %v782_v37  ;;  %2031 = vrot.lane.b32.xlu1 %v1998_v4, %s3390_s10  ;;  %v1168_v4 = vsel %vm468_vm1, %v1163_v29, %v1167_v30 }
 0x12e   : > { %2015 = vrot.lane.b32.xlu0 %v1974_v21, %s3390_s10  ;;  %v1276_v21 = vsel %vm468_vm1, %v1271_v6, %v1275_v22 }
 0x12f   : > { %v993_v43 = vpop.permute.xlu1 %992 }
 0x130   : > { %1031 = vst.msk [vmem:[#allocation2 + $0x50] sm:$0xff] %vm1020_vm7, %v993_v43  ;;  %v977_v50 = vpop.permute.xlu0 %976 }
 0x131   : > { %1023 = vst.msk [vmem:[#allocation2 + $0x10] sm:$0xff] %vm1020_vm7, %v977_v50  ;;  %691 = vrot.lane.b32.xlu1 %v660_v39, %s3385_s24  ;;  %v1180_v39 = vsel %vm468_vm1, %v1175_v33, %v1179_v16  ;;  %v4381_v50 = vld [vmem:[%s3612_s21 + $0xc0] sm:$0xff]  }
 0x132   : > { %675 = vrot.lane.b32.xlu0 %v564_v45, %s3385_s24  ;;  %v1386_v45 = vsel %vm726_vm0, %v1384_v34, %v1385_v35  ;;  %v1999_v33 = vrot.slane %v4381_v50, 1 }
 0x133   : > { %v995_v44 = vpop.permute.xlu1 %994 }
 0x134   : > { %1032 = vst.msk [vmem:[#allocation2 + $0x58] sm:$0xff] %vm1020_vm7, %v995_v44  ;;  %v979_v40 = vpop.permute.xlu0 %978  ;;  %v4387_v44 = vld [vmem:[%s3612_s21 + $0x60] sm:$0xff]  }
 0x135   : > { %1024 = vst.msk [vmem:[#allocation2 + $0x18] sm:$0xff] %vm1020_vm7, %v979_v40  ;;  %803 = vrot.lane.b32.xlu1 %v771_v15, %s3384_s20  ;;  %v1362_v15 = vsel %vm726_vm0, %v1360_v41, %v1361_v42  ;;  %v1871_v40 = vshll.u32 %v4381_v50, 16  ;;  %v1773_v51 = vshrl.u32 %v4387_v44, 16  ;;  %v1975_v35 = vrot.slane %v4387_v44, 1 }
 0x136   : > { %787 = vrot.lane.b32.xlu0 %v747_v52, %s3384_s20 }
 0x137   : > { %v1298_v56 = vpop.permute.xlu1 %1297  ;;  %v1873_v57 = vrot.slane %v1871_v40, 1 }
 0x138   : > { %1336 = vst.msk [vmem:[#allocation2 + $0x50] sm:$0xff] %vm1325_vm8, %v1298_v56  ;;  %v1282_v14 = vpop.permute.xlu0 %1281  ;;  %v1775_v56 = vshll.u32 %v4387_v44, 16 }
 0x139   : > { %1328 = vst.msk [vmem:[#allocation2 + $0x10] sm:$0xff] %vm1325_vm8, %v1282_v14  ;;  %805 = vrot.lane.b32.xlu1 %v774_v48, %s3384_s20  ;;  %v1365_v48 = vsel %vm726_vm0, %v1363_v1, %v1364_v18 }
 0x13a   : > { %789 = vrot.lane.b32.xlu0 %v750_v49, %s3384_s20  ;;  %v1777_v58 = vrot.slane %v1775_v56, 1 }
 0x13b   : > { %v1300_v11 = vpop.permute.xlu1 %1299 }
 0x13c   : > { %1337 = vst.msk [vmem:[#allocation2 + $0x58] sm:$0xff] %vm1325_vm8, %v1300_v11  ;;  %v1284_v17 = vpop.permute.xlu0 %1283  ;;  %v1778_v24 = vor.u32 %v1777_v58, %v1773_v51 }
 0x13d   : > { %1329 = vst.msk [vmem:[#allocation2 + $0x18] sm:$0xff] %vm1325_vm8, %v1284_v17  ;;  %1000 = vrot.lane.b32.xlu1 %v4297_v38, %s3383_s22 }
 0x13e   : > { %984 = vrot.lane.b32.xlu0 %v4307_v36, %s3383_s22  ;;  %v4398_v36 = vld [vmem:[%s3612_s21 + $0xc8] ss:$0 sps:$4 sm:$0x11]  }
 0x13f   : > { %v1411_v28 = vpop.permute.xlu1 %1410  ;;  %v1876_v14 = vshll.u32 %v4398_v36, 16  ;;  %v2000_v16 = vrot.slane %v4398_v36, 1 }
 0x140   : > { %1449 = vst.msk [vmem:[#allocation2 + $0x50] sm:$0xff] %vm1438_vm9, %v1411_v28  ;;  %v1395_v60 = vpop.permute.xlu0 %1394  ;;  %v1792_v28 = vshll.u32 %v4422_v12, 16 }
 0x141   : > { %1441 = vst.msk [vmem:[#allocation2 + $0x10] sm:$0xff] %vm1438_vm9, %v1395_v60  ;;  %1002 = vrot.lane.b32.xlu1 %v4316_v55, %s3383_s22  ;;  %v4403_v55 = vld [vmem:[%s3612_s21 + $0x6c] sm:$0xff]   ;;  %v1878_v17 = vrot.slane %v1876_v14, 1  ;;  %v2001_v42 = vsel %vm726_vm0, %v1999_v33, %v2000_v16  ;;  %s3290_s21 = scalar_lea.vmem %s4641_s28, 2048 }
 0x142   : > { %986 = vrot.lane.b32.xlu0 %v4323_v13, %s3383_s22  ;;  %v1869_v13 = vshrl.u32 %v4381_v50, 16  ;;  %v1787_v11 = vshll.u32 %v4403_v55, 16  ;;  %v1785_v7 = vshrl.u32 %v4403_v55, 16  ;;  %v1794_v22 = vrot.slane %v1792_v28, 1  ;;  %p3291_p8 = scmp.ne.s32.totalorder %s4641_s28, %s3290_s21  ;;  %s3392_s22 = smov [#allocation9]  }
 0x143   : > { %v1413_v0 = vpop.permute.xlu1 %1412  ;;  %s3294_s20 = sshll.u32 %s3392_s22, 4  ;;  %s3295_s20 = int_to_ptr.vmem [resolvable:$false] %s3294_s20 }
 0x144   : > { %1450 = vst.msk [vmem:[#allocation2 + $0x58] sm:$0xff] %vm1438_vm9, %v1413_v0  ;;  %v1397_v9 = vpop.permute.xlu0 %1396  ;;  %v1874_v8 = vor.u32 %v1873_v57, %v1869_v13  ;;  %v1789_v27 = vrot.slane %v1787_v11, 1  ;;  %p3292_p1 = pnand %p3291_p8, %p4718_p12  ;;  %s3296_s24 = scalar_lea.vmem %s3295_s20, 4096 }
 0x145   : > { %1442 = vst.msk [vmem:[#allocation2 + $0x18] sm:$0xff] %vm1438_vm9, %v1397_v9  ;;  %1305 = vrot.lane.b32.xlu1 %v1264_v2, %s3386_s11  ;;  %v1783_v2 = vsel %vm468_vm1, %v1778_v24, %v1782_v25  ;;  %p3297_p3 = scmp.lt.s32.totalorder %s4641_s28, %s3295_s20  ;;  %p3298_p5 = scmp.lt.s32.totalorder %s3296_s24, %s3290_s21 }
 0x146   : > { %1289 = vrot.lane.b32.xlu0 %v1168_v4, %s3386_s11  ;;  %v1879_v30 = vsel %vm468_vm1, %v1874_v8, %v1878_v17  ;;  %v1790_v6 = vor.u32 %v1789_v27, %v1785_v7  ;;  %v1891_v4 = vsel %vm468_vm1, %v1886_v31, %v1890_v32  ;;  %p3293_p10 = pneg %p3292_p1 }
 0x147   : > { %v1608_v37 = vpop.permute.xlu1 %1607  ;;  %p3299_p9 = por %p3298_p5, %p3297_p3 }
 0x148   : > { %1646 = vst.msk [vmem:[#allocation2 + $0x50] sm:$0xff] %vm1635_vm10, %v1608_v37  ;;  %v1592_v43 = vpop.permute.xlu0 %1591  ;;  %v1795_v34 = vsel %vm468_vm1, %v1790_v6, %v1794_v22  ;;  %v1976_v37 = vrot.slane %v4406_v26, 1 }
 0x149   : > { %1638 = vst.msk [vmem:[#allocation2 + $0x10] sm:$0xff] %vm1635_vm10, %v1592_v43  ;;  %1307 = vrot.lane.b32.xlu1 %v1276_v21, %s3386_s11  ;;  %v2002_v43 = vrot.slane %v4395_v3, 1  ;;  %p3300_p2 = pnand %p3299_p9, %p3293_p10 }
 0x14a   : > { %1291 = vrot.lane.b32.xlu0 %v1180_v39, %s3386_s11  ;;  %v1977_v47 = vsel %vm726_vm0, %v1975_v35, %v1976_v37 }
 0x14b   : > { %v1610_v38 = vpop.permute.xlu1 %1609 }
 0x14c   : > { %1647 = vst.msk [vmem:[#allocation2 + $0x58] sm:$0xff] %vm1635_vm10, %v1610_v38  ;;  %v1594_v52 = vpop.permute.xlu0 %1593  ;;  %v1979_v38 = vrot.slane %v4422_v12, 1 }
 0x14d   : > { %1639 = vst.msk [vmem:[#allocation2 + $0x18] sm:$0xff] %vm1635_vm10, %v1594_v52  ;;  %1418 = vrot.lane.b32.xlu1 %v1386_v45, %s3387_s18  ;;  %v2003_v45 = vrot.slane %v4417_v53, 1 }
 0x14e   : > { %1402 = vrot.lane.b32.xlu0 %v1362_v15, %s3387_s18 }
 0x14f   : > { %v1913_v5 = vpop.permute.xlu1 %1912  ;;  %v2004_v1 = vsel %vm726_vm0, %v2002_v43, %v2003_v45 }
 0x150   : > { %1951 = vst.msk [vmem:[#allocation2 + $0x50] sm:$0xff] %vm1940_vm11, %v1913_v5  ;;  %v1897_v49 = vpop.permute.xlu0 %1896 }
 0x151   : > { %1943 = vst.msk [vmem:[#allocation2 + $0x10] sm:$0xff] %vm1940_vm11, %v1897_v49  ;;  %1420 = vrot.lane.b32.xlu1 %v1389_v61, %s3387_s18 }
 0x152   : > { %1404 = vrot.lane.b32.xlu0 %v1365_v48, %s3387_s18 }
 0x153   : > { %v1915_v63 = vpop.permute.xlu1 %1914 }
 0x154   : > { %1952 = vst.msk [vmem:[#allocation2 + $0x58] sm:$0xff] %vm1940_vm11, %v1915_v63  ;;  %v1899_v54 = vpop.permute.xlu0 %1898 }
 0x155   : > { %1944 = vst.msk [vmem:[#allocation2 + $0x18] sm:$0xff] %vm1940_vm11, %v1899_v54  ;;  %1615 = vrot.lane.b32.xlu1 %v4381_v50, %s3388_s5  ;;  %v1978_v50 = vrot.slane %v4403_v55, 1 }
 0x156   : > { %1599 = vrot.lane.b32.xlu0 %v4387_v44, %s3388_s5 }
 0x157   : > { %v2026_v23 = vpop.permute.xlu1 %2025  ;;  %v1980_v52 = vsel %vm726_vm0, %v1978_v50, %v1979_v38 }
 0x158   : > { %2064 = vst.msk [vmem:[#allocation2 + $0x50] sm:$0xff] %vm2053_vm12, %v2026_v23  ;;  %v2010_v29 = vpop.permute.xlu0 %2009 }
 0x159   : > { %2056 = vst.msk [vmem:[#allocation2 + $0x10] sm:$0xff] %vm2053_vm12, %v2010_v29  ;;  %1617 = vrot.lane.b32.xlu1 %v4395_v3, %s3388_s5 }
 0x15a   : > { %1601 = vrot.lane.b32.xlu0 %v4403_v55, %s3388_s5 }
 0x15b   : > { %v686_v60 = vpop.permute.xlu1 %685 }
 0x15c   : > { %722 = vst.msk [vmem:[#allocation2 + $0x60] sm:$0xff] %vm709_vm5, %v686_v60  ;;  %v670_v0 = vpop.permute.xlu0 %669 }
 0x15d   : > { %714 = vst.msk [vmem:[#allocation2 + $0x20] sm:$0xff] %vm709_vm5, %v670_v0  ;;  %1920 = vrot.lane.b32.xlu1 %v1879_v30, %s3389_s26 }
 0x15e   : > { %1904 = vrot.lane.b32.xlu0 %v1783_v2, %s3389_s26 }
 0x15f   : > { %v2028_v9 = vpop.permute.xlu1 %2027  ;;  %v2080_v21 = vld [vmem:[#allocation2 + $0x50] sm:$0xff] }
 0x160   : > { %2065 = vst.msk [vmem:[#allocation2 + $0x58] sm:$0xff] %vm2053_vm12, %v2028_v9  ;;  %v2012_v39 = vpop.permute.xlu0 %2011  ;;  %v2072_v41 = vld [vmem:[#allocation2 + $0x10] sm:$0xff]  ;;  %2991 = vmatprep.mubr.msk.bf16.mxu1 %vm2108_vm13, %v2080_v21 }
 0x161   : > { %2057 = vst.msk [vmem:[#allocation2 + $0x18] sm:$0xff] %vm2053_vm12, %v2012_v39  ;;  %2975 = vmatprep.mubr.msk.bf16.mxu0 %vm2108_vm13, %v2072_v41  ;;  %1922 = vrot.lane.b32.xlu1 %v1891_v4, %s3389_s26 }
 0x162   : > { %1906 = vrot.lane.b32.xlu0 %v1795_v34, %s3389_s26 }
 0x163   : > { %v688_v46 = vpop.permute.xlu1 %687 }
 0x164   : > { %723 = vst.msk [vmem:[#allocation2 + $0x68] sm:$0xff] %vm709_vm5, %v688_v46  ;;  %v672_v15 = vpop.permute.xlu0 %671 }
 0x165   : > { %715 = vst.msk [vmem:[#allocation2 + $0x28] sm:$0xff] %vm709_vm5, %v672_v15  ;;  %2033 = vrot.lane.b32.xlu1 %v2001_v42, %s3390_s10 }
 0x166   : > { %2017 = vrot.lane.b32.xlu0 %v1977_v47, %s3390_s10 }
 0x167   : > { %v800_v18 = vpop.permute.xlu1 %799  ;;  %v2081_v44 = vld [vmem:[#allocation2 + $0x58] sm:$0xff] }
 0x168   : > { %836 = vst.msk [vmem:[#allocation2 + $0x60] sm:$0xff] %vm823_vm6, %v800_v18  ;;  %v784_v61 = vpop.permute.xlu0 %783  ;;  %v2073_v3 = vld [vmem:[#allocation2 + $0x18] sm:$0xff]  ;;  %2992 = vmatmul.mubr.msk.bf16.gmra.mrb[4].mxu1 %vm2108_vm13, %v2081_v44 }
 0x169   : > { %828 = vst.msk [vmem:[#allocation2 + $0x20] sm:$0xff] %vm823_vm6, %v784_v61  ;;  %2976 = vmatmul.mubr.msk.bf16.gmra.mrb[4].mxu0 %vm2108_vm13, %v2073_v3  ;;  %2035 = vrot.lane.b32.xlu1 %v2004_v1, %s3390_s10 }
 0x16a   : > { %2019 = vrot.lane.b32.xlu0 %v1980_v52, %s3390_s10 }
 0x16b   : > { %v802_v36 = vpop.permute.xlu1 %801 }
 0x16c   : > { %837 = vst.msk [vmem:[#allocation2 + $0x68] sm:$0xff] %vm823_vm6, %v802_v36  ;;  %v786_v40 = vpop.permute.xlu0 %785 }
 0x16d   : > { %829 = vst.msk [vmem:[#allocation2 + $0x28] sm:$0xff] %vm823_vm6, %v786_v40 }
 0x16f   : > { %v997_v5 = vpop.permute.xlu1 %996 }
 0x170   : > { %1033 = vst.msk [vmem:[#allocation2 + $0x60] sm:$0xff] %vm1020_vm7, %v997_v5  ;;  %v981_v48 = vpop.permute.xlu0 %980  ;;  %v4543_v5 = vld [vmem:[#allocation8] ss:$0 sm:$0xff] }
 0x171   : > { %1025 = vst.msk [vmem:[#allocation2 + $0x20] sm:$0xff] %vm1020_vm7, %v981_v48 }
 0x173   : > { %v999_v55 = vpop.permute.xlu1 %998 }
 0x174   : > { %1034 = vst.msk [vmem:[#allocation2 + $0x68] sm:$0xff] %vm1020_vm7, %v999_v55  ;;  %v983_v26 = vpop.permute.xlu0 %982 }
 0x175   : > { %1026 = vst.msk [vmem:[#allocation2 + $0x28] sm:$0xff] %vm1020_vm7, %v983_v26 }
 0x177   : > { %v1302_v56 = vpop.permute.xlu1 %1301 }
 0x178   : > { %1338 = vst.msk [vmem:[#allocation2 + $0x60] sm:$0xff] %vm1325_vm8, %v1302_v56  ;;  %v1286_v49 = vpop.permute.xlu0 %1285 }
 0x179   : > { %1330 = vst.msk [vmem:[#allocation2 + $0x20] sm:$0xff] %vm1325_vm8, %v1286_v49 }
 0x17b   : > { %v1304_v13 = vpop.permute.xlu1 %1303 }
 0x17c   : > { %1339 = vst.msk [vmem:[#allocation2 + $0x68] sm:$0xff] %vm1325_vm8, %v1304_v13  ;;  %v1288_v51 = vpop.permute.xlu0 %1287 }
 0x17d   : > { %1331 = vst.msk [vmem:[#allocation2 + $0x28] sm:$0xff] %vm1325_vm8, %v1288_v51 }
 0x17f   : > { %v1415_v57 = vpop.permute.xlu1 %1414 }
 0x180   : > { %1451 = vst.msk [vmem:[#allocation2 + $0x60] sm:$0xff] %vm1438_vm9, %v1415_v57  ;;  %v1399_v14 = vpop.permute.xlu0 %1398 }
 0x181   : > { %1443 = vst.msk [vmem:[#allocation2 + $0x20] sm:$0xff] %vm1438_vm9, %v1399_v14 }
 0x183   : > { %v1417_v53 = vpop.permute.xlu1 %1416 }
 0x184   : > { %1452 = vst.msk [vmem:[#allocation2 + $0x68] sm:$0xff] %vm1438_vm9, %v1417_v53  ;;  %v1401_v62 = vpop.permute.xlu0 %1400 }
 0x185   : > { %1444 = vst.msk [vmem:[#allocation2 + $0x28] sm:$0xff] %vm1438_vm9, %v1401_v62 }
 0x187   : > { %v1612_v63 = vpop.permute.xlu1 %1611 }
 0x188   : > { %1648 = vst.msk [vmem:[#allocation2 + $0x60] sm:$0xff] %vm1635_vm10, %v1612_v63  ;;  %v1596_v58 = vpop.permute.xlu0 %1595 }
 0x189   : > { %1640 = vst.msk [vmem:[#allocation2 + $0x20] sm:$0xff] %vm1635_vm10, %v1596_v58 }
 0x18b   : > { %v1614_v10 = vpop.permute.xlu1 %1613 }
 0x18c   : > { %1649 = vst.msk [vmem:[#allocation2 + $0x68] sm:$0xff] %vm1635_vm10, %v1614_v10  ;;  %v1598_v12 = vpop.permute.xlu0 %1597 }
 0x18d   : > { %1641 = vst.msk [vmem:[#allocation2 + $0x28] sm:$0xff] %vm1635_vm10, %v1598_v12 }
 0x18f   : > { %v1917_v11 = vpop.permute.xlu1 %1916 }
 0x190   : > { %1953 = vst.msk [vmem:[#allocation2 + $0x60] sm:$0xff] %vm1940_vm11, %v1917_v11  ;;  %v1901_v54 = vpop.permute.xlu0 %1900 }
 0x191   : > { %1945 = vst.msk [vmem:[#allocation2 + $0x20] sm:$0xff] %vm1940_vm11, %v1901_v54 }
 0x193   : > { %v1919_v59 = vpop.permute.xlu1 %1918 }
 0x194   : > { %1954 = vst.msk [vmem:[#allocation2 + $0x68] sm:$0xff] %vm1940_vm11, %v1919_v59  ;;  %v1903_v7 = vpop.permute.xlu0 %1902 }
 0x195   : > { %1946 = vst.msk [vmem:[#allocation2 + $0x28] sm:$0xff] %vm1940_vm11, %v1903_v7 }
 0x197   : > { %v2030_v8 = vpop.permute.xlu1 %2029 }
 0x198   : > { %2066 = vst.msk [vmem:[#allocation2 + $0x60] sm:$0xff] %vm2053_vm12, %v2030_v8  ;;  %v2014_v17 = vpop.permute.xlu0 %2013 }
 0x199   : > { %2058 = vst.msk [vmem:[#allocation2 + $0x20] sm:$0xff] %vm2053_vm12, %v2014_v17 }
 0x19b   : > { %v690_v19 = vpop.permute.xlu1 %689 }
 0x19c   : > { %724 = vst.msk [vmem:[#allocation2 + $0x70] sm:$0xff] %vm709_vm5, %v690_v19  ;;  %v674_v20 = vpop.permute.xlu0 %673 }
 0x19d   : > { %716 = vst.msk [vmem:[#allocation2 + $0x30] sm:$0xff] %vm709_vm5, %v674_v20 }
 0x19f   : > { %v2032_v23 = vpop.permute.xlu1 %2031  ;;  %v2082_v24 = vld [vmem:[#allocation2 + $0x60] sm:$0xff] }
 0x1a0   : > { %2067 = vst.msk [vmem:[#allocation2 + $0x68] sm:$0xff] %vm2053_vm12, %v2032_v23  ;;  %v2016_v25 = vpop.permute.xlu0 %2015  ;;  %v2074_v27 = vld [vmem:[#allocation2 + $0x20] sm:$0xff]  ;;  %2995 = vmatprep.mubr.msk.bf16.mxu1 %vm2108_vm13, %v2082_v24 }
 0x1a1   : > { %2059 = vst.msk [vmem:[#allocation2 + $0x28] sm:$0xff] %vm2053_vm12, %v2016_v25  ;;  %2979 = vmatprep.mubr.msk.bf16.mxu0 %vm2108_vm13, %v2074_v27 }
 0x1a3   : > { %v692_v28 = vpop.permute.xlu1 %691 }
 0x1a4   : > { %725 = vst.msk [vmem:[#allocation2 + $0x78] sm:$0xff] %vm709_vm5, %v692_v28  ;;  %v676_v29 = vpop.permute.xlu0 %675 }
 0x1a5   : > { %717 = vst.msk [vmem:[#allocation2 + $0x38] sm:$0xff] %vm709_vm5, %v676_v29 }
 0x1a7   : > { %v804_v30 = vpop.permute.xlu1 %803  ;;  %v2083_v31 = vld [vmem:[#allocation2 + $0x68] sm:$0xff] }
 0x1a8   : > { %838 = vst.msk [vmem:[#allocation2 + $0x70] sm:$0xff] %vm823_vm6, %v804_v30  ;;  %v788_v32 = vpop.permute.xlu0 %787  ;;  %v2075_v60 = vld [vmem:[#allocation2 + $0x28] sm:$0xff]  ;;  %2996 = vmatmul.mubr.msk.bf16.gmra.mrb[8].mxu1 %vm2108_vm13, %v2083_v31 }
 0x1a9   : > { %830 = vst.msk [vmem:[#allocation2 + $0x30] sm:$0xff] %vm823_vm6, %v788_v32  ;;  %2980 = vmatmul.mubr.msk.bf16.gmra.mrb[8].mxu0 %vm2108_vm13, %v2075_v60 }
 0x1ab   : > { %v806_v2 = vpop.permute.xlu1 %805 }
 0x1ac   : > { %839 = vst.msk [vmem:[#allocation2 + $0x78] sm:$0xff] %vm823_vm6, %v806_v2  ;;  %v790_v6 = vpop.permute.xlu0 %789 }
 0x1ad   : > { %831 = vst.msk [vmem:[#allocation2 + $0x38] sm:$0xff] %vm823_vm6, %v790_v6 }
 0x1af   : > { %v1001_v22 = vpop.permute.xlu1 %1000 }
 0x1b0   : > { %1035 = vst.msk [vmem:[#allocation2 + $0x70] sm:$0xff] %vm1020_vm7, %v1001_v22  ;;  %v985_v0 = vpop.permute.xlu0 %984 }
 0x1b1   : > { %1027 = vst.msk [vmem:[#allocation2 + $0x30] sm:$0xff] %vm1020_vm7, %v985_v0 }
 0x1b3   : > { %v1003_v4 = vpop.permute.xlu1 %1002 }
 0x1b4   : > { %1036 = vst.msk [vmem:[#allocation2 + $0x78] sm:$0xff] %vm1020_vm7, %v1003_v4  ;;  %v987_v33 = vpop.permute.xlu0 %986 }
 0x1b5   : > { %1028 = vst.msk [vmem:[#allocation2 + $0x38] sm:$0xff] %vm1020_vm7, %v987_v33 }
 0x1b7   : > { %v1306_v16 = vpop.permute.xlu1 %1305 }
 0x1b8   : > { %1340 = vst.msk [vmem:[#allocation2 + $0x70] sm:$0xff] %vm1325_vm8, %v1306_v16  ;;  %v1290_v9 = vpop.permute.xlu0 %1289 }
 0x1b9   : > { %1332 = vst.msk [vmem:[#allocation2 + $0x30] sm:$0xff] %vm1325_vm8, %v1290_v9 }
 0x1bb   : > { %v1308_v21 = vpop.permute.xlu1 %1307 }
 0x1bc   : > { %1341 = vst.msk [vmem:[#allocation2 + $0x78] sm:$0xff] %vm1325_vm8, %v1308_v21  ;;  %v1292_v34 = vpop.permute.xlu0 %1291 }
 0x1bd   : > { %1333 = vst.msk [vmem:[#allocation2 + $0x38] sm:$0xff] %vm1325_vm8, %v1292_v34 }
 0x1bf   : > { %v1419_v35 = vpop.permute.xlu1 %1418 }
 0x1c0   : > { %1453 = vst.msk [vmem:[#allocation2 + $0x70] sm:$0xff] %vm1438_vm9, %v1419_v35  ;;  %v1403_v37 = vpop.permute.xlu0 %1402 }
 0x1c1   : > { %1445 = vst.msk [vmem:[#allocation2 + $0x30] sm:$0xff] %vm1438_vm9, %v1403_v37 }
 0x1c3   : > { %v1421_v39 = vpop.permute.xlu1 %1420 }
 0x1c4   : > { %1454 = vst.msk [vmem:[#allocation2 + $0x78] sm:$0xff] %vm1438_vm9, %v1421_v39  ;;  %v1405_v41 = vpop.permute.xlu0 %1404 }
 0x1c5   : > { %1446 = vst.msk [vmem:[#allocation2 + $0x38] sm:$0xff] %vm1438_vm9, %v1405_v41 }
 0x1c7   : > { %v1616_v42 = vpop.permute.xlu1 %1615 }
 0x1c8   : > { %1650 = vst.msk [vmem:[#allocation2 + $0x70] sm:$0xff] %vm1635_vm10, %v1616_v42  ;;  %v1600_v43 = vpop.permute.xlu0 %1599 }
 0x1c9   : > { %1642 = vst.msk [vmem:[#allocation2 + $0x30] sm:$0xff] %vm1635_vm10, %v1600_v43 }
 0x1cb   : > { %v1618_v45 = vpop.permute.xlu1 %1617 }
 0x1cc   : > { %1651 = vst.msk [vmem:[#allocation2 + $0x78] sm:$0xff] %vm1635_vm10, %v1618_v45  ;;  %v1602_v46 = vpop.permute.xlu0 %1601 }
 0x1cd   : > { %1643 = vst.msk [vmem:[#allocation2 + $0x38] sm:$0xff] %vm1635_vm10, %v1602_v46 }
 0x1cf   : > { %v1921_v47 = vpop.permute.xlu1 %1920 }
 0x1d0   : > { %1955 = vst.msk [vmem:[#allocation2 + $0x70] sm:$0xff] %vm1940_vm11, %v1921_v47  ;;  %v1905_v50 = vpop.permute.xlu0 %1904 }
 0x1d1   : > { %1947 = vst.msk [vmem:[#allocation2 + $0x30] sm:$0xff] %vm1940_vm11, %v1905_v50 }
 0x1d3   : > { %v1923_v38 = vpop.permute.xlu1 %1922 }
 0x1d4   : > { %1956 = vst.msk [vmem:[#allocation2 + $0x78] sm:$0xff] %vm1940_vm11, %v1923_v38  ;;  %v1907_v15 = vpop.permute.xlu0 %1906 }
 0x1d5   : > { %1948 = vst.msk [vmem:[#allocation2 + $0x38] sm:$0xff] %vm1940_vm11, %v1907_v15 }
 0x1d7   : > { %v2034_v1 = vpop.permute.xlu1 %2033 }
 0x1d8   : > { %2068 = vst.msk [vmem:[#allocation2 + $0x70] sm:$0xff] %vm2053_vm12, %v2034_v1  ;;  %v2018_v18 = vpop.permute.xlu0 %2017 }
 0x1d9   : > { %2060 = vst.msk [vmem:[#allocation2 + $0x30] sm:$0xff] %vm2053_vm12, %v2018_v18 }
 0x1db   : > { %v2036_v44 = vpop.permute.xlu1 %2035 }
 0x1dc   : > { %2069 = vst.msk [vmem:[#allocation2 + $0x78] sm:$0xff] %vm2053_vm12, %v2036_v44  ;;  %v2020_v52 = vpop.permute.xlu0 %2019 }
 0x1dd   : > { %2061 = vst.msk [vmem:[#allocation2 + $0x38] sm:$0xff] %vm2053_vm12, %v2020_v52 }
 0x1df   : > { %v2084_v61 = vld [vmem:[#allocation2 + $0x70] sm:$0xff] }
 0x1e0   : > { %v2076_v3 = vld [vmem:[#allocation2 + $0x30] sm:$0xff]  ;;  %2999 = vmatprep.mubr.msk.bf16.mxu1 %vm2108_vm13, %v2084_v61 }
 0x1e1   : > { %2983 = vmatprep.mubr.msk.bf16.mxu0 %vm2108_vm13, %v2076_v3 }
 0x1e3   : > { %v2085_v36 = vld [vmem:[#allocation2 + $0x78] sm:$0xff] }
 0x1e4   : > { %v2077_v40 = vld [vmem:[#allocation2 + $0x38] sm:$0xff]  ;;  %3000 = vmatmul.mubr.msk.bf16.gmra.mrb[12].mxu1 %vm2108_vm13, %v2085_v36 }
 0x1e5   : > { %2984 = vmatmul.mubr.msk.bf16.gmra.mrb[12].mxu0 %vm2108_vm13, %v2077_v40 }
 0x1fb   : > { %v2989_v48 = vpop.f32.mrb[0].mxu1 }
 0x1fc   : > { %v2973_v55 = vpop.f32.mrb[0].mxu0  ;;  %v2271_v26 = vadd.f32 %v2989_v48, %v4543_v5  ;;  %v2262_v56 = vpop.f32.mrb[1].mxu1 }
 0x1fd   : > { %v2207_v49 = vadd.f32 %v2973_v55, %v4543_v5  ;;  %v2198_v13 = vpop.f32.mrb[1].mxu0  ;;  %v2263_v51 = vadd.f32 %v4543_v5, %v2262_v56  ;;  %v2990_v57 = vpop.f32.mrb[2].mxu1 }
 0x1fe   : > { %v2343_v14 = vmax.f32 %v2271_v26, 0.0  ;;  %v2199_v53 = vadd.f32 %v4543_v5, %v2198_v13  ;;  %v2974_v62 = vpop.f32.mrb[2].mxu0  ;;  %v2274_v63 = vadd.f32 %v2990_v57, %v4543_v5  ;;  %v2265_v58 = vpop.f32.mrb[3].mxu1 }
 0x1ff   : > { %v2327_v10 = vmax.f32 %v2207_v49, 0.0  ;;  %v2341_v12 = vmax.f32 %v2263_v51, 0.0  ;;  %v2210_v11 = vadd.f32 %v2974_v62, %v4543_v5  ;;  %v2201_v54 = vpop.f32.mrb[3].mxu0  ;;  %v2266_v59 = vadd.f32 %v4543_v5, %v2265_v58 }
 0x200   : > { %v2934_v7 = vpack.c.bf16 %v2343_v14, %v2343_v14  ;;  %v2325_v8 = vmax.f32 %v2199_v53, 0.0  ;;  %v2344_v17 = vmax.f32 %v2274_v63, 0.0  ;;  %v2202_v19 = vadd.f32 %v4543_v5, %v2201_v54 }
 0x201   : > { %v2918_v20 = vpack.c.bf16 %v2327_v10, %v2327_v10  ;;  %v2932_v23 = vpack.c.bf16 %v2341_v12, %v2341_v12  ;;  %v2328_v24 = vmax.f32 %v2210_v11, 0.0  ;;  %v2342_v25 = vmax.f32 %v2266_v59, 0.0 }
 0x202   : > { %2504 = vst.msk [vmem:[%s4554_s4 + $0x48] sm:$0xf] %vm2485_vm14, %v2934_v7  ;;  %v2916_v27 = vpack.c.bf16 %v2325_v8, %v2325_v8  ;;  %v2935_v28 = vpack.c.bf16 %v2344_v17, %v2344_v17  ;;  %v2326_v29 = vmax.f32 %v2202_v19, 0.0 }
 0x203   : > { %2488 = vst.msk [vmem:[%s4554_s4 + $0x8] sm:$0xf] %vm2485_vm14, %v2918_v20  ;;  %2502 = vst.msk [vmem:[%s4554_s4 + $0x40] sm:$0xf] %vm2485_vm14, %v2932_v23  ;;  %v2919_v30 = vpack.c.bf16 %v2328_v24, %v2328_v24  ;;  %v2933_v31 = vpack.c.bf16 %v2342_v25, %v2342_v25 }
 0x204   : > { %2486 = vst.msk [vmem:[%s4554_s4] sm:$0xf] %vm2485_vm14, %v2916_v27  ;;  %2505 = vst.msk [vmem:[%s4554_s4 + $0x4c] sm:$0xf] %vm2485_vm14, %v2935_v28  ;;  %v2917_v32 = vpack.c.bf16 %v2326_v29, %v2326_v29 }
 0x205   : > { %2489 = vst.msk [vmem:[%s4554_s4 + $0xc] sm:$0xf] %vm2485_vm14, %v2919_v30  ;;  %2503 = vst.msk [vmem:[%s4554_s4 + $0x44] sm:$0xf] %vm2485_vm14, %v2933_v31 }
 0x206   : > { %2487 = vst.msk [vmem:[%s4554_s4 + $0x4] sm:$0xf] %vm2485_vm14, %v2917_v32 }
 0x23b   : > { %v2993_v60 = vpop.f32.mrb[4].mxu1 }
 0x23c   : > { %v2977_v2 = vpop.f32.mrb[4].mxu0  ;;  %v2287_v6 = vadd.f32 %v2993_v60, %v4543_v5  ;;  %v2278_v22 = vpop.f32.mrb[5].mxu1 }
 0x23d   : > { %v2223_v0 = vadd.f32 %v2977_v2, %v4543_v5  ;;  %v2214_v4 = vpop.f32.mrb[5].mxu0  ;;  %v2279_v33 = vadd.f32 %v4543_v5, %v2278_v22  ;;  %v2994_v16 = vpop.f32.mrb[6].mxu1 }
 0x23e   : > { %v2347_v9 = vmax.f32 %v2287_v6, 0.0  ;;  %v2215_v21 = vadd.f32 %v4543_v5, %v2214_v4  ;;  %v2978_v34 = vpop.f32.mrb[6].mxu0  ;;  %v2290_v35 = vadd.f32 %v2994_v16, %v4543_v5  ;;  %v2281_v37 = vpop.f32.mrb[7].mxu1 }
 0x23f   : > { %v2331_v39 = vmax.f32 %v2223_v0, 0.0  ;;  %v2345_v41 = vmax.f32 %v2279_v33, 0.0  ;;  %v2226_v42 = vadd.f32 %v2978_v34, %v4543_v5  ;;  %v2217_v43 = vpop.f32.mrb[7].mxu0  ;;  %v2282_v45 = vadd.f32 %v4543_v5, %v2281_v37 }
 0x240   : > { %v2938_v46 = vpack.c.bf16 %v2347_v9, %v2347_v9  ;;  %v2329_v47 = vmax.f32 %v2215_v21, 0.0  ;;  %v2348_v50 = vmax.f32 %v2290_v35, 0.0  ;;  %v2218_v38 = vadd.f32 %v4543_v5, %v2217_v43 }
 0x241   : > { %v2922_v15 = vpack.c.bf16 %v2331_v39, %v2331_v39  ;;  %v2936_v1 = vpack.c.bf16 %v2345_v41, %v2345_v41  ;;  %v2332_v18 = vmax.f32 %v2226_v42, 0.0  ;;  %v2346_v44 = vmax.f32 %v2282_v45, 0.0 }
 0x242   : > { %2508 = vst.msk [vmem:[%s4554_s4 + $0x58] sm:$0xf] %vm2485_vm14, %v2938_v46  ;;  %v2920_v52 = vpack.c.bf16 %v2329_v47, %v2329_v47  ;;  %v2939_v61 = vpack.c.bf16 %v2348_v50, %v2348_v50  ;;  %v2330_v3 = vmax.f32 %v2218_v38, 0.0 }
 0x243   : > { %2492 = vst.msk [vmem:[%s4554_s4 + $0x18] sm:$0xf] %vm2485_vm14, %v2922_v15  ;;  %2506 = vst.msk [vmem:[%s4554_s4 + $0x50] sm:$0xf] %vm2485_vm14, %v2936_v1  ;;  %v2923_v36 = vpack.c.bf16 %v2332_v18, %v2332_v18  ;;  %v2937_v40 = vpack.c.bf16 %v2346_v44, %v2346_v44 }
 0x244   : > { %2490 = vst.msk [vmem:[%s4554_s4 + $0x10] sm:$0xf] %vm2485_vm14, %v2920_v52  ;;  %2509 = vst.msk [vmem:[%s4554_s4 + $0x5c] sm:$0xf] %vm2485_vm14, %v2939_v61  ;;  %v2921_v48 = vpack.c.bf16 %v2330_v3, %v2330_v3 }
 0x245   : > { %2493 = vst.msk [vmem:[%s4554_s4 + $0x1c] sm:$0xf] %vm2485_vm14, %v2923_v36  ;;  %2507 = vst.msk [vmem:[%s4554_s4 + $0x54] sm:$0xf] %vm2485_vm14, %v2937_v40 }
 0x246   : > { %2491 = vst.msk [vmem:[%s4554_s4 + $0x14] sm:$0xf] %vm2485_vm14, %v2921_v48 }
 0x27b   : > { %v2997_v55 = vpop.f32.mrb[8].mxu1 }
 0x27c   : > { %v2981_v26 = vpop.f32.mrb[8].mxu0  ;;  %v2303_v56 = vadd.f32 %v2997_v55, %v4543_v5  ;;  %v2294_v49 = vpop.f32.mrb[9].mxu1 }
 0x27d   : > { %v2239_v13 = vadd.f32 %v2981_v26, %v4543_v5  ;;  %v2230_v51 = vpop.f32.mrb[9].mxu0  ;;  %v2295_v57 = vadd.f32 %v4543_v5, %v2294_v49  ;;  %v2998_v14 = vpop.f32.mrb[10].mxu1 }
 0x27e   : > { %v2351_v53 = vmax.f32 %v2303_v56, 0.0  ;;  %v2231_v62 = vadd.f32 %v4543_v5, %v2230_v51  ;;  %v2982_v63 = vpop.f32.mrb[10].mxu0  ;;  %v2306_v58 = vadd.f32 %v2998_v14, %v4543_v5  ;;  %v2297_v10 = vpop.f32.mrb[11].mxu1 }
 0x27f   : > { %v2335_v12 = vmax.f32 %v2239_v13, 0.0  ;;  %v2349_v11 = vmax.f32 %v2295_v57, 0.0  ;;  %v2242_v54 = vadd.f32 %v2982_v63, %v4543_v5  ;;  %v2233_v59 = vpop.f32.mrb[11].mxu0  ;;  %v2298_v7 = vadd.f32 %v4543_v5, %v2297_v10 }
 0x280   : > { %v2942_v8 = vpack.c.bf16 %v2351_v53, %v2351_v53  ;;  %v2333_v17 = vmax.f32 %v2231_v62, 0.0  ;;  %v2352_v19 = vmax.f32 %v2306_v58, 0.0  ;;  %v2234_v20 = vadd.f32 %v4543_v5, %v2233_v59 }
 0x281   : > { %v2926_v23 = vpack.c.bf16 %v2335_v12, %v2335_v12  ;;  %v2940_v24 = vpack.c.bf16 %v2349_v11, %v2349_v11  ;;  %v2336_v25 = vmax.f32 %v2242_v54, 0.0  ;;  %v2350_v27 = vmax.f32 %v2298_v7, 0.0 }
 0x282   : > { %2512 = vst.msk [vmem:[%s4554_s4 + $0x68] sm:$0xf] %vm2485_vm14, %v2942_v8  ;;  %v2924_v28 = vpack.c.bf16 %v2333_v17, %v2333_v17  ;;  %v2943_v29 = vpack.c.bf16 %v2352_v19, %v2352_v19  ;;  %v2334_v30 = vmax.f32 %v2234_v20, 0.0 }
 0x283   : > { %2496 = vst.msk [vmem:[%s4554_s4 + $0x28] sm:$0xf] %vm2485_vm14, %v2926_v23  ;;  %2510 = vst.msk [vmem:[%s4554_s4 + $0x60] sm:$0xf] %vm2485_vm14, %v2940_v24  ;;  %v2927_v31 = vpack.c.bf16 %v2336_v25, %v2336_v25  ;;  %v2941_v32 = vpack.c.bf16 %v2350_v27, %v2350_v27 }
 0x284   : > { %2494 = vst.msk [vmem:[%s4554_s4 + $0x20] sm:$0xf] %vm2485_vm14, %v2924_v28  ;;  %2513 = vst.msk [vmem:[%s4554_s4 + $0x6c] sm:$0xf] %vm2485_vm14, %v2943_v29  ;;  %v2925_v60 = vpack.c.bf16 %v2334_v30, %v2334_v30 }
 0x285   : > { %2497 = vst.msk [vmem:[%s4554_s4 + $0x2c] sm:$0xf] %vm2485_vm14, %v2927_v31  ;;  %2511 = vst.msk [vmem:[%s4554_s4 + $0x64] sm:$0xf] %vm2485_vm14, %v2941_v32 }
 0x286   : > { %2495 = vst.msk [vmem:[%s4554_s4 + $0x24] sm:$0xf] %vm2485_vm14, %v2925_v60 }
 0x2b7   : > { %v3001_v2 = vpop.f32.mrb[12].mxu1 }
 0x2b8   : > { %v2985_v6 = vpop.f32.mrb[12].mxu0  ;;  %v2319_v22 = vadd.f32 %v3001_v2, %v4543_v5  ;;  %v2310_v0 = vpop.f32.mrb[13].mxu1 }
 0x2b9   : > { %v2255_v4 = vadd.f32 %v2985_v6, %v4543_v5  ;;  %v2246_v33 = vpop.f32.mrb[13].mxu0  ;;  %v2311_v16 = vadd.f32 %v4543_v5, %v2310_v0  ;;  %v3002_v9 = vpop.f32.mrb[14].mxu1 }
 0x2ba   : > { %v2355_v21 = vmax.f32 %v2319_v22, 0.0  ;;  %v2247_v34 = vadd.f32 %v4543_v5, %v2246_v33  ;;  %v2986_v35 = vpop.f32.mrb[14].mxu0  ;;  %v2322_v37 = vadd.f32 %v3002_v9, %v4543_v5  ;;  %v2313_v39 = vpop.f32.mrb[15].mxu1 }
 0x2bb   : > { %v2339_v41 = vmax.f32 %v2255_v4, 0.0  ;;  %v2353_v42 = vmax.f32 %v2311_v16, 0.0  ;;  %v2258_v43 = vadd.f32 %v2986_v35, %v4543_v5  ;;  %v2249_v45 = vpop.f32.mrb[15].mxu0  ;;  %v2314_v46 = vadd.f32 %v4543_v5, %v2313_v39 }
 0x2bc   : > { %v2946_v47 = vpack.c.bf16 %v2355_v21, %v2355_v21  ;;  %v2337_v50 = vmax.f32 %v2247_v34, 0.0  ;;  %v2356_v38 = vmax.f32 %v2322_v37, 0.0  ;;  %v2250_v15 = vadd.f32 %v4543_v5, %v2249_v45 }
 0x2bd   : > { %v2930_v1 = vpack.c.bf16 %v2339_v41, %v2339_v41  ;;  %v2944_v18 = vpack.c.bf16 %v2353_v42, %v2353_v42  ;;  %v2340_v44 = vmax.f32 %v2258_v43, 0.0  ;;  %v2354_v52 = vmax.f32 %v2314_v46, 0.0 }
 0x2be   : > { %2516 = vst.msk [vmem:[%s4554_s4 + $0x78] sm:$0xf] %vm2485_vm14, %v2946_v47  ;;  %v2928_v61 = vpack.c.bf16 %v2337_v50, %v2337_v50  ;;  %v2947_v3 = vpack.c.bf16 %v2356_v38, %v2356_v38  ;;  %v2338_v36 = vmax.f32 %v2250_v15, 0.0 }
 0x2bf   : > { %2500 = vst.msk [vmem:[%s4554_s4 + $0x38] sm:$0xf] %vm2485_vm14, %v2930_v1  ;;  %2514 = vst.msk [vmem:[%s4554_s4 + $0x70] sm:$0xf] %vm2485_vm14, %v2944_v18  ;;  %v2931_v5 = vpack.c.bf16 %v2340_v44, %v2340_v44  ;;  %v2945_v40 = vpack.c.bf16 %v2354_v52, %v2354_v52 }
 0x2c0   : > { %2498 = vst.msk [vmem:[%s4554_s4 + $0x30] sm:$0xf] %vm2485_vm14, %v2928_v61  ;;  %2517 = vst.msk [vmem:[%s4554_s4 + $0x7c] sm:$0xf] %vm2485_vm14, %v2947_v3  ;;  %v2929_v48 = vpack.c.bf16 %v2338_v36, %v2338_v36 }
 0x2c1   : > { %2501 = vst.msk [vmem:[%s4554_s4 + $0x3c] sm:$0xf] %vm2485_vm14, %v2931_v5  ;;  %2515 = vst.msk [vmem:[%s4554_s4 + $0x74] sm:$0xf] %vm2485_vm14, %v2945_v40 }
 0x2c2   : > { %2499 = vst.msk [vmem:[%s4554_s4 + $0x34] sm:$0xf] %vm2485_vm14, %v2929_v48 }
 0x2c3   : > { %3303 = shalt.err (!%p3300_p2)
}
 0x2c4   : > { %s3304_s11 = scalar_lea.hbm %s4639_s7, 2048  ;;  %s3308_s26 = scalar_lea.hbm %s4703_s3, 4096 }
 0x2c5   : > { %p3305_p0 = scmp.ne.s32.totalorder %s4639_s7, %s3304_s11  ;;  %p3309_p6 = scmp.lt.u32.totalorder %s4639_s7, %s4703_s3 }
 0x2c6   : > { %p3310_p7 = scmp.lt.u32.totalorder %s3308_s26, %s3304_s11  ;;  %p3312_p8 = scmp.lt.u32.totalorder %s3304_s11, %s4639_s7 }
 0x2c7   : > { %p3306_p4 = pnand %p3305_p0, %p4718_p12 }
 0x2c8   : > { %p3311_p11 = por %p3310_p7, %p3309_p6 }
 0x2c9   : > { %p3307_p13 = pneg %p3306_p4 }
 0x2ca   : > { %p3313_p1 = por %p3312_p8, %p3311_p11 }
 0x2cc   : > { %p3314_p10 = pnand %p3313_p1, %p3307_p13 }
 0x2ce   : > { %3317 = shalt.err (!%p3314_p10)
}
 0x2cf   : > { %s3393_s4 = smov 64   ;;  %s3394_s9 = smov 4  }
 0x2d0   : > { %3020 = dma.vmem_to_hbm [thread:$0]  (%p4718_p12), %s4641_s28, 2048, %s4639_s7, %s2519_s8, %s3393_s4, %s3393_s4, %s3394_s9  }
 0x2d1 PF: > { %s2551_s15 = sand.u32 1, %s3356_s12   ;;  %p4719_p3 = scmp.ne.s32.totalorder %s4711_s23, 0 }
 0x2d2   : > { %p4720_p5 = scmp.ge.s32.totalorder %s3376_s17, 2  ;;  %s2552_s29 = scalar_lea.sflag [#allocation5], %s2551_s15 }
 0x2d4   : > { %p3034_p9 = pnand %p4720_p5, %p4719_p3 }
 0x2d6   : > { %3351 = dma.done.wait (!%p3034_p9), %s2552_s29, 2048  }
 0x2d7   : > { %3353 = vsyncadd (!%p3034_p9), %s2552_s29, 4294965248  ;;  %s20_s17 = sadd.s32 1, %s3376_s17   ;;  %s4721_s12 = smov %s3360_s13 }
 0x2d8   : > { %p17_p2 = scmp.ge.s32.totalorder %s20_s17, 4   ;;  %s4722_s13 = smov %s3364_s14 }
 0x2d9   : > { %s4723_s14 = smov %s3564_s6  ;;  %s4724_s15 = smov %s3372_s16 }
 0x2da   : > { %s4725_s16 = smov %s4727_s25  ;;  %19 = sbr.rel (!%p17_p2) target bundleno = 7 (0x7), region = 90 }
 0x2e1   :  { %2557 = vsyncpa [#allocation4], 1 }
 0x2e2   :  { %2559 = vsyncpa [#allocation4 + $0x1], 1 }
 0x2e3   :  { %2560 = vsyncpa [#allocation7], 1 }
 0x2e4   :  { %2561 = vsyncpa [#allocation5], 1 }
 0x2e5   :  { %2563 = vsyncpa [#allocation5 + $0x1], 1 }

// kernel: _lambda_.8
= control target key start
LH: loop header
LB: loop body
LE: loop exit
PB: predicated region body
PF: predicated region fallthrough
CT: control target
= control target key end

     0   :  { %8 = vsyncpa [#allocation4], 0  ;;  %s5490_s0 = inlined_call_operand.hbm [shape: bf16[2,18,18,64], index: 0, kind: input, shape index: {}]   ;;  %s5491_s1 = inlined_call_operand.hbm [shape: bf16[1,576,64], index: 1, kind: input, shape index: {}]   ;;  %s5492_s2 = inlined_call_operand.hbm [shape: f32[1,64], index: 2, kind: input, shape index: {}]   ;;  %s5493_s3 = inlined_call_operand.hbm [shape: bf16[2,16,16,64], index: 3, kind: output, shape index: {}]  }
   0x1   :  { %10 = vsyncpa [#allocation4 + $0x1], 0 }
   0x2   :  { %11 = vsyncpa [#allocation7], 0 }
   0x3   :  { %12 = vsyncpa [#allocation5], 0 }
   0x4   :  { %14 = vsyncpa [#allocation5 + $0x1], 0  ;;  %s4227_s12 = smov 0   ;;  %s4229_s13 = smov 0  }
   0x5   :  { %s4231_s14 = smov 0   ;;  %s4233_s15 = smov 0  }
   0x6   :  { %s4235_s16 = smov 0   ;;  %s4237_s17 = smov 0  }
   0x7 LB: > { %s3173_s18 = sadd.s32 4294967295, %s4197_s17   ;;  %s3174_s19 = sadd.s32 4294967294, %s4197_s17   ;;  %s4197_s17 = sphi %s4237_s17, %s20_s17   ;;  %s4193_s16 = sphi %s4235_s16, %s5552_s16   ;;  %s4189_s15 = sphi %s4233_s15, %s5551_s15   ;;  %s4185_s14 = sphi %s4231_s14, %s5550_s14   ;;  %s4181_s13 = sphi %s4229_s13, %s5549_s13   ;;  %s4177_s12 = sphi %s4227_s12, %s5548_s12  }
   0x8   : > { %p59_p0 = scmp.ne.s32.totalorder %s4181_s13, %s4177_s12  ;;  %p4261_p1 = scmp.eq.s32.totalorder %s3173_s18, 0 }
   0x9   : > { %p4265_p2 = scmp.eq.s32.totalorder %s3173_s18, 1  ;;  %p145_p3 = scmp.eq.s32.totalorder %s3174_s19, 1 }
   0xa   : > { %s5501_s20 = scalar_select %p4261_p1, 1, 0 }
   0xb   : > { %p4271_p4 = por %p4261_p1, %p59_p0  ;;  %p3175_p5 = scmp.ge.s32.totalorder %s4197_s17, 1 }
   0xc   : > { %p4276_p6 = por %p145_p3, %p59_p0  ;;  %p152_p7 = scmp.lt.s32.totalorder %s4197_s17, 3 }
   0xd   : > { %s5503_s22 = scalar_select %p4271_p4, 1, 0 }
   0xe   : > { %s5504_s23 = scalar_select %p4276_p6, 1, 0 }
   0xf   : > { %p4281_p8 = pnand %p3175_p5, %p152_p7  ;;  %s4199_s25 = smov [#allocation6]  }
  0x10   : > { %s166_s26 = sshll.u32 %s4199_s25, 4  ;;  %s4200_s28 = smov [#allocation8]   ;;  %s4285_s26 = int_to_ptr.vmem [resolvable:$true] %s166_s26 }
  0x11   : > { %p3814_p9 = pneg %p4281_p8  ;;  %s182_s29 = sshll.u32 %s4200_s28, 4  ;;  %s4296_s29 = int_to_ptr.vmem [resolvable:$true] %s182_s29 }
  0x12   : > { %s4025_s5 = scalar_lea.hbm %s5491_s1, 4608 }
  0x13   : > { %p4292_p11 = pnand %p3814_p9, %p4261_p1  ;;  %p4026_p12 = scmp.ne.s32.totalorder %s5491_s1, %s4025_s5 }
  0x14   : > { %p4032_p5 = scmp.lt.u32.totalorder %s4025_s5, %s5491_s1 }
  0x15   : > { %p4027_p13 = pneg %p4292_p11 }
  0x17   : > { %p4028_p0 = pnand %p4027_p13, %p4026_p12 }
  0x19   : > { %p4029_p3 = pneg %p4028_p0 }
  0x1b   : > { %p4034_p7 = pnand %p4032_p5, %p4029_p3 }
  0x1d   : > { %4037 = shalt.err (!%p4034_p7)
}
  0x1e   : > { %s4038_s10 = scalar_lea.vmem %s4285_s26, 4608  ;;  %p4046_p1 = scmp.lt.s32.totalorder %s4285_s26, %s4285_s26 }
  0x1f   : > { %p4039_p9 = scmp.ne.s32.totalorder %s4285_s26, %s4038_s10  ;;  %p4047_p12 = scmp.lt.s32.totalorder %s4038_s10, %s4038_s10 }
  0x21   : > { %p4041_p10 = pnand %p4039_p9, %p4027_p13  ;;  %p4048_p0 = por %p4047_p12, %p4046_p1 }
  0x23   : > { %p4042_p6 = pneg %p4041_p10 }
  0x25   : > { %p4049_p4 = pnand %p4048_p0, %p4042_p6 }
  0x27   : > { %4052 = shalt.err (!%p4049_p4)
}
  0x28   : > { %s4201_s11 = smov 64   ;;  %s4202_s18 = smov 4  }
  0x29   : > { %3817 = dma.hbm_to_vmem [thread:$0]  (!%p4292_p11), %s5491_s1, 4608, %s4285_s26, [#allocation7], %s4201_s11, %s4201_s11, %s4202_s18  }
  0x2a   : > { %s4053_s4 = scalar_lea.hbm %s5492_s2, 16 }
  0x2b   : > { %p4054_p1 = scmp.ne.s32.totalorder %s5492_s2, %s4053_s4  ;;  %p4060_p10 = scmp.lt.u32.totalorder %s4053_s4, %s5492_s2 }
  0x2d   : > { %p4056_p4 = pnand %p4054_p1, %p4027_p13 }
  0x2f   : > { %p4057_p6 = pneg %p4056_p4 }
  0x31   : > { %p4062_p3 = pnand %p4060_p10, %p4057_p6 }
  0x33   : > { %4065 = shalt.err (!%p4062_p3)
}
  0x34   : > { %s4066_s26 = scalar_lea.vmem %s4296_s29, 16  ;;  %s4073_s9 = scalar_lea.vmem %s4296_s29, 32 }
  0x35   : > { %p4067_p5 = scmp.ne.s32.totalorder %s4296_s29, %s4066_s26  ;;  %p4074_p12 = scmp.lt.s32.totalorder %s4296_s29, %s4296_s29 }
  0x36   : > { %p4075_p0 = scmp.lt.s32.totalorder %s4073_s9, %s4066_s26 }
  0x37   : > { %p4069_p7 = pnand %p4067_p5, %p4027_p13 }
  0x38   : > { %p4076_p1 = por %p4075_p0, %p4074_p12 }
  0x39   : > { %p4070_p9 = pneg %p4069_p7 }
  0x3b   : > { %p4077_p4 = pnand %p4076_p1, %p4070_p9 }
  0x3d   : > { %4080 = shalt.err (!%p4077_p4)
}
  0x3e   : > { %3820 = dma.hbm_to_vmem [thread:$0]  (!%p4292_p11), %s5492_s2, 16, %s4296_s29, [#allocation7]  }
  0x3f   : > { %s39_s25 = sadd.s32 1, %s4193_s16  ;;  %s46_s28 = sadd.s32 1, %s4185_s14 }
  0x40   : > { %p41_p13 = scmp.ge.s32.totalorder %s39_s25, 2  ;;  %p53_p6 = scmp.ne.s32.totalorder %s4185_s14, %s4181_s13 }
  0x41   : > { %p54_p10 = scmp.eq.s32.totalorder %s4197_s17, 0  ;;  %p3831_p3 = scmp.lt.s32.totalorder %s4197_s17, 2 }
  0x42   : > { %s5554_s25 = smov (%p41_p13, %s39_s25), 0  ;;  %p4364_p7 = por %p4265_p2, %p53_p6 }
  0x43   : > { %p55_p5 = por %p54_p10, %p53_p6  ;;  %s43_s30 = ssub.s32 %s4193_s16, %s5554_s25 }
  0x44   : > { %s5507_s27 = scalar_select %p4364_p7, 1, 0 }
  0x45   : > { %s193_s4 = sand.u32 1, %s4185_s14   ;;  %p44_p9 = scmp.eq.s32.totalorder %s43_s30, 0 }
  0x46   : > { %s3799_s29 = smul.u32 216, %s193_s4  ;;  %p4371_p11 = pnand %p3831_p3, %p55_p5 }
  0x47   : > { %s4376_s6 = scalar_select %p44_p9, %s4185_s14, %s46_s28  }
  0x48   : > { %s3800_s7 = smul.u32 3456, %s4193_s16  ;;  %s197_s8 = scalar_lea.vmem [#allocation3], %s3799_s29 }
  0x49   : > { %s204_s26 = sshll.u32 %s197_s8, 4  ;;  %s4386_s19 = scalar_lea.sflag [#allocation4], %s193_s4  ;;  %s4384_s26 = int_to_ptr.vmem [resolvable:$true] %s204_s26 }
  0x4a   : > { %s4382_s10 = scalar_lea.hbm %s5490_s0, %s3800_s7  ;;  %p4083_p12 = pneg %p4371_p11 }
  0x4b   : > { %s4081_s30 = scalar_lea.hbm %s4382_s10, 3456  ;;  %s4086_s7 = scalar_lea.hbm %s5490_s0, 6912 }
  0x4c   : > { %p4082_p2 = scmp.ne.s32.totalorder %s4382_s10, %s4081_s30  ;;  %p4087_p4 = scmp.lt.u32.totalorder %s4382_s10, %s5490_s0 }
  0x4d   : > { %p4088_p13 = scmp.lt.u32.totalorder %s4086_s7, %s4081_s30  ;;  %p4090_p10 = scmp.lt.u32.totalorder %s4081_s30, %s4382_s10 }
  0x4e   : > { %p4084_p0 = pnand %p4083_p12, %p4082_p2 }
  0x4f   : > { %p4089_p6 = por %p4088_p13, %p4087_p4 }
  0x50   : > { %p4085_p1 = pneg %p4084_p0 }
  0x51   : > { %p4091_p3 = por %p4090_p10, %p4089_p6 }
  0x53   : > { %p4092_p5 = pnand %p4091_p3, %p4085_p1 }
  0x55   : > { %4095 = shalt.err (!%p4092_p5)
}
  0x56   : > { %s4096_s4 = scalar_lea.vmem %s4384_s26, 3456  ;;  %s4203_s9 = smov [#allocation3]  }
  0x57   : > { %p4097_p9 = scmp.ne.s32.totalorder %s4384_s26, %s4096_s4  ;;  %s4101_s28 = sshll.u32 %s4203_s9, 4  ;;  %s4102_s28 = int_to_ptr.vmem [resolvable:$false] %s4101_s28 }
  0x58   : > { %s4103_s29 = scalar_lea.vmem %s4102_s28, 6912  ;;  %p4104_p7 = scmp.lt.s32.totalorder %s4384_s26, %s4102_s28 }
  0x59   : > { %p4099_p2 = pnand %p4097_p9, %p4083_p12  ;;  %p4105_p4 = scmp.lt.s32.totalorder %s4103_s29, %s4096_s4 }
  0x5b   : > { %p4100_p0 = pneg %p4099_p2  ;;  %p4106_p13 = por %p4105_p4, %p4104_p7 }
  0x5d   : > { %p4107_p6 = pnand %p4106_p13, %p4100_p0 }
  0x5f   : > { %4110 = shalt.err (!%p4107_p6)
}
  0x60   : > { %3824 = dma.hbm_to_vmem [thread:$0]  (!%p4371_p11), %s4382_s10, 3456, %s4384_s26, %s4386_s19, %s4201_s11, %s4201_s11, %s4202_s18  }
  0x61   : > { %216 = sbr.rel (%p4281_p8) target bundleno = 636 (0x27c), region = 32 }
  0x68   : > { %s4420_s30 = sand.u32 1, %s4181_s13   ;;  %p5509_p7 = scmp.ne.s32.totalorder %s5503_s22, 0 }
  0x69   : > { %s3801_s7 = smul.u32 216, %s4420_s30  ;;  %s219_s8 = scalar_lea.sflag [#allocation4], %s4420_s30 }
  0x6b   : > { %s4424_s21 = scalar_lea.vmem [#allocation3], %s3801_s7 }
  0x6c   : > { %4164 = dma.done.wait (%p5509_p7), %s219_s8, 3456  }
  0x6d   : > { %4166 = vsyncadd (%p5509_p7), %s219_s8, 4294963840  ;;  %p5510_p11 = scmp.ne.s32.totalorder %s5501_s20, 0 }
  0x6f   : > { %4168 = dma.done.wait (%p5510_p11), [#allocation7], 4624  }
  0x70   : > { %4170 = vsyncadd (%p5510_p11), [#allocation7], 4294962672  ;;  %v4435_v0 = vld [vmem:[%s4424_s21 + $0x9c] sm:$0xff]   ;;  %vm468_vm0 = vsmask.f32 7424  ;;  %v4438_v1 = vld [vmem:[%s4424_s21 + $0xc] sm:$0xff]  }
  0x71   : > { %vm403_vm1 = vcmask 523264   ;;  %s4204_s24 = smov 64   ;;  %v1198_v3 = vshll.u32 %v4435_v0, 16  ;;  %v1052_v4 = vshrl.u32 %v4438_v1, 16  ;;  %v1054_v5 = vshll.u32 %v4438_v1, 16  ;;  %v4449_v6 = vld [vmem:[%s4424_s21 + $0x90] sm:$0xff]  }
  0x72   : > { %963 = vrot.lane.b32.xlu0 %v4435_v0, %s4204_s24  ;;  %939 = vrot.lane.b32.xlu1 %v4438_v1, %s4204_s24  ;;  %v4452_v7 = vld [vmem:[%s4424_s21] sm:$0xff]   ;;  %v4457_v9 = vld [vmem:[%s4424_s21 + $0x98] ss:$0 sps:$4 sm:$0x11]   ;;  %v614_v11 = vshrl.u32 %v4449_v6, 16  ;;  %v616_v12 = vshll.u32 %v4449_v6, 16 }
  0x73   : > { %v4454_v8 = vrot.slane %v1198_v3, 1  ;;  %v4459_v10 = vrot.slane %v1054_v5, 1  ;;  %v470_v13 = vshrl.u32 %v4452_v7, 16  ;;  %404 = vst.msk [vmem:[#allocation2] sm:$0xff] %vm403_vm1, %v4452_v7  ;;  %416 = vst.msk [vmem:[#allocation2 + $0x1e0] sm:$0xff] %vm403_vm1, %v4449_v6  ;;  %v621_v14 = vshll.u32 %v4457_v9, 16 }
  0x74   : > { %v472_v16 = vshll.u32 %v4452_v7, 16  ;;  %v4472_v17 = vld [vmem:[%s4424_s21 + $0xa8] sm:$0xff]   ;;  %v618_v18 = vrot.slane %v616_v12, 1  ;;  %v4484_v29 = vld [vmem:[%s4424_s21 + $0x9c] sm:$0xff]   ;;  %v4515_v47 = vld [vmem:[%s4424_s21 + $0xb4] sm:$0xff]   ;;  %vm726_vm2 = vcmask 1046528  }
  0x75   : > { %v4475_v19 = vld [vmem:[%s4424_s21 + $0x8] ss:$0 sps:$4 sm:$0x11]   ;;  %v623_v20 = vrot.slane %v621_v14, 1  ;;  %v1210_v23 = vshll.u32 %v4472_v17, 16  ;;  %v626_v33 = vshrl.u32 %v4484_v29, 16  ;;  %v1057_v54 = vor.u32 %v4459_v10, %v1052_v4 }
  0x76   : > { %v474_v21 = vrot.slane %v472_v16, 1  ;;  %v619_v24 = vor.u32 %v618_v18, %v614_v11  ;;  %v477_v25 = vshll.u32 %v4475_v19, 16  ;;  %v4488_v32 = vld [vmem:[%s4424_s21 + $0xa4] ss:$0 sps:$4 sm:$0x11]   ;;  %v628_v34 = vshll.u32 %v4484_v29, 16 }
  0x77   : > { %v4481_v28 = vrot.slane %v1210_v23, 1  ;;  %v4494_v35 = vld [vmem:[%s4424_s21 + $0x18] sm:$0xff]   ;;  %v4497_v36 = vld [vmem:[%s4424_s21 + $0xc] sm:$0xff]   ;;  %417 = vst.msk [vmem:[#allocation2 + $0x208] sm:$0xff] %vm403_vm1, %v4484_v29  ;;  %v633_v38 = vshll.u32 %v4488_v32, 16  ;;  %v1222_v55 = vshll.u32 %v4515_v47, 16 }
  0x78   : > { %v475_v27 = vor.u32 %v474_v21, %v470_v13  ;;  %v624_v30 = vsel %vm468_vm0, %v619_v24, %v623_v20  ;;  %v479_v31 = vrot.slane %v477_v25, 1  ;;  %v630_v40 = vrot.slane %v628_v34, 1  ;;  %v4508_v43 = vld [vmem:[%s4424_s21 + $0x14] ss:$0 sps:$4 sm:$0x11]   ;;  %405 = vst.msk [vmem:[#allocation2 + $0x28] sm:$0xff] %vm403_vm1, %v4497_v36 }
  0x79   : > { %685 = vrot.lane.b32.xlu0 %v624_v30, %s4204_s24  ;;  %v1064_v41 = vshrl.u32 %v4494_v35, 16  ;;  %v1066_v42 = vshll.u32 %v4494_v35, 16  ;;  %v635_v44 = vrot.slane %v633_v38, 1  ;;  %v482_v45 = vshrl.u32 %v4497_v36, 16  ;;  %v4524_v52 = vld [vmem:[%s4424_s21 + $0xa8] sm:$0xff]   ;;  %v4547_v11 = vld [vmem:[%s4424_s21 + $0x18] sm:$0xff]  }
  0x7a   : > { %v480_v37 = vsel %vm468_vm0, %v475_v27, %v479_v31  ;;  %v484_v46 = vshll.u32 %v4497_v36, 16  ;;  %v631_v48 = vor.u32 %v630_v40, %v626_v33  ;;  %v489_v50 = vshll.u32 %v4508_v43, 16  ;;  %v4529_v56 = vld [vmem:[%s4424_s21 + $0x24] sm:$0xff]   ;;  %418 = vst.msk [vmem:[#allocation2 + $0x230] sm:$0xff] %vm403_vm1, %v4524_v52  ;;  %406 = vst.msk [vmem:[#allocation2 + $0x50] sm:$0xff] %vm403_vm1, %v4547_v11  ;;  %v4570_v33 = vld [vmem:[%s4424_s21 + $0xb4] sm:$0xff]  }
  0x7b   : > { %661 = vrot.lane.b32.xlu1 %v480_v37, %s4204_s24  ;;  %v4519_v49 = vrot.slane %v1066_v42, 1  ;;  %v638_v59 = vshrl.u32 %v4524_v52, 16  ;;  %v4536_v61 = vrot.slane %v1222_v55, 1  ;;  %v4539_v62 = vld [vmem:[%s4424_s21 + $0xb0] ss:$0 sps:$4 sm:$0x11]  }
  0x7c   : > { %v486_v53 = vrot.slane %v484_v46, 1  ;;  %v636_v57 = vsel %vm468_vm0, %v631_v48, %v635_v44  ;;  %v491_v58 = vrot.slane %v489_v50, 1  ;;  %v640_v63 = vshll.u32 %v4524_v52, 16  ;;  %v4553_v18 = vld [vmem:[%s4424_s21 + $0xc0] sm:$0xff]   ;;  %v4576_v42 = vld [vmem:[%s4424_s21 + $0x30] sm:$0xff]   ;;  %419 = vst.msk [vmem:[#allocation2 + $0x258] sm:$0xff] %vm403_vm1, %v4570_v33 }
  0x7d   : > { %965 = vrot.lane.b32.xlu0 %v4472_v17, %s4204_s24  ;;  %v1076_v3 = vshrl.u32 %v4529_v56, 16  ;;  %v1078_v5 = vshll.u32 %v4529_v56, 16  ;;  %v645_v14 = vshll.u32 %v4539_v62, 16  ;;  %v494_v21 = vshrl.u32 %v4547_v11, 16  ;;  %v3919_v2 = vld [vmem:[%s4424_s21 + $0x24] sm:$0xff]   ;;  %v4700_v51 = vld [vmem:[%s4424_s21 + $0x54] sm:$0xff]  }
  0x7e   : > { %v487_v60 = vor.u32 %v486_v53, %v482_v45  ;;  %v642_v13 = vrot.slane %v640_v63, 1  ;;  %v4562_v25 = vld [vmem:[%s4424_s21 + $0x20] ss:$0 sps:$4 sm:$0x11]   ;;  %v496_v27 = vshll.u32 %v4547_v11, 16  ;;  %v1234_v31 = vshll.u32 %v4553_v18, 16 }
  0x7f   : > { %687 = vrot.lane.b32.xlu1 %v636_v57, %s4204_s24  ;;  %v4555_v20 = vrot.slane %v1078_v5, 1  ;;  %v647_v24 = vrot.slane %v645_v14, 1  ;;  %v501_v38 = vshll.u32 %v4562_v25, 16  ;;  %v650_v45 = vshrl.u32 %v4570_v33, 16  ;;  %1536 = vst.msk [vmem:[#allocation2 + $0x40] sm:$0xff] %vm403_vm1, %v3919_v2  ;;  %v4662_v5 = vld [vmem:[%s4424_s21 + $0x48] sm:$0xff]  }
  0x80   : > { %v492_v12 = vsel %vm468_vm0, %v487_v60, %v491_v58  ;;  %v643_v23 = vor.u32 %v642_v13, %v638_v59  ;;  %v498_v37 = vrot.slane %v496_v27, 1  ;;  %v4578_v44 = vrot.slane %v1234_v31, 1  ;;  %v4585_v50 = vld [vmem:[%s4424_s21 + $0xbc] ss:$0 sps:$4 sm:$0x11]   ;;  %v4593_v58 = vld [vmem:[%s4424_s21 + $0x24] sm:$0xff]  }
  0x81   : > { %941 = vrot.lane.b32.xlu0 %v4494_v35, %s4204_s24  ;;  %v503_v48 = vrot.slane %v501_v38, 1  ;;  %v652_v53 = vshll.u32 %v4570_v33, 16  ;;  %v1088_v55 = vshrl.u32 %v4576_v42, 16  ;;  %v1090_v57 = vshll.u32 %v4576_v42, 16  ;;  %407 = vst.msk [vmem:[#allocation2 + $0x78] sm:$0xff] %vm403_vm1, %v4593_v58  ;;  %v4744_v15 = vld [vmem:[%s4424_s21 + $0x54] sm:$0xff]  }
  0x82   : > { %v648_v34 = vsel %vm468_vm0, %v643_v23, %v647_v24  ;;  %5511 = vst [vmem:[#allocation13_spill] sm:$0xff] %v4578_v44  ;;  %v499_v46 = vor.u32 %v498_v37, %v494_v21  ;;  %v657_v63 = vshll.u32 %v4585_v50, 16  ;;  %v506_v14 = vshrl.u32 %v4593_v58, 16  ;;  %v4606_v24 = vld [vmem:[%s4424_s21 + $0x2c] ss:$0 sps:$4 sm:$0x11]  }
  0x83   : > { %663 = vrot.lane.b32.xlu1 %v492_v12, %s4204_s24  ;;  %v654_v60 = vrot.slane %v652_v53, 1  ;;  %v3913_v12 = vld [vmem:[%s4424_s21 + $0x18] sm:$0xff]   ;;  %v4599_v13 = vrot.slane %v1090_v57, 1  ;;  %v508_v27 = vshll.u32 %v4593_v58, 16  ;;  %v513_v38 = vshll.u32 %v4606_v24, 16  ;;  %411 = vst.msk [vmem:[#allocation2 + $0x118] sm:$0xff] %vm403_vm1, %v4744_v15 }
  0x84   : > { %v504_v59 = vsel %vm468_vm0, %v499_v46, %v503_v48  ;;  %v659_v23 = vrot.slane %v657_v63, 1  ;;  %v1600_v31 = vshrl.u32 %v3913_v12, 16  ;;  %1535 = vst.msk [vmem:[#allocation2 + $0x18] sm:$0xff] %vm403_vm1, %v3913_v12  ;;  %v1602_v48 = vshll.u32 %v3913_v12, 16  ;;  %s3183_s20 = sshll.u32 %s4420_s30, 7  ;;  %s3498_s11 = sshll.u32 %s4189_s15, 11 }
  0x85   : > { %967 = vrot.lane.b32.xlu0 %v4515_v47, %s4204_s24  ;;  %v655_v21 = vor.u32 %v654_v60, %v650_v45  ;;  %v510_v37 = vrot.slane %v508_v27, 1  ;;  %v3914_v45 = vld [vmem:[%s4424_s21 + $0x20] ss:$0 sps:$4 sm:$0x11]   ;;  %v1855_v53 = vrot.slane %v3913_v12, 1  ;;  %v1275_v57 = vrot.slane %v4438_v1, 1  ;;  %s5433_s10 = scalar_lea.hbm %s5493_s3, %s3498_s11 }
  0x86   : > { %v515_v63 = vrot.slane %v513_v38, 1  ;;  %v1607_v30 = vshll.u32 %v3914_v45, 16  ;;  %v1604_v27 = vrot.slane %v1602_v48, 1  ;;  %v4633_v48 = vld [vmem:[%s4424_s21 + $0x30] sm:$0xff]   ;;  %vm709_vm3 = vcmask 1048064   ;;  %s5312_s22 = scalar_lea.vmem [#allocation9], %s3183_s20 }
  0x87   : > { %689 = vrot.lane.b32.xlu1 %v648_v34, %s4204_s24  ;;  %v660_v34 = vsel %vm468_vm0, %v655_v21, %v659_v23  ;;  %v511_v60 = vor.u32 %v510_v37, %v506_v14  ;;  %v1856_v21 = vrot.slane %v3914_v45, 1  ;;  %v3915_v23 = vld [vmem:[%s4424_s21 + $0x14] ss:$0 sps:$4 sm:$0x11]   ;;  %408 = vst.msk [vmem:[#allocation2 + $0xa0] sm:$0xff] %vm403_vm1, %v4633_v48  ;;  %vm3001_vm4 = vcmask 519168  }
  0x88   : > { %v1609_v14 = vrot.slane %v1607_v30, 1  ;;  %v1059_v38 = vshll.u32 %v3915_v23, 16  ;;  %v1605_v46 = vor.u32 %v1604_v27, %v1600_v31  ;;  %v1276_v45 = vrot.slane %v3915_v23, 1  ;;  %v4638_v4 = vld [vmem:[%s4424_s21 + $0x38] ss:$0 sps:$4 sm:$0x11]  }
  0x89   : > { %943 = vrot.lane.b32.xlu0 %v4529_v56, %s4204_s24  ;;  %v1857_v37 = vsel %vm726_vm2, %v1855_v53, %v1856_v21  ;;  %v518_v31 = vshrl.u32 %v4633_v48, 16  ;;  %v3920_v21 = vld [vmem:[%s4424_s21 + $0x2c] ss:$0 sps:$4 sm:$0x11]   ;;  %v1614_v23 = vshll.u32 %v3919_v2, 16  ;;  %v1858_v27 = vrot.slane %v3919_v2, 1 }
  0x8a   : > { %1919 = vst.msk [vmem:[#allocation2 + $0x20] sm:$0xff] %vm403_vm1, %v1857_v37  ;;  %v1061_v1 = vrot.slane %v1059_v38, 1  ;;  %v1610_v10 = vsel %vm468_vm0, %v1605_v46, %v1609_v14  ;;  %v1277_v30 = vsel %vm726_vm2, %v1275_v57, %v1276_v45  ;;  %v1612_v57 = vshrl.u32 %v3919_v2, 16  ;;  %v3921_v46 = vld [vmem:[%s4424_s21 + $0x20] ss:$0 sps:$4 sm:$0x11]  }
  0x8b   : > { %665 = vrot.lane.b32.xlu1 %v504_v59, %s4204_s24  ;;  %v4618_v59 = vld [vmem:[%s4424_s21 + $0x3c] sm:$0xff]   ;;  %v1619_v38 = vshll.u32 %v3920_v21, 16  ;;  %v1859_v45 = vrot.slane %v3920_v21, 1  ;;  %v3925_v21 = vld [vmem:[%s4424_s21 + $0x30] sm:$0xff]   ;;  %s3052_s18 = sshll.u32 %s5312_s22, 4  ;;  %s3035_s19 = scalar_lea.sflag [#allocation5], %s4420_s30  ;;  %s5437_s18 = int_to_ptr.vmem [resolvable:$true] %s3052_s18 }
  0x8c   : > { %v1100_v12 = vshrl.u32 %v4618_v59, 16  ;;  %v1102_v22 = vshll.u32 %v4618_v59, 16  ;;  %1537 = vst.msk [vmem:[#allocation2 + $0x68] sm:$0xff] %vm403_vm1, %v3925_v21  ;;  %v3927_v16 = vld [vmem:[%s4424_s21 + $0x2c] ss:$0 sps:$4 sm:$0x11]  }
  0x8d   : > { %969 = vrot.lane.b32.xlu0 %v4553_v18, %s4204_s24  ;;  %v1621_v2 = vrot.slane %v1619_v38, 1  ;;  %s4111_s15 = scalar_lea.vmem %s5437_s18, 2048  ;;  %p5545_p12 = scmp.ne.s32.totalorder %s5507_s27, 0 }
  0x8e   : > { %v4642_v53 = vrot.slane %v1102_v22, 1  ;;  %v1062_v22 = vsel %vm468_vm0, %v1057_v54, %v1061_v1  ;;  %v1860_v1 = vsel %vm726_vm2, %v1858_v27, %v1859_v45  ;;  %v1114_v27 = vshll.u32 %v4662_v5, 16  ;;  %p4112_p8 = scmp.ne.s32.totalorder %s5437_s18, %s4111_s15  ;;  %s4205_s4 = smov [#allocation9]  }
  0x8f   : > { %691 = vrot.lane.b32.xlu1 %v660_v34, %s4204_s24  ;;  %v516_v34 = vsel %vm468_vm0, %v511_v60, %v515_v63  ;;  %v520_v60 = vshll.u32 %v4633_v48, 16  ;;  %v525_v63 = vshll.u32 %v4638_v4, 16  ;;  %1259 = vst.msk [vmem:[#allocation2 + $0x10] sm:$0xff] %vm403_vm1, %v1062_v22  ;;  %1920 = vst.msk [vmem:[#allocation2 + $0x48] sm:$0xff] %vm403_vm1, %v1860_v1  ;;  %s4115_s9 = sshll.u32 %s4205_s4, 4  ;;  %s4116_s9 = int_to_ptr.vmem [resolvable:$false] %s4115_s9 }
  0x90   : > { %p4113_p1 = pnand %p4112_p8, %p5545_p12  ;;  %s4117_s28 = scalar_lea.vmem %s4116_s9, 4096 }
  0x91   : > { %945 = vrot.lane.b32.xlu0 %v4576_v42, %s4204_s24  ;;  %v522_v14 = vrot.slane %v520_v60, 1  ;;  %v527_v37 = vrot.slane %v525_v63, 1  ;;  %v1279_v60 = vrot.slane %v3921_v46, 1  ;;  %v4666_v63 = vld [vmem:[%s4424_s21 + $0x3c] sm:$0xff]   ;;  %p4118_p3 = scmp.lt.s32.totalorder %s5437_s18, %s4116_s9  ;;  %p4119_p5 = scmp.lt.s32.totalorder %s4117_s28, %s4111_s15 }
  0x92   : > { %409 = vst.msk [vmem:[#allocation2 + $0xc8] sm:$0xff] %vm403_vm1, %v4666_v63  ;;  %p4114_p10 = pneg %p4113_p1 }
  0x93   : > { %667 = vrot.lane.b32.xlu1 %v516_v34, %s4204_s24  ;;  %v1278_v34 = vrot.slane %v4494_v35, 1  ;;  %v523_v54 = vor.u32 %v522_v14, %v518_v31  ;;  %v1112_v31 = vshrl.u32 %v4662_v5, 16  ;;  %v4676_v14 = vld [vmem:[%s4424_s21 + $0x44] ss:$0 sps:$4 sm:$0x11]   ;;  %p4120_p9 = por %p4119_p5, %p4118_p3 }
  0x95   : > { %1791 = vrot.lane.b32.xlu0 %v1610_v10, %s4204_s24  ;;  %v1616_v10 = vrot.slane %v1614_v23, 1  ;;  %v1069_v23 = vor.u32 %v4519_v49, %v1064_v41  ;;  %v528_v40 = vsel %vm468_vm0, %v523_v54, %v527_v37  ;;  %v1280_v35 = vsel %vm726_vm2, %v1278_v34, %v1279_v60  ;;  %v3926_v34 = vld [vmem:[%s4424_s21 + $0x38] ss:$0 sps:$4 sm:$0x11]   ;;  %p4121_p2 = pnand %p4120_p9, %p4114_p10 }
  0x96   : > { %v530_v41 = vshrl.u32 %v4666_v63, 16  ;;  %v4687_v49 = vrot.slane %v1114_v27, 1  ;;  %v532_v37 = vshll.u32 %v4666_v63, 16  ;;  %v1626_v54 = vshll.u32 %v3925_v21, 16 }
  0x97   : > { %1323 = vrot.lane.b32.xlu1 %v1277_v30, %s4204_s24  ;;  %v1617_v22 = vor.u32 %v1616_v10, %v1612_v57  ;;  %v1071_v30 = vshll.u32 %v3921_v46, 16  ;;  %v1281_v57 = vrot.slane %v4529_v56, 1  ;;  %v1624_v10 = vshrl.u32 %v3925_v21, 16  ;;  %v4712_v56 = vld [vmem:[%s4424_s21 + $0x48] sm:$0xff]  }
  0x98   : > { %v1628_v60 = vrot.slane %v1626_v54, 1  ;;  %v1631_v27 = vshll.u32 %v3926_v34, 16  ;;  %410 = vst.msk [vmem:[#allocation2 + $0xf0] sm:$0xff] %vm403_vm1, %v4712_v56  ;;  %v3937_v54 = vld [vmem:[%s4424_s21 + $0x48] sm:$0xff]  }
  0x99   : > { %947 = vrot.lane.b32.xlu0 %v4618_v59, %s4204_s24  ;;  %v1622_v46 = vsel %vm468_vm0, %v1617_v22, %v1621_v2  ;;  %v1073_v38 = vrot.slane %v1071_v30, 1  ;;  %v1861_v2 = vrot.slane %v3925_v21, 1  ;;  %v534_v22 = vrot.slane %v532_v37, 1  ;;  %1539 = vst.msk [vmem:[#allocation2 + $0xb8] sm:$0xff] %vm403_vm1, %v3937_v54 }
  0x9a   : > { %v1284_v21 = vrot.slane %v4576_v42, 1 }
  0x9b   : > { %669 = vrot.lane.b32.xlu1 %v528_v40, %s4204_s24  ;;  %v537_v40 = vshll.u32 %v4676_v14, 16  ;;  %v1074_v1 = vsel %vm468_vm0, %v1069_v23, %v1073_v38  ;;  %v535_v45 = vor.u32 %v534_v22, %v530_v41  ;;  %v1081_v23 = vor.u32 %v4555_v20, %v1076_v3 }
  0x9c   : > { %1260 = vst.msk [vmem:[#allocation2 + $0x38] sm:$0xff] %vm403_vm1, %v1074_v1  ;;  %v1629_v38 = vor.u32 %v1628_v60, %v1624_v10  ;;  %v1282_v41 = vrot.slane %v3927_v16, 1  ;;  %v1126_v1 = vshll.u32 %v4700_v51, 16  ;;  %v4717_v10 = vld [vmem:[%s4424_s21 + $0x50] ss:$0 sps:$4 sm:$0x11]  }
  0x9d   : > { %1793 = vrot.lane.b32.xlu0 %v1622_v46, %s4204_s24  ;;  %v539_v30 = vrot.slane %v537_v40, 1  ;;  %v1862_v46 = vrot.slane %v3926_v34, 1  ;;  %v1083_v40 = vshll.u32 %v3927_v16, 16  ;;  %v544_v22 = vshll.u32 %v4712_v56, 16 }
  0x9e   : > { %v4721_v16 = vrot.slane %v1126_v1, 1  ;;  %v549_v60 = vshll.u32 %v4717_v10, 16 }
  0x9f   : > { %1325 = vrot.lane.b32.xlu1 %v1280_v35, %s4204_s24  ;;  %v1633_v35 = vrot.slane %v1631_v27, 1  ;;  %v1863_v37 = vsel %vm726_vm2, %v1861_v2, %v1862_v46  ;;  %v540_v34 = vsel %vm468_vm0, %v535_v45, %v539_v30  ;;  %v1085_v20 = vrot.slane %v1083_v40, 1  ;;  %v3931_v30 = vld [vmem:[%s4424_s21 + $0x3c] sm:$0xff]   ;;  %v3932_v46 = vld [vmem:[%s4424_s21 + $0x44] ss:$0 sps:$4 sm:$0x11]  }
  0xa0   : > { %1921 = vst.msk [vmem:[#allocation2 + $0x70] sm:$0xff] %vm403_vm1, %v1863_v37  ;;  %v1283_v45 = vsel %vm726_vm2, %v1281_v57, %v1282_v41  ;;  %v542_v2 = vshrl.u32 %v4712_v56, 16  ;;  %v1636_v37 = vshrl.u32 %v3931_v30, 16  ;;  %v1638_v40 = vshll.u32 %v3931_v30, 16  ;;  %1538 = vst.msk [vmem:[#allocation2 + $0x90] sm:$0xff] %vm403_vm1, %v3931_v30 }
  0xa1   : > { %949 = vrot.lane.b32.xlu0 %v4662_v5, %s4204_s24  ;;  %v1634_v3 = vsel %vm468_vm0, %v1629_v38, %v1633_v35  ;;  %v4732_v38 = vld [vmem:[%s4424_s21 + $0x60] sm:$0xff]   ;;  %v1086_v57 = vsel %vm468_vm0, %v1081_v23, %v1085_v20  ;;  %v546_v35 = vrot.slane %v544_v22, 1  ;;  %v551_v41 = vrot.slane %v549_v60, 1  ;;  %v3933_v27 = vld [vmem:[%s4424_s21 + $0x38] ss:$0 sps:$4 sm:$0x11]  }
  0xa2   : > { %1261 = vst.msk [vmem:[#allocation2 + $0x60] sm:$0xff] %vm403_vm1, %v1086_v57  ;;  %v1643_v1 = vshll.u32 %v3932_v46, 16  ;;  %v1640_v20 = vrot.slane %v1638_v40, 1  ;;  %v1095_v26 = vshll.u32 %v3933_v27, 16  ;;  %v1285_v57 = vrot.slane %v3933_v27, 1 }
  0xa3   : > { %671 = vrot.lane.b32.xlu1 %v540_v34, %s4204_s24  ;;  %v1864_v34 = vrot.slane %v3931_v30, 1  ;;  %v547_v23 = vor.u32 %v546_v35, %v542_v2  ;;  %v1093_v2 = vor.u32 %v4599_v13, %v1088_v55  ;;  %v4755_v40 = vld [vmem:[%s4424_s21 + $0x5c] ss:$0 sps:$4 sm:$0x11]   ;;  %v554_v27 = vshrl.u32 %v4744_v15, 16 }
  0xa4   : > { %v1645_v39 = vrot.slane %v1643_v1, 1  ;;  %v1641_v60 = vor.u32 %v1640_v20, %v1636_v37  ;;  %v1097_v35 = vrot.slane %v1095_v26, 1  ;;  %v1648_v55 = vshrl.u32 %v3937_v54, 16 }
  0xa5   : > { %1795 = vrot.lane.b32.xlu0 %v1634_v3, %s4204_s24  ;;  %v1865_v3 = vrot.slane %v3932_v46, 1  ;;  %v1138_v46 = vshll.u32 %v4732_v38, 16  ;;  %v561_v13 = vshll.u32 %v4755_v40, 16  ;;  %v1867_v20 = vrot.slane %v3937_v54, 1 }
  0xa6   : > { %v1646_v37 = vsel %vm468_vm0, %v1641_v60, %v1645_v39  ;;  %v1098_v39 = vsel %vm468_vm0, %v1093_v2, %v1097_v35  ;;  %v1287_v60 = vrot.slane %v4618_v59, 1  ;;  %v1293_v22 = vrot.slane %v4700_v51, 1 }
  0xa7   : > { %1327 = vrot.lane.b32.xlu1 %v1283_v45, %s4204_s24  ;;  %v1866_v30 = vsel %vm726_vm2, %v1864_v34, %v1865_v3  ;;  %v552_v45 = vsel %vm468_vm0, %v547_v23, %v551_v41  ;;  %v556_v34 = vshll.u32 %v4744_v15, 16  ;;  %v1286_v41 = vsel %vm726_vm2, %v1284_v21, %v1285_v57  ;;  %v3938_v23 = vld [vmem:[%s4424_s21 + $0x50] ss:$0 sps:$4 sm:$0x11]   ;;  %1262 = vst.msk [vmem:[#allocation2 + $0x88] sm:$0xff] %vm403_vm1, %v1098_v39 }
  0xa8   : > { %1922 = vst.msk [vmem:[#allocation2 + $0x98] sm:$0xff] %vm403_vm1, %v1866_v30  ;;  %v4763_v42 = vrot.slane %v1138_v46, 1  ;;  %v1650_v3 = vshll.u32 %v3937_v54, 16  ;;  %v563_v30 = vrot.slane %v561_v13, 1  ;;  %v1655_v46 = vshll.u32 %v3938_v23, 16 }
  0xa9   : > { %951 = vrot.lane.b32.xlu0 %v4700_v51, %s4204_s24  ;;  %v558_v26 = vrot.slane %v556_v34, 1  ;;  %v1868_v34 = vrot.slane %v3938_v23, 1  ;;  %v1105_v23 = vor.u32 %v4642_v53, %v1100_v12 }
  0xaa   : > { %v1652_v57 = vrot.slane %v1650_v3, 1  ;;  %v3943_v3 = vld [vmem:[%s4424_s21 + $0x54] sm:$0xff]  }
  0xab   : > { %673 = vrot.lane.b32.xlu1 %v552_v45, %s4204_s24  ;;  %v559_v21 = vor.u32 %v558_v26, %v554_v27  ;;  %v3939_v45 = vld [vmem:[%s4424_s21 + $0x44] ss:$0 sps:$4 sm:$0x11]   ;;  %v4779_v27 = vld [vmem:[%s4424_s21 + $0x6c] sm:$0xff]   ;;  %v1657_v26 = vrot.slane %v1655_v46, 1  ;;  %v1869_v13 = vsel %vm726_vm2, %v1867_v20, %v1868_v34  ;;  %1540 = vst.msk [vmem:[#allocation2 + $0xe0] sm:$0xff] %vm403_vm1, %v3943_v3 }
  0xac   : > { %v1653_v2 = vor.u32 %v1652_v57, %v1648_v55  ;;  %v1107_v35 = vshll.u32 %v3939_v45, 16  ;;  %1923 = vst.msk [vmem:[#allocation2 + $0xc0] sm:$0xff] %vm403_vm1, %v1869_v13  ;;  %v1660_v34 = vshrl.u32 %v3943_v3, 16  ;;  %v3945_v13 = vld [vmem:[%s4424_s21 + $0x50] ss:$0 sps:$4 sm:$0x11]  }
  0xad   : > { %1797 = vrot.lane.b32.xlu0 %v1646_v37, %s4204_s24  ;;  %v564_v54 = vsel %vm468_vm0, %v559_v21, %v563_v30  ;;  %v1288_v37 = vrot.slane %v3939_v45, 1  ;;  %v1150_v21 = vshll.u32 %v4779_v27, 16  ;;  %v4794_v30 = vld [vmem:[%s4424_s21 + $0x68] ss:$0 sps:$4 sm:$0x11]   ;;  %v4814_v46 = vld [vmem:[%s4424_s21 + $0x78] sm:$0xff]  }
  0xae   : > { %v1109_v39 = vrot.slane %v1107_v35, 1  ;;  %v1658_v20 = vsel %vm468_vm0, %v1653_v2, %v1657_v26  ;;  %v573_v45 = vshll.u32 %v4794_v30, 16  ;;  %v3944_v2 = vld [vmem:[%s4424_s21 + $0x5c] ss:$0 sps:$4 sm:$0x11]   ;;  %v1870_v35 = vrot.slane %v3943_v3, 1 }
  0xaf   : > { %1329 = vrot.lane.b32.xlu1 %v1286_v41, %s4204_s24  ;;  %v4782_v41 = vld [vmem:[%s4424_s21 + $0x60] sm:$0xff]   ;;  %v1289_v59 = vsel %vm726_vm2, %v1287_v60, %v1288_v37  ;;  %v4804_v57 = vrot.slane %v1150_v21, 1  ;;  %v1662_v60 = vshll.u32 %v3943_v3, 16  ;;  %v1667_v1 = vshll.u32 %v3944_v2, 16 }
  0xb0   : > { %412 = vst.msk [vmem:[#allocation2 + $0x140] sm:$0xff] %vm403_vm1, %v4782_v41  ;;  %v566_v12 = vshrl.u32 %v4782_v41, 16  ;;  %v568_v53 = vshll.u32 %v4782_v41, 16  ;;  %v1110_v37 = vsel %vm468_vm0, %v1105_v23, %v1109_v39  ;;  %v575_v26 = vrot.slane %v573_v45, 1  ;;  %v4820_v39 = vld [vmem:[%s4424_s21 + $0x6c] sm:$0xff]  }
  0xb1   : > { %953 = vrot.lane.b32.xlu0 %v4732_v38, %s4204_s24  ;;  %1263 = vst.msk [vmem:[#allocation2 + $0xb0] sm:$0xff] %vm403_vm1, %v1110_v37  ;;  %v1871_v55 = vrot.slane %v3944_v2, 1  ;;  %v1290_v3 = vrot.slane %v4662_v5, 1  ;;  %v1291_v23 = vrot.slane %v3945_v13, 1  ;;  %v1162_v5 = vshll.u32 %v4814_v46, 16  ;;  %413 = vst.msk [vmem:[#allocation2 + $0x168] sm:$0xff] %vm403_vm1, %v4820_v39 }
  0xb3   : > { %675 = vrot.lane.b32.xlu1 %v564_v54, %s4204_s24  ;;  %v570_v54 = vrot.slane %v568_v53, 1  ;;  %v1119_v53 = vshll.u32 %v3945_v13, 16  ;;  %v1872_v2 = vsel %vm726_vm2, %v1870_v35, %v1871_v55  ;;  %v1292_v13 = vsel %vm726_vm2, %v1290_v3, %v1291_v23  ;;  %v4843_v35 = vld [vmem:[%s4424_s21 + $0x84] sm:$0xff]  }
  0xb4   : > { %1924 = vst.msk [vmem:[#allocation2 + $0xe8] sm:$0xff] %vm403_vm1, %v1872_v2  ;;  %v580_v55 = vshll.u32 %v4820_v39, 16 }
  0xb5   : > { %1799 = vrot.lane.b32.xlu0 %v1658_v20, %s4204_s24  ;;  %v571_v21 = vor.u32 %v570_v54, %v566_v12  ;;  %v1664_v20 = vrot.slane %v1662_v60, 1  ;;  %v1669_v54 = vrot.slane %v1667_v1, 1  ;;  %v3949_v60 = vld [vmem:[%s4424_s21 + $0x60] sm:$0xff]   ;;  %v1121_v37 = vrot.slane %v1119_v53, 1 }
  0xb6   : > { %v578_v1 = vshrl.u32 %v4820_v39, 16  ;;  %1541 = vst.msk [vmem:[#allocation2 + $0x108] sm:$0xff] %vm403_vm1, %v3949_v60  ;;  %v582_v53 = vrot.slane %v580_v55, 1 }
  0xb7   : > { %1331 = vrot.lane.b32.xlu1 %v1289_v59, %s4204_s24  ;;  %v1117_v59 = vor.u32 %v4687_v49, %v1112_v31  ;;  %v576_v12 = vsel %vm468_vm0, %v571_v21, %v575_v26  ;;  %v1665_v45 = vor.u32 %v1664_v20, %v1660_v34  ;;  %v4837_v49 = vld [vmem:[%s4424_s21 + $0x74] ss:$0 sps:$4 sm:$0x11]   ;;  %v1672_v34 = vshrl.u32 %v3949_v60, 16 }
  0xb8   : > { %5512 = vst [vmem:[#allocation14_spill] sm:$0xff] %v4837_v49  ;;  %v4846_v26 = vrot.slane %v1162_v5, 1  ;;  %v1674_v21 = vshll.u32 %v3949_v60, 16  ;;  %v585_v3 = vshll.u32 %v4837_v49, 16  ;;  %v583_v2 = vor.u32 %v582_v53, %v578_v1 }
  0xb9   : > { %955 = vrot.lane.b32.xlu0 %v4779_v27, %s4204_s24  ;;  %v1670_v31 = vsel %vm468_vm0, %v1665_v45, %v1669_v54  ;;  %v1122_v20 = vsel %vm468_vm0, %v1117_v59, %v1121_v37  ;;  %v3950_v45 = vld [vmem:[%s4424_s21 + $0x68] ss:$0 sps:$4 sm:$0x11]   ;;  %v3951_v5 = vld [vmem:[%s4424_s21 + $0x5c] ss:$0 sps:$4 sm:$0x11]  }
  0xba   : > { %1264 = vst.msk [vmem:[#allocation2 + $0xd8] sm:$0xff] %vm403_vm1, %v1122_v20  ;;  %v1676_v54 = vrot.slane %v1674_v21, 1  ;;  %v1874_v55 = vrot.slane %v3950_v45, 1  ;;  %v1131_v20 = vshll.u32 %v3951_v5, 16  ;;  %v1294_v23 = vrot.slane %v3951_v5, 1  ;;  %v4862_v21 = vld [vmem:[%s4424_s21 + $0x78] sm:$0xff]  }
  0xbb   : > { %677 = vrot.lane.b32.xlu1 %v576_v12, %s4204_s24  ;;  %v1873_v12 = vrot.slane %v3949_v60, 1  ;;  %v1679_v60 = vshll.u32 %v3950_v45, 16  ;;  %v1174_v1 = vshll.u32 %v4843_v35, 16  ;;  %v3955_v59 = vld [vmem:[%s4424_s21 + $0x6c] sm:$0xff]   ;;  %v5513_v49 = vshrl.u32 %v4700_v51, 16  ;;  %414 = vst.msk [vmem:[#allocation2 + $0x190] sm:$0xff] %vm403_vm1, %v4862_v21 }
  0xbc   : > { %v1677_v37 = vor.u32 %v1676_v54, %v1672_v34  ;;  %v1133_v45 = vrot.slane %v1131_v20, 1  ;;  %v1295_v54 = vsel %vm726_vm2, %v1293_v22, %v1294_v23  ;;  %v590_v5 = vshrl.u32 %v4862_v21, 16  ;;  %1542 = vst.msk [vmem:[#allocation2 + $0x130] sm:$0xff] %vm403_vm1, %v3955_v59 }
  0xbd   : > { %1801 = vrot.lane.b32.xlu0 %v1670_v31, %s4204_s24  ;;  %v587_v31 = vrot.slane %v585_v3, 1  ;;  %v1681_v53 = vrot.slane %v1679_v60, 1  ;;  %v1875_v3 = vsel %vm726_vm2, %v1873_v12, %v1874_v55  ;;  %v1129_v34 = vor.u32 %v4721_v16, %v5513_v49 }
  0xbe   : > { %1925 = vst.msk [vmem:[#allocation2 + $0x110] sm:$0xff] %vm403_vm1, %v1875_v3  ;;  %v592_v16 = vshll.u32 %v4862_v21, 16  ;;  %v1684_v49 = vshrl.u32 %v3955_v59, 16  ;;  %v1686_v12 = vshll.u32 %v3955_v59, 16  ;;  %v1876_v60 = vrot.slane %v3955_v59, 1 }
  0xbf   : > { %1333 = vrot.lane.b32.xlu1 %v1292_v13, %s4204_s24  ;;  %v588_v13 = vsel %vm468_vm0, %v583_v2, %v587_v31  ;;  %v4872_v2 = vrot.slane %v1174_v1, 1  ;;  %v4875_v31 = vld [vmem:[%s4424_s21 + $0x80] ss:$0 sps:$4 sm:$0x11]   ;;  %v1682_v51 = vsel %vm468_vm0, %v1677_v37, %v1681_v53  ;;  %v1134_v37 = vsel %vm468_vm0, %v1129_v34, %v1133_v45  ;;  %v4898_v34 = vld [vmem:[%s4424_s21 + $0x84] sm:$0xff]  }
  0xc0   : > { %5514 = vst [vmem:[#allocation15_spill] sm:$0xff] %v4875_v31  ;;  %v597_v22 = vshll.u32 %v4875_v31, 16  ;;  %v594_v55 = vrot.slane %v592_v16, 1  ;;  %v1688_v1 = vrot.slane %v1686_v12, 1  ;;  %v1296_v3 = vrot.slane %v4732_v38, 1  ;;  %1265 = vst.msk [vmem:[#allocation2 + $0x100] sm:$0xff] %vm403_vm1, %v1134_v37 }
  0xc1   : > { %957 = vrot.lane.b32.xlu0 %v4814_v46, %s4204_s24  ;;  %v3957_v53 = vld [vmem:[%s4424_s21 + $0x68] ss:$0 sps:$4 sm:$0x11]   ;;  %v4895_v31 = vld [vmem:[%s4424_s21 + $0x90] sm:$0xff]   ;;  %v5515_v45 = vshrl.u32 %v4732_v38, 16  ;;  %415 = vst.msk [vmem:[#allocation2 + $0x1b8] sm:$0xff] %vm403_vm1, %v4898_v34 }
  0xc2   : > { %v599_v20 = vrot.slane %v597_v22, 1  ;;  %v1689_v59 = vor.u32 %v1688_v1, %v1684_v49  ;;  %v1297_v16 = vrot.slane %v3957_v53, 1  ;;  %v1186_v1 = vshll.u32 %v4895_v31, 16 }
  0xc3   : > { %679 = vrot.lane.b32.xlu1 %v588_v13, %s4204_s24  ;;  %v3956_v13 = vld [vmem:[%s4424_s21 + $0x74] ss:$0 sps:$4 sm:$0x11]   ;;  %v1141_v22 = vor.u32 %v4763_v42, %v5515_v45  ;;  %v602_v42 = vshrl.u32 %v4898_v34, 16 }
  0xc4   : > { %v1691_v44 = vshll.u32 %v3956_v13, 16  ;;  %v1877_v23 = vrot.slane %v3956_v13, 1  ;;  %v3961_v13 = vld [vmem:[#allocation6 + $0x40] sm:$0xff]  }
  0xc5   : > { %1803 = vrot.lane.b32.xlu0 %v1682_v51, %s4204_s24  ;;  %v595_v51 = vor.u32 %v594_v55, %v590_v5  ;;  %3783 = vmatprep.subr.bf16.mxu1 %v3961_v13 }
  0xc6   : > { %v1693_v5 = vrot.slane %v1691_v44, 1  ;;  %v1878_v55 = vsel %vm726_vm2, %v1876_v60, %v1877_v23  ;;  %v1298_v44 = vsel %vm726_vm2, %v1296_v3, %v1297_v16  ;;  %v604_v23 = vshll.u32 %v4898_v34, 16  ;;  %3499 = vmatprep.subr.bf16.mxu0 %v3961_v13  ;;  %v3963_v16 = vld [vmem:[#allocation6 + $0x48] sm:$0xff]  }
  0xc7   : > { %1335 = vrot.lane.b32.xlu1 %v1295_v54, %s4204_s24  ;;  %v1143_v54 = vshll.u32 %v3957_v53, 16  ;;  %v600_v12 = vsel %vm468_vm0, %v595_v51, %v599_v20  ;;  %1926 = vst.msk [vmem:[#allocation2 + $0x138] sm:$0xff] %vm403_vm1, %v1878_v55  ;;  %v4910_v53 = vld [vmem:[%s4424_s21 + $0x8c] ss:$0 sps:$4 sm:$0x11]   ;;  %v4919_v60 = vrot.slane %v1186_v1, 1 }
  0xc8   : > { %5516 = vst [vmem:[#allocation16_spill] sm:$0xff] %v4910_v53  ;;  %v1694_v38 = vsel %vm468_vm0, %v1689_v59, %v1693_v5  ;;  %v609_v20 = vshll.u32 %v4910_v53, 16  ;;  %v606_v3 = vrot.slane %v604_v23, 1  ;;  %v3965_v55 = vld [vmem:[%s4424_s21 + $0x78] sm:$0xff]   ;;  %v1299_v1 = vrot.slane %v4779_v27, 1 }
  0xc9   : > { %959 = vrot.lane.b32.xlu0 %v4843_v35, %s4204_s24  ;;  %v1145_v49 = vrot.slane %v1143_v54, 1  ;;  %v3962_v54 = vld [vmem:[#allocation6] sm:$0xff]   ;;  %v3966_v13 = vld [vmem:[%s4424_s21 + $0x80] ss:$0 sps:$4 sm:$0x11]   ;;  %1543 = vst.msk [vmem:[#allocation2 + $0x158] sm:$0xff] %vm403_vm1, %v3965_v55 }
  0xca   : > { %v611_v45 = vrot.slane %v609_v20, 1  ;;  %3791 = vmatpush3.bf16.msra.mxu1 %v3962_v54  ;;  %v607_v5 = vor.u32 %v606_v3, %v602_v42  ;;  %3500 = vmatpush3.bf16.msra.mxu0 %v3962_v54  ;;  %v1703_v23 = vshll.u32 %v3966_v13, 16  ;;  %v1879_v42 = vrot.slane %v3965_v55, 1  ;;  %v3968_v3 = vld [vmem:[#allocation6 + $0x50] sm:$0xff]  }
  0xcb   : > { %681 = vrot.lane.b32.xlu1 %v600_v12, %s4204_s24  ;;  %v1146_v59 = vsel %vm468_vm0, %v1141_v22, %v1145_v49  ;;  %v3964_v12 = vld [vmem:[#allocation6 + $0x8] sm:$0xff]   ;;  %3784 = vmatprep.subr.bf16.mxu1 %v3963_v16  ;;  %v3967_v49 = vld [vmem:[%s4424_s21 + $0x74] ss:$0 sps:$4 sm:$0x11]   ;;  %v1880_v20 = vrot.slane %v3966_v13, 1 }
  0xcc   : > { %1266 = vst.msk [vmem:[#allocation2 + $0x128] sm:$0xff] %vm403_vm1, %v1146_v59  ;;  %3501 = vmatprep.subr.bf16.mxu0 %v3963_v16  ;;  %v612_v22 = vsel %vm468_vm0, %v607_v5, %v611_v45  ;;  %v1155_v54 = vshll.u32 %v3967_v49, 16  ;;  %v1300_v59 = vrot.slane %v3967_v49, 1  ;;  %v5517_v16 = vshrl.u32 %v4779_v27, 16  ;;  %v3970_v27 = vld [vmem:[#allocation6 + $0x58] sm:$0xff]  }
  0xcd   : > { %1805 = vrot.lane.b32.xlu0 %v1694_v38, %s4204_s24  ;;  %v1696_v38 = vshrl.u32 %v3965_v55, 16  ;;  %v1705_v51 = vrot.slane %v1703_v23, 1  ;;  %v763_v49 = vrot.slane %v4449_v6, 1  ;;  %v3972_v23 = vld [vmem:[%s4424_s21 + $0x84] sm:$0xff]  }
  0xce   : > { %3792 = vmatpush3.bf16.msra.mxu1 %v3964_v12  ;;  %3502 = vmatpush3.bf16.msra.mxu0 %v3964_v12  ;;  %v1153_v45 = vor.u32 %v4804_v57, %v5517_v16  ;;  %v1157_v37 = vrot.slane %v1155_v54, 1  ;;  %v1301_v53 = vsel %vm726_vm2, %v1299_v1, %v1300_v59  ;;  %v1302_v57 = vrot.slane %v4814_v46, 1  ;;  %v3971_v12 = vld [vmem:[#allocation6 + $0x18] sm:$0xff]   ;;  %1544 = vst.msk [vmem:[#allocation2 + $0x180] sm:$0xff] %vm403_vm1, %v3972_v23 }
  0xcf   : > { %1337 = vrot.lane.b32.xlu1 %v1298_v44, %s4204_s24  ;;  %v1698_v44 = vshll.u32 %v3965_v55, 16  ;;  %3785 = vmatprep.subr.bf16.mxu1 %v3968_v3  ;;  %v3969_v55 = vld [vmem:[#allocation6 + $0x10] sm:$0xff]   ;;  %v1708_v59 = vshrl.u32 %v3972_v23, 16  ;;  %v1710_v6 = vshll.u32 %v3972_v23, 16 }
  0xd0   : > { %3503 = vmatprep.subr.bf16.mxu0 %v3968_v3  ;;  %v1158_v1 = vsel %vm468_vm0, %v1153_v45, %v1157_v37  ;;  %v1882_v37 = vrot.slane %v3972_v23, 1 }
  0xd1   : > { %961 = vrot.lane.b32.xlu0 %v4895_v31, %s4204_s24  ;;  %v1700_v5 = vrot.slane %v1698_v44, 1  ;;  %1267 = vst.msk [vmem:[#allocation2 + $0x150] sm:$0xff] %vm403_vm1, %v1158_v1 }
  0xd2   : > { %3793 = vmatpush3.bf16.msra.mxu1 %v3969_v55  ;;  %3504 = vmatpush3.bf16.msra.mxu0 %v3969_v55  ;;  %v1712_v55 = vrot.slane %v1710_v6, 1  ;;  %v1305_v6 = vrot.slane %v4843_v35, 1 }
  0xd3   : > { %683 = vrot.lane.b32.xlu1 %v612_v22, %s4204_s24  ;;  %v1881_v22 = vsel %vm726_vm2, %v1879_v42, %v1880_v20  ;;  %v1701_v13 = vor.u32 %v1700_v5, %v1696_v38  ;;  %3786 = vmatprep.subr.bf16.mxu1 %v3970_v27  ;;  %v3973_v38 = vld [vmem:[%s4424_s21 + $0x8c] ss:$0 sps:$4 sm:$0x11]   ;;  %v3975_v42 = vld [vmem:[#allocation6 + $0x60] sm:$0xff]   ;;  %v5518_v20 = vrot.slane %v4457_v9, 1 }
  0xd4   : > { %1927 = vst.msk [vmem:[#allocation2 + $0x160] sm:$0xff] %vm403_vm1, %v1881_v22  ;;  %3505 = vmatprep.subr.bf16.mxu0 %v3970_v27  ;;  %v1715_v3 = vshll.u32 %v3973_v38, 16  ;;  %v3976_v5 = vld [vmem:[#allocation6 + $0x20] sm:$0xff]   ;;  %v5519_v22 = vshrl.u32 %v4814_v46, 16  ;;  %v3978_v46 = vld [vmem:[#allocation6 + $0x28] sm:$0xff]  }
  0xd5   : > { %v1706_v44 = vsel %vm468_vm0, %v1701_v13, %v1705_v51  ;;  %v765_v54 = vsel %vm726_vm2, %v763_v49, %v5518_v20  ;;  %v1883_v51 = vrot.slane %v3973_v38, 1  ;;  %v1713_v38 = vor.u32 %v1712_v55, %v1708_v59  ;;  %v3979_v20 = vld [vmem:[%s4424_s21 + $0x90] sm:$0xff]  }
  0xd6   : > { %1807 = vrot.lane.b32.xlu0 %v1706_v44, %s4204_s24  ;;  %803 = vst.msk [vmem:[#allocation2 + $0x1e8] sm:$0xff] %vm403_vm1, %v765_v54  ;;  %3794 = vmatpush3.bf16.msra.mxu1 %v3971_v12  ;;  %v1165_v9 = vor.u32 %v4846_v26, %v5519_v22  ;;  %v1717_v13 = vrot.slane %v1715_v3, 1  ;;  %v3977_v44 = vld [vmem:[#allocation6 + $0x68] sm:$0xff]   ;;  %v727_v26 = vrot.slane %v4452_v7, 1  ;;  %v1720_v3 = vshrl.u32 %v3979_v20, 16  ;;  %1545 = vst.msk [vmem:[#allocation2 + $0x1a8] sm:$0xff] %vm403_vm1, %v3979_v20 }
  0xd7   : > { %1339 = vrot.lane.b32.xlu1 %v1301_v53, %s4204_s24  ;;  %v3974_v53 = vld [vmem:[%s4424_s21 + $0x80] ss:$0 sps:$4 sm:$0x11]   ;;  %3506 = vmatpush3.bf16.msra.mxu0 %v3971_v12  ;;  %v1884_v27 = vsel %vm726_vm2, %v1882_v37, %v1883_v51  ;;  %v3980_v54 = vld [vmem:[%s4424_s21 + $0x98] ss:$0 sps:$4 sm:$0x11]  }
  0xd8   : > { %v1167_v16 = vshll.u32 %v3974_v53, 16  ;;  %v1303_v45 = vrot.slane %v3974_v53, 1  ;;  %3787 = vmatprep.subr.bf16.mxu1 %v3975_v42  ;;  %3507 = vmatprep.subr.bf16.mxu0 %v3975_v42  ;;  %1928 = vst.msk [vmem:[#allocation2 + $0x188] sm:$0xff] %vm403_vm1, %v1884_v27  ;;  %v5520_v53 = vrot.slane %v4475_v19, 1  ;;  %v1722_v37 = vshll.u32 %v3979_v20, 16  ;;  %v3982_v22 = vld [vmem:[#allocation6 + $0x70] sm:$0xff]  }
  0xd9   : > { %v3981_v7 = vld [vmem:[%s4424_s21 + $0x8c] ss:$0 sps:$4 sm:$0x11]   ;;  %v1727_v19 = vshll.u32 %v3980_v54, 16  ;;  %v1885_v51 = vrot.slane %v3979_v20, 1 }
  0xda   : > { %v1169_v49 = vrot.slane %v1167_v16, 1  ;;  %v1304_v1 = vsel %vm726_vm2, %v1302_v57, %v1303_v45  ;;  %3795 = vmatpush3.bf16.msra.mxu1 %v3976_v5  ;;  %v1718_v57 = vsel %vm468_vm0, %v1713_v38, %v1717_v13  ;;  %v729_v42 = vsel %vm726_vm2, %v727_v26, %v5520_v53 }
  0xdb   : > { %1341 = vrot.lane.b32.xlu1 %v1304_v1, %s4204_s24  ;;  %3508 = vmatpush3.bf16.msra.mxu0 %v3976_v5  ;;  %791 = vst.msk [vmem:[#allocation2 + $0x8] sm:$0xff] %vm403_vm1, %v729_v42  ;;  %v1886_v16 = vrot.slane %v3980_v54, 1  ;;  %v1179_v45 = vshll.u32 %v3981_v7, 16  ;;  %v1306_v5 = vrot.slane %v3981_v7, 1  ;;  %v1724_v13 = vrot.slane %v1722_v37, 1  ;;  %v3984_v1 = vld [vmem:[#allocation6 + $0x78] sm:$0xff]  }
  0xdc   : > { %v1170_v12 = vsel %vm468_vm0, %v1165_v9, %v1169_v49  ;;  %3788 = vmatprep.subr.bf16.mxu1 %v3977_v44  ;;  %3509 = vmatprep.subr.bf16.mxu0 %v3977_v44  ;;  %v5521_v9 = vshrl.u32 %v4843_v35, 16  ;;  %v1729_v27 = vrot.slane %v1727_v19, 1  ;;  %v3983_v49 = vld [vmem:[#allocation6 + $0x30] sm:$0xff]   ;;  %v766_v26 = vrot.slane %v4484_v29, 1  ;;  %v3985_v35 = vld [vmem:[#allocation6 + $0x38] sm:$0xff]  }
  0xdd   : > { %1268 = vst.msk [vmem:[#allocation2 + $0x178] sm:$0xff] %vm403_vm1, %v1170_v12  ;;  %1809 = vrot.lane.b32.xlu0 %v1718_v57, %s4204_s24  ;;  %v1887_v44 = vsel %vm726_vm2, %v1885_v51, %v1886_v16  ;;  %v1307_v38 = vsel %vm726_vm2, %v1305_v6, %v1306_v5  ;;  %v1725_v12 = vor.u32 %v1724_v13, %v1720_v3  ;;  %v5522_v57 = vrot.slane %v4488_v32, 1  ;;  %v3987_v7 = vld [vmem:[%s4424_s21 + $0xa4] ss:$0 sps:$4 sm:$0x11]  }
  0xde   : > { %3796 = vmatpush3.bf16.msra.mxu1 %v3978_v46  ;;  %v1177_v55 = vor.u32 %v4872_v2, %v5521_v9  ;;  %1929 = vst.msk [vmem:[#allocation2 + $0x1b0] sm:$0xff] %vm403_vm1, %v1887_v44  ;;  %v1308_v2 = vrot.slane %v4895_v31, 1  ;;  %v730_v29 = vrot.slane %v4497_v36, 1  ;;  %v3988_v6 = vld [vmem:[%s4424_s21 + $0x98] ss:$0 sps:$4 sm:$0x11]  }
  0xdf   : > { %3510 = vmatpush3.bf16.msra.mxu0 %v3978_v46  ;;  %3789 = vmatprep.subr.bf16.mxu1 %v3982_v22  ;;  %v768_v53 = vsel %vm726_vm2, %v766_v26, %v5522_v57  ;;  %v1730_v54 = vsel %vm468_vm0, %v1725_v12, %v1729_v27  ;;  %v3989_v36 = vld [vmem:[#allocation6 + $0xc0] sm:$0xff]   ;;  %v5523_v3 = vrot.slane %v4508_v43, 1  ;;  %v1739_v16 = vshll.u32 %v3987_v7, 16 }
  0xe0   : > { %3511 = vmatprep.subr.bf16.mxu0 %v3982_v22  ;;  %1343 = vrot.lane.b32.xlu1 %v1307_v38, %s4204_s24  ;;  %804 = vst.msk [vmem:[#allocation2 + $0x210] sm:$0xff] %vm403_vm1, %v768_v53  ;;  %v1889_v22 = vrot.slane %v3987_v7, 1  ;;  %v1191_v9 = vshll.u32 %v3988_v6, 16  ;;  %v5524_v43 = vshrl.u32 %v4895_v31, 16  ;;  %v3990_v26 = vld [vmem:[#allocation6 + $0x80] sm:$0xff]   ;;  %v3992_v53 = vld [vmem:[#allocation6 + $0xc8] sm:$0xff]  }
  0xe1   : > { %1811 = vrot.lane.b32.xlu0 %v1730_v54, %s4204_s24  ;;  %v732_v37 = vsel %vm726_vm2, %v730_v29, %v5523_v3  ;;  %v3991_v31 = vld [vmem:[#allocation6 + $0x100] sm:$0xff]   ;;  %v3993_v7 = vld [vmem:[%s4424_s21 + $0xa8] sm:$0xff]  }
  0xe2   : > { %3797 = vmatpush3.bf16.msra.mxu1 %v3983_v49  ;;  %792 = vst.msk [vmem:[#allocation2 + $0x30] sm:$0xff] %vm403_vm1, %v732_v37  ;;  %v1189_v27 = vor.u32 %v4919_v60, %v5524_v43  ;;  %v769_v60 = vrot.slane %v4524_v52, 1  ;;  %v5525_v52 = vrot.slane %v4539_v62, 1  ;;  %v1744_v62 = vshrl.u32 %v3993_v7, 16  ;;  %1547 = vst.msk [vmem:[#allocation2 + $0x1f8] sm:$0xff] %vm403_vm1, %v3993_v7 }
  0xe3   : > { %3512 = vmatpush3.bf16.msra.mxu0 %v3983_v49  ;;  %3790 = vmatprep.subr.bf16.mxu1 %v3984_v1  ;;  %v3996_v43 = vld [vmem:[%s4424_s21 + $0xa4] ss:$0 sps:$4 sm:$0x11]  }
  0xe4   : > { %v964_v23 = vpop.permute.xlu0 %963  ;;  %v940_v59 = vpop.permute.xlu1 %939  ;;  %3513 = vmatprep.subr.bf16.mxu0 %v3984_v1  ;;  %v1741_v1 = vrot.slane %v1739_v16, 1  ;;  %v5527_v16 = vrot.slane %v4585_v50, 1 }
  0xe5   : > { %999 = vst.msk [vmem:[#allocation2 + $0x1e8] sm:$0xff] %vm709_vm3, %v964_v23  ;;  %987 = vst.msk [vmem:[#allocation2 + $0x8] sm:$0xff] %vm709_vm3, %v940_v59  ;;  %v1181_v23 = vrot.slane %v1179_v45, 1  ;;  %v3986_v59 = vld [vmem:[%s4424_s21 + $0x9c] sm:$0xff]  }
  0xe6   : > { %v1732_v19 = vshrl.u32 %v3986_v59, 16  ;;  %v1734_v51 = vshll.u32 %v3986_v59, 16  ;;  %v1888_v45 = vrot.slane %v3986_v59, 1  ;;  %1546 = vst.msk [vmem:[#allocation2 + $0x1d0] sm:$0xff] %vm403_vm1, %v3986_v59  ;;  %3798 = vmatpush3.bf16.msra.mxu1 %v3985_v35  ;;  %v771_v59 = vsel %vm726_vm2, %v769_v60, %v5525_v52 }
  0xe7   : > { %v1182_v20 = vsel %vm468_vm0, %v1177_v55, %v1181_v23  ;;  %v1309_v55 = vrot.slane %v3988_v6, 1  ;;  %3514 = vmatpush3.bf16.msra.mxu0 %v3985_v35  ;;  %3611 = vmatprep.subr.bf16.mxu1 %v3989_v36  ;;  %v1193_v23 = vrot.slane %v1191_v9, 1  ;;  %805 = vst.msk [vmem:[#allocation2 + $0x238] sm:$0xff] %vm403_vm1, %v771_v59  ;;  %v3994_v6 = vld [vmem:[%s4424_s21 + $0xb0] ss:$0 sps:$4 sm:$0x11]  }
  0xe8   : > { %1269 = vst.msk [vmem:[#allocation2 + $0x1a0] sm:$0xff] %vm403_vm1, %v1182_v20  ;;  %v1736_v49 = vrot.slane %v1734_v51, 1  ;;  %v1890_v44 = vsel %vm726_vm2, %v1888_v45, %v1889_v22  ;;  %3743 = vmatprep.subr.bf16.mxu0 %v3991_v31  ;;  %v5526_v36 = vrot.slane %v4562_v25, 1  ;;  %v3995_v51 = vld [vmem:[#allocation6 + $0x88] sm:$0xff]   ;;  %v1892_v22 = vrot.slane %v3994_v6, 1 }
  0xe9   : > { %v1310_v38 = vsel %vm726_vm2, %v1308_v2, %v1309_v55  ;;  %1930 = vst.msk [vmem:[#allocation2 + $0x1d8] sm:$0xff] %vm403_vm1, %v1890_v44  ;;  %v733_v2 = vrot.slane %v4547_v11, 1  ;;  %v1194_v20 = vsel %vm468_vm0, %v1189_v27, %v1193_v23  ;;  %v3997_v55 = vld [vmem:[#allocation6 + $0xd0] sm:$0xff]   ;;  %v1203_v23 = vshll.u32 %v3996_v43, 16 }
  0xea   : > { %v1737_v12 = vor.u32 %v1736_v49, %v1732_v19  ;;  %1345 = vrot.lane.b32.xlu1 %v1310_v38, %s4204_s24  ;;  %1270 = vst.msk [vmem:[#allocation2 + $0x1c8] sm:$0xff] %vm403_vm1, %v1194_v20  ;;  %v1746_v19 = vshll.u32 %v3993_v7, 16  ;;  %v3998_v49 = vld [vmem:[#allocation6 + $0x90] sm:$0xff]   ;;  %v1312_v38 = vrot.slane %v3996_v43, 1 }
  0xeb   : > { %v686_v46 = vpop.permute.xlu0 %685  ;;  %v735_v3 = vsel %vm726_vm2, %v733_v2, %v5526_v36  ;;  %v1205_v2 = vrot.slane %v1203_v23, 1 }
  0xec   : > { %v1996_v42 = vld [vmem:[#allocation2 + $0x1e8] sm:$0xff]  ;;  %722 = vst.msk [vmem:[#allocation2 + $0x1e0] sm:$0xff] %vm709_vm3, %v686_v46  ;;  %v1742_v54 = vsel %vm468_vm0, %v1737_v12, %v1741_v1 }
  0xed   : > { %2486 = vmatprep.mubr.bf16.mxu1 %v1996_v42  ;;  %v662_v32 = vpop.permute.xlu1 %661  ;;  %v1936_v13 = vld [vmem:[#allocation2 + $0x8] sm:$0xff]  ;;  %v4021_v42 = vld [vmem:[%s4424_s21 + $0x9c] sm:$0xff]   ;;  %1813 = vrot.lane.b32.xlu0 %v1742_v54, %s4204_s24  ;;  %793 = vst.msk [vmem:[#allocation2 + $0x58] sm:$0xff] %vm403_vm1, %v735_v3 }
  0xee   : > { %710 = vst.msk [vmem:[#allocation2] sm:$0xff] %vm709_vm3, %v662_v32  ;;  %2390 = vmatprep.mubr.bf16.mxu0 %v1936_v13  ;;  %v1311_v29 = vrot.slane %v4021_v42, 1  ;;  %v772_v32 = vrot.slane %v4570_v33, 1  ;;  %v1891_v33 = vrot.slane %v3993_v7, 1  ;;  %v1748_v13 = vrot.slane %v1746_v19, 1  ;;  %v3999_v12 = vld [vmem:[#allocation6 + $0xd8] sm:$0xff]  }
  0xef   : > { %v966_v5 = vpop.permute.xlu0 %965  ;;  %v4000_v54 = vld [vmem:[%s4424_s21 + $0xb4] sm:$0xff]   ;;  %v736_v19 = vrot.slane %v4593_v58, 1  ;;  %v5530_v58 = vrot.slane %v4606_v24, 1 }
  0xf0   : > { %1000 = vst.msk [vmem:[#allocation2 + $0x210] sm:$0xff] %vm709_vm3, %v966_v5  ;;  %v774_v45 = vsel %vm726_vm2, %v772_v32, %v5527_v16  ;;  %v1751_v5 = vshll.u32 %v3994_v6, 16  ;;  %v1893_v50 = vsel %vm726_vm2, %v1891_v33, %v1892_v22  ;;  %v1749_v1 = vor.u32 %v1748_v13, %v1744_v62  ;;  %v4003_v62 = vld [vmem:[%s4424_s21 + $0xb0] ss:$0 sps:$4 sm:$0x11]  }
  0xf1   : > { %v688_v35 = vpop.permute.xlu1 %687  ;;  %806 = vst.msk [vmem:[#allocation2 + $0x260] sm:$0xff] %vm403_vm1, %v774_v45  ;;  %1931 = vst.msk [vmem:[#allocation2 + $0x200] sm:$0xff] %vm403_vm1, %v1893_v50  ;;  %v1313_v20 = vsel %vm726_vm2, %v1311_v29, %v1312_v38  ;;  %v1756_v7 = vshrl.u32 %v4000_v54, 16  ;;  %v1758_v32 = vshll.u32 %v4000_v54, 16  ;;  %v4004_v45 = vld [vmem:[#allocation6 + $0xe0] sm:$0xff]   ;;  %v1315_v13 = vrot.slane %v4003_v62, 1 }
  0xf2   : > { %723 = vst.msk [vmem:[#allocation2 + $0x208] sm:$0xff] %vm709_vm3, %v688_v35  ;;  %v1753_v27 = vrot.slane %v1751_v5, 1  ;;  %v5528_v35 = vshrl.u32 %v4435_v0, 16  ;;  %1347 = vrot.lane.b32.xlu1 %v1313_v20, %s4204_s24  ;;  %v4001_v0 = vld [vmem:[%s4424_s21 + $0xbc] ss:$0 sps:$4 sm:$0x11]   ;;  %v738_v43 = vsel %vm726_vm2, %v736_v19, %v5530_v58 }
  0xf3   : > { %v942_v46 = vpop.permute.xlu0 %941  ;;  %v1995_v57 = vld [vmem:[#allocation2 + $0x1e0] sm:$0xff]  ;;  %1548 = vst.msk [vmem:[#allocation2 + $0x220] sm:$0xff] %vm403_vm1, %v4000_v54  ;;  %v1763_v36 = vshll.u32 %v4001_v0, 16  ;;  %v1895_v3 = vrot.slane %v4001_v0, 1  ;;  %v4005_v50 = vld [vmem:[#allocation6 + $0xa0] sm:$0xff]   ;;  %794 = vst.msk [vmem:[#allocation2 + $0x80] sm:$0xff] %vm403_vm1, %v738_v43 }
  0xf4   : > { %988 = vst.msk [vmem:[#allocation2 + $0x30] sm:$0xff] %vm709_vm3, %v942_v46  ;;  %2487 = vmatmul.mubr.bf16.vlgmr.msra.gmra.mrb[0].mxu1 %v1995_v57  ;;  %v4022_v57 = vld [vmem:[%s4424_s21 + $0xa8] sm:$0xff]   ;;  %v1754_v42 = vsel %vm468_vm0, %v1749_v1, %v1753_v27  ;;  %v4006_v38 = vld [vmem:[#allocation6 + $0xe8] sm:$0xff]   ;;  %v5533_v58 = vrot.slane %v4676_v14, 1  ;;  %v745_v43 = vrot.slane %v4712_v56, 1 }
  0xf5   : > { %3612 = vmatpush3.bf16.msra.mxu1 %v3990_v26  ;;  %v1935_v11 = vld [vmem:[#allocation2] sm:$0xff]  ;;  %v664_v37 = vpop.permute.xlu1 %663  ;;  %1815 = vrot.lane.b32.xlu0 %v1754_v42, %s4204_s24  ;;  %v4017_v56 = vld [vmem:[#allocation6 + $0xb8] sm:$0xff]  }
  0xf6   : > { %2391 = vmatmul.mubr.bf16.vlgmr.msra.gmra.mrb[0].mxu0 %v1935_v11  ;;  %3613 = vmatprep.subr.bf16.mxu1 %v3992_v53  ;;  %711 = vst.msk [vmem:[#allocation2 + $0x28] sm:$0xff] %vm709_vm3, %v664_v37  ;;  %v1314_v53 = vrot.slane %v4022_v57, 1  ;;  %v1894_v11 = vrot.slane %v4000_v54, 1  ;;  %v1760_v37 = vrot.slane %v1758_v32, 1  ;;  %v4009_v57 = vld [vmem:[#allocation6 + $0xa8] sm:$0xff]   ;;  %v5531_v32 = vrot.slane %v4638_v4, 1 }
  0xf7   : > { %v968_v25 = vpop.permute.xlu0 %967  ;;  %3744 = vmatpush3.bf16.msra.mxu0 %v3991_v31  ;;  %v2001_v9 = vld [vmem:[#allocation2 + $0x210] sm:$0xff]  ;;  %v1201_v31 = vor.u32 %v4454_v8, %v5528_v35  ;;  %v4002_v8 = vld [vmem:[#allocation6 + $0x98] sm:$0xff]   ;;  %v4007_v35 = vld [vmem:[%s4424_s21 + $0xc0] sm:$0xff]   ;;  %v5532_v4 = vshrl.u32 %v4515_v47, 16 }
  0xf8   : > { %1001 = vst.msk [vmem:[#allocation2 + $0x238] sm:$0xff] %vm709_vm3, %v968_v25  ;;  %2494 = vmatprep.mubr.bf16.mxu1 %v2001_v9  ;;  %v1896_v16 = vsel %vm726_vm2, %v1894_v11, %v1895_v3  ;;  %v5529_v25 = vshrl.u32 %v4472_v17, 16  ;;  %v1761_v22 = vor.u32 %v1760_v37, %v1756_v7  ;;  %v1316_v24 = vsel %vm726_vm2, %v1314_v53, %v1315_v13  ;;  %v5086_v53 = vld [vmem:[%s4424_s21 + $0xc0] sm:$0xff]   ;;  %v4010_v7 = vld [vmem:[%s4424_s21 + $0xbc] ss:$0 sps:$4 sm:$0x11]  }
  0xf9   : > { %3614 = vmatpush3.bf16.msra.mxu1 %v3995_v51  ;;  %v690_v44 = vpop.permute.xlu1 %689  ;;  %v2000_v26 = vld [vmem:[#allocation2 + $0x208] sm:$0xff]  ;;  %v1206_v29 = vsel %vm468_vm0, %v1201_v31, %v1205_v2  ;;  %v1765_v51 = vrot.slane %v1763_v36, 1  ;;  %1932 = vst.msk [vmem:[#allocation2 + $0x228] sm:$0xff] %vm403_vm1, %v1896_v16  ;;  %1349 = vrot.lane.b32.xlu1 %v1316_v24, %s4204_s24  ;;  %v1320_v42 = vrot.slane %v5086_v53, 1  ;;  %v1768_v20 = vshrl.u32 %v4007_v35, 16  ;;  %1549 = vst.msk [vmem:[#allocation2 + $0x248] sm:$0xff] %vm403_vm1, %v4007_v35 }
  0xfa   : > { %3615 = vmatprep.subr.bf16.mxu1 %v3997_v55  ;;  %724 = vst.msk [vmem:[#allocation2 + $0x230] sm:$0xff] %vm709_vm3, %v690_v44  ;;  %v1213_v5 = vor.u32 %v4481_v28, %v5529_v25  ;;  %v1215_v55 = vshll.u32 %v4003_v62, 16  ;;  %v4023_v28 = vld [vmem:[%s4424_s21 + $0xb4] sm:$0xff]   ;;  %v4008_v31 = vld [vmem:[%s4424_s21 + $0xc8] ss:$0 sps:$4 sm:$0x11]  }
  0xfb   : > { %v944_v60 = vpop.permute.xlu0 %943  ;;  %v1941_v46 = vld [vmem:[#allocation2 + $0x30] sm:$0xff]  ;;  %1271 = vst.msk [vmem:[#allocation2 + $0x1f0] sm:$0xff] %vm403_vm1, %v1206_v29  ;;  %v1317_v1 = vrot.slane %v4023_v28, 1  ;;  %v1766_v44 = vsel %vm468_vm0, %v1761_v22, %v1765_v51  ;;  %v1770_v54 = vshll.u32 %v4007_v35, 16  ;;  %v1775_v0 = vshll.u32 %v4008_v31, 16  ;;  %v4012_v37 = vld [vmem:[#allocation6 + $0xb0] sm:$0xff]  }
  0xfc   : > { %989 = vst.msk [vmem:[#allocation2 + $0x58] sm:$0xff] %vm709_vm3, %v944_v60  ;;  %2495 = vmatmul.mubr.bf16.gmra.mrb[4].mxu1 %v2000_v26  ;;  %2398 = vmatprep.mubr.bf16.mxu0 %v1941_v46  ;;  %v1217_v23 = vrot.slane %v1215_v55, 1  ;;  %v739_v60 = vrot.slane %v4633_v48, 1  ;;  %v1227_v19 = vshll.u32 %v4010_v7, 16  ;;  %v1225_v51 = vor.u32 %v4536_v61, %v5532_v4  ;;  %v4013_v55 = vld [vmem:[#allocation6 + $0xf8] sm:$0xff]   ;;  %v4014_v13 = vld [vmem:[#allocation6 + $0x108] sm:$0xff]  }
  0xfd   : > { %3616 = vmatpush3.bf16.msra.mxu1 %v3998_v49  ;;  %v666_v52 = vpop.permute.xlu1 %665  ;;  %v1940_v59 = vld [vmem:[#allocation2 + $0x28] sm:$0xff]  ;;  %1817 = vrot.lane.b32.xlu0 %v1766_v44, %s4204_s24  ;;  %v1772_v29 = vrot.slane %v1770_v54, 1 }
  0xfe   : > { %712 = vst.msk [vmem:[#allocation2 + $0x50] sm:$0xff] %vm709_vm3, %v666_v52  ;;  %2399 = vmatmul.mubr.bf16.gmra.mrb[4].mxu0 %v1940_v59  ;;  %3617 = vmatprep.subr.bf16.mxu1 %v3999_v12  ;;  %v1218_v46 = vsel %vm468_vm0, %v1213_v5, %v1217_v23  ;;  %v4011_v52 = vld [vmem:[#allocation6 + $0xf0] sm:$0xff]   ;;  %v1898_v59 = vrot.slane %v4008_v31, 1  ;;  %v741_v11 = vsel %vm726_vm2, %v739_v60, %v5531_v32  ;;  %v742_v5 = vrot.slane %v4666_v63, 1 }
  0xff   : > { %v970_v6 = vpop.permute.xlu0 %969  ;;  %v2006_v33 = vld [vmem:[#allocation2 + $0x238] sm:$0xff]  ;;  %1272 = vst.msk [vmem:[#allocation2 + $0x218] sm:$0xff] %vm403_vm1, %v1218_v46  ;;  %795 = vst.msk [vmem:[#allocation2 + $0xa8] sm:$0xff] %vm403_vm1, %v741_v11  ;;  %v1773_v16 = vor.u32 %v1772_v29, %v1768_v20  ;;  %v1229_v22 = vrot.slane %v1227_v19, 1  ;;  %3745 = vmatprep.subr.bf16.mxu0 %v4014_v13  ;;  %v5535_v23 = vrot.slane %v4755_v40, 1  ;;  %v4019_v46 = vld [vmem:[#allocation6 + $0x110] sm:$0xff]  }
 0x100   : > { %1002 = vst.msk [vmem:[#allocation2 + $0x260] sm:$0xff] %vm709_vm3, %v970_v6  ;;  %2502 = vmatprep.mubr.bf16.mxu1 %v2006_v33  ;;  %v1777_v6 = vrot.slane %v1775_v0, 1  ;;  %v1318_v33 = vrot.slane %v4010_v7, 1  ;;  %v744_v63 = vsel %vm726_vm2, %v742_v5, %v5533_v58  ;;  %3746 = vmatpush3.bf16.msra.mxu0 %v4014_v13  ;;  %v4018_v20 = vld [vmem:[%s4424_s21 + $0xc8] ss:$0 sps:$4 sm:$0x11]  }
 0x101   : > { %3618 = vmatpush3.bf16.msra.mxu1 %v4002_v8  ;;  %v692_v9 = vpop.permute.xlu1 %691  ;;  %v2005_v27 = vld [vmem:[#allocation2 + $0x230] sm:$0xff]  ;;  %v1897_v8 = vrot.slane %v4007_v35, 1  ;;  %796 = vst.msk [vmem:[#allocation2 + $0xd0] sm:$0xff] %vm403_vm1, %v744_v63  ;;  %v1230_v28 = vsel %vm468_vm0, %v1225_v51, %v1229_v22  ;;  %3747 = vmatprep.subr.bf16.mxu0 %v4019_v46  ;;  %v1239_v7 = vshll.u32 %v4018_v20, 16  ;;  %v1321_v32 = vrot.slane %v4018_v20, 1  ;;  %v4020_v19 = vld [vmem:[#allocation6 + $0x118] sm:$0xff]  }
 0x102   : > { %725 = vst.msk [vmem:[#allocation2 + $0x258] sm:$0xff] %vm709_vm3, %v692_v9  ;;  %3619 = vmatprep.subr.bf16.mxu1 %v4004_v45  ;;  %v1319_v9 = vsel %vm726_vm2, %v1317_v1, %v1318_v33  ;;  %v1778_v47 = vsel %vm468_vm0, %v1773_v16, %v1777_v6  ;;  %v4016_v1 = vld [vmem:[%s4424_s21 + $0xd4] ss:$0 sps:$4 sm:$0x11]   ;;  %v5537_v11 = vshrl.u32 %v4553_v18, 16  ;;  %v760_v33 = vrot.slane %v4898_v34, 1 }
 0x103   : > { %v946_v49 = vpop.permute.xlu0 %945  ;;  %v1946_v17 = vld [vmem:[#allocation2 + $0x58] sm:$0xff]  ;;  %v1899_v62 = vsel %vm726_vm2, %v1897_v8, %v1898_v59  ;;  %1351 = vrot.lane.b32.xlu1 %v1319_v9, %s4204_s24  ;;  %1819 = vrot.lane.b32.xlu0 %v1778_v47, %s4204_s24  ;;  %1273 = vst.msk [vmem:[#allocation2 + $0x240] sm:$0xff] %vm403_vm1, %v1230_v28  ;;  %v1787_v35 = vshll.u32 %v4016_v1, 16  ;;  %v1901_v31 = vrot.slane %v4016_v1, 1  ;;  %v1241_v51 = vrot.slane %v1239_v7, 1  ;;  %v5543_v5 = vld [vmem:[#allocation16_spill] sm:$0xff] }
 0x104   : > { %990 = vst.msk [vmem:[#allocation2 + $0x80] sm:$0xff] %vm709_vm3, %v946_v49  ;;  %2503 = vmatmul.mubr.bf16.gmra.mrb[8].mxu1 %v2005_v27  ;;  %2406 = vmatprep.mubr.bf16.mxu0 %v1946_v17  ;;  %v748_v27 = vrot.slane %v4744_v15, 1  ;;  %v4015_v49 = vld [vmem:[%s4424_s21 + $0xcc] sm:$0xff]   ;;  %v751_v17 = vrot.slane %v4782_v41, 1  ;;  %v5534_v15 = vrot.slane %v4717_v10, 1  ;;  %v5536_v10 = vrot.slane %v4794_v30, 1 }
 0x105   : > { %3620 = vmatpush3.bf16.msra.mxu1 %v4005_v50  ;;  %v668_v26 = vpop.permute.xlu1 %667  ;;  %v1945_v12 = vld [vmem:[#allocation2 + $0x50] sm:$0xff]  ;;  %1933 = vst.msk [vmem:[#allocation2 + $0x250] sm:$0xff] %vm403_vm1, %v1899_v62  ;;  %v1780_v41 = vshrl.u32 %v4015_v49, 16  ;;  %1550 = vst.msk [vmem:[#allocation2 + $0x270] sm:$0xff] %vm403_vm1, %v4015_v49  ;;  %v1789_v54 = vrot.slane %v1787_v35, 1  ;;  %3748 = vmatpush3.bf16.msra.mxu0 %v4019_v46  ;;  %v1322_v18 = vsel %vm726_vm2, %v1320_v42, %v1321_v32  ;;  %v5544_v22 = vrot.slane %v5543_v5, 1 }
 0x106   : > { %713 = vst.msk [vmem:[#allocation2 + $0x78] sm:$0xff] %vm709_vm3, %v668_v26  ;;  %2407 = vmatmul.mubr.bf16.gmra.mrb[8].mxu0 %v1945_v12  ;;  %3621 = vmatprep.subr.bf16.mxu1 %v4006_v38  ;;  %v747_v44 = vsel %vm726_vm2, %v745_v43, %v5534_v15  ;;  %v750_v24 = vsel %vm726_vm2, %v748_v27, %v5535_v23  ;;  %v1782_v38 = vshll.u32 %v4015_v49, 16  ;;  %v1900_v26 = vrot.slane %v4015_v49, 1  ;;  %v5538_v29 = vld [vmem:[#allocation13_spill] sm:$0xff] }
 0x107   : > { %v1792_v2 = vpop.permute.xlu0 %1791  ;;  %v2011_v48 = vld [vmem:[#allocation2 + $0x260] sm:$0xff]  ;;  %797 = vst.msk [vmem:[#allocation2 + $0xf8] sm:$0xff] %vm403_vm1, %v747_v44  ;;  %798 = vst.msk [vmem:[#allocation2 + $0x120] sm:$0xff] %vm403_vm1, %v750_v24  ;;  %v753_v40 = vsel %vm726_vm2, %v751_v17, %v5536_v10  ;;  %v1237_v6 = vor.u32 %v5538_v29, %v5537_v11  ;;  %1353 = vrot.lane.b32.xlu1 %v1322_v18, %s4204_s24  ;;  %v762_v53 = vsel %vm726_vm2, %v760_v33, %v5544_v22  ;;  %v1944_v18 = vld [vmem:[#allocation2 + $0x48] sm:$0xff] }
 0x108   : > { %1839 = vst.msk [vmem:[#allocation2 + $0x18] sm:$0xff] %vm709_vm3, %v1792_v2  ;;  %2510 = vmatprep.mubr.bf16.mxu1 %v2011_v48  ;;  %v1902_v0 = vsel %vm726_vm2, %v1900_v26, %v1901_v31  ;;  %v754_v48 = vrot.slane %v4820_v39, 1  ;;  %3749 = vmatprep.subr.bf16.mxu0 %v4020_v19  ;;  %v1954_v22 = vld [vmem:[#allocation2 + $0x98] sm:$0xff] }
 0x109   : > { %3622 = vmatpush3.bf16.msra.mxu1 %v4009_v57  ;;  %v1324_v36 = vpop.permute.xlu1 %1323  ;;  %v2010_v3 = vld [vmem:[#allocation2 + $0x258] sm:$0xff]  ;;  %799 = vst.msk [vmem:[#allocation2 + $0x148] sm:$0xff] %vm403_vm1, %v753_v40  ;;  %v1784_v57 = vrot.slane %v1782_v38, 1  ;;  %1934 = vst.msk [vmem:[#allocation2 + $0x278] sm:$0xff] %vm403_vm1, %v1902_v0  ;;  %v1242_v42 = vsel %vm468_vm0, %v1237_v6, %v1241_v51  ;;  %3750 = vmatpush3.bf16.msra.mxu0 %v4020_v19  ;;  %v1939_v19 = vld [vmem:[#allocation2 + $0x20] sm:$0xff] }
 0x10a   : > { %1371 = vst.msk [vmem:[#allocation2 + $0x10] sm:$0xff] %vm709_vm3, %v1324_v36  ;;  %3623 = vmatprep.subr.bf16.mxu1 %v4011_v52  ;;  %v757_v52 = vrot.slane %v4862_v21, 1  ;;  %v5539_v36 = vld [vmem:[#allocation14_spill] sm:$0xff] }
 0x10b   : > { %v948_v45 = vpop.permute.xlu0 %947  ;;  %v1951_v25 = vld [vmem:[#allocation2 + $0x80] sm:$0xff]  ;;  %v1785_v59 = vor.u32 %v1784_v57, %v1780_v41  ;;  %802 = vst.msk [vmem:[#allocation2 + $0x1c0] sm:$0xff] %vm403_vm1, %v762_v53  ;;  %1274 = vst.msk [vmem:[#allocation2 + $0x268] sm:$0xff] %vm403_vm1, %v1242_v42 }
 0x10c   : > { %2511 = vmatmul.mubr.bf16.gmra.mrb[12].mxu1 %v2010_v3  ;;  %991 = vst.msk [vmem:[#allocation2 + $0xa8] sm:$0xff] %vm709_vm3, %v948_v45  ;;  %2414 = vmatprep.mubr.bf16.mxu0 %v1951_v25  ;;  %v5540_v3 = vrot.slane %v5539_v36, 1 }
 0x10d   : > { %3624 = vmatpush3.bf16.msra.mxu1 %v4012_v37  ;;  %v1950_v61 = vld [vmem:[#allocation2 + $0x78] sm:$0xff]  ;;  %v670_v50 = vpop.permute.xlu1 %669  ;;  %v5541_v37 = vld [vmem:[#allocation15_spill] sm:$0xff]  ;;  %v1790_v4 = vsel %vm468_vm0, %v1785_v59, %v1789_v54 }
 0x10e   : > { %2415 = vmatmul.mubr.bf16.gmra.mrb[12].mxu0 %v1950_v61  ;;  %714 = vst.msk [vmem:[#allocation2 + $0xa0] sm:$0xff] %vm709_vm3, %v670_v50  ;;  %3625 = vmatprep.subr.bf16.mxu1 %v4013_v55  ;;  %v756_v39 = vsel %vm726_vm2, %v754_v48, %v5540_v3  ;;  %v5542_v21 = vrot.slane %v5541_v37, 1 }
 0x10f   : > { %v1794_v14 = vpop.permute.xlu0 %1793  ;;  %v1938_v12 = vld [vmem:[#allocation2 + $0x18] sm:$0xff]  ;;  %800 = vst.msk [vmem:[#allocation2 + $0x170] sm:$0xff] %vm403_vm1, %v756_v39  ;;  %1821 = vrot.lane.b32.xlu0 %v1790_v4, %s4204_s24 }
 0x110   : > { %1840 = vst.msk [vmem:[#allocation2 + $0x40] sm:$0xff] %vm709_vm3, %v1794_v14  ;;  %2551 = vmatprep.mubr.bf16.mxu1 %v1938_v12  ;;  %v759_v62 = vsel %vm726_vm2, %v757_v52, %v5542_v21 }
 0x111   : > { %3626 = vmatpush3.bf16.msra.mxu1 %v4017_v56  ;;  %v1937_v60 = vld [vmem:[#allocation2 + $0x10] sm:$0xff]  ;;  %v1326_v2 = vpop.permute.xlu1 %1325  ;;  %801 = vst.msk [vmem:[#allocation2 + $0x198] sm:$0xff] %vm403_vm1, %v759_v62 }
 0x112   : > { %1372 = vst.msk [vmem:[#allocation2 + $0x38] sm:$0xff] %vm709_vm3, %v1326_v2 }
 0x113   : > { %v950_v8 = vpop.permute.xlu0 %949  ;;  %v1956_v30 = vld [vmem:[#allocation2 + $0xa8] sm:$0xff] }
 0x114   : > { %992 = vst.msk [vmem:[#allocation2 + $0xd0] sm:$0xff] %vm709_vm3, %v950_v8  ;;  %2552 = vmatmul.mubr.bf16.vlgmr.msra.gmra.mrb[16].mxu1 %v1937_v60  ;;  %2422 = vmatprep.mubr.bf16.mxu0 %v1956_v30 }
 0x115   : > { %v672_v16 = vpop.permute.xlu1 %671  ;;  %v1955_v45 = vld [vmem:[#allocation2 + $0xa0] sm:$0xff] }
 0x116   : > { %715 = vst.msk [vmem:[#allocation2 + $0xc8] sm:$0xff] %vm709_vm3, %v672_v16  ;;  %2423 = vmatmul.mubr.bf16.gmra.mrb[16].mxu0 %v1955_v45 }
 0x117   : > { %v1796_v34 = vpop.permute.xlu0 %1795  ;;  %v1943_v25 = vld [vmem:[#allocation2 + $0x40] sm:$0xff] }
 0x118   : > { %1841 = vst.msk [vmem:[#allocation2 + $0x68] sm:$0xff] %vm709_vm3, %v1796_v34  ;;  %2559 = vmatprep.mubr.bf16.mxu1 %v1943_v25  ;;  %v1949_v34 = vld [vmem:[#allocation2 + $0x70] sm:$0xff] }
 0x119   : > { %v1328_v9 = vpop.permute.xlu1 %1327  ;;  %v1942_v55 = vld [vmem:[#allocation2 + $0x38] sm:$0xff] }
 0x11a   : > { %1373 = vst.msk [vmem:[#allocation2 + $0x60] sm:$0xff] %vm709_vm3, %v1328_v9  ;;  %v1959_v9 = vld [vmem:[#allocation2 + $0xc0] sm:$0xff] }
 0x11b   : > { %v952_v47 = vpop.permute.xlu0 %951  ;;  %v1961_v61 = vld [vmem:[#allocation2 + $0xd0] sm:$0xff] }
 0x11c   : > { %993 = vst.msk [vmem:[#allocation2 + $0xf8] sm:$0xff] %vm709_vm3, %v952_v47  ;;  %2560 = vmatmul.mubr.bf16.gmra.mrb[20].mxu1 %v1942_v55  ;;  %2430 = vmatprep.mubr.bf16.mxu0 %v1961_v61  ;;  %v1964_v61 = vld [vmem:[#allocation2 + $0xe8] sm:$0xff] }
 0x11d   : > { %v674_v13 = vpop.permute.xlu1 %673  ;;  %v1960_v58 = vld [vmem:[#allocation2 + $0xc8] sm:$0xff] }
 0x11e   : > { %716 = vst.msk [vmem:[#allocation2 + $0xf0] sm:$0xff] %vm709_vm3, %v674_v13  ;;  %2431 = vmatmul.mubr.bf16.gmra.mrb[20].mxu0 %v1960_v58 }
 0x11f   : > { %v1948_v63 = vld [vmem:[#allocation2 + $0x68] sm:$0xff]  ;;  %v1798_v43 = vpop.permute.xlu0 %1797 }
 0x120   : > { %2567 = vmatprep.mubr.bf16.mxu1 %v1948_v63  ;;  %1842 = vst.msk [vmem:[#allocation2 + $0x90] sm:$0xff] %vm709_vm3, %v1798_v43  ;;  %v1969_v63 = vld [vmem:[#allocation2 + $0x110] sm:$0xff] }
 0x121   : > { %v1330_v27 = vpop.permute.xlu1 %1329  ;;  %v1947_v50 = vld [vmem:[#allocation2 + $0x60] sm:$0xff] }
 0x122   : > { %1374 = vst.msk [vmem:[#allocation2 + $0x88] sm:$0xff] %vm709_vm3, %v1330_v27  ;;  %v1974_v27 = vld [vmem:[#allocation2 + $0x138] sm:$0xff] }
 0x123   : > { %v1966_v49 = vld [vmem:[#allocation2 + $0xf8] sm:$0xff]  ;;  %v954_v17 = vpop.permute.xlu0 %953 }
 0x124   : > { %2568 = vmatmul.mubr.bf16.gmra.mrb[24].mxu1 %v1947_v50  ;;  %2438 = vmatprep.mubr.bf16.mxu0 %v1966_v49  ;;  %994 = vst.msk [vmem:[#allocation2 + $0x120] sm:$0xff] %vm709_vm3, %v954_v17 }
 0x125   : > { %v676_v28 = vpop.permute.xlu1 %675  ;;  %v1965_v14 = vld [vmem:[#allocation2 + $0xf0] sm:$0xff] }
 0x126   : > { %717 = vst.msk [vmem:[#allocation2 + $0x118] sm:$0xff] %vm709_vm3, %v676_v28  ;;  %2439 = vmatmul.mubr.bf16.gmra.mrb[24].mxu0 %v1965_v14  ;;  %v1979_v28 = vld [vmem:[#allocation2 + $0x160] sm:$0xff]  ;;  %v1984_v14 = vld [vmem:[#allocation2 + $0x188] sm:$0xff] }
 0x127   : > { %v1800_v1 = vpop.permute.xlu0 %1799  ;;  %v1953_v56 = vld [vmem:[#allocation2 + $0x90] sm:$0xff] }
 0x128   : > { %1843 = vst.msk [vmem:[#allocation2 + $0xb8] sm:$0xff] %vm709_vm3, %v1800_v1  ;;  %2575 = vmatprep.mubr.bf16.mxu1 %v1953_v56 }
 0x129   : > { %v1332_v15 = vpop.permute.xlu1 %1331  ;;  %v1952_v44 = vld [vmem:[#allocation2 + $0x88] sm:$0xff] }
 0x12a   : > { %1375 = vst.msk [vmem:[#allocation2 + $0xb0] sm:$0xff] %vm709_vm3, %v1332_v15 }
 0x12b   : > { %v956_v23 = vpop.permute.xlu0 %955  ;;  %v1971_v24 = vld [vmem:[#allocation2 + $0x120] sm:$0xff] }
 0x12c   : > { %2576 = vmatmul.mubr.bf16.gmra.mrb[28].mxu1 %v1952_v44  ;;  %995 = vst.msk [vmem:[#allocation2 + $0x148] sm:$0xff] %vm709_vm3, %v956_v23  ;;  %2446 = vmatprep.mubr.bf16.mxu0 %v1971_v24  ;;  %v1989_v23 = vld [vmem:[#allocation2 + $0x1b0] sm:$0xff]  ;;  %v1994_v24 = vld [vmem:[#allocation2 + $0x1d8] sm:$0xff] }
 0x12d   : > { %v678_v41 = vpop.permute.xlu1 %677  ;;  %v1970_v38 = vld [vmem:[#allocation2 + $0x118] sm:$0xff] }
 0x12e   : > { %718 = vst.msk [vmem:[#allocation2 + $0x140] sm:$0xff] %vm709_vm3, %v678_v41  ;;  %2447 = vmatmul.mubr.bf16.gmra.mrb[28].mxu0 %v1970_v38 }
 0x12f   : > { %v1802_v26 = vpop.permute.xlu0 %1801  ;;  %v1958_v12 = vld [vmem:[#allocation2 + $0xb8] sm:$0xff] }
 0x130   : > { %1844 = vst.msk [vmem:[#allocation2 + $0xe0] sm:$0xff] %vm709_vm3, %v1802_v26  ;;  %2583 = vmatprep.mubr.bf16.mxu1 %v1958_v12  ;;  %v1999_v26 = vld [vmem:[#allocation2 + $0x200] sm:$0xff] }
 0x131   : > { %v1334_v10 = vpop.permute.xlu1 %1333  ;;  %v1957_v40 = vld [vmem:[#allocation2 + $0xb0] sm:$0xff] }
 0x132   : > { %1376 = vst.msk [vmem:[#allocation2 + $0xd8] sm:$0xff] %vm709_vm3, %v1334_v10 }
 0x133   : > { %v958_v35 = vpop.permute.xlu0 %957  ;;  %v1976_v31 = vld [vmem:[#allocation2 + $0x148] sm:$0xff] }
 0x134   : > { %2584 = vmatmul.mubr.bf16.gmra.mrb[32].mxu1 %v1957_v40  ;;  %996 = vst.msk [vmem:[#allocation2 + $0x170] sm:$0xff] %vm709_vm3, %v958_v35  ;;  %2454 = vmatprep.mubr.bf16.mxu0 %v1976_v31  ;;  %v2004_v40 = vld [vmem:[#allocation2 + $0x228] sm:$0xff]  ;;  %v2009_v35 = vld [vmem:[#allocation2 + $0x250] sm:$0xff] }
 0x135   : > { %v680_v60 = vpop.permute.xlu1 %679  ;;  %v1975_v46 = vld [vmem:[#allocation2 + $0x140] sm:$0xff] }
 0x136   : > { %719 = vst.msk [vmem:[#allocation2 + $0x168] sm:$0xff] %vm709_vm3, %v680_v60  ;;  %2455 = vmatmul.mubr.bf16.gmra.mrb[32].mxu0 %v1975_v46 }
 0x137   : > { %v1963_v57 = vld [vmem:[#allocation2 + $0xe0] sm:$0xff]  ;;  %v1804_v2 = vpop.permute.xlu0 %1803 }
 0x138   : > { %2591 = vmatprep.mubr.bf16.mxu1 %v1963_v57  ;;  %1845 = vst.msk [vmem:[#allocation2 + $0x108] sm:$0xff] %vm709_vm3, %v1804_v2  ;;  %v2014_v2 = vld [vmem:[#allocation2 + $0x278] sm:$0xff] }
 0x139   : > { %v1336_v20 = vpop.permute.xlu1 %1335  ;;  %v1962_v54 = vld [vmem:[#allocation2 + $0xd8] sm:$0xff] }
 0x13a   : > { %1377 = vst.msk [vmem:[#allocation2 + $0x100] sm:$0xff] %vm709_vm3, %v1336_v20 }
 0x13b   : > { %v1981_v0 = vld [vmem:[#allocation2 + $0x170] sm:$0xff]  ;;  %v960_v8 = vpop.permute.xlu0 %959 }
 0x13c   : > { %2592 = vmatmul.mubr.bf16.gmra.mrb[36].mxu1 %v1962_v54  ;;  %2462 = vmatprep.mubr.bf16.mxu0 %v1981_v0  ;;  %997 = vst.msk [vmem:[#allocation2 + $0x198] sm:$0xff] %vm709_vm3, %v960_v8 }
 0x13d   : > { %v1980_v30 = vld [vmem:[#allocation2 + $0x168] sm:$0xff]  ;;  %v682_v48 = vpop.permute.xlu1 %681 }
 0x13e   : > { %720 = vst.msk [vmem:[#allocation2 + $0x190] sm:$0xff] %vm709_vm3, %v682_v48  ;;  %2463 = vmatmul.mubr.bf16.gmra.mrb[36].mxu0 %v1980_v30 }
 0x13f   : > { %v1806_v52 = vpop.permute.xlu0 %1805  ;;  %v1968_v59 = vld [vmem:[#allocation2 + $0x108] sm:$0xff] }
 0x140   : > { %1846 = vst.msk [vmem:[#allocation2 + $0x130] sm:$0xff] %vm709_vm3, %v1806_v52  ;;  %2599 = vmatprep.mubr.bf16.mxu1 %v1968_v59 }
 0x141   : > { %v1967_v7 = vld [vmem:[#allocation2 + $0x100] sm:$0xff]  ;;  %v1338_v32 = vpop.permute.xlu1 %1337 }
 0x142   : > { %1378 = vst.msk [vmem:[#allocation2 + $0x128] sm:$0xff] %vm709_vm3, %v1338_v32 }
 0x143   : > { %v962_v11 = vpop.permute.xlu0 %961  ;;  %v1986_v29 = vld [vmem:[#allocation2 + $0x198] sm:$0xff] }
 0x144   : > { %2600 = vmatmul.mubr.bf16.gmra.mrb[40].mxu1 %v1967_v7  ;;  %998 = vst.msk [vmem:[#allocation2 + $0x1c0] sm:$0xff] %vm709_vm3, %v962_v11  ;;  %2470 = vmatprep.mubr.bf16.mxu0 %v1986_v29 }
 0x145   : > { %v684_v6 = vpop.permute.xlu1 %683  ;;  %v1985_v36 = vld [vmem:[#allocation2 + $0x190] sm:$0xff] }
 0x146   : > { %721 = vst.msk [vmem:[#allocation2 + $0x1b8] sm:$0xff] %vm709_vm3, %v684_v6  ;;  %2471 = vmatmul.mubr.bf16.gmra.mrb[40].mxu0 %v1985_v36 }
 0x147   : > { %v1973_v3 = vld [vmem:[#allocation2 + $0x130] sm:$0xff] }
 0x148   : > { %2607 = vmatprep.mubr.bf16.mxu1 %v1973_v3  ;;  %v1808_v62 = vpop.permute.xlu0 %1807 }
 0x149   : > { %v1340_v39 = vpop.permute.xlu1 %1339  ;;  %v1972_v37 = vld [vmem:[#allocation2 + $0x128] sm:$0xff]  ;;  %1847 = vst.msk [vmem:[#allocation2 + $0x158] sm:$0xff] %vm709_vm3, %v1808_v62 }
 0x14a   : > { %1379 = vst.msk [vmem:[#allocation2 + $0x150] sm:$0xff] %vm709_vm3, %v1340_v39 }
 0x14b   : > { %v1991_v21 = vld [vmem:[#allocation2 + $0x1c0] sm:$0xff] }
 0x14c   : > { %2608 = vmatmul.mubr.bf16.gmra.mrb[44].mxu1 %v1972_v37  ;;  %2478 = vmatprep.mubr.bf16.mxu0 %v1991_v21 }
 0x14d   : > { %v1990_v33 = vld [vmem:[#allocation2 + $0x1b8] sm:$0xff]  ;;  %v1342_v4 = vpop.permute.xlu1 %1341 }
 0x14e   : > { %2479 = vmatmul.mubr.bf16.gmra.mrb[44].mxu0 %v1990_v33  ;;  %1380 = vst.msk [vmem:[#allocation2 + $0x178] sm:$0xff] %vm709_vm3, %v1342_v4 }
 0x14f   : > { %3751 = vmatprep.mubr.msk.bf16.mxu0 %vm403_vm1, %v1939_v19  ;;  %v1810_v16 = vpop.permute.xlu0 %1809 }
 0x150   : > { %v1978_v45 = vld [vmem:[#allocation2 + $0x158] sm:$0xff]  ;;  %1848 = vst.msk [vmem:[#allocation2 + $0x180] sm:$0xff] %vm709_vm3, %v1810_v16 }
 0x151   : > { %v1977_v51 = vld [vmem:[#allocation2 + $0x150] sm:$0xff]  ;;  %2615 = vmatprep.mubr.bf16.mxu1 %v1978_v45 }
 0x152   : > { %v1344_v25 = vpop.permute.xlu1 %1343 }
 0x153   : > { %1381 = vst.msk [vmem:[#allocation2 + $0x1a0] sm:$0xff] %vm709_vm3, %v1344_v25  ;;  %v1812_v53 = vpop.permute.xlu0 %1811 }
 0x154   : > { %2616 = vmatmul.mubr.bf16.gmra.mrb[48].mxu1 %v1977_v51  ;;  %1849 = vst.msk [vmem:[#allocation2 + $0x1a8] sm:$0xff] %vm709_vm3, %v1812_v53 }
 0x155   : > { %v1982_v5 = vld [vmem:[#allocation2 + $0x178] sm:$0xff] }
 0x156   : > { %3752 = vmatmul.mubr.msk.bf16.vlgmr.msra.gmra.mrb[48].mxu0 %vm403_vm1, %v1944_v18 }
 0x157   : > { %3755 = vmatprep.mubr.msk.bf16.mxu0 %vm403_vm1, %v1949_v34  ;;  %v1983_v42 = vld [vmem:[#allocation2 + $0x180] sm:$0xff] }
 0x158   : > { %2623 = vmatprep.mubr.bf16.mxu1 %v1983_v42 }
 0x15a   : > { %v1987_v47 = vld [vmem:[#allocation2 + $0x1a0] sm:$0xff] }
 0x15b   : > { %v1988_v58 = vld [vmem:[#allocation2 + $0x1a8] sm:$0xff] }
 0x15c   : > { %2624 = vmatmul.mubr.bf16.gmra.mrb[52].mxu1 %v1982_v5  ;;  %v1346_v55 = vpop.permute.xlu1 %1345 }
 0x15d   : > { %1382 = vst.msk [vmem:[#allocation2 + $0x1c8] sm:$0xff] %vm709_vm3, %v1346_v55  ;;  %2631 = vmatprep.mubr.bf16.mxu1 %v1988_v58 }
 0x15e   : > { %3756 = vmatmul.mubr.msk.bf16.gmra.mrb[52].mxu0 %vm403_vm1, %v1954_v22 }
 0x15f   : > { %3759 = vmatprep.mubr.msk.bf16.mxu0 %vm403_vm1, %v1959_v9  ;;  %v1814_v13 = vpop.permute.xlu0 %1813 }
 0x160   : > { %1850 = vst.msk [vmem:[#allocation2 + $0x1d0] sm:$0xff] %vm709_vm3, %v1814_v13 }
 0x164   : > { %2632 = vmatmul.mubr.bf16.gmra.mrb[56].mxu1 %v1987_v47  ;;  %v1992_v43 = vld [vmem:[#allocation2 + $0x1c8] sm:$0xff]  ;;  %v1348_v17 = vpop.permute.xlu1 %1347 }
 0x165   : > { %1383 = vst.msk [vmem:[#allocation2 + $0x1f0] sm:$0xff] %vm709_vm3, %v1348_v17 }
 0x166   : > { %3760 = vmatmul.mubr.msk.bf16.gmra.mrb[56].mxu0 %vm403_vm1, %v1964_v61 }
 0x167   : > { %3763 = vmatprep.mubr.msk.bf16.mxu0 %vm403_vm1, %v1969_v63  ;;  %v1816_v50 = vpop.permute.xlu0 %1815  ;;  %v1993_v49 = vld [vmem:[#allocation2 + $0x1d0] sm:$0xff] }
 0x168   : > { %1851 = vst.msk [vmem:[#allocation2 + $0x1f8] sm:$0xff] %vm709_vm3, %v1816_v50  ;;  %2639 = vmatprep.mubr.bf16.mxu1 %v1993_v49 }
 0x16b   : > { %v1350_v15 = vpop.permute.xlu1 %1349 }
 0x16c   : > { %2640 = vmatmul.mubr.bf16.gmra.mrb[60].mxu1 %v1992_v43  ;;  %v1997_v44 = vld [vmem:[#allocation2 + $0x1f0] sm:$0xff]  ;;  %1384 = vst.msk [vmem:[#allocation2 + $0x218] sm:$0xff] %vm709_vm3, %v1350_v15 }
 0x16e   : > { %3764 = vmatmul.mubr.msk.bf16.gmra.mrb[60].mxu0 %vm403_vm1, %v1974_v27 }
 0x16f   : > { %3767 = vmatprep.mubr.msk.bf16.mxu0 %vm403_vm1, %v1979_v28  ;;  %v1818_v1 = vpop.permute.xlu0 %1817  ;;  %v1998_v56 = vld [vmem:[#allocation2 + $0x1f8] sm:$0xff] }
 0x170   : > { %1852 = vst.msk [vmem:[#allocation2 + $0x220] sm:$0xff] %vm709_vm3, %v1818_v1  ;;  %2647 = vmatprep.mubr.bf16.mxu1 %v1998_v56 }
 0x173   : > { %v2002_v38 = vld [vmem:[#allocation2 + $0x218] sm:$0xff] }
 0x174   : > { %2648 = vmatmul.mubr.bf16.gmra.mrb[64].mxu1 %v1997_v44 }
 0x175   : > { %v1352_v12 = vpop.permute.xlu1 %1351  ;;  %v1820_v10 = vpop.permute.xlu0 %1819 }
 0x176   : > { %3768 = vmatmul.mubr.msk.bf16.gmra.mrb[64].mxu0 %vm403_vm1, %v1984_v14  ;;  %1385 = vst.msk [vmem:[#allocation2 + $0x240] sm:$0xff] %vm709_vm3, %v1352_v12  ;;  %1853 = vst.msk [vmem:[#allocation2 + $0x248] sm:$0xff] %vm709_vm3, %v1820_v10 }
 0x177   : > { %3771 = vmatprep.mubr.msk.bf16.mxu0 %vm403_vm1, %v1989_v23  ;;  %v2003_v41 = vld [vmem:[#allocation2 + $0x220] sm:$0xff] }
 0x178   : > { %2655 = vmatprep.mubr.bf16.mxu1 %v2003_v41 }
 0x179   : > { %v1354_v57 = vpop.permute.xlu1 %1353 }
 0x17a   : > { %1386 = vst.msk [vmem:[#allocation2 + $0x268] sm:$0xff] %vm709_vm3, %v1354_v57 }
 0x17c   : > { %2656 = vmatmul.mubr.bf16.gmra.mrb[68].mxu1 %v2002_v38 }
 0x17d   : > { %v2007_v31 = vld [vmem:[#allocation2 + $0x240] sm:$0xff]  ;;  %v2008_v60 = vld [vmem:[#allocation2 + $0x248] sm:$0xff] }
 0x17e   : > { %3772 = vmatmul.mubr.msk.bf16.gmra.mrb[68].mxu0 %vm403_vm1, %v1994_v24  ;;  %2663 = vmatprep.mubr.bf16.mxu1 %v2008_v60  ;;  %v5239_v24 = vld [vmem:[#allocation8] ss:$0 sm:$0xff] }
 0x17f   : > { %3775 = vmatprep.mubr.msk.bf16.mxu0 %vm403_vm1, %v1999_v26 }
 0x181   : > { %v1822_v46 = vpop.permute.xlu0 %1821  ;;  %v2012_v54 = vld [vmem:[#allocation2 + $0x268] sm:$0xff] }
 0x182   : > { %1854 = vst.msk [vmem:[#allocation2 + $0x270] sm:$0xff] %vm709_vm3, %v1822_v46 }
 0x184   : > { %2664 = vmatmul.mubr.bf16.gmra.mrb[72].mxu1 %v2007_v31 }
 0x186   : > { %3776 = vmatmul.mubr.msk.bf16.gmra.mrb[72].mxu0 %vm403_vm1, %v2004_v40 }
 0x187   : > { %3779 = vmatprep.mubr.msk.bf16.mxu0 %vm403_vm1, %v2009_v35 }
 0x189   : > { %v2013_v20 = vld [vmem:[#allocation2 + $0x270] sm:$0xff] }
 0x18a   : > { %2671 = vmatprep.mubr.bf16.mxu1 %v2013_v20 }
 0x18c   : > { %2672 = vmatmul.mubr.bf16.gmra.mrb[76].mxu1 %v2012_v54 }
 0x18e   : > { %3780 = vmatmul.mubr.msk.bf16.gmra.mrb[76].mxu0 %vm403_vm1, %v2014_v2 }
 0x1c7   : > { %v3587_v0 = vpop.f32.mrb[0].mxu1 }
 0x1c8   : > { %v3588_v8 = vpop.f32.mrb[1].mxu1 }
 0x1c9   : > { %v3515_v30 = vpop.f32.mrb[0].mxu0  ;;  %v5223_v48 = vadd.f32 %v3588_v8, %v3587_v0  ;;  %v3590_v52 = vpop.f32.mrb[2].mxu1 }
 0x1ca   : > { %v3516_v59 = vpop.f32.mrb[1].mxu0  ;;  %v3591_v7 = vpop.f32.mrb[3].mxu1 }
 0x1cb   : > { %v3517_v32 = vadd.f32 %v3516_v59, %v3515_v30  ;;  %v3518_v11 = vpop.f32.mrb[2].mxu0  ;;  %v5225_v29 = vadd.f32 %v3591_v7, %v3590_v52 }
 0x1cc   : > { %v3519_v6 = vpop.f32.mrb[3].mxu0 }
 0x1cd   : > { %v3520_v36 = vadd.f32 %v3519_v6, %v3518_v11  ;;  %v2393_v38 = vadd.f32 %v3517_v32, %v5239_v24 }
 0x1cf   : > { %v3593_v3 = vpop.f32.mrb[4].mxu1  ;;  %v2396_v40 = vadd.f32 %v3520_v36, %v5239_v24 }
 0x1d0   : > { %v3594_v39 = vpop.f32.mrb[5].mxu1 }
 0x1d1   : > { %v5227_v37 = vadd.f32 %v3594_v39, %v3593_v3  ;;  %v3596_v21 = vpop.f32.mrb[6].mxu1  ;;  %v3521_v62 = vpop.f32.mrb[4].mxu0 }
 0x1d2   : > { %v3597_v19 = vpop.f32.mrb[7].mxu1  ;;  %v3522_v33 = vpop.f32.mrb[5].mxu0 }
 0x1d3   : > { %v5229_v4 = vadd.f32 %v3597_v19, %v3596_v21  ;;  %v3523_v51 = vadd.f32 %v3522_v33, %v3521_v62  ;;  %v3524_v18 = vpop.f32.mrb[6].mxu0 }
 0x1d4   : > { %v3525_v16 = vpop.f32.mrb[7].mxu0 }
 0x1d5   : > { %v3526_v45 = vadd.f32 %v3525_v16, %v3524_v18  ;;  %v2401_v52 = vadd.f32 %v3523_v51, %v5239_v24 }
 0x1d7   : > { %v3599_v34 = vpop.f32.mrb[8].mxu1  ;;  %v2404_v11 = vadd.f32 %v3526_v45, %v5239_v24 }
 0x1d8   : > { %v3600_v25 = vpop.f32.mrb[9].mxu1 }
 0x1d9   : > { %v5231_v5 = vadd.f32 %v3600_v25, %v3599_v34  ;;  %v3602_v22 = vpop.f32.mrb[10].mxu1  ;;  %v3527_v53 = vpop.f32.mrb[8].mxu0 }
 0x1da   : > { %v3603_v42 = vpop.f32.mrb[11].mxu1  ;;  %v3528_v9 = vpop.f32.mrb[9].mxu0 }
 0x1db   : > { %v5233_v55 = vadd.f32 %v3603_v42, %v3602_v22  ;;  %v3529_v47 = vadd.f32 %v3528_v9, %v3527_v53  ;;  %v3530_v61 = vpop.f32.mrb[10].mxu0 }
 0x1dc   : > { %v3531_v13 = vpop.f32.mrb[11].mxu0 }
 0x1dd   : > { %v3532_v58 = vadd.f32 %v3531_v13, %v3530_v61  ;;  %v2409_v51 = vadd.f32 %v3529_v47, %v5239_v24 }
 0x1df   : > { %v3605_v63 = vpop.f32.mrb[12].mxu1  ;;  %v2412_v45 = vadd.f32 %v3532_v58, %v5239_v24 }
 0x1e0   : > { %v3606_v43 = vpop.f32.mrb[13].mxu1 }
 0x1e1   : > { %v5235_v27 = vadd.f32 %v3606_v43, %v3605_v63  ;;  %v3608_v50 = vpop.f32.mrb[14].mxu1  ;;  %v3533_v49 = vpop.f32.mrb[12].mxu0 }
 0x1e2   : > { %v3609_v17 = vpop.f32.mrb[15].mxu1  ;;  %v3534_v28 = vpop.f32.mrb[13].mxu0 }
 0x1e3   : > { %v5237_v14 = vadd.f32 %v3609_v17, %v3608_v50  ;;  %v3535_v1 = vadd.f32 %v3534_v28, %v3533_v49  ;;  %v3536_v56 = vpop.f32.mrb[14].mxu0 }
 0x1e4   : > { %v3537_v15 = vpop.f32.mrb[15].mxu0 }
 0x1e5   : > { %v3538_v44 = vadd.f32 %v3537_v15, %v3536_v56  ;;  %v2417_v47 = vadd.f32 %v3535_v1, %v5239_v24 }
 0x1e7   : > { %v3627_v23 = vpop.f32.mrb[16].mxu1  ;;  %v2420_v58 = vadd.f32 %v3538_v44, %v5239_v24 }
 0x1e8   : > { %v3628_v41 = vpop.f32.mrb[17].mxu1 }
 0x1e9   : > { %v3629_v26 = vadd.f32 %v3628_v41, %v3627_v23  ;;  %v3630_v12 = vpop.f32.mrb[18].mxu1  ;;  %v3539_v35 = vpop.f32.mrb[16].mxu0 }
 0x1ea   : > { %v3631_v10 = vpop.f32.mrb[19].mxu1  ;;  %v3540_v46 = vpop.f32.mrb[17].mxu0 }
 0x1eb   : > { %v3632_v31 = vadd.f32 %v3631_v10, %v3630_v12  ;;  %v5243_v60 = vadd.f32 %v3629_v26, %v2393_v38  ;;  %v3541_v57 = vadd.f32 %v3540_v46, %v3539_v35  ;;  %v3542_v2 = vpop.f32.mrb[18].mxu0 }
 0x1ec   : > { %v3543_v54 = vpop.f32.mrb[19].mxu0 }
 0x1ed   : > { %v5245_v20 = vadd.f32 %v3632_v31, %v2396_v40  ;;  %v3544_v0 = vadd.f32 %v3543_v54, %v3542_v2  ;;  %v2425_v1 = vadd.f32 %v3541_v57, %v5239_v24 }
 0x1ef   : > { %v3633_v8 = vpop.f32.mrb[20].mxu1  ;;  %v2428_v44 = vadd.f32 %v3544_v0, %v5239_v24 }
 0x1f0   : > { %v3634_v30 = vpop.f32.mrb[21].mxu1 }
 0x1f1   : > { %v3635_v59 = vadd.f32 %v3634_v30, %v3633_v8  ;;  %v3636_v7 = vpop.f32.mrb[22].mxu1  ;;  %v3545_v6 = vpop.f32.mrb[20].mxu0 }
 0x1f2   : > { %v3637_v32 = vpop.f32.mrb[23].mxu1  ;;  %v3546_v39 = vpop.f32.mrb[21].mxu0 }
 0x1f3   : > { %v3638_v36 = vadd.f32 %v3637_v32, %v3636_v7  ;;  %v5249_v3 = vadd.f32 %v3635_v59, %v2401_v52  ;;  %v3547_v21 = vadd.f32 %v3546_v39, %v3545_v6  ;;  %v3548_v62 = vpop.f32.mrb[22].mxu0 }
 0x1f4   : > { %v3549_v33 = vpop.f32.mrb[23].mxu0 }
 0x1f5   : > { %v5251_v19 = vadd.f32 %v3638_v36, %v2404_v11  ;;  %v3550_v18 = vadd.f32 %v3549_v33, %v3548_v62  ;;  %v2433_v57 = vadd.f32 %v3547_v21, %v5239_v24 }
 0x1f7   : > { %v3639_v16 = vpop.f32.mrb[24].mxu1  ;;  %v2436_v0 = vadd.f32 %v3550_v18, %v5239_v24 }
 0x1f8   : > { %v3640_v34 = vpop.f32.mrb[25].mxu1 }
 0x1f9   : > { %v3641_v25 = vadd.f32 %v3640_v34, %v3639_v16  ;;  %v3642_v22 = vpop.f32.mrb[26].mxu1  ;;  %v3551_v42 = vpop.f32.mrb[24].mxu0 }
 0x1fa   : > { %v3643_v53 = vpop.f32.mrb[27].mxu1  ;;  %v3552_v13 = vpop.f32.mrb[25].mxu0 }
 0x1fb   : > { %v3644_v9 = vadd.f32 %v3643_v53, %v3642_v22  ;;  %v5255_v61 = vadd.f32 %v3641_v25, %v2409_v51  ;;  %v3553_v63 = vadd.f32 %v3552_v13, %v3551_v42  ;;  %v3554_v43 = vpop.f32.mrb[26].mxu0 }
 0x1fc   : > { %v3555_v49 = vpop.f32.mrb[27].mxu0 }
 0x1fd   : > { %v5257_v50 = vadd.f32 %v3644_v9, %v2412_v45  ;;  %v3556_v17 = vadd.f32 %v3555_v49, %v3554_v43 }
 0x1ff   : > { %v3645_v28 = vpop.f32.mrb[28].mxu1 }
 0x200   : > { %v3646_v56 = vpop.f32.mrb[29].mxu1 }
 0x201   : > { %v3647_v15 = vadd.f32 %v3646_v56, %v3645_v28  ;;  %v3648_v23 = vpop.f32.mrb[30].mxu1  ;;  %v3557_v38 = vpop.f32.mrb[28].mxu0 }
 0x202   : > { %v3649_v41 = vpop.f32.mrb[31].mxu1  ;;  %v3558_v10 = vpop.f32.mrb[29].mxu0 }
 0x203   : > { %v3650_v26 = vadd.f32 %v3649_v41, %v3648_v23  ;;  %v5261_v12 = vadd.f32 %v3647_v15, %v2417_v47  ;;  %v3559_v40 = vadd.f32 %v3558_v10, %v3557_v38  ;;  %v3560_v35 = vpop.f32.mrb[30].mxu0  ;;  %v2441_v23 = vadd.f32 %v3553_v63, %v5239_v24 }
 0x204   : > { %v3561_v46 = vpop.f32.mrb[31].mxu0  ;;  %v2444_v38 = vadd.f32 %v3556_v17, %v5239_v24 }
 0x205   : > { %v5263_v31 = vadd.f32 %v3650_v26, %v2420_v58  ;;  %v3562_v2 = vadd.f32 %v3561_v46, %v3560_v35 }
 0x207   : > { %v3651_v54 = vpop.f32.mrb[32].mxu1 }
 0x208   : > { %v3652_v8 = vpop.f32.mrb[33].mxu1 }
 0x209   : > { %v3653_v30 = vadd.f32 %v3652_v8, %v3651_v54  ;;  %v3654_v52 = vpop.f32.mrb[34].mxu1  ;;  %v3563_v7 = vpop.f32.mrb[32].mxu0 }
 0x20a   : > { %v3655_v59 = vpop.f32.mrb[35].mxu1  ;;  %v3564_v6 = vpop.f32.mrb[33].mxu0 }
 0x20b   : > { %v3656_v32 = vadd.f32 %v3655_v59, %v3654_v52  ;;  %v5267_v11 = vadd.f32 %v3653_v30, %v2425_v1  ;;  %v3565_v36 = vadd.f32 %v3564_v6, %v3563_v7  ;;  %v3566_v39 = vpop.f32.mrb[34].mxu0  ;;  %v2452_v6 = vadd.f32 %v3562_v2, %v5239_v24 }
 0x20c   : > { %v3567_v33 = vpop.f32.mrb[35].mxu0 }
 0x20d   : > { %v5269_v62 = vadd.f32 %v3656_v32, %v2428_v44  ;;  %v3568_v16 = vadd.f32 %v3567_v33, %v3566_v39  ;;  %v2449_v44 = vadd.f32 %v3559_v40, %v5239_v24 }
 0x20f   : > { %v3657_v34 = vpop.f32.mrb[36].mxu1 }
 0x210   : > { %v3658_v51 = vpop.f32.mrb[37].mxu1 }
 0x211   : > { %v3659_v25 = vadd.f32 %v3658_v51, %v3657_v34  ;;  %v3660_v22 = vpop.f32.mrb[38].mxu1  ;;  %v3569_v45 = vpop.f32.mrb[36].mxu0 }
 0x212   : > { %v3661_v53 = vpop.f32.mrb[39].mxu1  ;;  %v3570_v13 = vpop.f32.mrb[37].mxu0 }
 0x213   : > { %v3662_v42 = vadd.f32 %v3661_v53, %v3660_v22  ;;  %v5273_v9 = vadd.f32 %v3659_v25, %v2433_v57  ;;  %v5275_v43 = vadd.f32 %v3570_v13, %v3569_v45  ;;  %v3572_v49 = vpop.f32.mrb[38].mxu0 }
 0x214   : > { %v3573_v56 = vpop.f32.mrb[39].mxu0 }
 0x215   : > { %v5277_v28 = vadd.f32 %v3662_v42, %v2436_v0  ;;  %v5279_v47 = vadd.f32 %v3573_v56, %v3572_v49  ;;  %v2457_v49 = vadd.f32 %v3565_v36, %v5239_v24 }
 0x217   : > { %v3663_v15 = vpop.f32.mrb[40].mxu1 }
 0x218   : > { %v3664_v21 = vpop.f32.mrb[41].mxu1 }
 0x219   : > { %v3665_v41 = vadd.f32 %v3664_v21, %v3663_v15  ;;  %v3666_v58 = vpop.f32.mrb[42].mxu1  ;;  %v3575_v26 = vpop.f32.mrb[40].mxu0 }
 0x21a   : > { %v3667_v18 = vpop.f32.mrb[43].mxu1  ;;  %v3576_v46 = vpop.f32.mrb[41].mxu0 }
 0x21b   : > { %v3668_v10 = vadd.f32 %v3667_v18, %v3666_v58  ;;  %v5283_v35 = vadd.f32 %v3665_v41, %v2441_v23  ;;  %v5285_v54 = vadd.f32 %v3576_v46, %v3575_v26  ;;  %v3578_v8 = vpop.f32.mrb[42].mxu0  ;;  %v2460_v41 = vadd.f32 %v3568_v16, %v5239_v24 }
 0x21c   : > { %v3579_v30 = vpop.f32.mrb[43].mxu0 }
 0x21d   : > { %v5287_v1 = vadd.f32 %v3668_v10, %v2444_v38  ;;  %v5289_v52 = vadd.f32 %v3579_v30, %v3578_v8 }
 0x21f   : > { %v3669_v59 = vpop.f32.mrb[44].mxu1 }
 0x220   : > { %v3670_v63 = vpop.f32.mrb[45].mxu1 }
 0x221   : > { %v3671_v7 = vadd.f32 %v3670_v63, %v3669_v59  ;;  %v3672_v17 = vpop.f32.mrb[46].mxu1  ;;  %v3581_v39 = vpop.f32.mrb[44].mxu0 }
 0x222   : > { %v3673_v32 = vpop.f32.mrb[47].mxu1  ;;  %v3582_v51 = vpop.f32.mrb[45].mxu0 }
 0x223   : > { %v3674_v33 = vadd.f32 %v3673_v32, %v3672_v17  ;;  %v5293_v34 = vadd.f32 %v3671_v7, %v2449_v44  ;;  %v5295_v57 = vadd.f32 %v3582_v51, %v3581_v39  ;;  %v3584_v25 = vpop.f32.mrb[46].mxu0 }
 0x224   : > { %v3585_v53 = vpop.f32.mrb[47].mxu0 }
 0x225   : > { %v5297_v22 = vadd.f32 %v3674_v33, %v2452_v6  ;;  %v5299_v0 = vadd.f32 %v3585_v53, %v3584_v25  ;;  %v2465_v6 = vadd.f32 %v5275_v43, %v5239_v24  ;;  %v2468_v53 = vadd.f32 %v5279_v47, %v5239_v24 }
 0x227   : > { %v3675_v40 = vpop.f32.mrb[48].mxu1 }
 0x228   : > { %v3676_v42 = vpop.f32.mrb[49].mxu1 }
 0x229   : > { %v3753_v45 = vpop.f32.mrb[48].mxu0  ;;  %v3677_v56 = vadd.f32 %v3676_v42, %v3675_v40  ;;  %v3678_v15 = vpop.f32.mrb[50].mxu1 }
 0x22a   : > { %v2723_v13 = vadd.f32 %v3753_v45, %v5249_v3  ;;  %v2714_v2 = vpop.f32.mrb[49].mxu0  ;;  %v3679_v18 = vpop.f32.mrb[51].mxu1 }
 0x22b   : > { %v2715_v21 = vadd.f32 %v2714_v2, %v5243_v60  ;;  %v3754_v23 = vpop.f32.mrb[50].mxu0  ;;  %v3680_v46 = vadd.f32 %v3679_v18, %v3678_v15  ;;  %v5308_v8 = vadd.f32 %v3677_v56, %v2457_v49 }
 0x22c   : > { %v2843_v58 = vmax.f32 %v2723_v13, 0.0  ;;  %v2726_v38 = vadd.f32 %v3754_v23, %v5251_v19  ;;  %v2717_v26 = vpop.f32.mrb[51].mxu0 }
 0x22d   : > { %v2841_v10 = vmax.f32 %v2715_v21, 0.0  ;;  %v2718_v3 = vadd.f32 %v2717_v26, %v5245_v20  ;;  %v5310_v60 = vadd.f32 %v3680_v46, %v2460_v41  ;;  %v2473_v26 = vadd.f32 %v5285_v54, %v5239_v24 }
 0x22e   : > { %v3468_v36 = vpack.c.bf16 %v2843_v58, %v2843_v58  ;;  %v2844_v30 = vmax.f32 %v2726_v38, 0.0 }
 0x22f   : > { %v3466_v59 = vpack.c.bf16 %v2841_v10, %v2841_v10  ;;  %v2842_v63 = vmax.f32 %v2718_v3, 0.0  ;;  %v3681_v16 = vpop.f32.mrb[52].mxu1 }
 0x230   : > { %3004 = vst.msk [vmem:[%s5312_s22 + $0x8] sm:$0xf] %vm3001_vm4, %v3468_v36  ;;  %v3469_v19 = vpack.c.bf16 %v2844_v30, %v2844_v30  ;;  %v3682_v7 = vpop.f32.mrb[53].mxu1  ;;  %v2476_v30 = vadd.f32 %v5289_v52, %v5239_v24 }
 0x231   : > { %3002 = vst.msk [vmem:[%s5312_s22] sm:$0xf] %vm3001_vm4, %v3466_v59  ;;  %v3467_v20 = vpack.c.bf16 %v2842_v63, %v2842_v63  ;;  %v3757_v44 = vpop.f32.mrb[52].mxu0  ;;  %v3683_v39 = vadd.f32 %v3682_v7, %v3681_v16  ;;  %v3684_v33 = vpop.f32.mrb[54].mxu1 }
 0x232   : > { %3005 = vst.msk [vmem:[%s5312_s22 + $0xc] sm:$0xf] %vm3001_vm4, %v3469_v19  ;;  %v2739_v17 = vadd.f32 %v3757_v44, %v5261_v12  ;;  %v2730_v32 = vpop.f32.mrb[53].mxu0  ;;  %v3685_v45 = vpop.f32.mrb[55].mxu1 }
 0x233   : > { %3003 = vst.msk [vmem:[%s5312_s22 + $0x4] sm:$0xf] %vm3001_vm4, %v3467_v20  ;;  %v2731_v51 = vadd.f32 %v2730_v32, %v5255_v61  ;;  %v3758_v25 = vpop.f32.mrb[54].mxu0  ;;  %v3686_v43 = vadd.f32 %v3685_v45, %v3684_v33  ;;  %v5330_v49 = vadd.f32 %v3683_v39, %v2465_v6 }
 0x234   : > { %v2847_v40 = vmax.f32 %v2739_v17, 0.0  ;;  %v2742_v12 = vadd.f32 %v3758_v25, %v5263_v31  ;;  %v2733_v42 = vpop.f32.mrb[55].mxu0 }
 0x235   : > { %v2845_v13 = vmax.f32 %v2731_v51, 0.0  ;;  %v2734_v2 = vadd.f32 %v2733_v42, %v5257_v50  ;;  %v5332_v23 = vadd.f32 %v3686_v43, %v2468_v53  ;;  %v2481_v53 = vadd.f32 %v5295_v57, %v5239_v24 }
 0x236   : > { %v3472_v56 = vpack.c.bf16 %v2847_v40, %v2847_v40  ;;  %v2848_v61 = vmax.f32 %v2742_v12, 0.0 }
 0x237   : > { %v3470_v15 = vpack.c.bf16 %v2845_v13, %v2845_v13  ;;  %v2846_v21 = vmax.f32 %v2734_v2, 0.0  ;;  %v3687_v41 = vpop.f32.mrb[56].mxu1  ;;  %v2484_v13 = vadd.f32 %v5299_v0, %v5239_v24 }
 0x238   : > { %3008 = vst.msk [vmem:[%s5312_s22 + $0x18] sm:$0xf] %vm3001_vm4, %v3472_v56  ;;  %v3473_v47 = vpack.c.bf16 %v2848_v61, %v2848_v61  ;;  %v3688_v50 = vpop.f32.mrb[57].mxu1 }
 0x239   : > { %3006 = vst.msk [vmem:[%s5312_s22 + $0x10] sm:$0xf] %vm3001_vm4, %v3470_v15  ;;  %v3471_v31 = vpack.c.bf16 %v2846_v21, %v2846_v21  ;;  %v3761_v58 = vpop.f32.mrb[56].mxu0  ;;  %v3689_v10 = vadd.f32 %v3688_v50, %v3687_v41  ;;  %v3690_v46 = vpop.f32.mrb[58].mxu1 }
 0x23a   : > { %3009 = vst.msk [vmem:[%s5312_s22 + $0x1c] sm:$0xf] %vm3001_vm4, %v3473_v47  ;;  %v2755_v18 = vadd.f32 %v3761_v58, %v5273_v9  ;;  %v2746_v38 = vpop.f32.mrb[57].mxu0  ;;  %v3691_v63 = vpop.f32.mrb[59].mxu1 }
 0x23b   : > { %3007 = vst.msk [vmem:[%s5312_s22 + $0x14] sm:$0xf] %vm3001_vm4, %v3471_v31  ;;  %v2747_v3 = vadd.f32 %v2746_v38, %v5267_v11  ;;  %v3762_v36 = vpop.f32.mrb[58].mxu0  ;;  %v3692_v54 = vadd.f32 %v3691_v63, %v3690_v46  ;;  %v5350_v44 = vadd.f32 %v3689_v10, %v2473_v26  ;;  %v2489_v10 = vadd.f32 %v5223_v48, %v5239_v24 }
 0x23c   : > { %v2851_v59 = vmax.f32 %v2755_v18, 0.0  ;;  %v2758_v9 = vadd.f32 %v3762_v36, %v5277_v28  ;;  %v2749_v19 = vpop.f32.mrb[59].mxu0 }
 0x23d   : > { %v2849_v20 = vmax.f32 %v2747_v3, 0.0  ;;  %v2750_v16 = vadd.f32 %v2749_v19, %v5269_v62  ;;  %v5352_v6 = vadd.f32 %v3692_v54, %v2476_v30 }
 0x23e   : > { %v3476_v7 = vpack.c.bf16 %v2851_v59, %v2851_v59  ;;  %v2852_v11 = vmax.f32 %v2758_v9, 0.0  ;;  %v2492_v59 = vadd.f32 %v5225_v29, %v5239_v24 }
 0x23f   : > { %v3474_v17 = vpack.c.bf16 %v2849_v20, %v2849_v20  ;;  %v2850_v32 = vmax.f32 %v2750_v16, 0.0  ;;  %v3693_v39 = vpop.f32.mrb[60].mxu1 }
 0x240   : > { %3012 = vst.msk [vmem:[%s5312_s22 + $0x28] sm:$0xf] %vm3001_vm4, %v3476_v7  ;;  %v3477_v52 = vpack.c.bf16 %v2852_v11, %v2852_v11  ;;  %v3694_v62 = vpop.f32.mrb[61].mxu1 }
 0x241   : > { %3010 = vst.msk [vmem:[%s5312_s22 + $0x20] sm:$0xf] %vm3001_vm4, %v3474_v17  ;;  %v3475_v28 = vpack.c.bf16 %v2850_v32, %v2850_v32  ;;  %v3765_v33 = vpop.f32.mrb[60].mxu0  ;;  %v3695_v40 = vadd.f32 %v3694_v62, %v3693_v39  ;;  %v3696_v45 = vpop.f32.mrb[62].mxu1  ;;  %v2497_v62 = vadd.f32 %v5227_v37, %v5239_v24 }
 0x242   : > { %3013 = vst.msk [vmem:[%s5312_s22 + $0x2c] sm:$0xf] %vm3001_vm4, %v3477_v52  ;;  %v2771_v51 = vadd.f32 %v3765_v33, %v5293_v34  ;;  %v2762_v25 = vpop.f32.mrb[61].mxu0  ;;  %v3697_v2 = vpop.f32.mrb[63].mxu1 }
 0x243   : > { %3011 = vst.msk [vmem:[%s5312_s22 + $0x24] sm:$0xf] %vm3001_vm4, %v3475_v28  ;;  %v2763_v12 = vadd.f32 %v2762_v25, %v5283_v35  ;;  %v3766_v42 = vpop.f32.mrb[62].mxu0  ;;  %v3698_v57 = vadd.f32 %v3697_v2, %v3696_v45  ;;  %v2642_v21 = vadd.f32 %v3695_v40, %v2481_v53  ;;  %v2500_v45 = vadd.f32 %v5229_v4, %v5239_v24 }
 0x244   : > { %v2855_v43 = vmax.f32 %v2771_v51, 0.0  ;;  %v2774_v34 = vadd.f32 %v3766_v42, %v5297_v22  ;;  %v2765_v56 = vpop.f32.mrb[63].mxu0 }
 0x245   : > { %v2853_v61 = vmax.f32 %v2763_v12, 0.0  ;;  %v2766_v15 = vadd.f32 %v2765_v56, %v5287_v1  ;;  %v2645_v58 = vadd.f32 %v3698_v57, %v2484_v13 }
 0x246   : > { %v3480_v47 = vpack.c.bf16 %v2855_v43, %v2855_v43  ;;  %v2856_v35 = vmax.f32 %v2774_v34, 0.0 }
 0x247   : > { %v3478_v31 = vpack.c.bf16 %v2853_v61, %v2853_v61  ;;  %v2854_v41 = vmax.f32 %v2766_v15, 0.0  ;;  %v3699_v22 = vpop.f32.mrb[64].mxu1 }
 0x248   : > { %3016 = vst.msk [vmem:[%s5312_s22 + $0x38] sm:$0xf] %vm3001_vm4, %v3480_v47  ;;  %v3481_v0 = vpack.c.bf16 %v2856_v35, %v2856_v35  ;;  %v3700_v38 = vpop.f32.mrb[65].mxu1 }
 0x249   : > { %3014 = vst.msk [vmem:[%s5312_s22 + $0x30] sm:$0xf] %vm3001_vm4, %v3478_v31  ;;  %v3479_v50 = vpack.c.bf16 %v2854_v41, %v2854_v41  ;;  %v3769_v18 = vpop.f32.mrb[64].mxu0  ;;  %v3701_v46 = vadd.f32 %v3700_v38, %v3699_v22  ;;  %v3702_v3 = vpop.f32.mrb[66].mxu1 }
 0x24a   : > { %3017 = vst.msk [vmem:[%s5312_s22 + $0x3c] sm:$0xf] %vm3001_vm4, %v3481_v0  ;;  %v2787_v1 = vadd.f32 %v3769_v18, %v5330_v49  ;;  %v2778_v26 = vpop.f32.mrb[65].mxu0  ;;  %v3703_v9 = vpop.f32.mrb[67].mxu1 }
 0x24b   : > { %3015 = vst.msk [vmem:[%s5312_s22 + $0x34] sm:$0xf] %vm3001_vm4, %v3479_v50  ;;  %v2779_v36 = vadd.f32 %v2778_v26, %v5308_v8  ;;  %v3770_v30 = vpop.f32.mrb[66].mxu0  ;;  %v3704_v48 = vadd.f32 %v3703_v9, %v3702_v3  ;;  %v2650_v16 = vadd.f32 %v3701_v46, %v2489_v10 }
 0x24c   : > { %v2859_v63 = vmax.f32 %v2787_v1, 0.0  ;;  %v2790_v49 = vadd.f32 %v3770_v30, %v5332_v23  ;;  %v2781_v19 = vpop.f32.mrb[67].mxu0  ;;  %v2505_v1 = vadd.f32 %v5231_v5, %v5239_v24 }
 0x24d   : > { %v2857_v20 = vmax.f32 %v2779_v36, 0.0  ;;  %v2782_v54 = vadd.f32 %v2781_v19, %v5310_v60  ;;  %v2653_v32 = vadd.f32 %v3704_v48, %v2492_v59  ;;  %v2508_v36 = vadd.f32 %v5233_v55, %v5239_v24 }
 0x24e   : > { %v3484_v7 = vpack.c.bf16 %v2859_v63, %v2859_v63  ;;  %v2860_v8 = vmax.f32 %v2790_v49, 0.0 }
 0x24f   : > { %v3482_v11 = vpack.c.bf16 %v2857_v20, %v2857_v20  ;;  %v2858_v17 = vmax.f32 %v2782_v54, 0.0  ;;  %v3705_v23 = vpop.f32.mrb[68].mxu1 }
 0x250   : > { %3020 = vst.msk [vmem:[%s5312_s22 + $0x48] sm:$0xf] %vm3001_vm4, %v3484_v7  ;;  %v3485_v29 = vpack.c.bf16 %v2860_v8, %v2860_v8  ;;  %v3706_v39 = vpop.f32.mrb[69].mxu1 }
 0x251   : > { %3018 = vst.msk [vmem:[%s5312_s22 + $0x40] sm:$0xf] %vm3001_vm4, %v3482_v11  ;;  %v3483_v52 = vpack.c.bf16 %v2858_v17, %v2858_v17  ;;  %v3773_v28 = vpop.f32.mrb[68].mxu0  ;;  %v3707_v51 = vadd.f32 %v3706_v39, %v3705_v23  ;;  %v3708_v25 = vpop.f32.mrb[70].mxu1  ;;  %v2513_v23 = vadd.f32 %v5235_v27, %v5239_v24 }
 0x252   : > { %3021 = vst.msk [vmem:[%s5312_s22 + $0x4c] sm:$0xf] %vm3001_vm4, %v3485_v29  ;;  %v2803_v33 = vadd.f32 %v3773_v28, %v2642_v21  ;;  %v2794_v60 = vpop.f32.mrb[69].mxu0  ;;  %v3709_v42 = vpop.f32.mrb[71].mxu1 }
 0x253   : > { %3019 = vst.msk [vmem:[%s5312_s22 + $0x44] sm:$0xf] %vm3001_vm4, %v3483_v52  ;;  %v2795_v53 = vadd.f32 %v2794_v60, %v5350_v44  ;;  %v3774_v40 = vpop.f32.mrb[70].mxu0  ;;  %v3710_v34 = vadd.f32 %v3709_v42, %v3708_v25  ;;  %v2658_v56 = vadd.f32 %v3707_v51, %v2497_v62  ;;  %v2516_v51 = vadd.f32 %v5237_v14, %v5239_v24 }
 0x254   : > { %v2863_v12 = vmax.f32 %v2803_v33, 0.0  ;;  %v2806_v13 = vadd.f32 %v3774_v40, %v2645_v58  ;;  %v2797_v43 = vpop.f32.mrb[71].mxu0 }
 0x255   : > { %v2861_v2 = vmax.f32 %v2795_v53, 0.0  ;;  %v2798_v37 = vadd.f32 %v2797_v43, %v5352_v6  ;;  %v2661_v21 = vadd.f32 %v3710_v34, %v2500_v45 }
 0x256   : > { %v3488_v61 = vpack.c.bf16 %v2863_v12, %v2863_v12  ;;  %v2864_v57 = vmax.f32 %v2806_v13, 0.0 }
 0x257   : > { %v3486_v44 = vpack.c.bf16 %v2861_v2, %v2861_v2  ;;  %v2862_v15 = vmax.f32 %v2798_v37, 0.0  ;;  %v3711_v6 = vpop.f32.mrb[72].mxu1 }
 0x258   : > { %3024 = vst.msk [vmem:[%s5312_s22 + $0x58] sm:$0xf] %vm3001_vm4, %v3488_v61  ;;  %v3489_v4 = vpack.c.bf16 %v2864_v57, %v2864_v57  ;;  %v3712_v50 = vpop.f32.mrb[73].mxu1 }
 0x259   : > { %3022 = vst.msk [vmem:[%s5312_s22 + $0x50] sm:$0xf] %vm3001_vm4, %v3486_v44  ;;  %v3487_v47 = vpack.c.bf16 %v2862_v15, %v2862_v15  ;;  %v3777_v35 = vpop.f32.mrb[72].mxu0  ;;  %v3713_v26 = vadd.f32 %v3712_v50, %v3711_v6  ;;  %v3714_v10 = vpop.f32.mrb[74].mxu1 }
 0x25a   : > { %3025 = vst.msk [vmem:[%s5312_s22 + $0x5c] sm:$0xf] %vm3001_vm4, %v3489_v4  ;;  %v2819_v31 = vadd.f32 %v3777_v35, %v2658_v56  ;;  %v2810_v41 = vpop.f32.mrb[73].mxu0  ;;  %v3715_v59 = vpop.f32.mrb[75].mxu1 }
 0x25b   : > { %3023 = vst.msk [vmem:[%s5312_s22 + $0x54] sm:$0xf] %vm3001_vm4, %v3487_v47  ;;  %v2811_v58 = vadd.f32 %v2810_v41, %v2650_v16  ;;  %v3778_v0 = vpop.f32.mrb[74].mxu0  ;;  %v3716_v49 = vadd.f32 %v3715_v59, %v3714_v10  ;;  %v2666_v20 = vadd.f32 %v3713_v26, %v2505_v1 }
 0x25c   : > { %v2867_v22 = vmax.f32 %v2819_v31, 0.0  ;;  %v2822_v18 = vadd.f32 %v3778_v0, %v2661_v21  ;;  %v2813_v38 = vpop.f32.mrb[75].mxu0 }
 0x25d   : > { %v2865_v46 = vmax.f32 %v2811_v58, 0.0  ;;  %v2814_v3 = vadd.f32 %v2813_v38, %v2653_v32  ;;  %v2669_v16 = vadd.f32 %v3716_v49, %v2508_v36 }
 0x25e   : > { %v3492_v30 = vpack.c.bf16 %v2867_v22, %v2867_v22  ;;  %v2868_v63 = vmax.f32 %v2822_v18, 0.0 }
 0x25f   : > { %v3490_v9 = vpack.c.bf16 %v2865_v46, %v2865_v46  ;;  %v2866_v19 = vmax.f32 %v2814_v3, 0.0  ;;  %v3717_v11 = vpop.f32.mrb[76].mxu1 }
 0x260   : > { %3028 = vst.msk [vmem:[%s5312_s22 + $0x68] sm:$0xf] %vm3001_vm4, %v3492_v30  ;;  %v3493_v48 = vpack.c.bf16 %v2868_v63, %v2868_v63  ;;  %v3718_v32 = vpop.f32.mrb[77].mxu1 }
 0x261   : > { %3026 = vst.msk [vmem:[%s5312_s22 + $0x60] sm:$0xf] %vm3001_vm4, %v3490_v9  ;;  %v3491_v5 = vpack.c.bf16 %v2866_v19, %v2866_v19  ;;  %v3781_v54 = vpop.f32.mrb[76].mxu0  ;;  %v3719_v28 = vadd.f32 %v3718_v32, %v3717_v11  ;;  %v3720_v39 = vpop.f32.mrb[78].mxu1 }
 0x262   : > { %3029 = vst.msk [vmem:[%s5312_s22 + $0x6c] sm:$0xf] %vm3001_vm4, %v3493_v48  ;;  %v2826_v7 = vpop.f32.mrb[77].mxu0  ;;  %v3721_v60 = vpop.f32.mrb[79].mxu1 }
 0x263   : > { %3027 = vst.msk [vmem:[%s5312_s22 + $0x64] sm:$0xf] %vm3001_vm4, %v3491_v5  ;;  %v2827_v55 = vadd.f32 %v2826_v7, %v2666_v20  ;;  %v3782_v8 = vpop.f32.mrb[78].mxu0  ;;  %v2674_v25 = vadd.f32 %v3719_v28, %v2513_v23  ;;  %v3722_v53 = vadd.f32 %v3721_v60, %v3720_v39 }
 0x264   : > { %v2829_v17 = vpop.f32.mrb[79].mxu0 }
 0x265   : > { %v2869_v29 = vmax.f32 %v2827_v55, 0.0  ;;  %v2830_v52 = vadd.f32 %v2829_v17, %v2669_v16  ;;  %v2835_v45 = vadd.f32 %v3781_v54, %v2674_v25  ;;  %v2677_v27 = vadd.f32 %v3722_v53, %v2516_v51 }
 0x267   : > { %v3494_v33 = vpack.c.bf16 %v2869_v29, %v2869_v29  ;;  %v2870_v62 = vmax.f32 %v2830_v52, 0.0  ;;  %v2871_v12 = vmax.f32 %v2835_v45, 0.0  ;;  %v2838_v42 = vadd.f32 %v3782_v8, %v2677_v27 }
 0x269   : > { %3030 = vst.msk [vmem:[%s5312_s22 + $0x70] sm:$0xf] %vm3001_vm4, %v3494_v33  ;;  %v3495_v40 = vpack.c.bf16 %v2870_v62, %v2870_v62  ;;  %v3496_v13 = vpack.c.bf16 %v2871_v12, %v2871_v12  ;;  %v2872_v43 = vmax.f32 %v2838_v42, 0.0 }
 0x26b   : > { %3031 = vst.msk [vmem:[%s5312_s22 + $0x74] sm:$0xf] %vm3001_vm4, %v3495_v40  ;;  %3032 = vst.msk [vmem:[%s5312_s22 + $0x78] sm:$0xf] %vm3001_vm4, %v3496_v13  ;;  %v3497_v14 = vpack.c.bf16 %v2872_v43, %v2872_v43 }
 0x26d   : > { %3033 = vst.msk [vmem:[%s5312_s22 + $0x7c] sm:$0xf] %vm3001_vm4, %v3497_v14 }
 0x26e   : > { %4124 = shalt.err (!%p4121_p2)
}
 0x26f   : > { %s4125_s29 = scalar_lea.hbm %s5433_s10, 2048  ;;  %s4129_s21 = scalar_lea.hbm %s5493_s3, 4096 }
 0x270   : > { %p4126_p0 = scmp.ne.s32.totalorder %s5433_s10, %s4125_s29  ;;  %p4130_p6 = scmp.lt.u32.totalorder %s5433_s10, %s5493_s3 }
 0x271   : > { %p4131_p7 = scmp.lt.u32.totalorder %s4129_s21, %s4125_s29  ;;  %p4133_p8 = scmp.lt.u32.totalorder %s4125_s29, %s5433_s10 }
 0x272   : > { %p4127_p4 = pnand %p4126_p0, %p5545_p12 }
 0x273   : > { %p4132_p11 = por %p4131_p7, %p4130_p6 }
 0x274   : > { %p4128_p13 = pneg %p4127_p4 }
 0x275   : > { %p4134_p1 = por %p4133_p8, %p4132_p11 }
 0x277   : > { %p4135_p10 = pnand %p4134_p1, %p4128_p13 }
 0x279   : > { %4138 = shalt.err (!%p4135_p10)
}
 0x27a   : > { %s4206_s11 = smov 4  }
 0x27b   : > { %3812 = dma.vmem_to_hbm [thread:$0]  (%p5545_p12), %s5437_s18, 2048, %s5433_s10, %s3035_s19, %s4204_s24, %s4204_s24, %s4206_s11  }
 0x27c PF: > { %s3067_s5 = sand.u32 1, %s4177_s12   ;;  %p5546_p3 = scmp.ne.s32.totalorder %s5504_s23, 0 }
 0x27d   : > { %p5547_p5 = scmp.ge.s32.totalorder %s4197_s17, 2  ;;  %s3068_s26 = scalar_lea.sflag [#allocation5], %s3067_s5 }
 0x27f   : > { %p3826_p9 = pnand %p5547_p5, %p5546_p3 }
 0x281   : > { %4172 = dma.done.wait (!%p3826_p9), %s3068_s26, 2048  }
 0x282   : > { %4174 = vsyncadd (!%p3826_p9), %s3068_s26, 4294965248  ;;  %s20_s17 = sadd.s32 1, %s4197_s17   ;;  %s5548_s12 = smov %s4181_s13 }
 0x283   : > { %p17_p2 = scmp.ge.s32.totalorder %s20_s17, 4   ;;  %s5549_s13 = smov %s4185_s14 }
 0x284   : > { %s5550_s14 = smov %s4376_s6  ;;  %s5551_s15 = smov %s4193_s16 }
 0x285   : > { %s5552_s16 = smov %s5554_s25  ;;  %19 = sbr.rel (!%p17_p2) target bundleno = 7 (0x7), region = 90 }
 0x28c   :  { %3073 = vsyncpa [#allocation4], 1 }
 0x28d   :  { %3075 = vsyncpa [#allocation4 + $0x1], 1 }
 0x28e   :  { %3076 = vsyncpa [#allocation7], 1 }
 0x28f   :  { %3077 = vsyncpa [#allocation5], 1 }
 0x290   :  { %3079 = vsyncpa [#allocation5 + $0x1], 1 }

// kernel: _lambda_.11
= control target key start
LH: loop header
LB: loop body
LE: loop exit
PB: predicated region body
PF: predicated region fallthrough
CT: control target
= control target key end

     0   :  { %8 = vsyncpa [#allocation4], 0  ;;  %s3154_s0 = inlined_call_operand.hbm [shape: bf16[2,10,10,64], index: 0, kind: input, shape index: {}]   ;;  %s3155_s1 = inlined_call_operand.hbm [shape: bf16[1,576,128], index: 1, kind: input, shape index: {}]   ;;  %s3156_s2 = inlined_call_operand.hbm [shape: f32[1,128], index: 2, kind: input, shape index: {}]   ;;  %s3157_s3 = inlined_call_operand.hbm [shape: bf16[2,8,8,128], index: 3, kind: output, shape index: {}]  }
   0x1   :  { %10 = vsyncpa [#allocation4 + $0x1], 0 }
   0x2   :  { %11 = vsyncpa [#allocation7], 0 }
   0x3   :  { %12 = vsyncpa [#allocation5], 0 }
   0x4   :  { %14 = vsyncpa [#allocation5 + $0x1], 0  ;;  %s2405_s12 = smov 0   ;;  %s2407_s13 = smov 0  }
   0x5   :  { %s2409_s14 = smov 0   ;;  %s2411_s15 = smov 0  }
   0x6   :  { %s2413_s16 = smov 0   ;;  %s2415_s17 = smov 0  }
   0x7 LB: > { %s1784_s18 = sadd.s32 4294967295, %s2375_s17   ;;  %s1785_s19 = sadd.s32 4294967294, %s2375_s17   ;;  %s2375_s17 = sphi %s2415_s17, %s20_s17   ;;  %s2371_s16 = sphi %s2413_s16, %s3187_s16   ;;  %s2367_s15 = sphi %s2411_s15, %s3186_s15   ;;  %s2363_s14 = sphi %s2409_s14, %s3185_s14   ;;  %s2359_s13 = sphi %s2407_s13, %s3184_s13   ;;  %s2355_s12 = sphi %s2405_s12, %s3183_s12  }
   0x8   : > { %p59_p0 = scmp.ne.s32.totalorder %s2359_s13, %s2355_s12  ;;  %p2439_p1 = scmp.eq.s32.totalorder %s1784_s18, 0 }
   0x9   : > { %p2443_p2 = scmp.eq.s32.totalorder %s1784_s18, 1  ;;  %p145_p3 = scmp.eq.s32.totalorder %s1785_s19, 1 }
   0xa   : > { %s3162_s20 = scalar_select %p2439_p1, 1, 0 }
   0xb   : > { %p2449_p4 = por %p2439_p1, %p59_p0  ;;  %p1786_p5 = scmp.ge.s32.totalorder %s2375_s17, 1 }
   0xc   : > { %p2454_p6 = por %p145_p3, %p59_p0  ;;  %p152_p7 = scmp.lt.s32.totalorder %s2375_s17, 3 }
   0xd   : > { %s3164_s22 = scalar_select %p2449_p4, 1, 0 }
   0xe   : > { %s3165_s23 = scalar_select %p2454_p6, 1, 0 }
   0xf   : > { %p2459_p8 = pnand %p1786_p5, %p152_p7  ;;  %s2377_s25 = smov [#allocation6]  }
  0x10   : > { %s166_s26 = sshll.u32 %s2377_s25, 4  ;;  %s2378_s28 = smov [#allocation8]   ;;  %s2463_s26 = int_to_ptr.vmem [resolvable:$true] %s166_s26 }
  0x11   : > { %p2068_p9 = pneg %p2459_p8  ;;  %s182_s29 = sshll.u32 %s2378_s28, 4  ;;  %s2474_s29 = int_to_ptr.vmem [resolvable:$true] %s182_s29 }
  0x12   : > { %s2203_s5 = scalar_lea.hbm %s3155_s1, 4608 }
  0x13   : > { %p2470_p11 = pnand %p2068_p9, %p2439_p1  ;;  %p2204_p12 = scmp.ne.s32.totalorder %s3155_s1, %s2203_s5 }
  0x14   : > { %p2210_p5 = scmp.lt.u32.totalorder %s2203_s5, %s3155_s1 }
  0x15   : > { %p2205_p13 = pneg %p2470_p11 }
  0x17   : > { %p2206_p0 = pnand %p2205_p13, %p2204_p12 }
  0x19   : > { %p2207_p3 = pneg %p2206_p0 }
  0x1b   : > { %p2212_p7 = pnand %p2210_p5, %p2207_p3 }
  0x1d   : > { %2215 = shalt.err (!%p2212_p7)
}
  0x1e   : > { %s2216_s10 = scalar_lea.vmem %s2463_s26, 4608  ;;  %p2224_p1 = scmp.lt.s32.totalorder %s2463_s26, %s2463_s26 }
  0x1f   : > { %p2217_p9 = scmp.ne.s32.totalorder %s2463_s26, %s2216_s10  ;;  %p2225_p12 = scmp.lt.s32.totalorder %s2216_s10, %s2216_s10 }
  0x21   : > { %p2219_p10 = pnand %p2217_p9, %p2205_p13  ;;  %p2226_p0 = por %p2225_p12, %p2224_p1 }
  0x23   : > { %p2220_p6 = pneg %p2219_p10 }
  0x25   : > { %p2227_p4 = pnand %p2226_p0, %p2220_p6 }
  0x27   : > { %2230 = shalt.err (!%p2227_p4)
}
  0x28   : > { %s2379_s11 = smov 64   ;;  %s2380_s18 = smov 4  }
  0x29   : > { %2071 = dma.hbm_to_vmem [thread:$0]  (!%p2470_p11), %s3155_s1, 4608, %s2463_s26, [#allocation7], %s2379_s11, %s2379_s11, %s2380_s18  }
  0x2a   : > { %s2231_s4 = scalar_lea.hbm %s3156_s2, 16 }
  0x2b   : > { %p2232_p1 = scmp.ne.s32.totalorder %s3156_s2, %s2231_s4  ;;  %p2238_p10 = scmp.lt.u32.totalorder %s2231_s4, %s3156_s2 }
  0x2d   : > { %p2234_p4 = pnand %p2232_p1, %p2205_p13 }
  0x2f   : > { %p2235_p6 = pneg %p2234_p4 }
  0x31   : > { %p2240_p3 = pnand %p2238_p10, %p2235_p6 }
  0x33   : > { %2243 = shalt.err (!%p2240_p3)
}
  0x34   : > { %s2244_s26 = scalar_lea.vmem %s2474_s29, 16  ;;  %s2251_s9 = scalar_lea.vmem %s2474_s29, 32 }
  0x35   : > { %p2245_p5 = scmp.ne.s32.totalorder %s2474_s29, %s2244_s26  ;;  %p2252_p12 = scmp.lt.s32.totalorder %s2474_s29, %s2474_s29 }
  0x36   : > { %p2253_p0 = scmp.lt.s32.totalorder %s2251_s9, %s2244_s26 }
  0x37   : > { %p2247_p7 = pnand %p2245_p5, %p2205_p13 }
  0x38   : > { %p2254_p1 = por %p2253_p0, %p2252_p12 }
  0x39   : > { %p2248_p9 = pneg %p2247_p7 }
  0x3b   : > { %p2255_p4 = pnand %p2254_p1, %p2248_p9 }
  0x3d   : > { %2258 = shalt.err (!%p2255_p4)
}
  0x3e   : > { %2074 = dma.hbm_to_vmem [thread:$0]  (!%p2470_p11), %s3156_s2, 16, %s2474_s29, [#allocation7]  }
  0x3f   : > { %s39_s25 = sadd.s32 1, %s2371_s16  ;;  %s46_s28 = sadd.s32 1, %s2363_s14 }
  0x40   : > { %p41_p13 = scmp.ge.s32.totalorder %s39_s25, 2  ;;  %p53_p6 = scmp.ne.s32.totalorder %s2363_s14, %s2359_s13 }
  0x41   : > { %p54_p10 = scmp.eq.s32.totalorder %s2375_s17, 0  ;;  %p2085_p3 = scmp.lt.s32.totalorder %s2375_s17, 2 }
  0x42   : > { %s3189_s25 = smov (%p41_p13, %s39_s25), 0  ;;  %p2542_p7 = por %p2443_p2, %p53_p6 }
  0x43   : > { %p55_p5 = por %p54_p10, %p53_p6  ;;  %s43_s30 = ssub.s32 %s2371_s16, %s3189_s25 }
  0x44   : > { %s3168_s27 = scalar_select %p2542_p7, 1, 0 }
  0x45   : > { %s193_s4 = sand.u32 1, %s2363_s14   ;;  %p44_p9 = scmp.eq.s32.totalorder %s43_s30, 0 }
  0x46   : > { %s2053_s29 = smul.u32 80, %s193_s4  ;;  %p2549_p11 = pnand %p2085_p3, %p55_p5 }
  0x47   : > { %s2554_s6 = scalar_select %p44_p9, %s2363_s14, %s46_s28  }
  0x48   : > { %s2054_s7 = smul.u32 1280, %s2371_s16  ;;  %s197_s8 = scalar_lea.vmem [#allocation3], %s2053_s29 }
  0x49   : > { %s204_s26 = sshll.u32 %s197_s8, 4  ;;  %s2564_s19 = scalar_lea.sflag [#allocation4], %s193_s4  ;;  %s2562_s26 = int_to_ptr.vmem [resolvable:$true] %s204_s26 }
  0x4a   : > { %s2560_s10 = scalar_lea.hbm %s3154_s0, %s2054_s7  ;;  %p2261_p12 = pneg %p2549_p11 }
  0x4b   : > { %s2259_s30 = scalar_lea.hbm %s2560_s10, 1280  ;;  %s2264_s7 = scalar_lea.hbm %s3154_s0, 2560 }
  0x4c   : > { %p2260_p2 = scmp.ne.s32.totalorder %s2560_s10, %s2259_s30  ;;  %p2265_p4 = scmp.lt.u32.totalorder %s2560_s10, %s3154_s0 }
  0x4d   : > { %p2266_p13 = scmp.lt.u32.totalorder %s2264_s7, %s2259_s30  ;;  %p2268_p10 = scmp.lt.u32.totalorder %s2259_s30, %s2560_s10 }
  0x4e   : > { %p2262_p0 = pnand %p2261_p12, %p2260_p2 }
  0x4f   : > { %p2267_p6 = por %p2266_p13, %p2265_p4 }
  0x50   : > { %p2263_p1 = pneg %p2262_p0 }
  0x51   : > { %p2269_p3 = por %p2268_p10, %p2267_p6 }
  0x53   : > { %p2270_p5 = pnand %p2269_p3, %p2263_p1 }
  0x55   : > { %2273 = shalt.err (!%p2270_p5)
}
  0x56   : > { %s2274_s4 = scalar_lea.vmem %s2562_s26, 1280  ;;  %s2381_s9 = smov [#allocation3]  }
  0x57   : > { %p2275_p9 = scmp.ne.s32.totalorder %s2562_s26, %s2274_s4  ;;  %s2279_s28 = sshll.u32 %s2381_s9, 4  ;;  %s2280_s28 = int_to_ptr.vmem [resolvable:$false] %s2279_s28 }
  0x58   : > { %s2281_s29 = scalar_lea.vmem %s2280_s28, 2560  ;;  %p2282_p7 = scmp.lt.s32.totalorder %s2562_s26, %s2280_s28 }
  0x59   : > { %p2277_p2 = pnand %p2275_p9, %p2261_p12  ;;  %p2283_p4 = scmp.lt.s32.totalorder %s2281_s29, %s2274_s4 }
  0x5b   : > { %p2278_p0 = pneg %p2277_p2  ;;  %p2284_p13 = por %p2283_p4, %p2282_p7 }
  0x5d   : > { %p2285_p6 = pnand %p2284_p13, %p2278_p0 }
  0x5f   : > { %2288 = shalt.err (!%p2285_p6)
}
  0x60   : > { %2078 = dma.hbm_to_vmem [thread:$0]  (!%p2549_p11), %s2560_s10, 1280, %s2562_s26, %s2564_s19, %s2379_s11, %s2379_s11, %s2380_s18  }
  0x61   : > { %216 = sbr.rel (%p2459_p8) target bundleno = 554 (0x22a), region = 32  ;;  %s2598_s30 = sand.u32 (!%p2459_p8), 1, %s2359_s13  }
  0x62   : > { %s2055_s7 = smul.u32 (!%p2459_p8), 80, %s2598_s30  ;;  %s219_s8 = scalar_lea.sflag (!%p2459_p8), [#allocation4], %s2598_s30 }
  0x63   : > { %p3170_p7 = scmp.ne.s32.totalorder (!%p2459_p8), %s3164_s22, 0 }
  0x64   : > { %s2602_s21 = scalar_lea.vmem (!%p2459_p8), [#allocation3], %s2055_s7 }
  0x68   : > { %2342 = dma.done.wait (%p3170_p7), %s219_s8, 1280  }
  0x69   : > { %2344 = vsyncadd (%p3170_p7), %s219_s8, 4294966016  ;;  %p3171_p11 = scmp.ne.s32.totalorder %s3162_s20, 0 }
  0x6b   : > { %2346 = dma.done.wait (%p3171_p11), [#allocation7], 4624  }
  0x6c   : > { %2348 = vsyncadd (%p3171_p11), [#allocation7], 4294962672  ;;  %vm448_vm0 = vcmask 1042432   ;;  %vm449_vm1 = vcmask 1046532   ;;  %vm275_vm2 = vcmask 519168   ;;  %s2382_s22 = smov 64  }
  0x6d   : > { %v1803_v0 = vld [vmem:[%s2602_s21 + $0x8] sm:$0xf]  ;;  %v1805_v1 = vld [vmem:[%s2602_s21 + $0x10] sm:$0xf]  ;;  %v1804_v2 = vld [vmem:[%s2602_s21 + $0xc] sm:$0x1] }
  0x6e   : > { %vm284_vm3 = vsmask.f32 3328  ;;  %vm285_vm4 = vsmask.f32 7440  ;;  %527 = vrot.lane.b32.xlu1 %v1803_v0, %s2382_s22  ;;  %v560_v3 = vshrl.u32 %v1803_v0, 16  ;;  %v563_v4 = vshll.u32 %v1803_v0, 16  ;;  %vm2616_vm5 = vmor %vm448_vm0, %vm449_vm1 }
  0x6f   : > { %v574_v5 = vshrl.u32 %v1805_v1, 16  ;;  %v577_v6 = vshll.u32 %v1805_v1, 16  ;;  %v1806_v8 = vld [vmem:[%s2602_s21 + $0x14] sm:$0x1]  ;;  %v569_v9 = vshll.u32 %v1804_v2, 16  ;;  %v1819_v10 = vrot.slane %v1803_v0, 9  ;;  %vm2677_vm6 = vmor %vm284_vm3, %vm285_vm4 }
  0x70   : > { %v697_v11 = vrot.slane %v1804_v2, 5  ;;  %v583_v12 = vshll.u32 %v1806_v8, 16  ;;  %v2622_v13 = vld [vmem:[%s2602_s21] sm:$0xf]  ;;  %v562_v14 = vrot.slane %v560_v3, 4  ;;  %v565_v15 = vrot.slane %v563_v4, 5 }
  0x71   : > { %v576_v16 = vrot.slane %v574_v5, 4  ;;  %v579_v17 = vrot.slane %v577_v6, 5  ;;  %v2625_v18 = vld [vmem:[%s2602_s21 + $0x4] sm:$0x1]  ;;  %276 = vst.msk [vmem:[#allocation2] sm:$0xf] %vm275_vm2, %v2622_v13 }
  0x72   : > { %v2629_v19 = vrot.slane %v569_v9, 5  ;;  %v698_v20 = vsel %vm2616_vm5, %v1819_v10, %v697_v11  ;;  %v2633_v21 = vrot.slane %v583_v12, 5  ;;  %v1820_v22 = vrot.slane %v1805_v1, 9  ;;  %v1829_v23 = vld [vmem:[%s2602_s21 + $0x18] sm:$0xf]  ;;  %v2143_v24 = vld [vmem:[#allocation6 + $0x40] sm:$0xff]   ;;  %529 = vrot.lane.b32.xlu1 %v1805_v1, %s2382_s22 }
  0x73   : > { %v566_v25 = vor.u32 %v565_v15, %v562_v14  ;;  %v580_v26 = vor.u32 %v579_v17, %v576_v16  ;;  %727 = vrot.lane.b32.xlu0 %v698_v20, %s2382_s22  ;;  %v701_v27 = vrot.slane %v1806_v8, 5  ;;  %v288_v28 = vshrl.u32 %v2622_v13, 16  ;;  %v1830_v29 = vld [vmem:[%s2602_s21 + $0x1c] sm:$0x1]  ;;  %780 = vst.msk [vmem:[#allocation2 + $0x20] sm:$0xf] %vm275_vm2, %v1829_v23  ;;  %1941 = vmatprep.subr.bf16.mxu0 %v2143_v24 }
  0x74   : > { %v2642_v30 = vld [vmem:[%s2602_s21 + $0x8] sm:$0xf]  ;;  %v291_v31 = vshll.u32 %v2622_v13, 16  ;;  %v297_v32 = vshll.u32 %v2625_v18, 16  ;;  %v453_v33 = vrot.slane %v2625_v18, 5  ;;  %v802_v34 = vshrl.u32 %v1829_v23, 16 }
  0x75   : > { %v2648_v35 = vld [vmem:[%s2602_s21 + $0xc] sm:$0x1]  ;;  %277 = vst.msk [vmem:[#allocation2 + $0x14] sm:$0xf] %vm275_vm2, %v2642_v30  ;;  %v2652_v36 = vrot.slane %v566_v25, 4  ;;  %v2654_v37 = vrot.slane %v580_v26, 4  ;;  %v702_v38 = vsel %vm2616_vm5, %v1820_v22, %v701_v27 }
  0x76   : > { %v290_v39 = vrot.slane %v288_v28, 4  ;;  %v2659_v40 = vld [vmem:[%s2602_s21 + $0x18] sm:$0xf]  ;;  %v2144_v41 = vld [vmem:[#allocation6] sm:$0xff]   ;;  %v293_v42 = vrot.slane %v291_v31, 5  ;;  %v299_v43 = vrot.slane %v297_v32, 5  ;;  %729 = vrot.lane.b32.xlu1 %v702_v38, %s2382_s22 }
  0x77   : > { %v804_v44 = vrot.slane %v802_v34, 4  ;;  %v805_v45 = vshll.u32 %v1829_v23, 16  ;;  %279 = vst.msk [vmem:[#allocation2 + $0x3c] sm:$0xf] %vm275_vm2, %v2659_v40  ;;  %v811_v46 = vshll.u32 %v1830_v29, 16  ;;  %v1844_v47 = vrot.slane %v1829_v23, 9  ;;  %1942 = vmatpush3.bf16.msra.mxu0 %v2144_v41 }
  0x78   : > { %v953_v48 = vrot.slane %v1830_v29, 5  ;;  %v302_v49 = vshrl.u32 %v2642_v30, 16  ;;  %v2666_v50 = vld [vmem:[%s2602_s21 + $0x10] sm:$0xf]  ;;  %v294_v51 = vor.u32 %v293_v42, %v290_v39  ;;  %v305_v53 = vshll.u32 %v2642_v30, 16  ;;  %v2145_v56 = vld [vmem:[#allocation6 + $0x48] sm:$0xff]  }
  0x79   : > { %v807_v52 = vrot.slane %v805_v45, 5  ;;  %v311_v54 = vshll.u32 %v2648_v35, 16  ;;  %v2671_v55 = vld [vmem:[%s2602_s21 + $0x1c] sm:$0x1]  ;;  %779 = vst.msk [vmem:[#allocation2 + $0xc] sm:$0xf] %vm275_vm2, %v2666_v50  ;;  %1943 = vmatprep.subr.bf16.mxu0 %v2145_v56 }
  0x7a   : > { %v813_v58 = vrot.slane %v811_v46, 5  ;;  %v954_v59 = vsel %vm2616_vm5, %v1844_v47, %v953_v48  ;;  %v304_v60 = vrot.slane %v302_v49, 4  ;;  %v457_v61 = vrot.slane %v2648_v35, 5  ;;  %v2146_v62 = vld [vmem:[#allocation6 + $0xc0] sm:$0xff]   ;;  %v2147_v4 = vld [vmem:[#allocation6 + $0x8] sm:$0xff]   ;;  %v2149_v41 = vld [vmem:[#allocation6 + $0x50] sm:$0xff]  }
  0x7b   : > { %v295_v63 = vrot.slane %v294_v51, 4  ;;  %v808_v0 = vor.u32 %v807_v52, %v804_v44  ;;  %988 = vst.msk [vmem:[#allocation2 + $0x24] sm:$0xf] %vm275_vm2, %v954_v59  ;;  %v307_v1 = vrot.slane %v305_v53, 5  ;;  %v313_v2 = vrot.slane %v311_v54, 5  ;;  %1981 = vmatprep.subr.bf16.mxu1 %v2146_v62  ;;  %1944 = vmatpush3.bf16.msra.mxu0 %v2147_v4  ;;  %v2148_v29 = vld [vmem:[#allocation6 + $0x80] sm:$0xff]  }
  0x7c   : > { %v2686_v3 = vld [vmem:[%s2602_s21 + $0x10] sm:$0xf]  ;;  %v330_v5 = vshrl.u32 %v2659_v40, 16  ;;  %v333_v6 = vshll.u32 %v2659_v40, 16  ;;  %v339_v8 = vshll.u32 %v2671_v55, 16  ;;  %v465_v9 = vrot.slane %v2671_v55, 5  ;;  %1982 = vmatpush3.bf16.msra.mxu1 %v2148_v29  ;;  %1945 = vmatprep.subr.bf16.mxu0 %v2149_v41 }
  0x7d   : > { %v1828_v10 = vld [vmem:[%s2602_s21 + $0x14] sm:$0x1]  ;;  %278 = vst.msk [vmem:[#allocation2 + $0x28] sm:$0xf] %vm275_vm2, %v2686_v3  ;;  %v300_v11 = vsel %vm2677_vm6, %v295_v63, %v299_v43  ;;  %v809_v12 = vrot.slane %v808_v0, 4  ;;  %v308_v14 = vor.u32 %v307_v1, %v304_v60  ;;  %v788_v15 = vshrl.u32 %v2666_v50, 16 }
  0x7e   : > { %399 = vrot.lane.b32.xlu0 %v300_v11, %s2382_s22  ;;  %v332_v16 = vrot.slane %v330_v5, 4  ;;  %v335_v17 = vrot.slane %v333_v6, 5  ;;  %v341_v20 = vrot.slane %v339_v8, 5  ;;  %v791_v22 = vshll.u32 %v2666_v50, 16  ;;  %v2701_v23 = vld [vmem:[%s2602_s21 + $0x28] sm:$0xf] }
  0x7f   : > { %v814_v24 = vsel %vm2677_vm6, %v809_v12, %v813_v58  ;;  %v309_v25 = vrot.slane %v308_v14, 4  ;;  %v790_v26 = vrot.slane %v788_v15, 4  ;;  %v797_v27 = vshll.u32 %v1828_v10, 16  ;;  %v2706_v28 = vld [vmem:[%s2602_s21 + $0x20] sm:$0xf]  ;;  %v2150_v47 = vld [vmem:[#allocation6 + $0xc8] sm:$0xff]  }
  0x80   : > { %782 = vst.msk [vmem:[#allocation2 + $0x48] sm:$0xf] %vm275_vm2, %v2701_v23  ;;  %901 = vrot.lane.b32.xlu1 %v814_v24, %s2382_s22  ;;  %v336_v31 = vor.u32 %v335_v17, %v332_v16  ;;  %v793_v32 = vrot.slane %v791_v22, 5  ;;  %v1843_v34 = vrot.slane %v2666_v50, 9  ;;  %v949_v38 = vrot.slane %v1828_v10, 5  ;;  %1983 = vmatprep.subr.bf16.mxu1 %v2150_v47  ;;  %v2152_v11 = vld [vmem:[#allocation6 + $0x88] sm:$0xff]  }
  0x81   : > { %v2713_v39 = vld [vmem:[%s2602_s21 + $0x14] sm:$0x1]  ;;  %v314_v42 = vsel %vm2677_vm6, %v309_v25, %v313_v2  ;;  %v799_v43 = vrot.slane %v797_v27, 5  ;;  %v602_v44 = vshrl.u32 %v2706_v28, 16  ;;  %v605_v45 = vshll.u32 %v2706_v28, 16  ;;  %1984 = vmatpush3.bf16.msra.mxu1 %v2152_v11  ;;  %v2155_v41 = vld [vmem:[#allocation6 + $0x18] sm:$0xff]  }
  0x82   : > { %v2720_v46 = vld [vmem:[%s2602_s21 + $0x28] sm:$0xf]  ;;  %401 = vrot.lane.b32.xlu0 %v314_v42, %s2382_s22  ;;  %v337_v48 = vrot.slane %v336_v31, 4  ;;  %v794_v49 = vor.u32 %v793_v32, %v790_v26  ;;  %v950_v50 = vsel %vm2616_vm5, %v1843_v34, %v949_v38  ;;  %v316_v51 = vshrl.u32 %v2686_v3, 16  ;;  %v2729_v52 = vld [vmem:[%s2602_s21 + $0x20] sm:$0xf] }
  0x83   : > { %281 = vst.msk [vmem:[#allocation2 + $0x64] sm:$0xf] %vm275_vm2, %v2720_v46  ;;  %987 = vst.msk [vmem:[#allocation2 + $0x10] sm:$0xf] %vm275_vm2, %v950_v50  ;;  %v604_v53 = vrot.slane %v602_v44, 4  ;;  %v607_v54 = vrot.slane %v605_v45, 5 }
  0x84   : > { %v319_v56 = vshll.u32 %v2686_v3, 16  ;;  %v325_v58 = vshll.u32 %v2713_v39, 16  ;;  %v1810_v59 = vld [vmem:[%s2602_s21 + $0x24] sm:$0x1]  ;;  %781 = vst.msk [vmem:[#allocation2 + $0x34] sm:$0xf] %vm275_vm2, %v2729_v52  ;;  %v342_v60 = vsel %vm2677_vm6, %v337_v48, %v341_v20 }
  0x85   : > { %v795_v62 = vrot.slane %v794_v49, 4  ;;  %v318_v63 = vrot.slane %v316_v51, 4  ;;  %v461_v0 = vrot.slane %v2713_v39, 5  ;;  %v2741_v1 = vld [vmem:[%s2602_s21 + $0x18] sm:$0xf]  ;;  %v2151_v2 = vld [vmem:[#allocation6 + $0x10] sm:$0xff]   ;;  %405 = vrot.lane.b32.xlu1 %v342_v60, %s2382_s22  ;;  %v608_v4 = vor.u32 %v607_v54, %v604_v53 }
  0x86   : > { %v321_v5 = vrot.slane %v319_v56, 5  ;;  %v327_v6 = vrot.slane %v325_v58, 5  ;;  %v611_v8 = vshll.u32 %v1810_v59, 16  ;;  %v2745_v10 = vld [vmem:[%s2602_s21 + $0x20] sm:$0xf]  ;;  %v1822_v14 = vrot.slane %v2706_v28, 9  ;;  %1946 = vmatpush3.bf16.msra.mxu0 %v2151_v2 }
  0x87   : > { %v800_v12 = vsel %vm2677_vm6, %v795_v62, %v799_v43  ;;  %v709_v15 = vrot.slane %v1810_v59, 5  ;;  %v588_v16 = vshrl.u32 %v2741_v1, 16  ;;  %v1834_v17 = vld [vmem:[%s2602_s21 + $0x2c] sm:$0x1]  ;;  %280 = vst.msk [vmem:[#allocation2 + $0x50] sm:$0xf] %vm275_vm2, %v2745_v10 }
  0x88   : > { %v2153_v20 = vld [vmem:[#allocation6 + $0x58] sm:$0xff]   ;;  %899 = vrot.lane.b32.xlu0 %v800_v12, %s2382_s22  ;;  %v2755_v22 = vrot.slane %v608_v4, 4  ;;  %v322_v24 = vor.u32 %v321_v5, %v318_v63  ;;  %v2757_v25 = vrot.slane %v611_v8, 5  ;;  %v591_v26 = vshll.u32 %v2741_v1, 16  ;;  %v2154_v27 = vld [vmem:[#allocation6 + $0xd0] sm:$0xff]   ;;  %s1794_s20 = sshll.u32 %s2598_s30, 5 }
  0x89   : > { %v710_v29 = vsel %vm2616_vm5, %v1822_v14, %v709_v15  ;;  %v590_v31 = vrot.slane %v588_v16, 4  ;;  %v830_v32 = vshrl.u32 %v2701_v23, 16  ;;  %v833_v34 = vshll.u32 %v2701_v23, 16  ;;  %v1808_v38 = vld [vmem:[%s2602_s21 + $0x1c] sm:$0x1]  ;;  %1947 = vmatprep.subr.bf16.mxu0 %v2153_v20  ;;  %533 = vrot.lane.b32.xlu1 %v2706_v28, %s2382_s22  ;;  %s252_s24 = scalar_lea.vmem [#allocation9], %s1794_s20 }
  0x8a   : > { %v323_v42 = vrot.slane %v322_v24, 4  ;;  %v593_v43 = vrot.slane %v591_v26, 5  ;;  %v839_v44 = vshll.u32 %v1834_v17, 16  ;;  %v1846_v45 = vrot.slane %v2701_v23, 9  ;;  %v2769_v47 = vld [vmem:[%s2602_s21 + $0x38] sm:$0xf]  ;;  %1985 = vmatprep.subr.bf16.mxu1 %v2154_v27  ;;  %1948 = vmatpush3.bf16.msra.mxu0 %v2155_v41 }
  0x8b   : > { %v832_v48 = vrot.slane %v830_v32, 4  ;;  %v835_v49 = vrot.slane %v833_v34, 5  ;;  %v961_v50 = vrot.slane %v1834_v17, 5  ;;  %v597_v51 = vshll.u32 %v1808_v38, 16  ;;  %v2772_v53 = vld [vmem:[%s2602_s21 + $0x2c] sm:$0x1] }
  0x8c   : > { %784 = vst.msk [vmem:[#allocation2 + $0x70] sm:$0xf] %vm275_vm2, %v2769_v47  ;;  %v328_v28 = vsel %vm2677_vm6, %v323_v42, %v327_v6  ;;  %v594_v54 = vor.u32 %v593_v43, %v590_v31  ;;  %v841_v56 = vrot.slane %v839_v44, 5  ;;  %v1821_v23 = vrot.slane %v2741_v1, 9  ;;  %v2780_v58 = vld [vmem:[%s2602_s21 + $0x38] sm:$0xf] }
  0x8d   : > { %403 = vrot.lane.b32.xlu0 %v328_v28, %s2382_s22  ;;  %v836_v59 = vor.u32 %v835_v49, %v832_v48  ;;  %v962_v60 = vsel %vm2616_vm5, %v1846_v45, %v961_v50  ;;  %v2785_v62 = vrot.slane %v597_v51, 5  ;;  %v705_v63 = vrot.slane %v1808_v38, 5  ;;  %283 = vst.msk [vmem:[#allocation2 + $0x8c] sm:$0xf] %vm275_vm2, %v2780_v58  ;;  %v2790_v2 = vld [vmem:[%s2602_s21 + $0x30] sm:$0xf]  ;;  %733 = vrot.lane.b32.xlu1 %v710_v29, %s2382_s22 }
  0x8e   : > { %v2793_v4 = vrot.slane %v594_v54, 4  ;;  %990 = vst.msk [vmem:[#allocation2 + $0x4c] sm:$0xf] %vm275_vm2, %v962_v60  ;;  %v358_v5 = vshrl.u32 %v2720_v46, 16  ;;  %v361_v6 = vshll.u32 %v2720_v46, 16  ;;  %v367_v8 = vshll.u32 %v2772_v53, 16 }
  0x8f   : > { %v1832_v11 = vld [vmem:[%s2602_s21 + $0x24] sm:$0x1]  ;;  %783 = vst.msk [vmem:[#allocation2 + $0x5c] sm:$0xf] %vm275_vm2, %v2790_v2  ;;  %v837_v12 = vrot.slane %v836_v59, 4  ;;  %v706_v14 = vsel %vm2616_vm5, %v1821_v23, %v705_v63  ;;  %v816_v16 = vshrl.u32 %v2729_v52, 16 }
  0x90   : > { %v2156_v17 = vld [vmem:[#allocation6 + $0x90] sm:$0xff]   ;;  %v360_v20 = vrot.slane %v358_v5, 4  ;;  %v363_v24 = vrot.slane %v361_v6, 5  ;;  %v369_v26 = vrot.slane %v367_v8, 5  ;;  %v819_v27 = vshll.u32 %v2729_v52, 16  ;;  %v2157_v42 = vld [vmem:[#allocation6 + $0x60] sm:$0xff]  }
  0x91   : > { %v2808_v29 = vld [vmem:[%s2602_s21 + $0x30] sm:$0xf]  ;;  %531 = vrot.lane.b32.xlu0 %v2741_v1, %s2382_s22  ;;  %v842_v31 = vsel %vm2677_vm6, %v837_v12, %v841_v56  ;;  %v818_v32 = vrot.slane %v816_v16, 4  ;;  %v825_v34 = vshll.u32 %v1832_v11, 16  ;;  %v1845_v38 = vrot.slane %v2729_v52, 9  ;;  %1986 = vmatpush3.bf16.msra.mxu1 %v2156_v17  ;;  %v2158_v49 = vld [vmem:[#allocation6 + $0xd8] sm:$0xff]  }
  0x92   : > { %v1813_v41 = vld [vmem:[%s2602_s21 + $0x30] sm:$0xf]  ;;  %282 = vst.msk [vmem:[#allocation2 + $0x78] sm:$0xf] %vm275_vm2, %v2808_v29  ;;  %905 = vrot.lane.b32.xlu1 %v842_v31, %s2382_s22  ;;  %v364_v43 = vor.u32 %v363_v24, %v360_v20  ;;  %v821_v44 = vrot.slane %v819_v27, 5  ;;  %v957_v1 = vrot.slane %v1832_v11, 5  ;;  %1949 = vmatprep.subr.bf16.mxu0 %v2157_v42 }
  0x93   : > { %v630_v45 = vshrl.u32 %v1813_v41, 16  ;;  %v2820_v48 = vld [vmem:[%s2602_s21 + $0x24] sm:$0x1]  ;;  %v827_v50 = vrot.slane %v825_v34, 5  ;;  %v633_v51 = vshll.u32 %v1813_v41, 16  ;;  %v344_v52 = vshrl.u32 %v2745_v10, 16  ;;  %1987 = vmatprep.subr.bf16.mxu1 %v2158_v49 }
  0x94   : > { %v347_v28 = vshll.u32 %v2745_v10, 16  ;;  %v365_v54 = vrot.slane %v364_v43, 4  ;;  %v822_v56 = vor.u32 %v821_v44, %v818_v32  ;;  %v958_v23 = vsel %vm2616_vm5, %v1845_v38, %v957_v1  ;;  %v1814_v60 = vld [vmem:[%s2602_s21 + $0x34] sm:$0x1]  ;;  %v2828_v63 = vld [vmem:[%s2602_s21 + $0x48] sm:$0xf] }
  0x95   : > { %v632_v59 = vrot.slane %v630_v45, 4  ;;  %731 = vrot.lane.b32.xlu0 %v706_v14, %s2382_s22  ;;  %989 = vst.msk [vmem:[#allocation2 + $0x38] sm:$0xf] %vm275_vm2, %v958_v23  ;;  %v635_v5 = vrot.slane %v633_v51, 5  ;;  %v346_v6 = vrot.slane %v344_v52, 4  ;;  %v353_v11 = vshll.u32 %v2820_v48, 16 }
  0x96   : > { %v349_v8 = vrot.slane %v347_v28, 5  ;;  %v2834_v12 = vld [vmem:[%s2602_s21 + $0x28] sm:$0xf]  ;;  %786 = vst.msk [vmem:[#allocation2 + $0x98] sm:$0xf] %vm275_vm2, %v2828_v63  ;;  %v370_v16 = vsel %vm2677_vm6, %v365_v54, %v369_v26  ;;  %v823_v17 = vrot.slane %v822_v56, 4 }
  0x97   : > { %v639_v20 = vshll.u32 %v1814_v60, 16  ;;  %v2842_v24 = vld [vmem:[%s2602_s21 + $0x40] sm:$0xf]  ;;  %409 = vrot.lane.b32.xlu1 %v370_v16, %s2382_s22  ;;  %v636_v31 = vor.u32 %v635_v5, %v632_v59  ;;  %v355_v34 = vrot.slane %v353_v11, 5  ;;  %v1824_v38 = vrot.slane %v1813_v41, 9  ;;  %v2160_v49 = vld [vmem:[#allocation6 + $0x98] sm:$0xff]  }
  0x98   : > { %v2159_v27 = vld [vmem:[#allocation6 + $0x20] sm:$0xff]   ;;  %v350_v32 = vor.u32 %v349_v8, %v346_v6  ;;  %v1838_v42 = vld [vmem:[%s2602_s21 + $0x3c] sm:$0x1]  ;;  %785 = vst.msk [vmem:[#allocation2 + $0x84] sm:$0xf] %vm275_vm2, %v2842_v24  ;;  %v828_v26 = vsel %vm2677_vm6, %v823_v17, %v827_v50  ;;  %v717_v44 = vrot.slane %v1814_v60, 5  ;;  %1988 = vmatpush3.bf16.msra.mxu1 %v2160_v49 }
  0x99   : > { %v2850_v43 = vrot.slane %v639_v20, 5  ;;  %v616_v1 = vshrl.u32 %v2834_v12, 16  ;;  %v1812_v45 = vld [vmem:[%s2602_s21 + $0x2c] sm:$0x1]  ;;  %1950 = vmatpush3.bf16.msra.mxu0 %v2159_v27  ;;  %903 = vrot.lane.b32.xlu0 %v828_v26, %s2382_s22  ;;  %v2855_v51 = vrot.slane %v636_v31, 4  ;;  %v619_v28 = vshll.u32 %v2834_v12, 16 }
  0x9a   : > { %v351_v52 = vrot.slane %v350_v32, 4  ;;  %v858_v54 = vshrl.u32 %v2769_v47, 16  ;;  %v718_v50 = vsel %vm2616_vm5, %v1824_v38, %v717_v44  ;;  %v861_v23 = vshll.u32 %v2769_v47, 16  ;;  %v2863_v60 = vld [vmem:[%s2602_s21 + $0x3c] sm:$0x1]  ;;  %v2162_v17 = vld [vmem:[#allocation6 + $0xe0] sm:$0xff]  }
  0x9b   : > { %v618_v56 = vrot.slane %v616_v1, 4  ;;  %v867_v59 = vshll.u32 %v1838_v42, 16  ;;  %v2161_v5 = vld [vmem:[#allocation6 + $0x68] sm:$0xff]   ;;  %537 = vrot.lane.b32.xlu1 %v1813_v41, %s2382_s22  ;;  %v621_v8 = vrot.slane %v619_v28, 5  ;;  %v1848_v16 = vrot.slane %v2769_v47, 9  ;;  %1989 = vmatprep.subr.bf16.mxu1 %v2162_v17  ;;  %s1663_s11 = sshll.u32 %s252_s24, 4  ;;  %s3098_s11 = int_to_ptr.vmem [resolvable:$true] %s1663_s11 }
  0x9c   : > { %v356_v6 = vsel %vm2677_vm6, %v351_v52, %v355_v34  ;;  %v860_v11 = vrot.slane %v858_v54, 4  ;;  %v863_v20 = vrot.slane %v861_v23, 5  ;;  %v969_v31 = vrot.slane %v1838_v42, 5  ;;  %v1836_v38 = vld [vmem:[%s2602_s21 + $0x34] sm:$0x1]  ;;  %1951 = vmatprep.subr.bf16.mxu0 %v2161_v5  ;;  %v2163_v34 = vld [vmem:[#allocation6 + $0x28] sm:$0xff]  }
  0x9d   : > { %v869_v27 = vrot.slane %v867_v59, 5  ;;  %v625_v32 = vshll.u32 %v1812_v45, 16  ;;  %407 = vrot.lane.b32.xlu0 %v356_v6, %s2382_s22  ;;  %v622_v26 = vor.u32 %v621_v8, %v618_v56  ;;  %v1823_v44 = vrot.slane %v2834_v12, 9  ;;  %1952 = vmatpush3.bf16.msra.mxu0 %v2163_v34  ;;  %v2164_v23 = vld [vmem:[#allocation6 + $0xa0] sm:$0xff]   ;;  %s1917_s18 = sshll.u32 %s2367_s15, 9  ;;  %s1647_s19 = scalar_lea.sflag [#allocation5], %s2598_s30 }
  0x9e   : > { %v713_v41 = vrot.slane %v1812_v45, 5  ;;  %v386_v1 = vshrl.u32 %v2780_v58, 16  ;;  %v864_v49 = vor.u32 %v863_v20, %v860_v11  ;;  %v970_v47 = vsel %vm2616_vm5, %v1848_v16, %v969_v31  ;;  %v2888_v11 = vld [vmem:[%s2602_s21 + $0x40] sm:$0xf]  ;;  %1990 = vmatpush3.bf16.msra.mxu1 %v2164_v23  ;;  %s3103_s10 = scalar_lea.hbm %s3157_s3, %s1917_s18  ;;  %s2289_s4 = scalar_lea.vmem %s3098_s11, 512 }
  0x9f   : > { %v2875_v42 = vrot.slane %v625_v32, 5  ;;  %v389_v52 = vshll.u32 %v2780_v58, 16  ;;  %737 = vrot.lane.b32.xlu1 %v718_v50, %s2382_s22  ;;  %v2879_v28 = vrot.slane %v622_v26, 4  ;;  %992 = vst.msk [vmem:[#allocation2 + $0x74] sm:$0xf] %vm275_vm2, %v970_v47  ;;  %v395_v56 = vshll.u32 %v2863_v60, 16  ;;  %p2290_p8 = scmp.ne.s32.totalorder %s3098_s11, %s2289_s4 }
  0xa0   : > { %v714_v45 = vsel %vm2616_vm5, %v1823_v44, %v713_v41  ;;  %v388_v54 = vrot.slane %v386_v1, 4  ;;  %v865_v59 = vrot.slane %v864_v49, 4  ;;  %v844_v8 = vshrl.u32 %v2790_v2, 16  ;;  %v2891_v50 = vld [vmem:[%s2602_s21 + $0x34] sm:$0x1]  ;;  %p3180_p12 = scmp.ne.s32.totalorder %s3168_s27, 0 }
  0xa1   : > { %v391_v5 = vrot.slane %v389_v52, 5  ;;  %535 = vrot.lane.b32.xlu0 %v2834_v12, %s2382_s22  ;;  %v397_v16 = vrot.slane %v395_v56, 5  ;;  %v847_v17 = vshll.u32 %v2790_v2, 16  ;;  %v853_v20 = vshll.u32 %v1836_v38, 16  ;;  %v1818_v47 = vld [vmem:[%s2602_s21 + $0x44] sm:$0x1] }
  0xa2   : > { %v1847_v31 = vrot.slane %v2790_v2, 9  ;;  %v870_v32 = vsel %vm2677_vm6, %v865_v59, %v869_v27  ;;  %v846_v44 = vrot.slane %v844_v8, 4  ;;  %v965_v41 = vrot.slane %v1836_v38, 5  ;;  %v2165_v38 = vld [vmem:[#allocation6 + $0x70] sm:$0xff]   ;;  %v2911_v8 = vld [vmem:[%s2602_s21 + $0x38] sm:$0xf]  ;;  %p2291_p1 = pnand %p2290_p8, %p3180_p12 }
  0xa3   : > { %v392_v26 = vor.u32 %v391_v5, %v388_v54  ;;  %909 = vrot.lane.b32.xlu1 %v870_v32, %s2382_s22  ;;  %v849_v1 = vrot.slane %v847_v17, 5  ;;  %v855_v34 = vrot.slane %v853_v20, 5  ;;  %v658_v12 = vshrl.u32 %v2888_v11, 16  ;;  %v2166_v17 = vld [vmem:[#allocation6 + $0xe8] sm:$0xff]   ;;  %1953 = vmatprep.subr.bf16.mxu0 %v2165_v38  ;;  %s2383_s15 = smov [#allocation9]  }
  0xa4   : > { %v661_v49 = vshll.u32 %v2888_v11, 16  ;;  %v966_v2 = vsel %vm2616_vm5, %v1847_v31, %v965_v41  ;;  %v372_v27 = vshrl.u32 %v2808_v29, 16  ;;  %v375_v54 = vshll.u32 %v2808_v29, 16  ;;  %v1842_v41 = vld [vmem:[%s2602_s21 + $0x4c] sm:$0x1]  ;;  %1991 = vmatprep.subr.bf16.mxu1 %v2166_v17  ;;  %p2292_p10 = pneg %p2291_p1  ;;  %s2293_s9 = sshll.u32 %s2383_s15, 4  ;;  %s2294_s9 = int_to_ptr.vmem [resolvable:$false] %s2293_s9 }
  0xa5   : > { %v393_v52 = vrot.slane %v392_v26, 4  ;;  %735 = vrot.lane.b32.xlu0 %v714_v45, %s2382_s22  ;;  %v850_v56 = vor.u32 %v849_v1, %v846_v44  ;;  %991 = vst.msk [vmem:[#allocation2 + $0x60] sm:$0xf] %vm275_vm2, %v966_v2  ;;  %v660_v23 = vrot.slane %v658_v12, 4  ;;  %v381_v5 = vshll.u32 %v2891_v50, 16  ;;  %v2167_v45 = vld [vmem:[#allocation6 + $0x30] sm:$0xff]   ;;  %p2296_p3 = scmp.lt.s32.totalorder %s3098_s11, %s2294_s9 }
  0xa6   : > { %v663_v59 = vrot.slane %v661_v49, 5  ;;  %v374_v31 = vrot.slane %v372_v27, 4  ;;  %v377_v32 = vrot.slane %v375_v54, 5  ;;  %v667_v49 = vshll.u32 %v1818_v47, 16  ;;  %v2168_v2 = vld [vmem:[#allocation6 + $0xa8] sm:$0xff]   ;;  %1954 = vmatpush3.bf16.msra.mxu0 %v2167_v45  ;;  %v2169_v27 = vld [vmem:[#allocation6 + $0x78] sm:$0xff]  }
  0xa7   : > { %v398_v20 = vsel %vm2677_vm6, %v393_v52, %v397_v16  ;;  %v851_v44 = vrot.slane %v850_v56, 4  ;;  %v383_v12 = vrot.slane %v381_v5, 5  ;;  %v1826_v14 = vrot.slane %v2888_v11, 9  ;;  %1992 = vmatpush3.bf16.msra.mxu1 %v2168_v2  ;;  %v2170_v5 = vld [vmem:[#allocation6 + $0xf0] sm:$0xff]   ;;  %1955 = vmatprep.subr.bf16.mxu0 %v2169_v27  ;;  %s2295_s28 = scalar_lea.vmem %s2294_s9, 1024 }
  0xa8   : > { %413 = vrot.lane.b32.xlu1 %v398_v20, %s2382_s22  ;;  %v664_v1 = vor.u32 %v663_v59, %v660_v23  ;;  %v378_v6 = vor.u32 %v377_v32, %v374_v31  ;;  %v725_v16 = vrot.slane %v1818_v47, 5  ;;  %v644_v52 = vshrl.u32 %v2911_v8, 16  ;;  %v1816_v59 = vld [vmem:[%s2602_s21 + $0x3c] sm:$0x1]  ;;  %v1840_v32 = vld [vmem:[%s2602_s21 + $0x44] sm:$0x1]  ;;  %1993 = vmatprep.subr.bf16.mxu1 %v2170_v5  ;;  %p2297_p5 = scmp.lt.s32.totalorder %s2295_s28, %s2289_s4 }
  0xa9   : > { %v856_v54 = vsel %vm2677_vm6, %v851_v44, %v855_v34  ;;  %v2924_v56 = vrot.slane %v667_v49, 5  ;;  %v647_v23 = vshll.u32 %v2911_v8, 16  ;;  %v886_v31 = vshrl.u32 %v2828_v63, 16  ;;  %v2171_v34 = vld [vmem:[#allocation6 + $0x38] sm:$0xff]  }
  0xaa   : > { %v2922_v38 = vrot.slane %v664_v1, 4  ;;  %907 = vrot.lane.b32.xlu0 %v856_v54, %s2382_s22  ;;  %v379_v47 = vrot.slane %v378_v6, 4  ;;  %v726_v17 = vsel %vm2616_vm5, %v1826_v14, %v725_v16  ;;  %v646_v20 = vrot.slane %v644_v52, 4  ;;  %1956 = vmatpush3.bf16.msra.mxu0 %v2171_v34  ;;  %v2172_v52 = vld [vmem:[#allocation6 + $0xb0] sm:$0xff]   ;;  %p2298_p9 = por %p2297_p5, %p2296_p3 }
  0xab   : > { %v649_v45 = vrot.slane %v647_v23, 5  ;;  %v889_v44 = vshll.u32 %v2828_v63, 16  ;;  %v895_v1 = vshll.u32 %v1842_v41, 16  ;;  %v1850_v49 = vrot.slane %v2828_v63, 9  ;;  %v2176_v23 = vld [vmem:[#allocation6 + $0xf8] sm:$0xff]   ;;  %1994 = vmatpush3.bf16.msra.mxu1 %v2172_v52 }
  0xac   : > { %541 = vrot.lane.b32.xlu1 %v2888_v11, %s2382_s22  ;;  %v384_v6 = vsel %vm2677_vm6, %v379_v47, %v383_v12  ;;  %v888_v14 = vrot.slane %v886_v31, 4  ;;  %v977_v2 = vrot.slane %v1842_v41, 5  ;;  %v653_v16 = vshll.u32 %v1816_v59, 16  ;;  %v2177_v41 = vld [vmem:[#allocation6 + $0xb8] sm:$0xff]   ;;  %1995 = vmatprep.subr.bf16.mxu1 %v2176_v23  ;;  %p2299_p2 = pnand %p2298_p9, %p2292_p10 }
  0xad   : > { %v650_v27 = vor.u32 %v649_v45, %v646_v20  ;;  %v891_v54 = vrot.slane %v889_v44, 5  ;;  %v897_v26 = vrot.slane %v895_v1, 5  ;;  %v1825_v11 = vrot.slane %v2911_v8, 9  ;;  %v2947_v45 = vld [vmem:[#allocation6 + $0x100] sm:$0xff]  }
  0xae   : > { %411 = vrot.lane.b32.xlu0 %v384_v6, %s2382_s22  ;;  %v978_v63 = vsel %vm2616_vm5, %v1850_v49, %v977_v2  ;;  %v655_v5 = vrot.slane %v653_v16, 5  ;;  %v721_v15 = vrot.slane %v1816_v59, 5  ;;  %v872_v12 = vshrl.u32 %v2842_v24, 16  ;;  %2029 = vmatprep.subr.bf16.mxu0 %v2947_v45 }
  0xaf   : > { %v651_v47 = vrot.slane %v650_v27, 4  ;;  %v892_v20 = vor.u32 %v891_v54, %v888_v14  ;;  %994 = vst.msk [vmem:[#allocation2 + $0x9c] sm:$0xf] %vm275_vm2, %v978_v63  ;;  %v875_v31 = vshll.u32 %v2842_v24, 16  ;;  %v881_v34 = vshll.u32 %v1840_v32, 16  ;;  %1996 = vmatpush3.bf16.msra.mxu1 %v2177_v41  ;;  %v2190_v54 = vld [vmem:[#allocation6 + $0x108] sm:$0xff]  }
  0xb0   : > { %741 = vrot.lane.b32.xlu1 %v726_v17, %s2382_s22  ;;  %v722_v44 = vsel %vm2616_vm5, %v1825_v11, %v721_v15  ;;  %v874_v59 = vrot.slane %v872_v12, 4  ;;  %v1849_v1 = vrot.slane %v2842_v24, 9  ;;  %v973_v49 = vrot.slane %v1840_v32, 5  ;;  %2045 = vmatprep.subr.bf16.mxu1 %v2947_v45  ;;  %v2193_v63 = vld [vmem:[#allocation6 + $0x110] sm:$0xff]  }
  0xb1   : > { %v893_v6 = vrot.slane %v892_v20, 4  ;;  %v877_v2 = vrot.slane %v875_v31, 5  ;;  %v883_v17 = vrot.slane %v881_v34, 5  ;;  %v1795_v14 = vrot.slane %v2622_v13, 9  ;;  %v2195_v20 = vld [vmem:[#allocation6 + $0x118] sm:$0xff]  }
  0xb2   : > { %539 = vrot.lane.b32.xlu0 %v2911_v8, %s2382_s22  ;;  %v974_v16 = vsel %vm2616_vm5, %v1849_v1, %v973_v49  ;;  %v1796_v52 = vrot.slane %v2642_v30, 9  ;;  %v572_v15 = vsel %vm2677_vm6, %v2652_v36, %v2629_v19  ;;  %v586_v13 = vsel %vm2677_vm6, %v2654_v37, %v2633_v21 }
  0xb3   : > { %v898_v24 = vsel %vm2677_vm6, %v893_v6, %v897_v26  ;;  %v878_v8 = vor.u32 %v877_v2, %v874_v59  ;;  %993 = vst.msk [vmem:[#allocation2 + $0x88] sm:$0xf] %vm275_vm2, %v974_v16  ;;  %v454_v30 = vsel %vm2616_vm5, %v1795_v14, %v453_v33  ;;  %679 = vst.msk [vmem:[#allocation2 + $0x8] sm:$0xf] %vm275_vm2, %v572_v15  ;;  %v1798_v37 = vrot.slane %v2659_v40, 9 }
  0xb4   : > { %680 = vst.msk [vmem:[#allocation2 + $0x1c] sm:$0xf] %vm275_vm2, %v586_v13  ;;  %v614_v19 = vsel %vm2677_vm6, %v2755_v22, %v2757_v25  ;;  %913 = vrot.lane.b32.xlu1 %v898_v24, %s2382_s22  ;;  %491 = vst.msk [vmem:[#allocation2 + $0x4] sm:$0xf] %vm275_vm2, %v454_v30  ;;  %v458_v18 = vsel %vm2616_vm5, %v1796_v52, %v457_v61  ;;  %v600_v21 = vsel %vm2677_vm6, %v2793_v4, %v2785_v62  ;;  %vm423_vm7 = vcmask 1043968  }
  0xb5   : > { %682 = vst.msk [vmem:[#allocation2 + $0x44] sm:$0xf] %vm275_vm2, %v614_v19  ;;  %v642_v33 = vsel %vm2677_vm6, %v2855_v51, %v2850_v43  ;;  %v628_v35 = vsel %vm2677_vm6, %v2879_v28, %v2875_v42  ;;  %v879_v36 = vrot.slane %v878_v8, 4  ;;  %492 = vst.msk [vmem:[#allocation2 + $0x18] sm:$0xf] %vm275_vm2, %v458_v18  ;;  %v670_v61 = vsel %vm2677_vm6, %v2922_v38, %v2924_v56 }
  0xb6   : > { %681 = vst.msk [vmem:[#allocation2 + $0x30] sm:$0xf] %vm275_vm2, %v600_v21  ;;  %684 = vst.msk [vmem:[#allocation2 + $0x6c] sm:$0xf] %vm275_vm2, %v642_v33  ;;  %v656_v22 = vsel %vm2677_vm6, %v651_v47, %v655_v5  ;;  %739 = vrot.lane.b32.xlu0 %v722_v44, %s2382_s22  ;;  %v466_v25 = vsel %vm2616_vm5, %v1798_v37, %v465_v9  ;;  %v1797_v62 = vrot.slane %v2686_v3, 9  ;;  %v1800_v4 = vrot.slane %v2720_v46, 9 }
  0xb7   : > { %683 = vst.msk [vmem:[#allocation2 + $0x58] sm:$0xf] %vm275_vm2, %v628_v35  ;;  %686 = vst.msk [vmem:[#allocation2 + $0x94] sm:$0xf] %vm275_vm2, %v670_v61  ;;  %v884_v40 = vsel %vm2677_vm6, %v879_v36, %v883_v17  ;;  %v1799_v43 = vrot.slane %v2745_v10, 9  ;;  %v1802_v51 = vrot.slane %v2780_v58, 9 }
  0xb8   : > { %685 = vst.msk [vmem:[#allocation2 + $0x80] sm:$0xf] %vm275_vm2, %v656_v22  ;;  %494 = vst.msk [vmem:[#allocation2 + $0x40] sm:$0xf] %vm275_vm2, %v466_v25  ;;  %v462_v55 = vsel %vm2616_vm5, %v1797_v62, %v461_v0  ;;  %v3176_v57 = vrot.slane %v2772_v53, 5  ;;  %v1801_v42 = vrot.slane %v2808_v29, 9 }
  0xb9   : > { %493 = vst.msk [vmem:[#allocation2 + $0x2c] sm:$0xf] %vm275_vm2, %v462_v55  ;;  %v3177_v3 = vrot.slane %v2820_v48, 5  ;;  %v3178_v39 = vrot.slane %v2863_v60, 5  ;;  %v3179_v10 = vrot.slane %v2891_v50, 5  ;;  %vm1414_vm8 = vcmask 523264  }
  0xba   : > { %911 = vrot.lane.b32.xlu0 %v884_v40, %s2382_s22  ;;  %v474_v9 = vsel %vm2616_vm5, %v1800_v4, %v3176_v57  ;;  %v2198_v55 = vld [vmem:[#allocation2 + $0x10] ss:$20 sps:$4 sm:$0xff]  }
  0xbb   : > { %496 = vst.msk [vmem:[#allocation2 + $0x68] sm:$0xf] %vm275_vm2, %v474_v9  ;;  %v470_v46 = vsel %vm2616_vm5, %v1799_v43, %v3177_v3  ;;  %v482_v0 = vsel %vm2616_vm5, %v1802_v51, %v3178_v39  ;;  %v478_v53 = vsel %vm2616_vm5, %v1801_v42, %v3179_v10  ;;  %v2200_v3 = vld [vmem:[#allocation2 + $0x38] ss:$20 sps:$4 sm:$0xff]   ;;  %v2202_v10 = vld [vmem:[#allocation2 + $0x88] ss:$20 sps:$4 sm:$0xff]  }
  0xbc   : > { %495 = vst.msk [vmem:[#allocation2 + $0x54] sm:$0xf] %vm275_vm2, %v470_v46  ;;  %498 = vst.msk [vmem:[#allocation2 + $0x90] sm:$0xf] %vm275_vm2, %v482_v0  ;;  %v2201_v46 = vld [vmem:[#allocation2 + $0x60] ss:$20 sps:$4 sm:$0xff]  }
  0xbd   : > { %497 = vst.msk [vmem:[#allocation2 + $0x7c] sm:$0xf] %vm275_vm2, %v478_v53 }
  0xe0   : > { %v528_v58 = vpop.permute.xlu1 %527 }
  0xe1   : > { %551 = vst.msk [vmem:[#allocation2 + $0x4] sm:$0xf] %vm423_vm7, %v528_v58 }
  0xe4   : > { %v530_v29 = vpop.permute.xlu1 %529 }
  0xe5   : > { %v728_v48 = vpop.permute.xlu0 %727  ;;  %552 = vst.msk [vmem:[#allocation2 + $0x18] sm:$0xf] %vm423_vm7, %v530_v29 }
  0xe6   : > { %751 = vst.msk [vmem:[#allocation2 + $0x8] sm:$0xf] %vm423_vm7, %v728_v48 }
  0xe8   : > { %v730_v60 = vpop.permute.xlu1 %729 }
  0xe9   : > { %752 = vst.msk [vmem:[#allocation2 + $0x1c] sm:$0xf] %vm423_vm7, %v730_v60 }
  0xec   : > { %v2175_v27 = vld [vmem:[#allocation2 + $0x4] ss:$20 sps:$4 sm:$0xff]  }
  0xed   : > { %1459 = vmatprep.mubr.bf16.mxu0 %v2175_v27 }
  0xf0   : > { %v400_v28 = vpop.permute.xlu0 %399  ;;  %v2178_v5 = vld [vmem:[#allocation2 + $0x8] ss:$20 sps:$4 sm:$0xff]  }
  0xf1   : > { %424 = vst.msk [vmem:[#allocation2] sm:$0xf] %vm423_vm7, %v400_v28  ;;  %v3086_v28 = vld [vmem:[#allocation8] ss:$0 sm:$0xff] }
  0xf2   : > { %v902_v7 = vpop.permute.xlu1 %901 }
  0xf3   : > { %924 = vst.msk [vmem:[#allocation2 + $0x20] sm:$0xf] %vm423_vm7, %v902_v7 }
  0xf4   : > { %v402_v50 = vpop.permute.xlu0 %401 }
  0xf5   : > { %425 = vst.msk [vmem:[#allocation2 + $0x14] sm:$0xf] %vm423_vm7, %v402_v50 }
  0xf7   : > { %v406_v26 = vpop.permute.xlu1 %405 }
  0xf8   : > { %427 = vst.msk [vmem:[#allocation2 + $0x3c] sm:$0xf] %vm423_vm7, %v406_v26 }
  0xfa   : > { %v900_v38 = vpop.permute.xlu0 %899 }
  0xfb   : > { %923 = vst.msk [vmem:[#allocation2 + $0xc] sm:$0xf] %vm423_vm7, %v900_v38  ;;  %v534_v56 = vpop.permute.xlu1 %533 }
  0xfc   : > { %554 = vst.msk [vmem:[#allocation2 + $0x40] sm:$0xf] %vm423_vm7, %v534_v56  ;;  %v2173_v32 = vld [vmem:[#allocation2] ss:$20 sps:$4 sm:$0xff]  }
  0xfd   : > { %1460 = vmatmul.mubr.bf16.vlgmr.msra.gmra.mrb[0].mxu0 %v2173_v32 }
  0xfe   : > { %2030 = vmatpush3.bf16.msra.mxu0 %v2947_v45 }
  0xff   : > { %v404_v11 = vpop.permute.xlu0 %403  ;;  %v734_v23 = vpop.permute.xlu1 %733  ;;  %2031 = vmatprep.subr.bf16.mxu0 %v2190_v54 }
 0x100   : > { %426 = vst.msk [vmem:[#allocation2 + $0x28] sm:$0xf] %vm423_vm7, %v404_v11  ;;  %754 = vst.msk [vmem:[#allocation2 + $0x44] sm:$0xf] %vm423_vm7, %v734_v23 }
 0x102   : > { %v2180_v12 = vld [vmem:[#allocation2 + $0xc] ss:$20 sps:$4 sm:$0xff]   ;;  %2032 = vmatpush3.bf16.msra.mxu0 %v2190_v54 }
 0x103   : > { %v532_v41 = vpop.permute.xlu0 %531  ;;  %1524 = vmatprep.mubr.bf16.mxu1 %v2180_v12  ;;  %2033 = vmatprep.subr.bf16.mxu0 %v2193_v63  ;;  %v1004_v1 = vld [vmem:[#allocation2 + $0x3c] sm:$0xff] }
 0x104   : > { %553 = vst.msk [vmem:[#allocation2 + $0x2c] sm:$0xf] %vm423_vm7, %v532_v41  ;;  %v906_v47 = vpop.permute.xlu1 %905  ;;  %1525 = vmatmul.mubr.bf16.vlgmr.msra.gmra.mrb[0].mxu1 %v2178_v5 }
 0x105   : > { %926 = vst.msk [vmem:[#allocation2 + $0x48] sm:$0xf] %vm423_vm7, %v906_v47  ;;  %2049 = vmatpush3.bf16.msra.mxu1 %v2947_v45 }
 0x106   : > { %2046 = vmatprep.subr.bf16.mxu1 %v2190_v54  ;;  %2034 = vmatpush3.bf16.msra.mxu0 %v2193_v63 }
 0x107   : > { %v732_v31 = vpop.permute.xlu0 %731  ;;  %2035 = vmatprep.subr.bf16.mxu0 %v2195_v20 }
 0x108   : > { %753 = vst.msk [vmem:[#allocation2 + $0x30] sm:$0xf] %vm423_vm7, %v732_v31 }
 0x109   : > { %v410_v34 = vpop.permute.xlu1 %409  ;;  %2050 = vmatpush3.bf16.msra.mxu1 %v2190_v54 }
 0x10a   : > { %429 = vst.msk [vmem:[#allocation2 + $0x64] sm:$0xf] %vm423_vm7, %v410_v34  ;;  %2047 = vmatprep.subr.bf16.mxu1 %v2193_v63  ;;  %2036 = vmatpush3.bf16.msra.mxu0 %v2195_v20 }
 0x10b   : > { %v904_v44 = vpop.permute.xlu0 %903  ;;  %v1001_v59 = vld [vmem:[#allocation2 + $0x28] sm:$0xff] }
 0x10c   : > { %v2181_v49 = vld [vmem:[#allocation2 + $0x2c] ss:$20 sps:$4 sm:$0xff]   ;;  %925 = vst.msk [vmem:[#allocation2 + $0x34] sm:$0xf] %vm423_vm7, %v904_v44  ;;  %v1857_v45 = vcombine.low %v1001_v59, %v1004_v1  ;;  %v1005_v52 = vld [vmem:[#allocation2 + $0x44] sm:$0xff] }
 0x10d   : > { %1467 = vmatprep.mubr.bf16.mxu0 %v2181_v49  ;;  %v538_v6 = vpop.permute.xlu1 %537  ;;  %2051 = vmatpush3.bf16.msra.mxu1 %v2193_v63 }
 0x10e   : > { %556 = vst.msk [vmem:[#allocation2 + $0x68] sm:$0xf] %vm423_vm7, %v538_v6  ;;  %1468 = vmatmul.mubr.bf16.gmra.mrb[4].mxu0 %v1857_v45  ;;  %2048 = vmatprep.subr.bf16.mxu1 %v2195_v20 }
 0x10f   : > { %v408_v2 = vpop.permute.xlu0 %407 }
 0x110   : > { %428 = vst.msk [vmem:[#allocation2 + $0x50] sm:$0xf] %vm423_vm7, %v408_v2 }
 0x111   : > { %v738_v17 = vpop.permute.xlu1 %737  ;;  %2052 = vmatpush3.bf16.msra.mxu1 %v2195_v20 }
 0x112   : > { %756 = vst.msk [vmem:[#allocation2 + $0x6c] sm:$0xf] %vm423_vm7, %v738_v17 }
 0x113   : > { %v536_v14 = vpop.permute.xlu0 %535  ;;  %v1002_v16 = vld [vmem:[#allocation2 + $0x30] sm:$0xff] }
 0x114   : > { %v2183_v15 = vld [vmem:[#allocation2 + $0x34] ss:$20 sps:$4 sm:$0xff]   ;;  %555 = vst.msk [vmem:[#allocation2 + $0x54] sm:$0xf] %vm423_vm7, %v536_v14  ;;  %v1859_v13 = vcombine.low %v1002_v16, %v1005_v52 }
 0x115   : > { %1532 = vmatprep.mubr.bf16.mxu1 %v2183_v15  ;;  %v910_v24 = vpop.permute.xlu1 %909  ;;  %v1010_v18 = vld [vmem:[#allocation2 + $0x64] sm:$0xff] }
 0x116   : > { %928 = vst.msk [vmem:[#allocation2 + $0x70] sm:$0xf] %vm423_vm7, %v910_v24  ;;  %1533 = vmatmul.mubr.bf16.gmra.mrb[4].mxu1 %v1859_v13 }
 0x117   : > { %v736_v8 = vpop.permute.xlu0 %735 }
 0x118   : > { %755 = vst.msk [vmem:[#allocation2 + $0x58] sm:$0xf] %vm423_vm7, %v736_v8 }
 0x11a   : > { %v414_v30 = vpop.permute.xlu1 %413 }
 0x11b   : > { %431 = vst.msk [vmem:[#allocation2 + $0x8c] sm:$0xf] %vm423_vm7, %v414_v30  ;;  %v1007_v19 = vld [vmem:[#allocation2 + $0x50] sm:$0xff] }
 0x11c   : > { %v2185_v21 = vld [vmem:[#allocation2 + $0x54] ss:$20 sps:$4 sm:$0xff]   ;;  %v908_v33 = vpop.permute.xlu0 %907  ;;  %v1862_v35 = vcombine.low %v1007_v19, %v1010_v18 }
 0x11d   : > { %927 = vst.msk [vmem:[#allocation2 + $0x5c] sm:$0xf] %vm423_vm7, %v908_v33  ;;  %1475 = vmatprep.mubr.bf16.mxu0 %v2185_v21  ;;  %v1011_v25 = vld [vmem:[#allocation2 + $0x6c] sm:$0xff] }
 0x11e   : > { %v542_v36 = vpop.permute.xlu1 %541  ;;  %1476 = vmatmul.mubr.bf16.gmra.mrb[8].mxu0 %v1862_v35 }
 0x11f   : > { %558 = vst.msk [vmem:[#allocation2 + $0x90] sm:$0xf] %vm423_vm7, %v542_v36 }
 0x120   : > { %v412_v37 = vpop.permute.xlu0 %411 }
 0x121   : > { %430 = vst.msk [vmem:[#allocation2 + $0x78] sm:$0xf] %vm423_vm7, %v412_v37 }
 0x122   : > { %v742_v61 = vpop.permute.xlu1 %741 }
 0x123   : > { %758 = vst.msk [vmem:[#allocation2 + $0x94] sm:$0xf] %vm423_vm7, %v742_v61 }
 0x124   : > { %v540_v22 = vpop.permute.xlu0 %539  ;;  %v1008_v40 = vld [vmem:[#allocation2 + $0x58] sm:$0xff] }
 0x125   : > { %v2188_v62 = vld [vmem:[#allocation2 + $0x5c] ss:$20 sps:$4 sm:$0xff]   ;;  %557 = vst.msk [vmem:[#allocation2 + $0x7c] sm:$0xf] %vm423_vm7, %v540_v22  ;;  %v1864_v4 = vcombine.low %v1008_v40, %v1011_v25 }
 0x126   : > { %1540 = vmatprep.mubr.bf16.mxu1 %v2188_v62  ;;  %v914_v43 = vpop.permute.xlu1 %913 }
 0x127   : > { %930 = vst.msk [vmem:[#allocation2 + $0x98] sm:$0xf] %vm423_vm7, %v914_v43  ;;  %1541 = vmatmul.mubr.bf16.gmra.mrb[8].mxu1 %v1864_v4 }
 0x128   : > { %v740_v51 = vpop.permute.xlu0 %739  ;;  %v2194_v42 = vld [vmem:[#allocation2 + $0x78] ss:$20 sps:$4 sm:$0xff]  }
 0x129   : > { %757 = vst.msk [vmem:[#allocation2 + $0x80] sm:$0xf] %vm423_vm7, %v740_v51 }
 0x12c   : > { %v912_v57 = vpop.permute.xlu0 %911  ;;  %v2191_v9 = vld [vmem:[#allocation2 + $0x7c] ss:$20 sps:$4 sm:$0xff]  }
 0x12d   : > { %929 = vst.msk [vmem:[#allocation2 + $0x84] sm:$0xf] %vm423_vm7, %v912_v57  ;;  %1483 = vmatprep.mubr.bf16.mxu0 %v2191_v9 }
 0x12e   : > { %1484 = vmatmul.mubr.bf16.gmra.mrb[12].mxu0 %v2194_v42 }
 0x12f   : > { %2037 = vmatprep.mubr.msk.bf16.mxu0 %vm1414_vm8, %v2198_v55 }
 0x130   : > { %v2199_v0 = vld [vmem:[#allocation2 + $0x80] ss:$20 sps:$4 sm:$0xff]  }
 0x134   : > { %v2196_v39 = vld [vmem:[#allocation2 + $0x84] ss:$20 sps:$4 sm:$0xff]  }
 0x135   : > { %1548 = vmatprep.mubr.bf16.mxu1 %v2196_v39 }
 0x136   : > { %1549 = vmatmul.mubr.bf16.gmra.mrb[12].mxu1 %v2199_v0  ;;  %2038 = vmatmul.mubr.msk.bf16.vlgmr.msra.gmra.mrb[16].mxu0 %vm1414_vm8, %v2200_v3 }
 0x137   : > { %2041 = vmatprep.mubr.msk.bf16.mxu1 %vm1414_vm8, %v2201_v46 }
 0x13e   : > { %2042 = vmatmul.mubr.msk.bf16.vlgmr.msra.gmra.mrb[16].mxu1 %vm1414_vm8, %v2202_v10 }
 0x1d0   : > { %v1957_v53 = vpop.f32.mrb[0].mxu0 }
 0x1d1   : > { %v1958_v58 = vpop.f32.mrb[1].mxu0 }
 0x1d2   : > { %v1959_v29 = vadd.f32 %v1958_v58, %v1957_v53  ;;  %v1960_v48 = vpop.f32.mrb[2].mxu0 }
 0x1d3   : > { %v1961_v60 = vpop.f32.mrb[3].mxu0 }
 0x1d4   : > { %v1962_v7 = vadd.f32 %v1961_v60, %v1960_v48  ;;  %v1462_v38 = vadd.f32 %v1959_v29, %v3086_v28 }
 0x1d6   : > { %v1465_v54 = vadd.f32 %v1962_v7, %v3086_v28 }
 0x1d7   : > { %v1997_v50 = vpop.f32.mrb[0].mxu1 }
 0x1d8   : > { %v1998_v26 = vpop.f32.mrb[1].mxu1 }
 0x1d9   : > { %v1999_v56 = vadd.f32 %v1998_v26, %v1997_v50  ;;  %v2000_v32 = vpop.f32.mrb[2].mxu1 }
 0x1da   : > { %v2001_v27 = vpop.f32.mrb[3].mxu1 }
 0x1db   : > { %v2002_v11 = vadd.f32 %v2001_v27, %v2000_v32  ;;  %v1527_v23 = vadd.f32 %v1999_v56, %v1462_v38 }
 0x1dd   : > { %v1530_v63 = vadd.f32 %v2002_v11, %v1465_v54 }
 0x1e1   : > { %v1963_v5 = vpop.f32.mrb[4].mxu0 }
 0x1e2   : > { %v1964_v12 = vpop.f32.mrb[5].mxu0 }
 0x1e3   : > { %v1965_v41 = vadd.f32 %v1964_v12, %v1963_v5  ;;  %v1966_v47 = vpop.f32.mrb[6].mxu0 }
 0x1e4   : > { %v1967_v20 = vpop.f32.mrb[7].mxu0 }
 0x1e5   : > { %v1968_v31 = vadd.f32 %v1967_v20, %v1966_v47  ;;  %v1470_v59 = vadd.f32 %v1965_v41, %v3086_v28 }
 0x1e7   : > { %v1473_v6 = vadd.f32 %v1968_v31, %v3086_v28 }
 0x1e9   : > { %v2003_v34 = vpop.f32.mrb[4].mxu1 }
 0x1ea   : > { %v2004_v44 = vpop.f32.mrb[5].mxu1 }
 0x1eb   : > { %v2005_v1 = vadd.f32 %v2004_v44, %v2003_v34  ;;  %v2006_v49 = vpop.f32.mrb[6].mxu1 }
 0x1ec   : > { %v2007_v45 = vpop.f32.mrb[7].mxu1 }
 0x1ed   : > { %v2008_v2 = vadd.f32 %v2007_v45, %v2006_v49  ;;  %v1535_v17 = vadd.f32 %v2005_v1, %v1470_v59 }
 0x1ef   : > { %v1538_v14 = vadd.f32 %v2008_v2, %v1473_v6 }
 0x1f1   : > { %v1969_v16 = vpop.f32.mrb[8].mxu0 }
 0x1f2   : > { %v1970_v52 = vpop.f32.mrb[9].mxu0 }
 0x1f3   : > { %v1971_v15 = vadd.f32 %v1970_v52, %v1969_v16  ;;  %v1972_v13 = vpop.f32.mrb[10].mxu0 }
 0x1f4   : > { %v1973_v24 = vpop.f32.mrb[11].mxu0 }
 0x1f5   : > { %v1974_v8 = vadd.f32 %v1973_v24, %v1972_v13  ;;  %v1478_v18 = vadd.f32 %v1971_v15, %v3086_v28 }
 0x1f7   : > { %v1481_v36 = vadd.f32 %v1974_v8, %v3086_v28 }
 0x1fa   : > { %v2009_v30 = vpop.f32.mrb[8].mxu1 }
 0x1fb   : > { %v2010_v19 = vpop.f32.mrb[9].mxu1 }
 0x1fc   : > { %v2011_v21 = vadd.f32 %v2010_v19, %v2009_v30  ;;  %v2012_v33 = vpop.f32.mrb[10].mxu1 }
 0x1fd   : > { %v2013_v35 = vpop.f32.mrb[11].mxu1 }
 0x1fe   : > { %v2014_v37 = vadd.f32 %v2013_v35, %v2012_v33  ;;  %v1543_v61 = vadd.f32 %v2011_v21, %v1478_v18 }
 0x200   : > { %v1546_v22 = vadd.f32 %v2014_v37, %v1481_v36 }
 0x201   : > { %v1975_v40 = vpop.f32.mrb[12].mxu0 }
 0x202   : > { %v1976_v25 = vpop.f32.mrb[13].mxu0 }
 0x203   : > { %v1977_v62 = vadd.f32 %v1976_v25, %v1975_v40  ;;  %v1978_v4 = vpop.f32.mrb[14].mxu0 }
 0x204   : > { %v1979_v43 = vpop.f32.mrb[15].mxu0 }
 0x205   : > { %v1980_v51 = vadd.f32 %v1979_v43, %v1978_v4  ;;  %v1486_v46 = vadd.f32 %v1977_v62, %v3086_v28 }
 0x207   : > { %v1489_v60 = vadd.f32 %v1980_v51, %v3086_v28 }
 0x209   : > { %v2015_v55 = vpop.f32.mrb[12].mxu1  ;;  %v2039_v57 = vpop.f32.mrb[16].mxu0 }
 0x20a   : > { %v1600_v9 = vadd.f32 %v2039_v57, %v1535_v17  ;;  %v2016_v42 = vpop.f32.mrb[13].mxu1  ;;  %v1591_v3 = vpop.f32.mrb[17].mxu0 }
 0x20b   : > { %v2017_v39 = vadd.f32 %v2016_v42, %v2015_v55  ;;  %v1592_v0 = vadd.f32 %v1591_v3, %v1527_v23  ;;  %v2018_v10 = vpop.f32.mrb[14].mxu1  ;;  %v2040_v53 = vpop.f32.mrb[18].mxu0 }
 0x20c   : > { %v1603_v58 = vadd.f32 %v2040_v53, %v1538_v14  ;;  %v2019_v29 = vpop.f32.mrb[15].mxu1  ;;  %v1594_v48 = vpop.f32.mrb[19].mxu0  ;;  %v1624_v38 = vmax.f32 %v1600_v9, 0.0 }
 0x20d   : > { %v2020_v7 = vadd.f32 %v2019_v29, %v2018_v10  ;;  %v1595_v50 = vadd.f32 %v1594_v48, %v1530_v63  ;;  %v1551_v26 = vadd.f32 %v2017_v39, %v1486_v46  ;;  %v1622_v32 = vmax.f32 %v1592_v0, 0.0 }
 0x20e   : > { %v1625_v56 = vmax.f32 %v1603_v58, 0.0 }
 0x20f   : > { %v1623_v27 = vmax.f32 %v1595_v50, 0.0  ;;  %v1554_v54 = vadd.f32 %v2020_v7, %v1489_v60 }
 0x210   : > { %v1926_v11 = vpack.c.bf16 %v1625_v56, %v1624_v38 }
 0x211   : > { %v1921_v5 = vpack.c.bf16 %v1623_v27, %v1622_v32  ;;  %v2043_v23 = vpop.f32.mrb[16].mxu1 }
 0x212   : > { %1938 = vst [vmem:[%s252_s24 + $0x8] sm:$0xff] %v1926_v11   ;;  %v1616_v12 = vadd.f32 %v2043_v23, %v1551_v26  ;;  %v1607_v41 = vpop.f32.mrb[17].mxu1 }
 0x213   : > { %1922 = vst [vmem:[%s252_s24] sm:$0xff] %v1921_v5   ;;  %v1608_v47 = vadd.f32 %v1607_v41, %v1543_v61  ;;  %v2044_v20 = vpop.f32.mrb[18].mxu1 }
 0x214   : > { %v1619_v28 = vadd.f32 %v2044_v20, %v1554_v54  ;;  %v1610_v63 = vpop.f32.mrb[19].mxu1  ;;  %v1628_v34 = vmax.f32 %v1616_v12, 0.0 }
 0x215   : > { %v1611_v31 = vadd.f32 %v1610_v63, %v1546_v22  ;;  %v1626_v59 = vmax.f32 %v1608_v47, 0.0 }
 0x216   : > { %v1629_v44 = vmax.f32 %v1619_v28, 0.0 }
 0x217   : > { %v1627_v1 = vmax.f32 %v1611_v31, 0.0 }
 0x218   : > { %v1936_v49 = vpack.c.bf16 %v1629_v44, %v1628_v34 }
 0x219   : > { %v1931_v45 = vpack.c.bf16 %v1627_v1, %v1626_v59 }
 0x21a   : > { %1940 = vst [vmem:[%s252_s24 + $0x18] sm:$0xff] %v1936_v49  }
 0x21b   : > { %1939 = vst [vmem:[%s252_s24 + $0x10] sm:$0xff] %v1931_v45  }
 0x21c   : > { %2302 = shalt.err (!%p2299_p2)
}
 0x21d   : > { %s2303_s29 = scalar_lea.hbm %s3103_s10, 512  ;;  %s2307_s21 = scalar_lea.hbm %s3157_s3, 1024 }
 0x21e   : > { %p2304_p0 = scmp.ne.s32.totalorder %s3103_s10, %s2303_s29  ;;  %p2308_p6 = scmp.lt.u32.totalorder %s3103_s10, %s3157_s3 }
 0x21f   : > { %p2309_p7 = scmp.lt.u32.totalorder %s2307_s21, %s2303_s29  ;;  %p2311_p8 = scmp.lt.u32.totalorder %s2303_s29, %s3103_s10 }
 0x220   : > { %p2305_p4 = pnand %p2304_p0, %p3180_p12 }
 0x221   : > { %p2310_p11 = por %p2309_p7, %p2308_p6 }
 0x222   : > { %p2306_p13 = pneg %p2305_p4 }
 0x223   : > { %p2312_p1 = por %p2311_p8, %p2310_p11 }
 0x225   : > { %p2313_p10 = pnand %p2312_p1, %p2306_p13 }
 0x227   : > { %2316 = shalt.err (!%p2313_p10)
}
 0x228   : > { %s2384_s18 = smov 4  }
 0x229   : > { %2066 = dma.vmem_to_hbm [thread:$0]  (%p3180_p12), %s3098_s11, 512, %s3103_s10, %s1647_s19, %s2382_s22, %s2382_s22, %s2384_s18  }
 0x22a PF: > { %s1678_s5 = sand.u32 1, %s2355_s12   ;;  %p3181_p3 = scmp.ne.s32.totalorder %s3165_s23, 0 }
 0x22b   : > { %p3182_p5 = scmp.ge.s32.totalorder %s2375_s17, 2  ;;  %s1679_s26 = scalar_lea.sflag [#allocation5], %s1678_s5 }
 0x22d   : > { %p2080_p9 = pnand %p3182_p5, %p3181_p3 }
 0x22f   : > { %2350 = dma.done.wait (!%p2080_p9), %s1679_s26, 512  }
 0x230   : > { %2352 = vsyncadd (!%p2080_p9), %s1679_s26, 4294966784  ;;  %s20_s17 = sadd.s32 1, %s2375_s17   ;;  %s3183_s12 = smov %s2359_s13 }
 0x231   : > { %p17_p2 = scmp.ge.s32.totalorder %s20_s17, 4   ;;  %s3184_s13 = smov %s2363_s14 }
 0x232   : > { %s3185_s14 = smov %s2554_s6  ;;  %s3186_s15 = smov %s2371_s16 }
 0x233   : > { %s3187_s16 = smov %s3189_s25  ;;  %19 = sbr.rel (!%p17_p2) target bundleno = 7 (0x7), region = 90 }
 0x23a   :  { %1684 = vsyncpa [#allocation4], 1 }
 0x23b   :  { %1686 = vsyncpa [#allocation4 + $0x1], 1 }
 0x23c   :  { %1687 = vsyncpa [#allocation7], 1 }
 0x23d   :  { %1688 = vsyncpa [#allocation5], 1 }
 0x23e   :  { %1690 = vsyncpa [#allocation5 + $0x1], 1 }

// kernel: _lambda_.13
= control target key start
LH: loop header
LB: loop body
LE: loop exit
PB: predicated region body
PF: predicated region fallthrough
CT: control target
= control target key end

     0   :  { %6 = vsyncpa [#allocation4], 0  ;;  %s684_s0 = inlined_call_operand.hbm [shape: bf16[2,8,8,128], index: 0, kind: input, shape index: {}]   ;;  %s685_s1 = inlined_call_operand.hbm [shape: f32[2,1,128], index: 1, kind: output, shape index: {}]  }
   0x1   :  { %8 = vsyncpa [#allocation4 + $0x1], 0 }
   0x2   :  { %9 = vsyncpa [#allocation5], 0 }
   0x3   :  { %11 = vsyncpa [#allocation5 + $0x1], 0  ;;  %s510_s6 = smov 0   ;;  %s512_s7 = smov 0  }
   0x4   :  { %s514_s8 = smov 0   ;;  %s516_s9 = smov 0  }
   0x5   :  { %s518_s10 = smov 0   ;;  %s520_s11 = smov 0  }
   0x6 LB: > { %s284_s12 = sadd.s32 4294967295, %s493_s11   ;;  %s285_s13 = sadd.s32 4294967294, %s493_s11   ;;  %s493_s11 = sphi %s520_s11, %s17_s11   ;;  %s489_s10 = sphi %s518_s10, %s700_s10   ;;  %s485_s9 = sphi %s516_s9, %s699_s9   ;;  %s481_s8 = sphi %s514_s8, %s698_s8   ;;  %s477_s7 = sphi %s512_s7, %s697_s7   ;;  %s473_s6 = sphi %s510_s6, %s696_s6  }
   0x7   : > { %s29_s14 = sadd.s32 1, %s489_s10  ;;  %s38_s15 = sadd.s32 1, %s481_s8 }
   0x8   : > { %p31_p0 = scmp.ge.s32.totalorder %s29_s14, 2  ;;  %p45_p1 = scmp.ne.s32.totalorder %s481_s8, %s477_s7 }
   0x9   : > { %p46_p2 = scmp.eq.s32.totalorder %s493_s11, 0  ;;  %p51_p3 = scmp.ne.s32.totalorder %s477_s7, %s473_s6 }
   0xa   : > { %s702_s14 = smov (%p31_p0, %s29_s14), 0  ;;  %p52_p5 = scmp.eq.s32.totalorder %s284_s12, 0 }
   0xb   : > { %p551_p4 = por %p46_p2, %p45_p1  ;;  %s33_s17 = ssub.s32 %s489_s10, %s702_s14 }
   0xc   : > { %p75_p6 = scmp.eq.s32.totalorder %s284_s12, 1  ;;  %p36_p7 = scmp.eq.s32.totalorder %s33_s17, 0 }
   0xd   : > { %p557_p8 = por %p52_p5, %p51_p3  ;;  %p81_p10 = scmp.eq.s32.totalorder %s285_s13, 1 }
   0xe   : > { %p561_p9 = por %p75_p6, %p45_p1  ;;  %p328_p13 = scmp.lt.s32.totalorder %s493_s11, 2 }
   0xf   : > { %s566_s20 = scalar_select %p36_p7, %s481_s8, %s38_s15  }
  0x10   : > { %s689_s19 = scalar_select %p561_p9, 1, 0 }
  0x11   : > { %p568_p11 = por %p81_p10, %p51_p3  ;;  %s101_s22 = sand.u32 1, %s481_s8  }
  0x12   : > { %s288_s23 = sshll.u32 %s101_s22, 5  ;;  %s296_s24 = sshll.u32 %s489_s10, 9 }
  0x13   : > { %s690_s21 = scalar_select %p568_p11, 1, 0 }
  0x14   : > { %s579_s27 = scalar_lea.hbm %s684_s0, %s296_s24  ;;  %s105_s28 = scalar_lea.vmem [#allocation3], %s288_s23 }
  0x15   : > { %s114_s29 = sshll.u32 %s105_s28, 4  ;;  %p585_p0 = pnand %p328_p13, %p551_p4  ;;  %s581_s29 = int_to_ptr.vmem [resolvable:$true] %s114_s29 }
  0x16   : > { %s590_s2 = scalar_lea.sflag [#allocation4], %s101_s22  ;;  %s381_s3 = scalar_lea.hbm %s579_s27, 512 }
  0x17   : > { %p382_p2 = scmp.ne.s32.totalorder %s579_s27, %s381_s3  ;;  %p383_p3 = pneg %p585_p0 }
  0x18   : > { %s386_s12 = scalar_lea.hbm %s684_s0, 1024  ;;  %p387_p4 = scmp.lt.u32.totalorder %s579_s27, %s684_s0 }
  0x19   : > { %p384_p5 = pnand %p383_p3, %p382_p2  ;;  %p388_p7 = scmp.lt.u32.totalorder %s386_s12, %s381_s3 }
  0x1a   : > { %p390_p13 = scmp.lt.u32.totalorder %s381_s3, %s579_s27 }
  0x1b   : > { %p385_p6 = pneg %p384_p5  ;;  %p389_p10 = por %p388_p7, %p387_p4 }
  0x1d   : > { %p391_p12 = por %p390_p13, %p389_p10 }
  0x1f   : > { %p392_p1 = pnand %p391_p12, %p385_p6 }
  0x21   : > { %395 = shalt.err (!%p392_p1)
}
  0x22   : > { %s396_s16 = scalar_lea.vmem %s581_s29, 512  ;;  %s495_s17 = smov [#allocation3]  }
  0x23   : > { %p397_p2 = scmp.ne.s32.totalorder %s581_s29, %s396_s16  ;;  %s401_s22 = sshll.u32 %s495_s17, 4  ;;  %s402_s22 = int_to_ptr.vmem [resolvable:$false] %s401_s22 }
  0x24   : > { %s403_s23 = scalar_lea.vmem %s402_s22, 1024  ;;  %p404_p9 = scmp.lt.s32.totalorder %s581_s29, %s402_s22 }
  0x25   : > { %p399_p5 = pnand %p397_p2, %p383_p3  ;;  %p405_p4 = scmp.lt.s32.totalorder %s403_s23, %s396_s16 }
  0x27   : > { %p400_p11 = pneg %p399_p5  ;;  %p406_p7 = por %p405_p4, %p404_p9 }
  0x29   : > { %p407_p10 = pnand %p406_p7, %p400_p11 }
  0x2b   : > { %410 = shalt.err (!%p407_p10)
}
  0x2c   : > { %s496_s24 = smov 64   ;;  %s497_s25 = smov 4  }
  0x2d   : > { %323 = dma.hbm_to_vmem [thread:$0]  (!%p585_p0), %s579_s27, 512, %s581_s29, %s590_s2, %s496_s24, %s496_s24, %s497_s25  }
  0x2e   : > { %p122_p12 = scmp.lt.s32.totalorder %s493_s11, 3  ;;  %p692_p1 = scmp.ge.s32.totalorder %s493_s11, 1 }
  0x30   : > { %p123_p3 = pnand %p692_p1, %p122_p12 }
  0x31   : > { %s622_s26 = sand.u32 (!%p123_p3), 1, %s477_s7  }
  0x32   : > { %126 = sbr.rel (%p123_p3) target bundleno = 113 (0x71), region = 24  ;;  %s292_s28 = sshll.u32 (!%p123_p3), %s622_s26, 5 }
  0x33   : > { %s129_s3 = scalar_lea.sflag (!%p123_p3), [#allocation4], %s622_s26  ;;  %s132_s4 = scalar_lea.vmem (!%p123_p3), [#allocation3], %s292_s28 }
  0x39   : > { %464 = dma.done.wait (%p557_p8), %s129_s3, 512  }
  0x3a   : > { %466 = vsyncadd (%p557_p8), %s129_s3, 4294966784  ;;  %v498_v0 = vmov 0.0   ;;  %v298_v1 = vld [vmem:[%s132_s4] sm:$0xff]   ;;  %v313_v2 = vld [vmem:[%s132_s4 + $0x8] sm:$0xff]   ;;  %s149_s18 = scalar_lea.vmem [#allocation6], %s622_s26  ;;  %s293_s29 = sshll.u32 %s485_s9, 4 }
  0x3b   : > { %155 = vst [vmem:[#allocation2] sm:$0x1] %v498_v0  ;;  %v299_v3 = vunpack.c.l.bf16 %v298_v1  ;;  %v300_v4 = vunpack.c.h.bf16 %v298_v1  ;;  %v303_v5 = vunpack.c.l.bf16 %v313_v2  ;;  %v314_v6 = vld [vmem:[%s132_s4 + $0x10] sm:$0xff]   ;;  %v304_v7 = vunpack.c.h.bf16 %v313_v2  ;;  %v315_v11 = vld [vmem:[%s132_s4 + $0x18] sm:$0xff]   ;;  %s207_s27 = sshll.u32 %s149_s18, 4  ;;  %s637_s5 = scalar_lea.hbm %s685_s1, %s293_s29  ;;  %s632_s27 = int_to_ptr.vmem [resolvable:$true] %s207_s27 }
  0x3c   : > { %v307_v9 = vunpack.c.l.bf16 %v314_v6  ;;  %v308_v12 = vunpack.c.h.bf16 %v314_v6  ;;  %v311_v14 = vunpack.c.l.bf16 %v315_v11  ;;  %v312_v16 = vunpack.c.h.bf16 %v315_v11  ;;  %s195_s12 = scalar_lea.sflag [#allocation5], %s622_s26  ;;  %s411_s13 = scalar_lea.vmem %s632_s27, 16 }
  0x3d   : > { %v173_v8 = vadd.f32 %v300_v4, %v299_v3  ;;  %p412_p8 = scmp.ne.s32.totalorder %s632_s27, %s411_s13  ;;  %p693_p9 = scmp.ne.s32.totalorder %s689_s19, 0 }
  0x3e   : > { %s499_s9 = smov [#allocation6]  }
  0x3f   : > { %v174_v10 = vadd.f32 %v303_v5, %v173_v8  ;;  %p413_p11 = pnand %p412_p8, %p693_p9  ;;  %s415_s15 = sshll.u32 %s499_s9, 4  ;;  %s416_s15 = int_to_ptr.vmem [resolvable:$false] %s415_s15 }
  0x40   : > { %s417_s16 = scalar_lea.vmem %s416_s15, 32  ;;  %p418_p6 = scmp.lt.s32.totalorder %s632_s27, %s416_s15 }
  0x41   : > { %v175_v13 = vadd.f32 %v304_v7, %v174_v10  ;;  %p414_p0 = pneg %p413_p11  ;;  %p419_p13 = scmp.lt.s32.totalorder %s417_s16, %s411_s13 }
  0x42   : > { %v172_v25 = vld [vmem:[#allocation2] sm:$0x1] }
  0x43   : > { %v176_v15 = vadd.f32 %v307_v9, %v175_v13  ;;  %p420_p2 = por %p419_p13, %p418_p6 }
  0x45   : > { %v177_v17 = vadd.f32 %v308_v12, %v176_v15  ;;  %p421_p5 = pnand %p420_p2, %p414_p0 }
  0x47   : > { %v178_v18 = vadd.f32 %v311_v14, %v177_v17 }
  0x49   : > { %v179_v19 = vadd.f32 %v312_v16, %v178_v18 }
  0x4b   : > { %v180_v20 = vrot.slane %v179_v19, 4 }
  0x4d   : > { %v181_v21 = vadd.f32 %v180_v20, %v179_v19 }
  0x4f   : > { %v182_v22 = vrot.slane %v181_v21, 2 }
  0x51   : > { %v183_v23 = vadd.f32 %v182_v22, %v181_v21 }
  0x53   : > { %v184_v24 = vrot.slane %v183_v23, 1 }
  0x55   : > { %v185_v26 = vadd.f32 %v184_v24, %v183_v23 }
  0x57   : > { %v186_v27 = vadd.f32 %v185_v26, %v172_v25 }
  0x59   : > { %187 = vst [vmem:[#allocation2] sm:$0x1] %v186_v27 }
  0x60   : > { %v191_v28 = vld [vmem:[#allocation2] sm:$0x1] }
  0x61   : > { %v192_v29 = vmul.f32 0.015625, %v191_v28 }
  0x63   : > { %193 = vst [vmem:[%s149_s18] sm:$0x1] %v192_v29 }
  0x64   : > { %424 = shalt.err (!%p421_p5)
}
  0x65   : > { %s425_s17 = scalar_lea.hbm %s637_s5, 16  ;;  %s429_s24 = scalar_lea.hbm %s685_s1, 32 }
  0x66   : > { %p426_p4 = scmp.ne.s32.totalorder %s637_s5, %s425_s17  ;;  %p430_p12 = scmp.lt.u32.totalorder %s637_s5, %s685_s1 }
  0x67   : > { %p431_p1 = scmp.lt.u32.totalorder %s429_s24, %s425_s17  ;;  %p433_p8 = scmp.lt.u32.totalorder %s425_s17, %s637_s5 }
  0x68   : > { %p427_p7 = pnand %p426_p4, %p693_p9 }
  0x69   : > { %p432_p3 = por %p431_p1, %p430_p12 }
  0x6a   : > { %p428_p10 = pneg %p427_p7 }
  0x6b   : > { %p434_p11 = por %p433_p8, %p432_p3 }
  0x6d   : > { %p435_p0 = pnand %p434_p11, %p428_p10 }
  0x6f   : > { %438 = shalt.err (!%p435_p0)
}
  0x70   : > { %318 = dma.vmem_to_hbm [thread:$0]  (%p693_p9), %s632_s27, 16, %s637_s5, %s195_s12  }
  0x71 PF: > { %s219_s28 = sand.u32 1, %s473_s6   ;;  %p694_p6 = scmp.ne.s32.totalorder %s690_s21, 0 }
  0x72   : > { %p695_p13 = scmp.ge.s32.totalorder %s493_s11, 2  ;;  %s220_s3 = scalar_lea.sflag [#allocation5], %s219_s28 }
  0x74   : > { %p325_p2 = pnand %p695_p13, %p694_p6 }
  0x76   : > { %468 = dma.done.wait (!%p325_p2), %s220_s3, 16  }
  0x77   : > { %470 = vsyncadd (!%p325_p2), %s220_s3, 4294967280  ;;  %s17_s11 = sadd.s32 1, %s493_s11   ;;  %s696_s6 = smov %s477_s7 }
  0x78   : > { %p14_p5 = scmp.ge.s32.totalorder %s17_s11, 4   ;;  %s697_s7 = smov %s481_s8 }
  0x79   : > { %s698_s8 = smov %s566_s20  ;;  %s699_s9 = smov %s489_s10 }
  0x7a   : > { %s700_s10 = smov %s702_s14  ;;  %16 = sbr.rel (!%p14_p5) target bundleno = 6 (0x6), region = 77 }
  0x81   :  { %224 = vsyncpa [#allocation4], 1 }
  0x82   :  { %226 = vsyncpa [#allocation4 + $0x1], 1 }
  0x83   :  { %227 = vsyncpa [#allocation5], 1 }
  0x84   :  { %229 = vsyncpa [#allocation5 + $0x1], 1 }

// kernel: _lambda_.12
= control target key start
LH: loop header
LB: loop body
LE: loop exit
PB: predicated region body
PF: predicated region fallthrough
CT: control target
= control target key end

     0   :  { %8 = vsyncpa [#allocation4], 0  ;;  %s3679_s0 = inlined_call_operand.hbm [shape: bf16[2,10,10,128], index: 0, kind: input, shape index: {}]   ;;  %s3680_s1 = inlined_call_operand.hbm [shape: bf16[1,1152,128], index: 1, kind: input, shape index: {}]   ;;  %s3681_s2 = inlined_call_operand.hbm [shape: f32[1,128], index: 2, kind: input, shape index: {}]   ;;  %s3682_s3 = inlined_call_operand.hbm [shape: bf16[2,8,8,128], index: 3, kind: output, shape index: {}]  }
   0x1   :  { %10 = vsyncpa [#allocation4 + $0x1], 0 }
   0x2   :  { %11 = vsyncpa [#allocation7], 0 }
   0x3   :  { %12 = vsyncpa [#allocation5], 0 }
   0x4   :  { %14 = vsyncpa [#allocation5 + $0x1], 0  ;;  %s3042_s12 = smov 0   ;;  %s3044_s13 = smov 0  }
   0x5   :  { %s3046_s14 = smov 0   ;;  %s3048_s15 = smov 0  }
   0x6   :  { %s3050_s16 = smov 0   ;;  %s3052_s17 = smov 0  }
   0x7 LB: > { %s2215_s18 = sadd.s32 4294967295, %s3012_s17   ;;  %s2216_s19 = sadd.s32 4294967294, %s3012_s17   ;;  %s3012_s17 = sphi %s3052_s17, %s20_s17   ;;  %s3008_s16 = sphi %s3050_s16, %s3708_s16   ;;  %s3004_s15 = sphi %s3048_s15, %s3707_s15   ;;  %s3000_s14 = sphi %s3046_s14, %s3706_s14   ;;  %s2996_s13 = sphi %s3044_s13, %s3705_s13   ;;  %s2992_s12 = sphi %s3042_s12, %s3704_s12  }
   0x8   : > { %p59_p0 = scmp.ne.s32.totalorder %s2996_s13, %s2992_s12  ;;  %p3076_p1 = scmp.eq.s32.totalorder %s2215_s18, 0 }
   0x9   : > { %p3080_p2 = scmp.eq.s32.totalorder %s2215_s18, 1  ;;  %p145_p3 = scmp.eq.s32.totalorder %s2216_s19, 1 }
   0xa   : > { %s3687_s20 = scalar_select %p3076_p1, 1, 0 }
   0xb   : > { %p3086_p4 = por %p3076_p1, %p59_p0  ;;  %p2217_p5 = scmp.ge.s32.totalorder %s3012_s17, 1 }
   0xc   : > { %p3091_p6 = por %p145_p3, %p59_p0  ;;  %p152_p7 = scmp.lt.s32.totalorder %s3012_s17, 3 }
   0xd   : > { %s3689_s22 = scalar_select %p3086_p4, 1, 0 }
   0xe   : > { %s3690_s23 = scalar_select %p3091_p6, 1, 0 }
   0xf   : > { %p3096_p8 = pnand %p2217_p5, %p152_p7  ;;  %s3014_s25 = smov [#allocation6]  }
  0x10   : > { %s166_s26 = sshll.u32 %s3014_s25, 4  ;;  %s3015_s28 = smov [#allocation8]   ;;  %s3100_s26 = int_to_ptr.vmem [resolvable:$true] %s166_s26 }
  0x11   : > { %p2647_p9 = pneg %p3096_p8  ;;  %s182_s29 = sshll.u32 %s3015_s28, 4  ;;  %s3111_s29 = int_to_ptr.vmem [resolvable:$true] %s182_s29 }
  0x12   : > { %s2840_s5 = scalar_lea.hbm %s3680_s1, 9216 }
  0x13   : > { %p3107_p11 = pnand %p2647_p9, %p3076_p1  ;;  %p2841_p12 = scmp.ne.s32.totalorder %s3680_s1, %s2840_s5 }
  0x14   : > { %p2847_p5 = scmp.lt.u32.totalorder %s2840_s5, %s3680_s1 }
  0x15   : > { %p2842_p13 = pneg %p3107_p11 }
  0x17   : > { %p2843_p0 = pnand %p2842_p13, %p2841_p12 }
  0x19   : > { %p2844_p3 = pneg %p2843_p0 }
  0x1b   : > { %p2849_p7 = pnand %p2847_p5, %p2844_p3 }
  0x1d   : > { %2852 = shalt.err (!%p2849_p7)
}
  0x1e   : > { %s2853_s10 = scalar_lea.vmem %s3100_s26, 9216  ;;  %p2861_p1 = scmp.lt.s32.totalorder %s3100_s26, %s3100_s26 }
  0x1f   : > { %p2854_p9 = scmp.ne.s32.totalorder %s3100_s26, %s2853_s10  ;;  %p2862_p12 = scmp.lt.s32.totalorder %s2853_s10, %s2853_s10 }
  0x21   : > { %p2856_p10 = pnand %p2854_p9, %p2842_p13  ;;  %p2863_p0 = por %p2862_p12, %p2861_p1 }
  0x23   : > { %p2857_p6 = pneg %p2856_p10 }
  0x25   : > { %p2864_p4 = pnand %p2863_p0, %p2857_p6 }
  0x27   : > { %2867 = shalt.err (!%p2864_p4)
}
  0x28   : > { %s3016_s11 = smov 64   ;;  %s3017_s18 = smov 4  }
  0x29   : > { %2650 = dma.hbm_to_vmem [thread:$0]  (!%p3107_p11), %s3680_s1, 9216, %s3100_s26, [#allocation7], %s3016_s11, %s3016_s11, %s3017_s18  }
  0x2a   : > { %s2868_s4 = scalar_lea.hbm %s3681_s2, 16 }
  0x2b   : > { %p2869_p1 = scmp.ne.s32.totalorder %s3681_s2, %s2868_s4  ;;  %p2875_p10 = scmp.lt.u32.totalorder %s2868_s4, %s3681_s2 }
  0x2d   : > { %p2871_p4 = pnand %p2869_p1, %p2842_p13 }
  0x2f   : > { %p2872_p6 = pneg %p2871_p4 }
  0x31   : > { %p2877_p3 = pnand %p2875_p10, %p2872_p6 }
  0x33   : > { %2880 = shalt.err (!%p2877_p3)
}
  0x34   : > { %s2881_s26 = scalar_lea.vmem %s3111_s29, 16  ;;  %s2888_s9 = scalar_lea.vmem %s3111_s29, 32 }
  0x35   : > { %p2882_p5 = scmp.ne.s32.totalorder %s3111_s29, %s2881_s26  ;;  %p2889_p12 = scmp.lt.s32.totalorder %s3111_s29, %s3111_s29 }
  0x36   : > { %p2890_p0 = scmp.lt.s32.totalorder %s2888_s9, %s2881_s26 }
  0x37   : > { %p2884_p7 = pnand %p2882_p5, %p2842_p13 }
  0x38   : > { %p2891_p1 = por %p2890_p0, %p2889_p12 }
  0x39   : > { %p2885_p9 = pneg %p2884_p7 }
  0x3b   : > { %p2892_p4 = pnand %p2891_p1, %p2885_p9 }
  0x3d   : > { %2895 = shalt.err (!%p2892_p4)
}
  0x3e   : > { %2653 = dma.hbm_to_vmem [thread:$0]  (!%p3107_p11), %s3681_s2, 16, %s3111_s29, [#allocation7]  }
  0x3f   : > { %s39_s25 = sadd.s32 1, %s3008_s16  ;;  %s46_s28 = sadd.s32 1, %s3000_s14 }
  0x40   : > { %p41_p13 = scmp.ge.s32.totalorder %s39_s25, 2  ;;  %p53_p6 = scmp.ne.s32.totalorder %s3000_s14, %s2996_s13 }
  0x41   : > { %p54_p10 = scmp.eq.s32.totalorder %s3012_s17, 0  ;;  %p2664_p3 = scmp.lt.s32.totalorder %s3012_s17, 2 }
  0x42   : > { %s3710_s25 = smov (%p41_p13, %s39_s25), 0  ;;  %p3179_p7 = por %p3080_p2, %p53_p6 }
  0x43   : > { %p55_p5 = por %p54_p10, %p53_p6  ;;  %s43_s30 = ssub.s32 %s3008_s16, %s3710_s25 }
  0x44   : > { %s3693_s27 = scalar_select %p3179_p7, 1, 0 }
  0x45   : > { %s193_s4 = sand.u32 1, %s3000_s14   ;;  %p44_p9 = scmp.eq.s32.totalorder %s43_s30, 0 }
  0x46   : > { %s2632_s29 = smul.u32 80, %s193_s4  ;;  %p3186_p11 = pnand %p2664_p3, %p55_p5 }
  0x47   : > { %s3191_s6 = scalar_select %p44_p9, %s3000_s14, %s46_s28  }
  0x48   : > { %s2633_s7 = smul.u32 1280, %s3008_s16  ;;  %s197_s8 = scalar_lea.vmem [#allocation3], %s2632_s29 }
  0x49   : > { %s204_s26 = sshll.u32 %s197_s8, 4  ;;  %s3201_s19 = scalar_lea.sflag [#allocation4], %s193_s4  ;;  %s3199_s26 = int_to_ptr.vmem [resolvable:$true] %s204_s26 }
  0x4a   : > { %s3197_s10 = scalar_lea.hbm %s3679_s0, %s2633_s7  ;;  %p2898_p12 = pneg %p3186_p11 }
  0x4b   : > { %s2896_s30 = scalar_lea.hbm %s3197_s10, 1280  ;;  %s2901_s7 = scalar_lea.hbm %s3679_s0, 2560 }
  0x4c   : > { %p2897_p2 = scmp.ne.s32.totalorder %s3197_s10, %s2896_s30  ;;  %p2902_p4 = scmp.lt.u32.totalorder %s3197_s10, %s3679_s0 }
  0x4d   : > { %p2903_p13 = scmp.lt.u32.totalorder %s2901_s7, %s2896_s30  ;;  %p2905_p10 = scmp.lt.u32.totalorder %s2896_s30, %s3197_s10 }
  0x4e   : > { %p2899_p0 = pnand %p2898_p12, %p2897_p2 }
  0x4f   : > { %p2904_p6 = por %p2903_p13, %p2902_p4 }
  0x50   : > { %p2900_p1 = pneg %p2899_p0 }
  0x51   : > { %p2906_p3 = por %p2905_p10, %p2904_p6 }
  0x53   : > { %p2907_p5 = pnand %p2906_p3, %p2900_p1 }
  0x55   : > { %2910 = shalt.err (!%p2907_p5)
}
  0x56   : > { %s2911_s4 = scalar_lea.vmem %s3199_s26, 1280  ;;  %s3018_s9 = smov [#allocation3]  }
  0x57   : > { %p2912_p9 = scmp.ne.s32.totalorder %s3199_s26, %s2911_s4  ;;  %s2916_s28 = sshll.u32 %s3018_s9, 4  ;;  %s2917_s28 = int_to_ptr.vmem [resolvable:$false] %s2916_s28 }
  0x58   : > { %s2918_s29 = scalar_lea.vmem %s2917_s28, 2560  ;;  %p2919_p7 = scmp.lt.s32.totalorder %s3199_s26, %s2917_s28 }
  0x59   : > { %p2914_p2 = pnand %p2912_p9, %p2898_p12  ;;  %p2920_p4 = scmp.lt.s32.totalorder %s2918_s29, %s2911_s4 }
  0x5b   : > { %p2915_p0 = pneg %p2914_p2  ;;  %p2921_p13 = por %p2920_p4, %p2919_p7 }
  0x5d   : > { %p2922_p6 = pnand %p2921_p13, %p2915_p0 }
  0x5f   : > { %2925 = shalt.err (!%p2922_p6)
}
  0x60   : > { %2657 = dma.hbm_to_vmem [thread:$0]  (!%p3186_p11), %s3197_s10, 1280, %s3199_s26, %s3201_s19, %s3016_s11, %s3016_s11, %s3017_s18  }
  0x61   : > { %216 = sbr.rel (%p3096_p8) target bundleno = 467 (0x1d3), region = 32  ;;  %s3235_s30 = sand.u32 (!%p3096_p8), 1, %s2996_s13  }
  0x62   : > { %s2634_s7 = smul.u32 (!%p3096_p8), 80, %s3235_s30  ;;  %s219_s8 = scalar_lea.sflag (!%p3096_p8), [#allocation4], %s3235_s30 }
  0x63   : > { %p3695_p7 = scmp.ne.s32.totalorder (!%p3096_p8), %s3689_s22, 0 }
  0x64   : > { %s3239_s21 = scalar_lea.vmem (!%p3096_p8), [#allocation3], %s2634_s7 }
  0x68   : > { %2979 = dma.done.wait (%p3695_p7), %s219_s8, 1280  }
  0x69   : > { %2981 = vsyncadd (%p3695_p7), %s219_s8, 4294966016  ;;  %p3696_p11 = scmp.ne.s32.totalorder %s3687_s20, 0 }
  0x6b   : > { %2983 = dma.done.wait (%p3696_p11), [#allocation7], 9232  }
  0x6c   : > { %2985 = vsyncadd (%p3696_p11), [#allocation7], 4294958064  ;;  %v2722_v0 = vld [vmem:[#allocation6 + $0x40] sm:$0xff]   ;;  %v2726_v4 = vld [vmem:[#allocation6 + $0x48] sm:$0xff]   ;;  %vm283_vm0 = vsmask.f32 3328 }
  0x6d   : > { %v2723_v1 = vld [vmem:[#allocation6 + $0xc0] sm:$0xff]   ;;  %2420 = vmatprep.subr.bf16.mxu0 %v2722_v0  ;;  %v2727_v5 = vld [vmem:[#allocation6 + $0xc8] sm:$0xff]   ;;  %v2730_v8 = vld [vmem:[#allocation6 + $0x50] sm:$0xff]   ;;  %vm284_vm1 = vsmask.f32 7440  ;;  %vm430_vm2 = vcmask 1042432  }
  0x6e   : > { %v2724_v2 = vld [vmem:[#allocation6] sm:$0xff]   ;;  %2460 = vmatprep.subr.bf16.mxu1 %v2723_v1  ;;  %v2728_v6 = vld [vmem:[#allocation6 + $0x8] sm:$0xff]   ;;  %v2731_v9 = vld [vmem:[#allocation6 + $0xd0] sm:$0xff]   ;;  %vm431_vm3 = vcmask 1046532   ;;  %s2225_s20 = sshll.u32 %s3235_s30, 5  ;;  %s2396_s11 = sshll.u32 %s3004_s15, 9 }
  0x6f   : > { %v2725_v3 = vld [vmem:[#allocation6 + $0x80] sm:$0xff]   ;;  %2421 = vmatpush3.bf16.msra.mxu0 %v2724_v2  ;;  %v2729_v7 = vld [vmem:[#allocation6 + $0x88] sm:$0xff]   ;;  %v2732_v10 = vld [vmem:[#allocation6 + $0x10] sm:$0xff]   ;;  %s252_s22 = scalar_lea.vmem [#allocation9], %s2225_s20  ;;  %s3630_s26 = scalar_lea.hbm %s3682_s3, %s2396_s11 }
  0x70   : > { %2461 = vmatpush3.bf16.msra.mxu1 %v2725_v3  ;;  %2422 = vmatprep.subr.bf16.mxu0 %v2726_v4  ;;  %v2733_v11 = vld [vmem:[#allocation6 + $0x90] sm:$0xff]   ;;  %v2734_v12 = vld [vmem:[#allocation6 + $0x58] sm:$0xff]   ;;  %v2738_v16 = vld [vmem:[#allocation6 + $0x60] sm:$0xff]   ;;  %s2094_s24 = sshll.u32 %s252_s22, 4  ;;  %s2078_s10 = scalar_lea.sflag [#allocation5], %s3235_s30  ;;  %s3625_s24 = int_to_ptr.vmem [resolvable:$true] %s2094_s24 }
  0x71   : > { %2462 = vmatprep.subr.bf16.mxu1 %v2727_v5  ;;  %v2735_v13 = vld [vmem:[#allocation6 + $0xd8] sm:$0xff]   ;;  %v2739_v17 = vld [vmem:[#allocation6 + $0xe0] sm:$0xff]   ;;  %v2742_v20 = vld [vmem:[#allocation6 + $0x68] sm:$0xff]   ;;  %s2926_s15 = scalar_lea.vmem %s3625_s24, 512  ;;  %p3701_p12 = scmp.ne.s32.totalorder %s3693_s27, 0 }
  0x72   : > { %v2736_v14 = vld [vmem:[#allocation6 + $0x18] sm:$0xff]   ;;  %v2740_v18 = vld [vmem:[#allocation6 + $0x20] sm:$0xff]   ;;  %v2743_v21 = vld [vmem:[#allocation6 + $0xe8] sm:$0xff]   ;;  %p2927_p8 = scmp.ne.s32.totalorder %s3625_s24, %s2926_s15  ;;  %s3019_s19 = smov [#allocation9]  }
  0x73   : > { %2423 = vmatpush3.bf16.msra.mxu0 %v2728_v6  ;;  %v2737_v15 = vld [vmem:[#allocation6 + $0x98] sm:$0xff]   ;;  %v2741_v19 = vld [vmem:[#allocation6 + $0xa0] sm:$0xff]   ;;  %v2744_v22 = vld [vmem:[#allocation6 + $0x28] sm:$0xff]   ;;  %s2930_s4 = sshll.u32 %s3019_s19, 4  ;;  %s2931_s4 = int_to_ptr.vmem [resolvable:$false] %s2930_s4 }
  0x74   : > { %2463 = vmatpush3.bf16.msra.mxu1 %v2729_v7  ;;  %2424 = vmatprep.subr.bf16.mxu0 %v2730_v8  ;;  %v2745_v23 = vld [vmem:[#allocation6 + $0xa8] sm:$0xff]   ;;  %v2746_v24 = vld [vmem:[#allocation6 + $0x70] sm:$0xff]   ;;  %v2750_v28 = vld [vmem:[#allocation6 + $0x78] sm:$0xff]   ;;  %p2928_p1 = pnand %p2927_p8, %p3701_p12  ;;  %s2932_s9 = scalar_lea.vmem %s2931_s4, 1024 }
  0x75   : > { %2464 = vmatprep.subr.bf16.mxu1 %v2731_v9  ;;  %v2747_v25 = vld [vmem:[#allocation6 + $0xf0] sm:$0xff]   ;;  %v2751_v29 = vld [vmem:[#allocation6 + $0xf8] sm:$0xff]   ;;  %vm3255_vm4 = vmor %vm430_vm2, %vm431_vm3  ;;  %p2933_p3 = scmp.lt.s32.totalorder %s3625_s24, %s2931_s4  ;;  %p2934_p5 = scmp.lt.s32.totalorder %s2932_s9, %s2926_s15 }
  0x76   : > { %v2748_v26 = vld [vmem:[#allocation6 + $0x30] sm:$0xff]   ;;  %v2752_v30 = vld [vmem:[#allocation6 + $0x38] sm:$0xff]   ;;  %v2760_v54 = vld [vmem:[#allocation6 + $0x140] sm:$0xff]   ;;  %p2929_p10 = pneg %p2928_p1 }
  0x77   : > { %2425 = vmatpush3.bf16.msra.mxu0 %v2732_v10  ;;  %v2749_v27 = vld [vmem:[#allocation6 + $0xb0] sm:$0xff]   ;;  %v2753_v31 = vld [vmem:[#allocation6 + $0xb8] sm:$0xff]   ;;  %v2761_v59 = vld [vmem:[#allocation6 + $0x1c0] sm:$0xff]   ;;  %p2935_p9 = por %p2934_p5, %p2933_p3 }
  0x78   : > { %2465 = vmatpush3.bf16.msra.mxu1 %v2733_v11  ;;  %2426 = vmatprep.subr.bf16.mxu0 %v2734_v12  ;;  %v259_v32 = vld [vmem:[%s3239_s21] sm:$0xf]  ;;  %v260_v33 = vld [vmem:[%s3239_s21 + $0x4] sm:$0x1]  ;;  %v261_v34 = vld [vmem:[%s3239_s21 + $0x8] sm:$0xf] }
  0x79   : > { %2466 = vmatprep.subr.bf16.mxu1 %v2735_v13  ;;  %v262_v35 = vld [vmem:[%s3239_s21 + $0xc] sm:$0x1]  ;;  %275 = vst [vmem:[#allocation2] sm:$0xf] %v259_v32  ;;  %276 = vst [vmem:[#allocation2 + $0x24] sm:$0xf] %v261_v34  ;;  %p2936_p2 = pnand %p2935_p9, %p2929_p10 }
  0x7a   : > { %v287_v36 = vshrl.u32 %v259_v32, 16  ;;  %v290_v37 = vshll.u32 %v259_v32, 16  ;;  %v296_v38 = vshll.u32 %v260_v33, 16  ;;  %v301_v39 = vshrl.u32 %v261_v34, 16  ;;  %v3260_v45 = vld [vmem:[%s3239_s21 + $0x8] sm:$0xf]  ;;  %vm3273_vm5 = vmor %vm283_vm0, %vm284_vm1 }
  0x7b   : > { %2427 = vmatpush3.bf16.msra.mxu0 %v2736_v14  ;;  %v304_v41 = vshll.u32 %v261_v34, 16  ;;  %v310_v42 = vshll.u32 %v262_v35, 16  ;;  %v2226_v43 = vrot.slane %v259_v32, 9  ;;  %v435_v44 = vrot.slane %v260_v33, 5  ;;  %v3263_v49 = vld [vmem:[%s3239_s21 + $0x10] sm:$0xf] }
  0x7c   : > { %2467 = vmatpush3.bf16.msra.mxu1 %v2737_v15  ;;  %2428 = vmatprep.subr.bf16.mxu0 %v2738_v16  ;;  %v289_v46 = vrot.slane %v287_v36, 4  ;;  %v292_v47 = vrot.slane %v290_v37, 5  ;;  %v303_v48 = vrot.slane %v301_v39, 4  ;;  %501 = vst [vmem:[#allocation2 + $0xc] sm:$0xf] %v3260_v45  ;;  %v298_v50 = vrot.slane %v296_v38, 5 }
  0x7d   : > { %2468 = vmatprep.subr.bf16.mxu1 %v2739_v17  ;;  %v306_v51 = vrot.slane %v304_v41, 5  ;;  %v436_v52 = vsel %vm3255_vm4, %v2226_v43, %v435_v44  ;;  %v2227_v53 = vrot.slane %v261_v34, 9  ;;  %502 = vst [vmem:[#allocation2 + $0x30] sm:$0xf] %v3263_v49  ;;  %v439_v56 = vrot.slane %v262_v35, 5  ;;  %v2763_v13 = vld [vmem:[#allocation6 + $0x180] sm:$0xff]  }
  0x7e   : > { %v293_v55 = vor.u32 %v292_v47, %v289_v46  ;;  %473 = vst [vmem:[#allocation2 + $0x8] sm:$0xf] %v436_v52  ;;  %v510_v57 = vshrl.u32 %v3260_v45, 16  ;;  %v513_v58 = vshll.u32 %v3260_v45, 16  ;;  %v312_v62 = vrot.slane %v310_v42, 5  ;;  %v2765_v14 = vld [vmem:[#allocation6 + $0x1c8] sm:$0xff]  }
  0x7f   : > { %2429 = vmatpush3.bf16.msra.mxu0 %v2740_v18  ;;  %v307_v61 = vor.u32 %v306_v51, %v303_v48  ;;  %v524_v63 = vshrl.u32 %v3263_v49, 16  ;;  %v440_v1 = vsel %vm3255_vm4, %v2227_v53, %v439_v56  ;;  %v527_v5 = vshll.u32 %v3263_v49, 16  ;;  %v263_v15 = vld [vmem:[%s3239_s21 + $0x10] sm:$0xf]  ;;  %v264_v16 = vld [vmem:[%s3239_s21 + $0x14] sm:$0x1] }
  0x80   : > { %2469 = vmatpush3.bf16.msra.mxu1 %v2741_v19  ;;  %2430 = vmatprep.subr.bf16.mxu0 %v2742_v20  ;;  %v294_v0 = vrot.slane %v293_v55, 4  ;;  %v512_v2 = vrot.slane %v510_v57, 4  ;;  %v515_v3 = vrot.slane %v513_v58, 5  ;;  %474 = vst [vmem:[#allocation2 + $0x2c] sm:$0xf] %v440_v1  ;;  %v2250_v10 = vrot.slane %v3260_v45, 9 }
  0x81   : > { %2470 = vmatprep.subr.bf16.mxu1 %v2743_v21  ;;  %v308_v4 = vrot.slane %v307_v61, 4  ;;  %v526_v9 = vrot.slane %v524_v63, 4  ;;  %v529_v11 = vrot.slane %v527_v5, 5  ;;  %v2251_v12 = vrot.slane %v3263_v49, 9  ;;  %277 = vst [vmem:[#allocation2 + $0x48] sm:$0xf] %v263_v15 }
  0x82   : > { %v299_v6 = vsel %vm3273_vm5, %v294_v0, %v298_v50  ;;  %v516_v8 = vor.u32 %v515_v3, %v512_v2  ;;  %v315_v20 = vshrl.u32 %v263_v15, 16  ;;  %v2762_v21 = vld [vmem:[#allocation6 + $0x100] sm:$0xff]   ;;  %v2767_v35 = vld [vmem:[#allocation6 + $0x188] sm:$0xff]   ;;  %v2228_v42 = vrot.slane %v263_v15, 9  ;;  %v2774_v47 = vld [vmem:[#allocation6 + $0x1d0] sm:$0xff]  }
  0x83   : > { %2431 = vmatpush3.bf16.msra.mxu0 %v2744_v22  ;;  %v313_v7 = vsel %vm3273_vm5, %v308_v4, %v312_v62  ;;  %406 = vst [vmem:[#allocation2 + $0x4] sm:$0xf] %v299_v6  ;;  %v265_v22 = vld [vmem:[%s3239_s21 + $0x18] sm:$0xf]  ;;  %v2754_v32 = vld [vmem:[#allocation2] ss:$36 sps:$4 sm:$0xff]  }
  0x84   : > { %2471 = vmatpush3.bf16.msra.mxu1 %v2745_v23  ;;  %2432 = vmatprep.subr.bf16.mxu0 %v2746_v24  ;;  %407 = vst [vmem:[#allocation2 + $0x28] sm:$0xf] %v313_v7  ;;  %v3289_v17 = vrot.slane %v516_v8, 4  ;;  %v2759_v19 = vld [vmem:[#allocation2 + $0xc] ss:$36 sps:$4 sm:$0xff]   ;;  %v318_v24 = vshll.u32 %v263_v15, 16 }
  0x85   : > { %2472 = vmatprep.subr.bf16.mxu1 %v2747_v25  ;;  %v266_v23 = vld [vmem:[%s3239_s21 + $0x1c] sm:$0x1]  ;;  %v324_v25 = vshll.u32 %v264_v16, 16  ;;  %1825 = vmatprep.mubr.bf16.mxu1 %v2759_v19  ;;  %278 = vst [vmem:[#allocation2 + $0x6c] sm:$0xf] %v265_v22  ;;  %v443_v43 = vrot.slane %v264_v16, 5 }
  0x86   : > { %v320_v34 = vrot.slane %v318_v24, 5  ;;  %v3294_v39 = vld [vmem:[%s3239_s21 + $0x18] sm:$0xf]  ;;  %v2229_v44 = vrot.slane %v265_v22, 9  ;;  %v3297_v46 = vld [vmem:[%s3239_s21 + $0x20] sm:$0xf] }
  0x87   : > { %2433 = vmatpush3.bf16.msra.mxu0 %v2748_v26  ;;  %v2757_v18 = vld [vmem:[#allocation2 + $0x8] ss:$36 sps:$4 sm:$0xff]   ;;  %v530_v26 = vor.u32 %v529_v11, %v526_v9  ;;  %v326_v36 = vrot.slane %v324_v25, 5  ;;  %503 = vst [vmem:[#allocation2 + $0x54] sm:$0xf] %v3294_v39  ;;  %v447_v51 = vrot.slane %v266_v23, 5  ;;  %v444_v55 = vsel %vm3255_vm4, %v2228_v42, %v443_v43 }
  0x88   : > { %2473 = vmatpush3.bf16.msra.mxu1 %v2749_v27  ;;  %2434 = vmatprep.subr.bf16.mxu0 %v2750_v28  ;;  %v2764_v27 = vld [vmem:[#allocation6 + $0x148] sm:$0xff]   ;;  %v317_v28 = vrot.slane %v315_v20, 4  ;;  %504 = vst [vmem:[#allocation2 + $0x78] sm:$0xf] %v3297_v46  ;;  %v538_v56 = vshrl.u32 %v3294_v39, 16  ;;  %v2773_v57 = vld [vmem:[#allocation6 + $0x150] sm:$0xff]  }
  0x89   : > { %2474 = vmatprep.subr.bf16.mxu1 %v2751_v29  ;;  %v329_v29 = vshrl.u32 %v265_v22, 16  ;;  %v3301_v52 = vrot.slane %v530_v26, 4  ;;  %v2766_v53 = vld [vmem:[#allocation6 + $0x108] sm:$0xff]   ;;  %475 = vst [vmem:[#allocation2 + $0x50] sm:$0xf] %v444_v55  ;;  %v2776_v61 = vld [vmem:[#allocation6 + $0x190] sm:$0xff]  }
  0x8a   : > { %v321_v41 = vor.u32 %v320_v34, %v317_v28  ;;  %v2775_v63 = vld [vmem:[#allocation6 + $0x110] sm:$0xff]   ;;  %v541_v1 = vshll.u32 %v3294_v39, 16  ;;  %v2778_v2 = vld [vmem:[#allocation6 + $0x1d8] sm:$0xff]   ;;  %v552_v3 = vshrl.u32 %v3297_v46, 16  ;;  %v555_v5 = vshll.u32 %v3297_v46, 16  ;;  %v2786_v26 = vld [vmem:[#allocation6 + $0x160] sm:$0xff]  }
  0x8b   : > { %2435 = vmatpush3.bf16.msra.mxu0 %v2752_v30  ;;  %v332_v30 = vshll.u32 %v265_v22, 16  ;;  %v2756_v33 = vld [vmem:[#allocation2 + $0x4] ss:$36 sps:$4 sm:$0xff]   ;;  %v331_v37 = vrot.slane %v329_v29, 4  ;;  %v2777_v4 = vld [vmem:[#allocation6 + $0x158] sm:$0xff]   ;;  %v540_v42 = vrot.slane %v538_v56, 4 }
  0x8c   : > { %2475 = vmatpush3.bf16.msra.mxu1 %v2753_v31  ;;  %2500 = vmatprep.subr.bf16.mxu0 %v2760_v54  ;;  %v338_v31 = vshll.u32 %v266_v23, 16  ;;  %v322_v54 = vrot.slane %v321_v41, 4  ;;  %v2779_v6 = vld [vmem:[#allocation6 + $0x118] sm:$0xff]   ;;  %v267_v8 = vld [vmem:[%s3239_s21 + $0x20] sm:$0xf]  ;;  %v543_v43 = vrot.slane %v541_v1, 5 }
  0x8d   : > { %2540 = vmatprep.subr.bf16.mxu1 %v2761_v59  ;;  %v334_v38 = vrot.slane %v332_v30, 5  ;;  %1760 = vmatprep.mubr.bf16.mxu0 %v2756_v33  ;;  %v448_v59 = vsel %vm3255_vm4, %v2229_v44, %v447_v51  ;;  %v2780_v7 = vld [vmem:[#allocation6 + $0x198] sm:$0xff]   ;;  %v268_v9 = vld [vmem:[%s3239_s21 + $0x24] sm:$0x1]  ;;  %279 = vst [vmem:[#allocation2 + $0x90] sm:$0xf] %v267_v8 }
  0x8e   : > { %1761 = vmatmul.mubr.bf16.vlgmr.msra.gmra.mrb[0].mxu0 %v2754_v32  ;;  %v340_v50 = vrot.slane %v338_v31, 5  ;;  %v327_v62 = vsel %vm3273_vm5, %v322_v54, %v326_v36  ;;  %476 = vst [vmem:[#allocation2 + $0x74] sm:$0xf] %v448_v59  ;;  %v269_v11 = vld [vmem:[%s3239_s21 + $0x28] sm:$0xf]  ;;  %v346_v15 = vshll.u32 %v267_v8, 16 }
  0x8f   : > { %1826 = vmatmul.mubr.bf16.vlgmr.msra.gmra.mrb[0].mxu1 %v2757_v18  ;;  %v335_v48 = vor.u32 %v334_v38, %v331_v37  ;;  %2501 = vmatpush3.bf16.msra.mxu0 %v2762_v21  ;;  %408 = vst [vmem:[#allocation2 + $0x4c] sm:$0xf] %v327_v62  ;;  %280 = vst [vmem:[#allocation2 + $0xb4] sm:$0xf] %v269_v11  ;;  %v352_v16 = vshll.u32 %v268_v9, 16  ;;  %v357_v20 = vshrl.u32 %v269_v11, 16 }
  0x90   : > { %2541 = vmatpush3.bf16.msra.mxu1 %v2763_v13  ;;  %2502 = vmatprep.subr.bf16.mxu0 %v2764_v27  ;;  %v270_v13 = vld [vmem:[%s3239_s21 + $0x2c] sm:$0x1]  ;;  %v2770_v18 = vld [vmem:[#allocation2 + $0x54] ss:$36 sps:$4 sm:$0xff]   ;;  %v348_v23 = vrot.slane %v346_v15, 5  ;;  %v360_v25 = vshll.u32 %v269_v11, 16 }
  0x91   : > { %2542 = vmatprep.subr.bf16.mxu1 %v2765_v14  ;;  %v336_v58 = vrot.slane %v335_v48, 4  ;;  %v343_v14 = vshrl.u32 %v267_v8, 16  ;;  %v354_v24 = vrot.slane %v352_v16, 5  ;;  %1833 = vmatprep.mubr.bf16.mxu1 %v2770_v18  ;;  %v359_v29 = vrot.slane %v357_v20, 4  ;;  %v3320_v36 = vld [vmem:[%s3239_s21 + $0x28] sm:$0xf] }
  0x92   : > { %v366_v30 = vshll.u32 %v270_v13, 16  ;;  %v2230_v31 = vrot.slane %v267_v8, 9  ;;  %v362_v34 = vrot.slane %v360_v25, 5  ;;  %v3323_v37 = vld [vmem:[%s3239_s21 + $0x30] sm:$0xf]  ;;  %v2231_v38 = vrot.slane %v269_v11, 9 }
  0x93   : > { %v341_v0 = vsel %vm3273_vm5, %v336_v58, %v340_v50  ;;  %2503 = vmatpush3.bf16.msra.mxu0 %v2766_v53  ;;  %v345_v22 = vrot.slane %v343_v14, 4  ;;  %v455_v41 = vrot.slane %v270_v13, 5  ;;  %505 = vst [vmem:[#allocation2 + $0x9c] sm:$0xf] %v3320_v36  ;;  %506 = vst [vmem:[#allocation2 + $0xc0] sm:$0xf] %v3323_v37 }
  0x94   : > { %2543 = vmatpush3.bf16.msra.mxu1 %v2767_v35  ;;  %409 = vst [vmem:[#allocation2 + $0x70] sm:$0xf] %v341_v0  ;;  %2504 = vmatprep.subr.bf16.mxu0 %v2773_v57  ;;  %v451_v35 = vrot.slane %v268_v9, 5  ;;  %v368_v48 = vrot.slane %v366_v30, 5  ;;  %v566_v53 = vshrl.u32 %v3320_v36, 16  ;;  %v2787_v54 = vld [vmem:[#allocation6 + $0x1e0] sm:$0xff]  }
  0x95   : > { %2544 = vmatprep.subr.bf16.mxu1 %v2774_v47  ;;  %v2772_v19 = vld [vmem:[#allocation2 + $0x50] ss:$36 sps:$4 sm:$0xff]   ;;  %v349_v33 = vor.u32 %v348_v23, %v345_v22  ;;  %v363_v47 = vor.u32 %v362_v34, %v359_v29  ;;  %v456_v51 = vsel %vm3255_vm4, %v2231_v38, %v455_v41  ;;  %v2788_v55 = vld [vmem:[#allocation6 + $0x120] sm:$0xff]   ;;  %v3334_v57 = vrot.slane %v552_v3, 4  ;;  %v2790_v0 = vld [vmem:[#allocation6 + $0x168] sm:$0xff]  }
  0x96   : > { %v931_v21 = vld [vmem:[#allocation2 + $0x48] sm:$0xff]  ;;  %v452_v50 = vsel %vm3255_vm4, %v2230_v31, %v451_v35  ;;  %478 = vst [vmem:[#allocation2 + $0xbc] sm:$0xf] %v456_v51  ;;  %v2789_v59 = vld [vmem:[#allocation6 + $0x1a0] sm:$0xff]   ;;  %v580_v1 = vshrl.u32 %v3323_v37, 16  ;;  %v583_v3 = vshll.u32 %v3323_v37, 16 }
  0x97   : > { %2505 = vmatpush3.bf16.msra.mxu0 %v2775_v63  ;;  %1834 = vmatmul.mubr.bf16.gmra.mrb[4].mxu1 %v2772_v19  ;;  %v350_v44 = vrot.slane %v349_v33, 4  ;;  %477 = vst [vmem:[#allocation2 + $0x98] sm:$0xf] %v452_v50  ;;  %v364_v58 = vrot.slane %v363_v47, 4  ;;  %v569_v63 = vshll.u32 %v3320_v36, 16  ;;  %v2799_v47 = vld [vmem:[#allocation6 + $0x170] sm:$0xff]  }
  0x98   : > { %2545 = vmatpush3.bf16.msra.mxu1 %v2776_v61  ;;  %2506 = vmatprep.subr.bf16.mxu0 %v2777_v4  ;;  %v544_v61 = vor.u32 %v543_v43, %v540_v42  ;;  %v2792_v4 = vld [vmem:[#allocation6 + $0x128] sm:$0xff]   ;;  %v272_v9 = vld [vmem:[%s3239_s21 + $0x34] sm:$0x1]  ;;  %v3356_v41 = vld [vmem:[%s3239_s21 + $0x40] sm:$0xf] }
  0x99   : > { %2546 = vmatprep.subr.bf16.mxu1 %v2778_v2  ;;  %v355_v56 = vsel %vm3273_vm5, %v350_v44, %v354_v24  ;;  %v369_v62 = vsel %vm3273_vm5, %v364_v58, %v368_v48  ;;  %v2791_v2 = vld [vmem:[#allocation6 + $0x1e8] sm:$0xff]   ;;  %v459_v31 = vrot.slane %v272_v9, 5  ;;  %508 = vst [vmem:[#allocation2 + $0x108] sm:$0xf] %v3356_v41  ;;  %v2252_v48 = vrot.slane %v3294_v39, 9 }
  0x9a   : > { %410 = vst [vmem:[#allocation2 + $0x94] sm:$0xf] %v355_v56  ;;  %411 = vst [vmem:[#allocation2 + $0xb8] sm:$0xf] %v369_v62  ;;  %v3344_v8 = vrot.slane %v544_v61, 4 }
  0x9b   : > { %v936_v27 = vld [vmem:[#allocation2 + $0x6c] sm:$0xff]  ;;  %2507 = vmatpush3.bf16.msra.mxu0 %v2779_v6  ;;  %v273_v11 = vld [vmem:[%s3239_s21 + $0x38] sm:$0xf]  ;;  %v2783_v14 = vld [vmem:[#allocation2 + $0x9c] ss:$36 sps:$4 sm:$0xff]  }
  0x9c   : > { %2547 = vmatpush3.bf16.msra.mxu1 %v2780_v7  ;;  %v2768_v28 = vld [vmem:[#allocation2 + $0x4c] ss:$36 sps:$4 sm:$0xff]   ;;  %v2292_v32 = vcombine.low %v931_v21, %v936_v27  ;;  %2508 = vmatprep.subr.bf16.mxu0 %v2786_v26  ;;  %282 = vst [vmem:[#allocation2 + $0xfc] sm:$0xf] %v273_v11  ;;  %v380_v21 = vshll.u32 %v272_v9, 16  ;;  %v385_v22 = vshrl.u32 %v273_v11, 16 }
  0x9d   : > { %1768 = vmatprep.mubr.bf16.mxu0 %v2768_v28  ;;  %2548 = vmatprep.subr.bf16.mxu1 %v2787_v54  ;;  %v2793_v6 = vld [vmem:[#allocation6 + $0x1a8] sm:$0xff]   ;;  %v271_v7 = vld [vmem:[%s3239_s21 + $0x30] sm:$0xf]  ;;  %v388_v24 = vshll.u32 %v273_v11, 16  ;;  %v2233_v43 = vrot.slane %v273_v11, 9  ;;  %v608_v9 = vshrl.u32 %v3356_v41, 16 }
  0x9e   : > { %1769 = vmatmul.mubr.bf16.gmra.mrb[4].mxu0 %v2292_v32  ;;  %281 = vst [vmem:[#allocation2 + $0xd8] sm:$0xf] %v271_v7  ;;  %v371_v13 = vshrl.u32 %v271_v7, 16  ;;  %v2785_v15 = vld [vmem:[#allocation2 + $0x98] ss:$36 sps:$4 sm:$0xff]   ;;  %v374_v16 = vshll.u32 %v271_v7, 16  ;;  %1841 = vmatprep.mubr.bf16.mxu1 %v2783_v14 }
  0x9f   : > { %2509 = vmatpush3.bf16.msra.mxu0 %v2788_v55  ;;  %v274_v19 = vld [vmem:[%s3239_s21 + $0x3c] sm:$0x1]  ;;  %v2232_v26 = vrot.slane %v271_v7, 9  ;;  %v3350_v27 = vld [vmem:[%s3239_s21 + $0x38] sm:$0xf]  ;;  %1842 = vmatmul.mubr.bf16.gmra.mrb[8].mxu1 %v2785_v15  ;;  %v387_v30 = vrot.slane %v385_v22, 4 }
  0xa0   : > { %2549 = vmatpush3.bf16.msra.mxu1 %v2789_v59  ;;  %2510 = vmatprep.subr.bf16.mxu0 %v2790_v0  ;;  %v373_v20 = vrot.slane %v371_v13, 4  ;;  %v376_v23 = vrot.slane %v374_v16, 5  ;;  %v394_v25 = vshll.u32 %v274_v19, 16  ;;  %507 = vst [vmem:[#allocation2 + $0xe4] sm:$0xf] %v3350_v27  ;;  %v557_v32 = vrot.slane %v555_v5, 5 }
  0xa1   : > { %2550 = vmatprep.subr.bf16.mxu1 %v2791_v2  ;;  %v941_v18 = vld [vmem:[#allocation2 + $0x90] sm:$0xff]  ;;  %v382_v35 = vrot.slane %v380_v21, 5  ;;  %v390_v38 = vrot.slane %v388_v24, 5  ;;  %v460_v42 = vsel %vm3255_vm4, %v2232_v26, %v459_v31  ;;  %v463_v44 = vrot.slane %v274_v19, 5  ;;  %v2803_v7 = vld [vmem:[#allocation6 + $0x178] sm:$0xff]  }
  0xa2   : > { %v946_v28 = vld [vmem:[#allocation2 + $0xb4] sm:$0xff]  ;;  %v377_v34 = vor.u32 %v376_v23, %v373_v20  ;;  %v396_v51 = vrot.slane %v394_v25, 5  ;;  %479 = vst [vmem:[#allocation2 + $0xe0] sm:$0xf] %v460_v42  ;;  %v2253_v55 = vrot.slane %v3297_v46, 9  ;;  %v594_v58 = vshrl.u32 %v3350_v27, 16 }
  0xa3   : > { %2511 = vmatpush3.bf16.msra.mxu0 %v2792_v4  ;;  %v2781_v29 = vld [vmem:[#allocation2 + $0x94] ss:$36 sps:$4 sm:$0xff]   ;;  %v2301_v33 = vcombine.low %v941_v18, %v946_v28  ;;  %v391_v5 = vor.u32 %v390_v38, %v387_v30  ;;  %v464_v56 = vsel %vm3255_vm4, %v2233_v43, %v463_v44  ;;  %v558_v2 = vor.u32 %v557_v32, %v3334_v57  ;;  %v2235_v57 = vld [vmem:[%s3239_s21 + $0xc] sm:$0x1]  ;;  %v3383_v22 = vld [vmem:[%s3239_s21 + $0x10] sm:$0xf] }
  0xa4   : > { %2551 = vmatpush3.bf16.msra.mxu1 %v2793_v6  ;;  %1776 = vmatprep.mubr.bf16.mxu0 %v2781_v29  ;;  %v378_v50 = vrot.slane %v377_v34, 4  ;;  %v2800_v54 = vld [vmem:[#allocation6 + $0x1f0] sm:$0xff]   ;;  %480 = vst [vmem:[#allocation2 + $0x104] sm:$0xf] %v464_v56  ;;  %v597_v6 = vshll.u32 %v3350_v27, 16  ;;  %v2804_v11 = vld [vmem:[#allocation6 + $0x1f8] sm:$0xff]  }
  0xa5   : > { %2512 = vmatprep.subr.bf16.mxu0 %v2799_v47  ;;  %v2801_v59 = vld [vmem:[#allocation6 + $0x130] sm:$0xff]   ;;  %v392_v62 = vrot.slane %v391_v5, 4  ;;  %2552 = vmatprep.subr.bf16.mxu1 %v2800_v54  ;;  %v611_v13 = vshll.u32 %v3356_v41, 16  ;;  %v2805_v14 = vld [vmem:[#allocation6 + $0x138] sm:$0xff]   ;;  %v3375_v16 = vrot.slane %v558_v2, 4  ;;  %v3379_v18 = vrot.slane %v566_v53, 4 }
  0xa6   : > { %1777 = vmatmul.mubr.bf16.gmra.mrb[8].mxu0 %v2301_v33  ;;  %v383_v61 = vsel %vm3273_vm5, %v378_v50, %v382_v35  ;;  %v2802_v0 = vld [vmem:[#allocation6 + $0x1b0] sm:$0xff]   ;;  %v2806_v15 = vld [vmem:[#allocation6 + $0x1b8] sm:$0xff]   ;;  %v519_v20 = vshll.u32 %v2235_v57, 16  ;;  %v655_v21 = vrot.slane %v2235_v57, 5  ;;  %721 = vst [vmem:[#allocation2 + $0x18] sm:$0xf] %v3383_v22 }
  0xa7   : > { %412 = vst [vmem:[#allocation2 + $0xdc] sm:$0xf] %v383_v61  ;;  %2513 = vmatpush3.bf16.msra.mxu0 %v2801_v59  ;;  %v397_v4 = vsel %vm3273_vm5, %v392_v62, %v396_v51  ;;  %v2237_v19 = vld [vmem:[%s3239_s21 + $0x14] sm:$0x1]  ;;  %v730_v31 = vshrl.u32 %v3383_v22, 16  ;;  %v733_v35 = vshll.u32 %v3383_v22, 16 }
  0xa8   : > { %2553 = vmatpush3.bf16.msra.mxu1 %v2802_v0  ;;  %413 = vst [vmem:[#allocation2 + $0x100] sm:$0xf] %v397_v4  ;;  %2514 = vmatprep.subr.bf16.mxu0 %v2803_v7  ;;  %v2796_v23 = vld [vmem:[#allocation2 + $0xe4] ss:$36 sps:$4 sm:$0xff]   ;;  %v533_v25 = vshll.u32 %v2237_v19, 16  ;;  %v521_v28 = vrot.slane %v519_v20, 5  ;;  %v656_v53 = vsel %vm3255_vm4, %v2250_v10, %v655_v21 }
  0xa9   : > { %2554 = vmatprep.subr.bf16.mxu1 %v2804_v11  ;;  %v659_v29 = vrot.slane %v2237_v19, 5  ;;  %v3391_v30 = vld [vmem:[%s3239_s21 + $0x14] sm:$0x1]  ;;  %1849 = vmatprep.mubr.bf16.mxu1 %v2796_v23  ;;  %693 = vst [vmem:[#allocation2 + $0x14] sm:$0xf] %v656_v53  ;;  %v732_v43 = vrot.slane %v730_v31, 4 }
  0xaa   : > { %v535_v32 = vrot.slane %v533_v25, 5  ;;  %v3395_v33 = vld [vmem:[%s3239_s21 + $0x18] sm:$0xf]  ;;  %v3398_v34 = vld [vmem:[%s3239_s21 + $0x1c] sm:$0x1]  ;;  %v522_v45 = vsel %vm3273_vm5, %v3289_v17, %v521_v28  ;;  %v739_v44 = vshll.u32 %v3391_v30, 16 }
  0xab   : > { %2515 = vmatpush3.bf16.msra.mxu0 %v2805_v14  ;;  %v2798_v24 = vld [vmem:[#allocation2 + $0xe0] ss:$36 sps:$4 sm:$0xff]   ;;  %v660_v10 = vsel %vm3255_vm4, %v2251_v12, %v659_v29  ;;  %722 = vst [vmem:[#allocation2 + $0x3c] sm:$0xf] %v3395_v33  ;;  %629 = vst [vmem:[#allocation2 + $0x10] sm:$0xf] %v522_v45 }
  0xac   : > { %2555 = vmatpush3.bf16.msra.mxu1 %v2806_v15  ;;  %v3410_v47 = vld [vmem:[#allocation6 + $0x200] sm:$0xff]   ;;  %v536_v5 = vsel %vm3273_vm5, %v3301_v52, %v535_v32  ;;  %694 = vst [vmem:[#allocation2 + $0x38] sm:$0xf] %v660_v10  ;;  %v735_v17 = vrot.slane %v733_v35, 5  ;;  %v744_v49 = vshrl.u32 %v3395_v33, 16  ;;  %v747_v12 = vshll.u32 %v3395_v33, 16 }
  0xad   : > { %1850 = vmatmul.mubr.bf16.gmra.mrb[12].mxu1 %v2798_v24  ;;  %630 = vst [vmem:[#allocation2 + $0x34] sm:$0xf] %v536_v5  ;;  %v753_v51 = vshll.u32 %v3398_v34, 16  ;;  %2592 = vmatprep.subr.bf16.mxu0 %v3410_v47  ;;  %v3421_v54 = vrot.slane %v569_v63, 5  ;;  %v3425_v52 = vrot.slane %v580_v1, 4  ;;  %v741_v59 = vrot.slane %v739_v44, 5 }
  0xae   : > { %v951_v26 = vld [vmem:[#allocation2 + $0xd8] sm:$0xff]  ;;  %v736_v56 = vor.u32 %v735_v17, %v732_v43  ;;  %v746_v61 = vrot.slane %v744_v49, 4  ;;  %2616 = vmatprep.subr.bf16.mxu1 %v3410_v47  ;;  %v749_v0 = vrot.slane %v747_v12, 5  ;;  %v2241_v2 = vld [vmem:[%s3239_s21 + $0x24] sm:$0x1]  ;;  %v585_v63 = vrot.slane %v583_v3, 5 }
  0xaf   : > { %v956_v38 = vld [vmem:[#allocation2 + $0xfc] sm:$0xff]  ;;  %v755_v1 = vrot.slane %v753_v51, 5  ;;  %v561_v14 = vshll.u32 %v2241_v2, 16  ;;  %v667_v15 = vrot.slane %v2241_v2, 5  ;;  %v3440_v23 = vld [vmem:[%s3239_s21 + $0x24] sm:$0x1] }
  0xb0   : > { %v2794_v42 = vld [vmem:[#allocation2 + $0xdc] ss:$36 sps:$4 sm:$0xff]   ;;  %v2310_v50 = vcombine.low %v951_v26, %v956_v38  ;;  %v737_v11 = vrot.slane %v736_v56, 4  ;;  %v750_v19 = vor.u32 %v749_v0, %v746_v61  ;;  %v3443_v24 = vld [vmem:[%s3239_s21 + $0x28] sm:$0xf]  ;;  %v767_v46 = vshll.u32 %v3440_v23, 16 }
  0xb1   : > { %1784 = vmatprep.mubr.bf16.mxu0 %v2794_v42  ;;  %v2239_v62 = vld [vmem:[%s3239_s21 + $0x1c] sm:$0x1]  ;;  %v3433_v57 = vld [vmem:[%s3239_s21 + $0x20] sm:$0xf]  ;;  %v563_v26 = vrot.slane %v561_v14, 5  ;;  %v668_v39 = vsel %vm3255_vm4, %v2253_v55, %v667_v15  ;;  %v572_v42 = vor.u32 %v3421_v54, %v3379_v18  ;;  %v586_v45 = vor.u32 %v585_v63, %v3425_v52 }
  0xb2   : > { %1785 = vmatmul.mubr.bf16.gmra.mrb[12].mxu0 %v2310_v50  ;;  %v547_v4 = vshll.u32 %v2239_v62, 16  ;;  %v663_v7 = vrot.slane %v2239_v62, 5  ;;  %723 = vst [vmem:[#allocation2 + $0x60] sm:$0xf] %v3433_v57  ;;  %v758_v3 = vshrl.u32 %v3433_v57, 16  ;;  %v742_v25 = vsel %vm3273_vm5, %v737_v11, %v741_v59  ;;  %v3470_v10 = vld [vmem:[#allocation6 + $0x208] sm:$0xff]  }
  0xb3   : > { %v3454_v28 = vld [vmem:[%s3239_s21 + $0x2c] sm:$0x1]  ;;  %724 = vst [vmem:[#allocation2 + $0x84] sm:$0xf] %v3443_v24  ;;  %v751_v53 = vrot.slane %v750_v19, 4  ;;  %v564_v55 = vsel %vm3273_vm5, %v3375_v16, %v563_v26  ;;  %v769_v43 = vrot.slane %v767_v46, 5 }
  0xb4   : > { %v549_v20 = vrot.slane %v547_v4, 5  ;;  %v664_v21 = vsel %vm3255_vm4, %v2252_v48, %v663_v7  ;;  %v761_v48 = vshll.u32 %v3433_v57, 16  ;;  %849 = vst [vmem:[#allocation2 + $0x1c] sm:$0xf] %v742_v25  ;;  %696 = vst [vmem:[#allocation2 + $0x80] sm:$0xf] %v668_v39 }
  0xb5   : > { %695 = vst [vmem:[#allocation2 + $0x5c] sm:$0xf] %v664_v21  ;;  %v760_v31 = vrot.slane %v758_v3, 4  ;;  %v2807_v32 = vld [vmem:[#allocation2 + $0x10] ss:$36 sps:$4 sm:$0xff]   ;;  %v772_v44 = vshrl.u32 %v3443_v24, 16 }
  0xb6   : > { %v550_v29 = vsel %vm3273_vm5, %v3344_v8, %v549_v20  ;;  %v2809_v35 = vld [vmem:[#allocation2 + $0x14] ss:$36 sps:$4 sm:$0xff]   ;;  %v763_v38 = vrot.slane %v761_v48, 5  ;;  %v756_v8 = vsel %vm3273_vm5, %v751_v53, %v755_v1  ;;  %632 = vst [vmem:[#allocation2 + $0x7c] sm:$0xf] %v564_v55  ;;  %v775_v50 = vshll.u32 %v3443_v24, 16 }
  0xb7   : > { %631 = vst [vmem:[#allocation2 + $0x58] sm:$0xf] %v550_v29  ;;  %1890 = vmatprep.mubr.bf16.mxu0 %v2809_v35  ;;  %850 = vst [vmem:[#allocation2 + $0x40] sm:$0xf] %v756_v8  ;;  %v781_v18 = vshll.u32 %v3454_v28, 16  ;;  %v2276_v5 = vrot.slane %v3433_v57, 9 }
  0xb8   : > { %v764_v16 = vor.u32 %v763_v38, %v760_v31  ;;  %v883_v17 = vrot.slane %v3440_v23, 5  ;;  %v774_v49 = vrot.slane %v772_v44, 4  ;;  %v777_v12 = vrot.slane %v775_v50, 5  ;;  %v2243_v52 = vld [vmem:[%s3239_s21 + $0x2c] sm:$0x1]  ;;  %v3483_v4 = vld [vmem:[#allocation6 + $0x210] sm:$0xff]  }
  0xb9   : > { %v2277_v51 = vrot.slane %v3443_v24, 9  ;;  %v887_v54 = vrot.slane %v3454_v28, 5  ;;  %v783_v59 = vrot.slane %v781_v18, 5  ;;  %v2245_v61 = vld [vmem:[%s3239_s21 + $0x34] sm:$0x1]  ;;  %v573_v62 = vrot.slane %v572_v42, 4 }
  0xba   : > { %1891 = vmatmul.mubr.bf16.vlgmr.msra.gmra.mrb[16].mxu0 %v2807_v32  ;;  %v765_v56 = vrot.slane %v764_v16, 4  ;;  %v575_v0 = vshll.u32 %v2243_v52, 16  ;;  %v778_v2 = vor.u32 %v777_v12, %v774_v49  ;;  %v587_v7 = vrot.slane %v586_v45, 4  ;;  %v3487_v1 = vld [vmem:[%s3239_s21 + $0x30] sm:$0xf]  ;;  %v3496_v24 = vld [vmem:[#allocation6 + $0x218] sm:$0xff]  }
  0xbb   : > { %2593 = vmatpush3.bf16.msra.mxu0 %v3410_v47  ;;  %v589_v63 = vshll.u32 %v2245_v61, 16  ;;  %v2254_v11 = vrot.slane %v3320_v36, 9  ;;  %v671_v57 = vrot.slane %v2243_v52, 5  ;;  %v2255_v19 = vrot.slane %v3323_v37, 9  ;;  %v3493_v20 = vld [vmem:[%s3239_s21 + $0x34] sm:$0x1] }
  0xbc   : > { %2594 = vmatprep.subr.bf16.mxu0 %v3470_v10  ;;  %v770_v14 = vsel %vm3273_vm5, %v765_v56, %v769_v43  ;;  %v577_v15 = vrot.slane %v575_v0, 5  ;;  %725 = vst [vmem:[#allocation2 + $0xa8] sm:$0xf] %v3487_v1  ;;  %v779_v23 = vrot.slane %v778_v2, 4  ;;  %v675_v3 = vrot.slane %v2245_v61, 5  ;;  %v3527_v18 = vld [vmem:[#allocation6 + $0x220] sm:$0xff]  }
  0xbd   : > { %851 = vst [vmem:[#allocation2 + $0x64] sm:$0xf] %v770_v14  ;;  %v591_v36 = vrot.slane %v589_v63, 5  ;;  %v3499_v25 = vld [vmem:[%s3239_s21 + $0x38] sm:$0xf]  ;;  %v884_v26 = vsel %vm3255_vm4, %v2276_v5, %v883_v17  ;;  %v938_v37 = vld [vmem:[#allocation2 + $0x7c] sm:$0xff]  ;;  %v672_v48 = vsel %vm3255_vm4, %v2254_v11, %v671_v57  ;;  %v888_v31 = vsel %vm3255_vm4, %v2277_v51, %v887_v54 }
  0xbe   : > { %v933_v21 = vld [vmem:[#allocation2 + $0x58] sm:$0xff]  ;;  %v578_v28 = vsel %vm3273_vm5, %v573_v62, %v577_v15  ;;  %726 = vst [vmem:[#allocation2 + $0xcc] sm:$0xf] %v3499_v25  ;;  %v786_v29 = vshrl.u32 %v3487_v1, 16  ;;  %915 = vst [vmem:[#allocation2 + $0x68] sm:$0xf] %v884_v26  ;;  %v784_v35 = vsel %vm3273_vm5, %v779_v23, %v783_v59  ;;  %v676_v42 = vsel %vm3255_vm4, %v2255_v19, %v675_v3 }
  0xbf   : > { %2595 = vmatpush3.bf16.msra.mxu0 %v3470_v10  ;;  %v2815_v39 = vld [vmem:[#allocation2 + $0x5c] ss:$36 sps:$4 sm:$0xff]   ;;  %v2296_v55 = vcombine.low %v933_v21, %v938_v37  ;;  %v592_v38 = vsel %vm3273_vm5, %v587_v7, %v591_v36  ;;  %633 = vst [vmem:[#allocation2 + $0xa0] sm:$0xf] %v578_v28  ;;  %697 = vst [vmem:[#allocation2 + $0xa4] sm:$0xf] %v672_v48 }
  0xc0   : > { %v3509_v53 = vld [vmem:[%s3239_s21 + $0x3c] sm:$0x1]  ;;  %2596 = vmatprep.subr.bf16.mxu0 %v3483_v4  ;;  %916 = vst [vmem:[#allocation2 + $0x8c] sm:$0xf] %v888_v31  ;;  %1898 = vmatprep.mubr.bf16.mxu0 %v2815_v39  ;;  %852 = vst [vmem:[#allocation2 + $0x88] sm:$0xf] %v784_v35 }
  0xc1   : > { %v2810_v46 = vld [vmem:[#allocation2 + $0x18] ss:$36 sps:$4 sm:$0xff]   ;;  %634 = vst [vmem:[#allocation2 + $0xc4] sm:$0xf] %v592_v38  ;;  %698 = vst [vmem:[#allocation2 + $0xc8] sm:$0xf] %v676_v42 }
  0xc2   : > { %v2812_v32 = vld [vmem:[#allocation2 + $0x1c] ss:$36 sps:$4 sm:$0xff]   ;;  %v788_v45 = vrot.slane %v786_v29, 4  ;;  %v789_v8 = vshll.u32 %v3487_v1, 16  ;;  %v795_v43 = vshll.u32 %v3493_v20, 16  ;;  %v800_v44 = vshrl.u32 %v3499_v25, 16  ;;  %1899 = vmatmul.mubr.bf16.gmra.mrb[20].mxu0 %v2296_v55 }
  0xc3   : > { %1955 = vmatprep.mubr.bf16.mxu1 %v2812_v32  ;;  %v803_v50 = vshll.u32 %v3499_v25, 16  ;;  %v809_v16 = vshll.u32 %v3509_v53, 16  ;;  %2597 = vmatpush3.bf16.msra.mxu0 %v3483_v4  ;;  %v596_v12 = vrot.slane %v594_v58, 4  ;;  %v2247_v52 = vld [vmem:[%s3239_s21 + $0x3c] sm:$0x1]  ;;  %v599_v61 = vrot.slane %v597_v6, 5 }
  0xc4   : > { %1956 = vmatmul.mubr.bf16.vlgmr.msra.gmra.mrb[16].mxu1 %v2810_v46  ;;  %v791_v5 = vrot.slane %v789_v8, 5  ;;  %v797_v17 = vrot.slane %v795_v43, 5  ;;  %v802_v49 = vrot.slane %v800_v44, 4  ;;  %2598 = vmatprep.subr.bf16.mxu0 %v3496_v24  ;;  %v2249_v56 = vld [vmem:[%s3239_s21 + $0x44] sm:$0x1]  ;;  %v603_v62 = vshll.u32 %v2247_v52, 16 }
  0xc5   : > { %2624 = vmatpush3.bf16.msra.mxu1 %v3410_v47  ;;  %v805_v51 = vrot.slane %v803_v50, 5  ;;  %v811_v54 = vrot.slane %v809_v16, 5  ;;  %v610_v58 = vrot.slane %v608_v9, 4  ;;  %v3542_v0 = vld [vmem:[%s3239_s21 + $0x40] sm:$0xf]  ;;  %v613_v2 = vrot.slane %v611_v13, 5 }
  0xc6   : > { %2617 = vmatprep.subr.bf16.mxu1 %v3470_v10  ;;  %v792_v59 = vor.u32 %v791_v5, %v788_v45  ;;  %v617_v7 = vshll.u32 %v2249_v56, 16  ;;  %v2256_v63 = vrot.slane %v3350_v27, 9  ;;  %727 = vst [vmem:[#allocation2 + $0xf0] sm:$0xf] %v3542_v0  ;;  %v943_v11 = vld [vmem:[#allocation2 + $0xa0] sm:$0xff]  ;;  %v600_v14 = vor.u32 %v599_v61, %v596_v12  ;;  %v3561_v37 = vld [vmem:[#allocation6 + $0x228] sm:$0xff]  }
  0xc7   : > { %v806_v47 = vor.u32 %v805_v51, %v802_v49  ;;  %2599 = vmatpush3.bf16.msra.mxu0 %v3496_v24  ;;  %v605_v15 = vrot.slane %v603_v62, 5  ;;  %v679_v57 = vrot.slane %v2247_v52, 5  ;;  %v3550_v19 = vld [vmem:[%s3239_s21 + $0x44] sm:$0x1]  ;;  %v3553_v9 = vld [vmem:[%s3239_s21 + $0x48] sm:$0xf]  ;;  %v614_v27 = vor.u32 %v613_v2, %v610_v58 }
  0xc8   : > { %v793_v6 = vrot.slane %v792_v59, 4  ;;  %v2817_v21 = vld [vmem:[#allocation2 + $0x64] ss:$36 sps:$4 sm:$0xff]   ;;  %2600 = vmatprep.subr.bf16.mxu0 %v3527_v18  ;;  %728 = vst [vmem:[#allocation2 + $0x114] sm:$0xf] %v3553_v9  ;;  %v601_v39 = vrot.slane %v600_v14, 4 }
  0xc9   : > { %2625 = vmatpush3.bf16.msra.mxu1 %v3470_v10  ;;  %v2819_v13 = vld [vmem:[#allocation2 + $0x60] ss:$36 sps:$4 sm:$0xff]   ;;  %v807_v23 = vrot.slane %v806_v47, 4  ;;  %v619_v10 = vrot.slane %v617_v7, 5  ;;  %v680_v28 = vsel %vm3255_vm4, %v2256_v63, %v679_v57  ;;  %1963 = vmatprep.mubr.bf16.mxu1 %v2817_v21  ;;  %v615_v31 = vrot.slane %v614_v27, 4  ;;  %v3583_v5 = vld [vmem:[#allocation6 + $0x230] sm:$0xff]  }
  0xca   : > { %2618 = vmatprep.subr.bf16.mxu1 %v3483_v4  ;;  %v948_v36 = vld [vmem:[#allocation2 + $0xc4] sm:$0xff]  ;;  %v798_v26 = vsel %vm3273_vm5, %v793_v6, %v797_v17  ;;  %v2257_v46 = vrot.slane %v3356_v41, 9  ;;  %699 = vst [vmem:[#allocation2 + $0xec] sm:$0xf] %v680_v28  ;;  %v2273_v32 = vld [vmem:[%s3239_s21 + $0x4c] sm:$0x1]  ;;  %v606_v35 = vsel %vm3273_vm5, %v601_v39, %v605_v15 }
  0xcb   : > { %v2822_v3 = vld [vmem:[#allocation2 + $0xa4] ss:$36 sps:$4 sm:$0xff]   ;;  %v812_v48 = vsel %vm3273_vm5, %v807_v23, %v811_v54  ;;  %853 = vst [vmem:[#allocation2 + $0xac] sm:$0xf] %v798_v26  ;;  %v2305_v29 = vcombine.low %v943_v11, %v948_v36  ;;  %v683_v55 = vrot.slane %v2249_v56, 5  ;;  %v814_v38 = vshrl.u32 %v3542_v0, 16  ;;  %2601 = vmatpush3.bf16.msra.mxu0 %v3527_v18 }
  0xcc   : > { %1964 = vmatmul.mubr.bf16.gmra.mrb[20].mxu1 %v2819_v13  ;;  %1906 = vmatprep.mubr.bf16.mxu0 %v2822_v3  ;;  %854 = vst [vmem:[#allocation2 + $0xd0] sm:$0xf] %v812_v48  ;;  %v817_v42 = vshll.u32 %v3542_v0, 16  ;;  %v620_v45 = vsel %vm3273_vm5, %v615_v31, %v619_v10  ;;  %635 = vst [vmem:[#allocation2 + $0xe8] sm:$0xf] %v606_v35  ;;  %v823_v41 = vshll.u32 %v3550_v19, 16 }
  0xcd   : > { %2626 = vmatpush3.bf16.msra.mxu1 %v3483_v4  ;;  %1907 = vmatmul.mubr.bf16.gmra.mrb[24].mxu0 %v2305_v29  ;;  %v828_v8 = vshrl.u32 %v3553_v9, 16  ;;  %v831_v43 = vshll.u32 %v3553_v9, 16  ;;  %636 = vst [vmem:[#allocation2 + $0x10c] sm:$0xf] %v620_v45  ;;  %v684_v44 = vsel %vm3255_vm4, %v2257_v46, %v683_v55  ;;  %v816_v4 = vrot.slane %v814_v38, 4 }
  0xce   : > { %2619 = vmatprep.subr.bf16.mxu1 %v3496_v24  ;;  %v819_v50 = vrot.slane %v817_v42, 5  ;;  %v837_v16 = vshll.u32 %v2273_v32, 16  ;;  %2602 = vmatprep.subr.bf16.mxu0 %v3561_v37  ;;  %700 = vst [vmem:[#allocation2 + $0x110] sm:$0xf] %v684_v44  ;;  %v825_v17 = vrot.slane %v823_v41, 5  ;;  %v2280_v51 = vrot.slane %v3542_v0, 9 }
  0xcf   : > { %v830_v49 = vrot.slane %v828_v8, 4  ;;  %v833_v12 = vrot.slane %v831_v43, 5  ;;  %v899_v56 = vrot.slane %v3550_v19, 5  ;;  %v2281_v59 = vrot.slane %v3553_v9, 9  ;;  %2603 = vmatpush3.bf16.msra.mxu0 %v3561_v37  ;;  %v2826_v6 = vld [vmem:[#allocation2 + $0xa8] ss:$36 sps:$4 sm:$0xff]  }
  0xd0   : > { %v820_v54 = vor.u32 %v819_v50, %v816_v4  ;;  %v839_v52 = vrot.slane %v837_v16, 5  ;;  %v903_v62 = vrot.slane %v2273_v32, 5  ;;  %v2274_v58 = vrot.slane %v3383_v22, 9  ;;  %2604 = vmatprep.subr.bf16.mxu0 %v3583_v5  ;;  %v2833_v27 = vld [vmem:[#allocation2 + $0xf0] ss:$36 sps:$4 sm:$0xff]  }
  0xd1   : > { %2627 = vmatpush3.bf16.msra.mxu1 %v3496_v24  ;;  %v834_v61 = vor.u32 %v833_v12, %v830_v49  ;;  %v875_v47 = vrot.slane %v3391_v30, 5  ;;  %v2275_v0 = vrot.slane %v3395_v33, 9  ;;  %v879_v7 = vrot.slane %v3398_v34, 5  ;;  %v2835_v34 = vld [vmem:[#allocation6 + $0x238] sm:$0xff]   ;;  %v2838_v36 = vld [vmem:[#allocation2 + $0x68] ss:$36 sps:$4 sm:$0xff]  }
  0xd2   : > { %2620 = vmatprep.subr.bf16.mxu1 %v3527_v18  ;;  %v821_v2 = vrot.slane %v820_v54, 4  ;;  %v2278_v63 = vrot.slane %v3487_v1, 9  ;;  %v900_v30 = vsel %vm3255_vm4, %v2280_v51, %v899_v56  ;;  %v904_v14 = vsel %vm3255_vm4, %v2281_v59, %v903_v62  ;;  %v2282_v29 = vld [vmem:[#allocation8] ss:$0 sm:$0xff] }
  0xd3   : > { %v2824_v11 = vld [vmem:[#allocation2 + $0xac] ss:$36 sps:$4 sm:$0xff]   ;;  %v835_v24 = vrot.slane %v834_v61, 4  ;;  %v876_v22 = vsel %vm3255_vm4, %v2274_v58, %v875_v47  ;;  %v880_v1 = vsel %vm3255_vm4, %v2275_v0, %v879_v7  ;;  %v891_v57 = vrot.slane %v3493_v20, 5  ;;  %919 = vst [vmem:[#allocation2 + $0xf8] sm:$0xf] %v900_v30  ;;  %2605 = vmatpush3.bf16.msra.mxu0 %v3583_v5 }
  0xd4   : > { %v953_v15 = vld [vmem:[#allocation2 + $0xe8] sm:$0xff]  ;;  %v826_v33 = vsel %vm3273_vm5, %v821_v2, %v825_v17  ;;  %913 = vst [vmem:[#allocation2 + $0x20] sm:$0xf] %v876_v22  ;;  %v2279_v19 = vrot.slane %v3499_v25, 9  ;;  %920 = vst [vmem:[#allocation2 + $0x11c] sm:$0xf] %v904_v14  ;;  %1971 = vmatprep.mubr.bf16.mxu1 %v2824_v11  ;;  %2606 = vmatprep.subr.bf16.mxu0 %v2835_v34 }
  0xd5   : > { %2628 = vmatpush3.bf16.msra.mxu1 %v3527_v18  ;;  %v840_v9 = vsel %vm3273_vm5, %v835_v24, %v839_v52  ;;  %855 = vst [vmem:[#allocation2 + $0xf4] sm:$0xf] %v826_v33  ;;  %914 = vst [vmem:[#allocation2 + $0x44] sm:$0xf] %v880_v1  ;;  %v895_v21 = vrot.slane %v3509_v53, 5  ;;  %v958_v13 = vld [vmem:[#allocation2 + $0x10c] sm:$0xff]  ;;  %v892_v20 = vsel %vm3255_vm4, %v2278_v63, %v891_v57 }
  0xd6   : > { %1972 = vmatmul.mubr.bf16.gmra.mrb[24].mxu1 %v2826_v6  ;;  %2621 = vmatprep.subr.bf16.mxu1 %v3561_v37  ;;  %v2829_v23 = vld [vmem:[#allocation2 + $0xec] ss:$36 sps:$4 sm:$0xff]   ;;  %856 = vst [vmem:[#allocation2 + $0x118] sm:$0xf] %v840_v9  ;;  %v2314_v25 = vcombine.low %v953_v15, %v958_v13  ;;  %917 = vst [vmem:[#allocation2 + $0xb0] sm:$0xf] %v892_v20 }
  0xd7   : > { %v896_v60 = vsel %vm3255_vm4, %v2279_v19, %v895_v21  ;;  %1914 = vmatprep.mubr.bf16.mxu0 %v2829_v23  ;;  %2607 = vmatpush3.bf16.msra.mxu0 %v2835_v34 }
  0xd8   : > { %918 = vst [vmem:[#allocation2 + $0xd4] sm:$0xf] %v896_v60  ;;  %1915 = vmatmul.mubr.bf16.gmra.mrb[28].mxu0 %v2314_v25 }
  0xd9   : > { %2629 = vmatpush3.bf16.msra.mxu1 %v3561_v37 }
  0xda   : > { %2622 = vmatprep.subr.bf16.mxu1 %v3583_v5 }
  0xdb   : > { %v2839_v3 = vld [vmem:[#allocation2 + $0xf8] ss:$36 sps:$4 sm:$0xff]  }
  0xdc   : > { %v2836_v53 = vld [vmem:[#allocation2 + $0x20] ss:$36 sps:$4 sm:$0xff]  }
  0xdd   : > { %v2831_v18 = vld [vmem:[#allocation2 + $0xf4] ss:$36 sps:$4 sm:$0xff]   ;;  %2630 = vmatpush3.bf16.msra.mxu1 %v3583_v5  ;;  %2608 = vmatprep.mubr.bf16.mxu0 %v2836_v53 }
  0xde   : > { %2623 = vmatprep.subr.bf16.mxu1 %v2835_v34  ;;  %1979 = vmatprep.mubr.bf16.mxu1 %v2831_v18 }
  0xdf   : > { %v2837_v40 = vld [vmem:[#allocation2 + $0xb0] ss:$36 sps:$4 sm:$0xff]   ;;  %1980 = vmatmul.mubr.bf16.gmra.mrb[28].mxu1 %v2833_v27 }
  0xe0   : > { %2612 = vmatprep.mubr.bf16.mxu1 %v2837_v40  ;;  %2609 = vmatmul.mubr.bf16.vlgmr.msra.gmra.mrb[32].mxu0 %v2838_v36 }
  0xe1   : > { %2631 = vmatpush3.bf16.msra.mxu1 %v2835_v34 }
  0xe7   : > { %2613 = vmatmul.mubr.bf16.vlgmr.msra.gmra.mrb[32].mxu1 %v2839_v3 }
 0x161   : > { %v2436_v28 = vpop.f32.mrb[0].mxu0 }
 0x162   : > { %v2476_v26 = vpop.f32.mrb[0].mxu1  ;;  %v2437_v31 = vpop.f32.mrb[1].mxu0 }
 0x163   : > { %v2477_v37 = vpop.f32.mrb[1].mxu1  ;;  %v2438_v32 = vadd.f32 %v2437_v31, %v2436_v28  ;;  %v2439_v35 = vpop.f32.mrb[2].mxu0 }
 0x164   : > { %v2478_v39 = vadd.f32 %v2477_v37, %v2476_v26  ;;  %v2479_v10 = vpop.f32.mrb[2].mxu1  ;;  %v2440_v55 = vpop.f32.mrb[3].mxu0 }
 0x165   : > { %v2480_v48 = vpop.f32.mrb[3].mxu1  ;;  %v1763_v38 = vadd.f32 %v2438_v32, %v2282_v29  ;;  %v2441_v42 = vadd.f32 %v2440_v55, %v2439_v35 }
 0x166   : > { %v2481_v46 = vadd.f32 %v2480_v48, %v2479_v10 }
 0x167   : > { %v1828_v45 = vadd.f32 %v2478_v39, %v1763_v38  ;;  %v1766_v41 = vadd.f32 %v2441_v42, %v2282_v29 }
 0x169   : > { %v1831_v8 = vadd.f32 %v2481_v46, %v1766_v41 }
 0x16a   : > { %v2482_v43 = vpop.f32.mrb[4].mxu1 }
 0x16b   : > { %v2483_v44 = vpop.f32.mrb[5].mxu1 }
 0x16c   : > { %v2484_v50 = vadd.f32 %v2483_v44, %v2482_v43  ;;  %v2485_v16 = vpop.f32.mrb[6].mxu1 }
 0x16d   : > { %v2486_v17 = vpop.f32.mrb[7].mxu1 }
 0x16e   : > { %v2487_v51 = vadd.f32 %v2486_v17, %v2485_v16 }
 0x171   : > { %v2442_v4 = vpop.f32.mrb[4].mxu0 }
 0x172   : > { %v2443_v5 = vpop.f32.mrb[5].mxu0  ;;  %v2488_v58 = vpop.f32.mrb[8].mxu1 }
 0x173   : > { %v2444_v49 = vadd.f32 %v2443_v5, %v2442_v4  ;;  %v2445_v12 = vpop.f32.mrb[6].mxu0  ;;  %v2489_v47 = vpop.f32.mrb[9].mxu1 }
 0x174   : > { %v2446_v54 = vpop.f32.mrb[7].mxu0  ;;  %v2490_v2 = vadd.f32 %v2489_v47, %v2488_v58  ;;  %v2491_v0 = vpop.f32.mrb[10].mxu1 }
 0x175   : > { %v1771_v52 = vadd.f32 %v2444_v49, %v2282_v29  ;;  %v2447_v56 = vadd.f32 %v2446_v54, %v2445_v12  ;;  %v2492_v63 = vpop.f32.mrb[11].mxu1 }
 0x176   : > { %v2493_v6 = vadd.f32 %v2492_v63, %v2491_v0 }
 0x177   : > { %v1836_v59 = vadd.f32 %v2484_v50, %v1771_v52  ;;  %v1774_v61 = vadd.f32 %v2447_v56, %v2282_v29 }
 0x179   : > { %v1839_v62 = vadd.f32 %v2487_v51, %v1774_v61  ;;  %v2448_v7 = vpop.f32.mrb[8].mxu0 }
 0x17a   : > { %v2449_v11 = vpop.f32.mrb[9].mxu0 }
 0x17b   : > { %v2450_v24 = vadd.f32 %v2449_v11, %v2448_v7  ;;  %v2451_v22 = vpop.f32.mrb[10].mxu0 }
 0x17c   : > { %v2452_v30 = vpop.f32.mrb[11].mxu0 }
 0x17d   : > { %v1779_v14 = vadd.f32 %v2450_v24, %v2282_v29  ;;  %v2453_v15 = vadd.f32 %v2452_v30, %v2451_v22 }
 0x17f   : > { %v1844_v33 = vadd.f32 %v2490_v2, %v1779_v14  ;;  %v1782_v34 = vadd.f32 %v2453_v15, %v2282_v29 }
 0x180   : > { %v2494_v57 = vpop.f32.mrb[12].mxu1 }
 0x181   : > { %v1847_v1 = vadd.f32 %v2493_v6, %v1782_v34  ;;  %v2495_v19 = vpop.f32.mrb[13].mxu1 }
 0x182   : > { %v2496_v9 = vadd.f32 %v2495_v19, %v2494_v57  ;;  %v2497_v21 = vpop.f32.mrb[14].mxu1 }
 0x183   : > { %v2498_v23 = vpop.f32.mrb[15].mxu1 }
 0x184   : > { %v2499_v25 = vadd.f32 %v2498_v23, %v2497_v21 }
 0x185   : > { %v2454_v13 = vpop.f32.mrb[12].mxu0 }
 0x186   : > { %v2455_v20 = vpop.f32.mrb[13].mxu0 }
 0x187   : > { %v2456_v60 = vadd.f32 %v2455_v20, %v2454_v13  ;;  %v2457_v53 = vpop.f32.mrb[14].mxu0 }
 0x188   : > { %v2458_v18 = vpop.f32.mrb[15].mxu0 }
 0x189   : > { %v1787_v27 = vadd.f32 %v2456_v60, %v2282_v29  ;;  %v2459_v36 = vadd.f32 %v2458_v18, %v2457_v53 }
 0x18b   : > { %v1852_v40 = vadd.f32 %v2496_v9, %v1787_v27  ;;  %v1790_v3 = vadd.f32 %v2459_v36, %v2282_v29 }
 0x18d   : > { %v1855_v26 = vadd.f32 %v2499_v25, %v1790_v3  ;;  %v2516_v37 = vpop.f32.mrb[16].mxu0 }
 0x18e   : > { %v2517_v39 = vpop.f32.mrb[17].mxu0 }
 0x18f   : > { %v2518_v10 = vadd.f32 %v2517_v39, %v2516_v37  ;;  %v2519_v28 = vpop.f32.mrb[18].mxu0 }
 0x190   : > { %v2520_v48 = vpop.f32.mrb[19].mxu0 }
 0x191   : > { %v1893_v31 = vadd.f32 %v2518_v10, %v1828_v45  ;;  %v2521_v46 = vadd.f32 %v2520_v48, %v2519_v28 }
 0x193   : > { %v1896_v32 = vadd.f32 %v2521_v46, %v1831_v8 }
 0x195   : > { %v2522_v35 = vpop.f32.mrb[20].mxu0 }
 0x196   : > { %v2523_v38 = vpop.f32.mrb[21].mxu0 }
 0x197   : > { %v2556_v55 = vpop.f32.mrb[16].mxu1  ;;  %v2524_v41 = vadd.f32 %v2523_v38, %v2522_v35  ;;  %v2525_v43 = vpop.f32.mrb[22].mxu0 }
 0x198   : > { %v2557_v42 = vpop.f32.mrb[17].mxu1  ;;  %v2526_v50 = vpop.f32.mrb[23].mxu0 }
 0x199   : > { %v2558_v44 = vadd.f32 %v2557_v42, %v2556_v55  ;;  %v2559_v4 = vpop.f32.mrb[18].mxu1  ;;  %v1901_v29 = vadd.f32 %v2524_v41, %v1836_v59  ;;  %v2527_v5 = vadd.f32 %v2526_v50, %v2525_v43 }
 0x19a   : > { %v2560_v16 = vpop.f32.mrb[19].mxu1 }
 0x19b   : > { %v2561_v17 = vadd.f32 %v2560_v16, %v2559_v4  ;;  %v1958_v49 = vadd.f32 %v2558_v44, %v1893_v31  ;;  %v1904_v12 = vadd.f32 %v2527_v5, %v1839_v62 }
 0x19d   : > { %v1961_v51 = vadd.f32 %v2561_v17, %v1896_v32 }
 0x19f   : > { %v2562_v54 = vpop.f32.mrb[20].mxu1 }
 0x1a0   : > { %v2563_v45 = vpop.f32.mrb[21].mxu1  ;;  %v2528_v52 = vpop.f32.mrb[24].mxu0 }
 0x1a1   : > { %v2564_v8 = vadd.f32 %v2563_v45, %v2562_v54  ;;  %v2565_v56 = vpop.f32.mrb[22].mxu1  ;;  %v2529_v61 = vpop.f32.mrb[25].mxu0 }
 0x1a2   : > { %v2566_v58 = vpop.f32.mrb[23].mxu1  ;;  %v2530_v47 = vadd.f32 %v2529_v61, %v2528_v52  ;;  %v2531_v2 = vpop.f32.mrb[26].mxu0 }
 0x1a3   : > { %v2567_v0 = vadd.f32 %v2566_v58, %v2565_v56  ;;  %v2532_v7 = vpop.f32.mrb[27].mxu0  ;;  %v1966_v63 = vadd.f32 %v2564_v8, %v1901_v29 }
 0x1a4   : > { %v1909_v11 = vadd.f32 %v2530_v47, %v1844_v33  ;;  %v2533_v6 = vadd.f32 %v2532_v7, %v2531_v2 }
 0x1a5   : > { %v1969_v59 = vadd.f32 %v2567_v0, %v1904_v12 }
 0x1a6   : > { %v1912_v24 = vadd.f32 %v2533_v6, %v1847_v1 }
 0x1a9   : > { %v2568_v22 = vpop.f32.mrb[24].mxu1 }
 0x1aa   : > { %v2569_v30 = vpop.f32.mrb[25].mxu1 }
 0x1ab   : > { %v2570_v62 = vadd.f32 %v2569_v30, %v2568_v22  ;;  %v2571_v14 = vpop.f32.mrb[26].mxu1  ;;  %v2534_v34 = vpop.f32.mrb[28].mxu0 }
 0x1ac   : > { %v2572_v15 = vpop.f32.mrb[27].mxu1  ;;  %v2535_v19 = vpop.f32.mrb[29].mxu0 }
 0x1ad   : > { %v2573_v57 = vadd.f32 %v2572_v15, %v2571_v14  ;;  %v1974_v9 = vadd.f32 %v2570_v62, %v1909_v11  ;;  %v2536_v21 = vadd.f32 %v2535_v19, %v2534_v34  ;;  %v2537_v13 = vpop.f32.mrb[30].mxu0 }
 0x1ae   : > { %v2538_v23 = vpop.f32.mrb[31].mxu0 }
 0x1af   : > { %v1977_v20 = vadd.f32 %v2573_v57, %v1912_v24  ;;  %v1917_v25 = vadd.f32 %v2536_v21, %v1852_v40  ;;  %v2539_v60 = vadd.f32 %v2538_v23, %v2537_v13 }
 0x1b1   : > { %v1920_v33 = vadd.f32 %v2539_v60, %v1855_v26 }
 0x1b2   : > { %v2574_v53 = vpop.f32.mrb[28].mxu1 }
 0x1b3   : > { %v2575_v18 = vpop.f32.mrb[29].mxu1  ;;  %v2610_v36 = vpop.f32.mrb[32].mxu0 }
 0x1b4   : > { %v2576_v1 = vadd.f32 %v2575_v18, %v2574_v53  ;;  %v2577_v27 = vpop.f32.mrb[30].mxu1  ;;  %v2031_v37 = vadd.f32 %v2610_v36, %v1966_v63  ;;  %v2022_v39 = vpop.f32.mrb[33].mxu0 }
 0x1b5   : > { %v2578_v3 = vpop.f32.mrb[31].mxu1  ;;  %v2023_v48 = vadd.f32 %v2022_v39, %v1958_v49  ;;  %v2611_v31 = vpop.f32.mrb[34].mxu0 }
 0x1b6   : > { %v2579_v10 = vadd.f32 %v2578_v3, %v2577_v27  ;;  %v1982_v28 = vadd.f32 %v2576_v1, %v1917_v25  ;;  %v2034_v46 = vadd.f32 %v2611_v31, %v1969_v59  ;;  %v2025_v32 = vpop.f32.mrb[35].mxu0  ;;  %v2055_v40 = vmax.f32 %v2031_v37, 0.0 }
 0x1b7   : > { %v2026_v55 = vadd.f32 %v2025_v32, %v1961_v51  ;;  %v2053_v42 = vmax.f32 %v2023_v48, 0.0 }
 0x1b8   : > { %v1985_v35 = vadd.f32 %v2579_v10, %v1920_v33  ;;  %v2056_v38 = vmax.f32 %v2034_v46, 0.0 }
 0x1b9   : > { %v2054_v41 = vmax.f32 %v2026_v55, 0.0 }
 0x1ba   : > { %v2614_v26 = vpop.f32.mrb[32].mxu1  ;;  %v2405_v4 = vpack.c.bf16 %v2056_v38, %v2055_v40 }
 0x1bb   : > { %v2047_v43 = vadd.f32 %v2614_v26, %v1982_v28  ;;  %v2038_v44 = vpop.f32.mrb[33].mxu1  ;;  %v2400_v29 = vpack.c.bf16 %v2054_v41, %v2053_v42 }
 0x1bc   : > { %v2039_v50 = vadd.f32 %v2038_v44, %v1974_v9  ;;  %v2615_v16 = vpop.f32.mrb[34].mxu1  ;;  %2417 = vst [vmem:[%s252_s22 + $0x8] sm:$0xff] %v2405_v4  }
 0x1bd   : > { %v2050_v5 = vadd.f32 %v2615_v16, %v1985_v35  ;;  %v2041_v17 = vpop.f32.mrb[35].mxu1  ;;  %2401 = vst [vmem:[%s252_s22] sm:$0xff] %v2400_v29   ;;  %v2059_v12 = vmax.f32 %v2047_v43, 0.0 }
 0x1be   : > { %v2042_v49 = vadd.f32 %v2041_v17, %v1977_v20  ;;  %v2057_v54 = vmax.f32 %v2039_v50, 0.0 }
 0x1bf   : > { %v2060_v51 = vmax.f32 %v2050_v5, 0.0 }
 0x1c0   : > { %v2058_v45 = vmax.f32 %v2042_v49, 0.0 }
 0x1c1   : > { %v2415_v52 = vpack.c.bf16 %v2060_v51, %v2059_v12 }
 0x1c2   : > { %v2410_v8 = vpack.c.bf16 %v2058_v45, %v2057_v54 }
 0x1c3   : > { %2419 = vst [vmem:[%s252_s22 + $0x18] sm:$0xff] %v2415_v52  }
 0x1c4   : > { %2418 = vst [vmem:[%s252_s22 + $0x10] sm:$0xff] %v2410_v8  }
 0x1c5   : > { %2939 = shalt.err (!%p2936_p2)
}
 0x1c6   : > { %s2940_s28 = scalar_lea.hbm %s3630_s26, 512  ;;  %s2944_s8 = scalar_lea.hbm %s3682_s3, 1024 }
 0x1c7   : > { %p2941_p0 = scmp.ne.s32.totalorder %s3630_s26, %s2940_s28  ;;  %p2945_p6 = scmp.lt.u32.totalorder %s3630_s26, %s3682_s3 }
 0x1c8   : > { %p2946_p7 = scmp.lt.u32.totalorder %s2944_s8, %s2940_s28  ;;  %p2948_p8 = scmp.lt.u32.totalorder %s2940_s28, %s3630_s26 }
 0x1c9   : > { %p2942_p4 = pnand %p2941_p0, %p3701_p12 }
 0x1ca   : > { %p2947_p11 = por %p2946_p7, %p2945_p6 }
 0x1cb   : > { %p2943_p13 = pneg %p2942_p4 }
 0x1cc   : > { %p2949_p1 = por %p2948_p8, %p2947_p11 }
 0x1ce   : > { %p2950_p10 = pnand %p2949_p1, %p2943_p13 }
 0x1d0   : > { %2953 = shalt.err (!%p2950_p10)
}
 0x1d1   : > { %s3020_s22 = smov 64   ;;  %s3021_s11 = smov 4  }
 0x1d2   : > { %2645 = dma.vmem_to_hbm [thread:$0]  (%p3701_p12), %s3625_s24, 512, %s3630_s26, %s2078_s10, %s3020_s22, %s3020_s22, %s3021_s11  }
 0x1d3 PF: > { %s2109_s18 = sand.u32 1, %s2992_s12   ;;  %p3702_p3 = scmp.ne.s32.totalorder %s3690_s23, 0 }
 0x1d4   : > { %p3703_p5 = scmp.ge.s32.totalorder %s3012_s17, 2  ;;  %s2110_s5 = scalar_lea.sflag [#allocation5], %s2109_s18 }
 0x1d6   : > { %p2659_p9 = pnand %p3703_p5, %p3702_p3 }
 0x1d8   : > { %2987 = dma.done.wait (!%p2659_p9), %s2110_s5, 512  }
 0x1d9   : > { %2989 = vsyncadd (!%p2659_p9), %s2110_s5, 4294966784  ;;  %s20_s17 = sadd.s32 1, %s3012_s17   ;;  %s3704_s12 = smov %s2996_s13 }
 0x1da   : > { %p17_p2 = scmp.ge.s32.totalorder %s20_s17, 4   ;;  %s3705_s13 = smov %s3000_s14 }
 0x1db   : > { %s3706_s14 = smov %s3191_s6  ;;  %s3707_s15 = smov %s3008_s16 }
 0x1dc   : > { %s3708_s16 = smov %s3710_s25  ;;  %19 = sbr.rel (!%p17_p2) target bundleno = 7 (0x7), region = 90 }
 0x1e3   :  { %2115 = vsyncpa [#allocation4], 1 }
 0x1e4   :  { %2117 = vsyncpa [#allocation4 + $0x1], 1 }
 0x1e5   :  { %2118 = vsyncpa [#allocation7], 1 }
 0x1e6   :  { %2119 = vsyncpa [#allocation5], 1 }
 0x1e7   :  { %2121 = vsyncpa [#allocation5 + $0x1], 1 }

</bundles_post_ra>
